<compile_context>
chip_gen: v6e
topology: v6e:2x2x1
jax: 0.10.0
libtpu: 0.0.40
codegen_flags: <defaults>
</compile_context>

<pallas_src>
import jax
import jax.numpy as jnp
import numpy as np
from jax import lax
from jax.experimental import pallas as pl
from jax.experimental.pallas import tpu as pltpu

EPS = 1e-5                     # nn.BatchNorm2d default eps
LANE = 128                     # TPU lane width
VMEM_LIMIT = 32 * 1024 * 1024  # fits the default scoped limit on v5e/v6e/v7x


# ----------------------------------------------------------------------------
# small helpers
# ----------------------------------------------------------------------------
def _round_up(x, m):
    return ((x + m - 1) // m) * m


def _pad_last(a, c):
    """Zero-pad the last axis of `a` to length c."""
    pad = c - a.shape[-1]
    if pad == 0:
        return a
    cfg = [(0, 0)] * (a.ndim - 1) + [(0, pad)]
    return jnp.pad(a, cfg)


def _pad_rows(a, tm):
    """Zero-pad axis 0 to a multiple of tm. Returns (padded, original_rows)."""
    p = a.shape[0]
    pp = _round_up(p, tm)
    if pp != p:
        a = jnp.pad(a, ((0, pp - p),) + ((0, 0),) * (a.ndim - 1))
    return a, p


def _pad_w_hwio(w_hwio, ci_p, co_p):
    """Pad HWIO conv weight on I/O channel axes and flatten to (9*ci_p, co_p)."""
    kh, kw, ci, co = w_hwio.shape
    w = jnp.pad(w_hwio, ((0, 0), (0, 0), (0, ci_p - ci), (0, co_p - co)))
    return w.reshape(kh * kw * ci_p, co_p)


def _strips(x_nhwc, th):
    """Pad spatially (pad=1) and gather overlapping row strips with halo.

    (N, H, W, C) -> (N * (H // th), th + 2, W + 2, C)
    """
    n, h, w, c = x_nhwc.shape
    s = h // th
    xp = jnp.pad(x_nhwc, ((0, 0), (1, 1), (1, 1), (0, 0)))
    row_idx = jnp.arange(s)[:, None] * th + jnp.arange(th + 2)[None, :]
    xs = xp[:, row_idx]                                # (N, S, th+2, W+2, C)
    return xs.reshape(n * s, th + 2, w + 2, c)


def _pick_strip_rows(h, w, c, budget_bytes=12 * 1024 * 1024, max_rows=64):
    """Largest divisor of h (<= max_rows) whose conv-tile VMEM footprint fits
    comfortably below the scoped VMEM limit on all generations (incl. v7x)."""
    best = 1
    for t in range(1, min(h, max_rows) + 1):
        if h % t:
            continue
        est = 4 * (
            2 * 2 * (t + 2) * (w + 2) * c      # <=2 inputs, double-buffered
            + 9 * t * w * c                    # im2col patch scratch
            + 2 * t * w * c                    # double-buffered conv output
            + 2 * 9 * c * c                    # resident weights (<=2)
        )
        if est <= budget_bytes:
            best = t
    return best


# ----------------------------------------------------------------------------
# Kernel A: ConvTranspose2d(k=2, s=2) as a tiled matmul.
# ----------------------------------------------------------------------------
def _tconv_kernel(x_ref, w_ref, b_ref, o_ref):
    # x_ref: (tm, Cin)   w_ref: (Cin, 4*Cp)   b_ref: (1, 4*Cp)   o_ref: (tm, 4*Cp)
    o_ref[...] = (
        jnp.dot(x_ref[...], w_ref[...], preferred_element_type=jnp.float32)
        + b_ref[...]
    )


def _tconv_matmul(xf, w_flat, b_flat, tm):
    m, cin = xf.shape
    k4 = w_flat.shape[1]
    return pl.pallas_call(
        _tconv_kernel,
        grid=(m // tm,),
        in_specs=[
            pl.BlockSpec((tm, cin), lambda i: (i, 0)),
            pl.BlockSpec((cin, k4), lambda i: (0, 0)),
            pl.BlockSpec((1, k4), lambda i: (0, 0)),
        ],
        out_specs=pl.BlockSpec((tm, k4), lambda i: (i, 0)),
        out_shape=jax.ShapeDtypeStruct((m, k4), jnp.float32),
        compiler_params=pltpu.CompilerParams(
            dimension_semantics=("parallel",),
            vmem_limit_bytes=VMEM_LIMIT,
        ),
    )(xf, w_flat, b_flat)


# ----------------------------------------------------------------------------
# Kernel B: conv3x3 (pad=1) per row-strip tile, single im2col matmul,
#           + per-tile BatchNorm partial statistics (sum, sumsq).
#           Optionally fuses a per-channel affine + ReLU on the input strip
#           (= previous layer's folded BatchNorm) before the im2col matmul.
# ----------------------------------------------------------------------------
def _im2col(x, th, w):
    # x: (1, th+2, w+2, C) ref or array -> (th*w, 9*C) patch matrix
    cols = []
    for dh in range(3):
        for dw in range(3):
            win = x[:, dh:dh + th, dw:dw + w, :]       # (1, th, w, C)
            cols.append(win.reshape(th * w, -1))
    return jnp.concatenate(cols, axis=-1)


def _make_conv_kernel(n_in, fuse_affine, strips_per_image):
    def kernel(*refs):
        i = 0
        x_refs = refs[i:i + n_in]; i += n_in
        w_refs = refs[i:i + n_in]; i += n_in
        if fuse_affine:
            sc_ref, sh_ref = refs[i], refs[i + 1]; i += 2
        b_ref = refs[i]; i += 1
        o_ref, st_ref = refs[i], refs[i + 1]

        th, wo = o_ref.shape[1], o_ref.shape[2]

        def load_input(x_ref):
            if not fuse_affine:
                return x_ref
            # Apply folded BN (scale, shift) + ReLU of the previous layer to
            # the raw conv output strip, then re-impose the spatial zero pad
            # (halo positions that correspond to padding=1 of the conv).
            x = x_ref[...]                                   # (1, th+2, wo+2, C)
            a = jnp.maximum(x * sc_ref[...] + sh_ref[...], 0.0)
            si = pl.program_id(0) % strips_per_image
            rows = lax.broadcasted_iota(jnp.int32, a.shape, 1)
            cols = lax.broadcasted_iota(jnp.int32, a.shape, 2)
            pad = jnp.logical_or(cols == 0, cols == wo + 1)
            pad = jnp.logical_or(
                pad, jnp.logical_and(rows == 0, si == 0))
            pad = jnp.logical_or(
                pad, jnp.logical_and(rows == th + 1, si == strips_per_image - 1))
            return jnp.where(pad, 0.0, a)

        acc = jnp.dot(_im2col(load_input(x_refs[0]), th, wo), w_refs[0][...],
                      preferred_element_type=jnp.float32)
        for j in range(1, n_in):
            acc = acc + jnp.dot(_im2col(load_input(x_refs[j]), th, wo),
                                w_refs[j][...],
                                preferred_element_type=jnp.float32)
        acc = acc + b_ref[...]

        o_ref[...] = acc.reshape(o_ref.shape)
        row = jnp.concatenate(
            [jnp.sum(acc, axis=0, keepdims=True),
             jnp.sum(acc * acc, axis=0, keepdims=True)], axis=-1)
        st_ref[...] = row.reshape(st_ref.shape)
    return kernel


def _conv3x3_tiled(x_list, w_list, bias, th, *, affine=None, strips_per_image=1):
    t = x_list[0].shape[0]
    w = x_list[0].shape[2] - 2
    cout = w_list[0].shape[1]
    fuse = affine is not None

    in_specs = []
    operands = []
    for xs in x_list:
        in_specs.append(
            pl.BlockSpec((1,) + xs.shape[1:], lambda i: (i, 0, 0, 0)))
        operands.append(xs)
    for wt in w_list:
        in_specs.append(pl.BlockSpec(wt.shape, lambda i: (0, 0)))
        operands.append(wt)
    if fuse:
        for a in affine:                                     # scale, shift
            in_specs.append(pl.BlockSpec(a.shape, lambda i: (0, 0, 0, 0)))
            operands.append(a)
    in_specs.append(pl.BlockSpec(bias.shape, lambda i: (0, 0)))
    operands.append(bias)

    out_specs = [
        pl.BlockSpec((1, th, w, cout), lambda i: (i, 0, 0, 0)),
        pl.BlockSpec((1, 1, 2 * cout), lambda i: (i, 0, 0)),
    ]
    out_shape = [
        jax.ShapeDtypeStruct((t, th, w, cout), jnp.float32),
        jax.ShapeDtypeStruct((t, 1, 2 * cout), jnp.float32),
    ]
    conv, stats = pl.pallas_call(
        _make_conv_kernel(len(x_list), fuse, strips_per_image),
        grid=(t,),
        in_specs=in_specs,
        out_specs=out_specs,
        out_shape=out_shape,
        compiler_params=pltpu.CompilerParams(
            dimension_semantics=("parallel",),
            vmem_limit_bytes=VMEM_LIMIT,
        ),
    )(*operands)
    return conv, stats


# ----------------------------------------------------------------------------
# Kernel C: folded BatchNorm (scale/shift) + ReLU, tiled elementwise pass
#           (used only for the FINAL activation; the intermediate one is
#           fused into the second conv kernel).
# ----------------------------------------------------------------------------
def _affine_relu_kernel(x_ref, sc_ref, sh_ref, o_ref):
    o_ref[...] = jnp.maximum(x_ref[...] * sc_ref[...] + sh_ref[...], 0.0)


def _affine_relu(x2d, scale, shift):
    p0 = x2d.shape[0]
    tm = min(1024, _round_up(p0, 8))
    x2d, p_real = _pad_rows(x2d, tm)
    p, c = x2d.shape
    out = pl.pallas_call(
        _affine_relu_kernel,
        grid=(p // tm,),
        in_specs=[
            pl.BlockSpec((tm, c), lambda i: (i, 0)),
            pl.BlockSpec((1, c), lambda i: (0, 0)),
            pl.BlockSpec((1, c), lambda i: (0, 0)),
        ],
        out_specs=pl.BlockSpec((tm, c), lambda i: (i, 0)),
        out_shape=jax.ShapeDtypeStruct((p, c), jnp.float32),
        compiler_params=pltpu.CompilerParams(
            dimension_semantics=("parallel",),
            vmem_limit_bytes=VMEM_LIMIT,
        ),
    )(x2d, scale, shift)
    return out[:p_real]


def _bn_fold(stats, gamma, beta, cp, count):
    """Fold train-mode BatchNorm into per-channel (scale, shift)."""
    st = stats.reshape(stats.shape[0], -1)          # (T, 2*Cp)
    s = jnp.sum(st[:, :cp], axis=0)
    ss = jnp.sum(st[:, cp:], axis=0)
    mean = s / count
    var = jnp.maximum(ss / count - mean * mean, 0.0)   # biased variance
    g = _pad_last(gamma, cp)
    b = _pad_last(beta, cp)
    scale = g * lax.rsqrt(var + EPS)
    shift = b - mean * scale
    return scale.reshape(1, cp), shift.reshape(1, cp)


# ----------------------------------------------------------------------------
# decoder_block forward (NCHW in / NCHW out, like the PyTorch module).
# ----------------------------------------------------------------------------
def decoder_block_forward(inputs_nchw, skip_nchw, params):
    x = jnp.transpose(inputs_nchw, (0, 2, 3, 1)).astype(jnp.float32)   # NHWC
    skip = jnp.transpose(skip_nchw, (0, 2, 3, 1)).astype(jnp.float32)  # NHWC
    n, h, w, cin = x.shape
    up_w, up_b = params["up_w"], params["up_b"]          # (Cin,Cout,2,2), (Cout,)
    cout = up_w.shape[1]
    cp = _round_up(cout, LANE)                           # lane-padded channels
    h2, w2 = 2 * h, 2 * w

    # --- Kernel A: ConvTranspose2d(k=2, s=2) as tiled matmul ---
    xf = x.reshape(n * h * w, cin)
    tma = min(512, _round_up(n * h * w, 8))
    xf, m_real = _pad_rows(xf, tma)
    w_flat = _pad_last(jnp.transpose(up_w, (0, 2, 3, 1)), cp).reshape(cin, 4 * cp)
    b_flat = jnp.tile(_pad_last(up_b, cp), 4).reshape(1, 4 * cp)
    yflat = _tconv_matmul(xf, w_flat, b_flat, tma)[:m_real]      # (M, 4*Cp)
    # 2x2 interleave to (N, 2H, 2W, Cp); lazy transpose, fused by XLA into the
    # strip gather below (no standalone HBM pass).
    y = yflat.reshape(n, h, w, 2, 2, cp).transpose(0, 1, 3, 2, 4, 5)
    y = y.reshape(n, h2, w2, cp)

    # --- conv_block ---
    w1, b1, g1, be1 = params["w1"], params["b1"], params["g1"], params["be1"]
    w2_, b2, g2, be2 = params["w2"], params["b2"], params["g2"], params["be2"]

    th = _pick_strip_rows(h2, w2, cp)
    s_per_img = h2 // th
    count = float(n * h2 * w2)

    # conv1: concat([up, skip]) @ w1 done as two split-weight matmuls
    # (kills the channel-concat HBM pass).
    y_strips = _strips(y, th)                            # (T, th+2, W2+2, Cp)
    skip_strips = _strips(_pad_last(skip, cp), th)
    w1y = _pad_w_hwio(w1[:, :, :cout, :], cp, cp)        # (9*Cp, Cp)
    w1s = _pad_w_hwio(w1[:, :, cout:, :], cp, cp)
    b1p = _pad_last(b1, cp).reshape(1, cp)
    c1, st1 = _conv3x3_tiled([y_strips, skip_strips], [w1y, w1s], b1p, th)

    # Fold BN1 from the tiny per-tile partials (a few KB of jnp).
    scale1, shift1 = _bn_fold(st1, g1, be1, cp, count)

    # conv2: BN1 affine + ReLU fused into the conv kernel itself (no
    # intermediate HBM pass over the activation).  Strips come from the RAW
    # conv1 output; the kernel applies scale/shift/ReLU and re-zeros the
    # padding halo before the im2col matmul.
    c1_strips = _strips(c1.reshape(n, h2, w2, cp), th)
    w2p = _pad_w_hwio(w2_, cp, cp)
    b2p = _pad_last(b2, cp).reshape(1, cp)
    c2, st2 = _conv3x3_tiled(
        [c1_strips], [w2p], b2p, th,
        affine=(scale1.reshape(1, 1, 1, cp), shift1.reshape(1, 1, 1, cp)),
        strips_per_image=s_per_img)

    # Final BN2 + ReLU epilogue (Kernel C).
    scale2, shift2 = _bn_fold(st2, g2, be2, cp, count)
    out = _affine_relu(c2.reshape(-1, cp), scale2, shift2)
    out = out.reshape(n, h2, w2, cp)[..., :cout]

    return jnp.transpose(out, (0, 3, 1, 2))              # back to NCHW


# ----------------------------------------------------------------------------
# Pure-JAX reference (for a correctness sanity check).
# ----------------------------------------------------------------------------
def _reference(inputs_nchw, skip_nchw, params):
    x = jnp.transpose(inputs_nchw, (0, 2, 3, 1)).astype(jnp.float32)
    skip = jnp.transpose(skip_nchw, (0, 2, 3, 1)).astype(jnp.float32)
    n, h, w, _ = x.shape
    up_w, up_b = params["up_w"], params["up_b"]

    t = jnp.einsum("nhwi,iodc->nhwdco", x, up_w) + up_b        # (N,H,W,2,2,Cout)
    t = jnp.transpose(t, (0, 1, 3, 2, 4, 5)).reshape(n, 2 * h, 2 * w, -1)
    z = jnp.concatenate([t, skip], axis=-1)

    def conv_bn_relu(v, wt, b, g, be):
        c = lax.conv_general_dilated(
            v, wt, (1, 1), "SAME", dimension_numbers=("NHWC", "HWIO", "NHWC")
        ) + b
        m = jnp.mean(c, axis=(0, 1, 2), keepdims=True)
        var = jnp.mean((c - m) ** 2, axis=(0, 1, 2), keepdims=True)
        out = (c - m) * lax.rsqrt(var + EPS) * g + be
        return jnp.maximum(out, 0.0)

    z = conv_bn_relu(z, params["w1"], params["b1"], params["g1"], params["be1"])
    z = conv_bn_relu(z, params["w2"], params["b2"], params["g2"], params["be2"])
    return jnp.transpose(z, (0, 3, 1, 2))


# ----------------------------------------------------------------------------
if __name__ == "__main__":
    # Small shapes consistent with decoder_block(in_c=8, out_c=4):
    #   inputs: (N, in_c, H, W) = (2, 8, 8, 8)
    #   skip:   (N, out_c, 2H, 2W) = (2, 4, 16, 16)
    N, in_c, out_c, H, W = 2, 8, 4, 8, 8

    key = jax.random.PRNGKey(0)
    ks = jax.random.split(key, 12)

    params = {
        # ConvTranspose2d weight layout: (in_c, out_c, kH, kW)
        "up_w": 0.1 * jax.random.normal(ks[0], (in_c, out_c, 2, 2), jnp.float32),
        "up_b": 0.1 * jax.random.normal(ks[1], (out_c,), jnp.float32),
        # conv1: in = out_c + out_c (after concat), HWIO layout
        "w1": 0.1 * jax.random.normal(ks[2], (3, 3, 2 * out_c, out_c), jnp.float32),
        "b1": 0.1 * jax.random.normal(ks[3], (out_c,), jnp.float32),
        "g1": 1.0 + 0.1 * jax.random.normal(ks[4], (out_c,), jnp.float32),
        "be1": 0.1 * jax.random.normal(ks[5], (out_c,), jnp.float32),
        # conv2: out_c -> out_c
        "w2": 0.1 * jax.random.normal(ks[6], (3, 3, out_c, out_c), jnp.float32),
        "b2": 0.1 * jax.random.normal(ks[7], (out_c,), jnp.float32),
        "g2": 1.0 + 0.1 * jax.random.normal(ks[8], (out_c,), jnp.float32),
        "be2": 0.1 * jax.random.normal(ks[9], (out_c,), jnp.float32),
    }

    inputs = jax.random.normal(ks[10], (N, in_c, H, W), jnp.float32)
    skip = jax.random.normal(ks[11], (N, out_c, 2 * H, 2 * W), jnp.float32)

    fwd = jax.jit(decoder_block_forward)
    out = jax.block_until_ready(fwd(inputs, skip, params))
    assert out.shape == (N, out_c, 2 * H, 2 * W), out.shape

    ref = jax.block_until_ready(_reference(inputs, skip, params))
    np.testing.assert_allclose(np.asarray(out), np.asarray(ref), rtol=1e-3, atol=1e-3)

    print("KERNEL_OK")
</pallas_src>

<mosaic_0001>
module attributes {stable_mosaic.version = 11 : i64} {
  func.func @_tconv_kernel(%arg0: i32, %arg1: memref<128x8xf32, #tpu.memory_space<vmem>>, %arg2: memref<8x512xf32, #tpu.memory_space<vmem>>, %arg3: memref<1x512xf32, #tpu.memory_space<vmem>>, %arg4: memref<128x512xf32, #tpu.memory_space<vmem>>) attributes {dimension_semantics = [#tpu.dimension_semantics<parallel>], iteration_bounds = array<i64: 1>, scalar_prefetch = 0 : i64, scratch_operands = 0 : i64, tpu.core_type = #tpu.core_type<tc>, window_params = [{transform_indices = @transform_0, window_bounds = array<i64: 128, 8>}, {pipeline_mode = #tpu.pipeline_mode<synchronous>, transform_indices = @transform_1, window_bounds = array<i64: 8, 512>}, {pipeline_mode = #tpu.pipeline_mode<synchronous>, transform_indices = @transform_2, window_bounds = array<i64: 1, 512>}, {transform_indices = @transform_3, window_bounds = array<i64: 128, 512>}]} {
    %c0 = arith.constant 0 : index
    %c0_0 = arith.constant 0 : index
    %0 = vector.load %arg1[%c0, %c0_0] : memref<128x8xf32, #tpu.memory_space<vmem>>, vector<128x8xf32>
    %c0_1 = arith.constant 0 : index
    %c0_2 = arith.constant 0 : index
    %1 = vector.load %arg2[%c0_1, %c0_2] : memref<8x512xf32, #tpu.memory_space<vmem>>, vector<8x512xf32>
    %cst = arith.constant dense<0.000000e+00> : vector<128x512xf32>
    %2 = tpu.matmul %0, %1, %cst {dimension_numbers = #tpu.dot_dimension_numbers<[1], [0], [0], [1], [0, 0, 1, 1], [], []>} : vector<128x8xf32>, vector<8x512xf32>, vector<128x512xf32> -> vector<128x512xf32>
    %c0_3 = arith.constant 0 : index
    %c0_4 = arith.constant 0 : index
    %3 = vector.load %arg3[%c0_3, %c0_4] : memref<1x512xf32, #tpu.memory_space<vmem>>, vector<1x512xf32>
    %4 = vector.broadcast %3 : vector<1x512xf32> to vector<128x512xf32>
    %5 = arith.addf %2, %4 : vector<128x512xf32>
    %c0_5 = arith.constant 0 : index
    %c0_6 = arith.constant 0 : index
    %6 = vector.load %arg4[%c0_5, %c0_6] : memref<128x512xf32, #tpu.memory_space<vmem>>, vector<128x512xf32>
    tpu.vector_store %arg4[%c0_5, %c0_6], %5 {strides = array<i32>} : memref<128x512xf32, #tpu.memory_space<vmem>>, vector<128x512xf32>,
    return
  }
  func.func @transform_0(%arg0: i32) -> (i32, i32) {
    %c0_i32 = arith.constant 0 : i32
    %c0_i32_0 = arith.constant 0 : i32
    return %arg0, %c0_i32 : i32, i32
  }
  func.func @transform_1(%arg0: i32) -> (i32, i32) {
    %c0_i32 = arith.constant 0 : i32
    %c0_i32_0 = arith.constant 0 : i32
    %c0_i32_1 = arith.constant 0 : i32
    return %c0_i32, %c0_i32_0 : i32, i32
  }
  func.func @transform_2(%arg0: i32) -> (i32, i32) {
    %c0_i32 = arith.constant 0 : i32
    %c0_i32_0 = arith.constant 0 : i32
    %c0_i32_1 = arith.constant 0 : i32
    return %c0_i32, %c0_i32_0 : i32, i32
  }
  func.func @transform_3(%arg0: i32) -> (i32, i32) {
    %c0_i32 = arith.constant 0 : i32
    %c0_i32_0 = arith.constant 0 : i32
    return %arg0, %c0_i32 : i32, i32
  }
}

module attributes {stable_mosaic.version = 11 : i64} {
  func.func @kernel(%arg0: i32, %arg1: memref<1x18x18x128xf32, #tpu.memory_space<vmem>>, %arg2: memref<1x18x18x128xf32, #tpu.memory_space<vmem>>, %arg3: memref<1152x128xf32, #tpu.memory_space<vmem>>, %arg4: memref<1152x128xf32, #tpu.memory_space<vmem>>, %arg5: memref<1x128xf32, #tpu.memory_space<vmem>>, %arg6: memref<1x16x16x128xf32, #tpu.memory_space<vmem>>, %arg7: memref<1x1x256xf32, #tpu.memory_space<vmem>>) attributes {dimension_semantics = [#tpu.dimension_semantics<parallel>], iteration_bounds = array<i64: 2>, scalar_prefetch = 0 : i64, scratch_operands = 0 : i64, tpu.core_type = #tpu.core_type<tc>, window_params = [{transform_indices = @transform_0, window_bounds = array<i64: 1, 18, 18, 128>}, {transform_indices = @transform_1, window_bounds = array<i64: 1, 18, 18, 128>}, {pipeline_mode = #tpu.pipeline_mode<synchronous>, transform_indices = @transform_2, window_bounds = array<i64: 1152, 128>}, {pipeline_mode = #tpu.pipeline_mode<synchronous>, transform_indices = @transform_3, window_bounds = array<i64: 1152, 128>}, {pipeline_mode = #tpu.pipeline_mode<synchronous>, transform_indices = @transform_4, window_bounds = array<i64: 1, 128>}, {transform_indices = @transform_5, window_bounds = array<i64: 1, 16, 16, 128>}, {transform_indices = @transform_6, window_bounds = array<i64: 1, 1, 256>}]} {
    %c0 = arith.constant 0 : index
    %c0_0 = arith.constant 0 : index
    %c0_1 = arith.constant 0 : index
    %c0_2 = arith.constant 0 : index
    %0 = vector.load %arg1[%c0, %c0_0, %c0_1, %c0_2] : memref<1x18x18x128xf32, #tpu.memory_space<vmem>>, vector<1x16x16x128xf32>
    %1 = vector.shape_cast %0 : vector<1x16x16x128xf32> to vector<256x128xf32>
    %c0_3 = arith.constant 0 : index
    %c0_4 = arith.constant 0 : index
    %c1 = arith.constant 1 : index
    %c0_5 = arith.constant 0 : index
    %2 = vector.load %arg1[%c0_3, %c0_4, %c1, %c0_5] : memref<1x18x18x128xf32, #tpu.memory_space<vmem>>, vector<1x16x16x128xf32>
    %3 = vector.shape_cast %2 : vector<1x16x16x128xf32> to vector<256x128xf32>
    %c0_6 = arith.constant 0 : index
    %c0_7 = arith.constant 0 : index
    %c2 = arith.constant 2 : index
    %c0_8 = arith.constant 0 : index
    %4 = vector.load %arg1[%c0_6, %c0_7, %c2, %c0_8] : memref<1x18x18x128xf32, #tpu.memory_space<vmem>>, vector<1x16x16x128xf32>
    %5 = vector.shape_cast %4 : vector<1x16x16x128xf32> to vector<256x128xf32>
    %c0_9 = arith.constant 0 : index
    %c1_10 = arith.constant 1 : index
    %c0_11 = arith.constant 0 : index
    %c0_12 = arith.constant 0 : index
    %6 = vector.load %arg1[%c0_9, %c1_10, %c0_11, %c0_12] : memref<1x18x18x128xf32, #tpu.memory_space<vmem>>, vector<1x16x16x128xf32>
    %7 = vector.shape_cast %6 : vector<1x16x16x128xf32> to vector<256x128xf32>
    %c0_13 = arith.constant 0 : index
    %c1_14 = arith.constant 1 : index
    %c1_15 = arith.constant 1 : index
    %c0_16 = arith.constant 0 : index
    %8 = vector.load %arg1[%c0_13, %c1_14, %c1_15, %c0_16] : memref<1x18x18x128xf32, #tpu.memory_space<vmem>>, vector<1x16x16x128xf32>
    %9 = vector.shape_cast %8 : vector<1x16x16x128xf32> to vector<256x128xf32>
    %c0_17 = arith.constant 0 : index
    %c1_18 = arith.constant 1 : index
    %c2_19 = arith.constant 2 : index
    %c0_20 = arith.constant 0 : index
    %10 = vector.load %arg1[%c0_17, %c1_18, %c2_19, %c0_20] : memref<1x18x18x128xf32, #tpu.memory_space<vmem>>, vector<1x16x16x128xf32>
    %11 = vector.shape_cast %10 : vector<1x16x16x128xf32> to vector<256x128xf32>
    %c0_21 = arith.constant 0 : index
    %c2_22 = arith.constant 2 : index
    %c0_23 = arith.constant 0 : index
    %c0_24 = arith.constant 0 : index
    %12 = vector.load %arg1[%c0_21, %c2_22, %c0_23, %c0_24] : memref<1x18x18x128xf32, #tpu.memory_space<vmem>>, vector<1x16x16x128xf32>
    %13 = vector.shape_cast %12 : vector<1x16x16x128xf32> to vector<256x128xf32>
    %c0_25 = arith.constant 0 : index
    %c2_26 = arith.constant 2 : index
    %c1_27 = arith.constant 1 : index
    %c0_28 = arith.constant 0 : index
    %14 = vector.load %arg1[%c0_25, %c2_26, %c1_27, %c0_28] : memref<1x18x18x128xf32, #tpu.memory_space<vmem>>, vector<1x16x16x128xf32>
    %15 = vector.shape_cast %14 : vector<1x16x16x128xf32> to vector<256x128xf32>
    %c0_29 = arith.constant 0 : index
    %c2_30 = arith.constant 2 : index
    %c2_31 = arith.constant 2 : index
    %c0_32 = arith.constant 0 : index
    %16 = vector.load %arg1[%c0_29, %c2_30, %c2_31, %c0_32] : memref<1x18x18x128xf32, #tpu.memory_space<vmem>>, vector<1x16x16x128xf32>
    %17 = vector.shape_cast %16 : vector<1x16x16x128xf32> to vector<256x128xf32>
    %18 = tpu.concatenate %1, %3, %5, %7, %9, %11, %13, %15, %17 in 1 : vector<256x128xf32>, vector<256x128xf32>, vector<256x128xf32>, vector<256x128xf32>, vector<256x128xf32>, vector<256x128xf32>, vector<256x128xf32>, vector<256x128xf32>, vector<256x128xf32> -> vector<256x1152xf32>
    %c0_33 = arith.constant 0 : index
    %c0_34 = arith.constant 0 : index
    %19 = vector.load %arg3[%c0_33, %c0_34] : memref<1152x128xf32, #tpu.memory_space<vmem>>, vector<1152x128xf32>
    %cst = arith.constant dense<0.000000e+00> : vector<256x128xf32>
    %20 = tpu.matmul %18, %19, %cst {dimension_numbers = #tpu.dot_dimension_numbers<[1], [0], [0], [1], [0, 0, 1, 1], [], []>} : vector<256x1152xf32>, vector<1152x128xf32>, vector<256x128xf32> -> vector<256x128xf32>
    %c0_35 = arith.constant 0 : index
    %c0_36 = arith.constant 0 : index
    %c0_37 = arith.constant 0 : index
    %c0_38 = arith.constant 0 : index
    %21 = vector.load %arg2[%c0_35, %c0_36, %c0_37, %c0_38] : memref<1x18x18x128xf32, #tpu.memory_space<vmem>>, vector<1x16x16x128xf32>
    %22 = vector.shape_cast %21 : vector<1x16x16x128xf32> to vector<256x128xf32>
    %c0_39 = arith.constant 0 : index
    %c0_40 = arith.constant 0 : index
    %c1_41 = arith.constant 1 : index
    %c0_42 = arith.constant 0 : index
    %23 = vector.load %arg2[%c0_39, %c0_40, %c1_41, %c0_42] : memref<1x18x18x128xf32, #tpu.memory_space<vmem>>, vector<1x16x16x128xf32>
    %24 = vector.shape_cast %23 : vector<1x16x16x128xf32> to vector<256x128xf32>
    %c0_43 = arith.constant 0 : index
    %c0_44 = arith.constant 0 : index
    %c2_45 = arith.constant 2 : index
    %c0_46 = arith.constant 0 : index
    %25 = vector.load %arg2[%c0_43, %c0_44, %c2_45, %c0_46] : memref<1x18x18x128xf32, #tpu.memory_space<vmem>>, vector<1x16x16x128xf32>
    %26 = vector.shape_cast %25 : vector<1x16x16x128xf32> to vector<256x128xf32>
    %c0_47 = arith.constant 0 : index
    %c1_48 = arith.constant 1 : index
    %c0_49 = arith.constant 0 : index
    %c0_50 = arith.constant 0 : index
    %27 = vector.load %arg2[%c0_47, %c1_48, %c0_49, %c0_50] : memref<1x18x18x128xf32, #tpu.memory_space<vmem>>, vector<1x16x16x128xf32>
    %28 = vector.shape_cast %27 : vector<1x16x16x128xf32> to vector<256x128xf32>
    %c0_51 = arith.constant 0 : index
    %c1_52 = arith.constant 1 : index
    %c1_53 = arith.constant 1 : index
    %c0_54 = arith.constant 0 : index
    %29 = vector.load %arg2[%c0_51, %c1_52, %c1_53, %c0_54] : memref<1x18x18x128xf32, #tpu.memory_space<vmem>>, vector<1x16x16x128xf32>
    %30 = vector.shape_cast %29 : vector<1x16x16x128xf32> to vector<256x128xf32>
    %c0_55 = arith.constant 0 : index
    %c1_56 = arith.constant 1 : index
    %c2_57 = arith.constant 2 : index
    %c0_58 = arith.constant 0 : index
    %31 = vector.load %arg2[%c0_55, %c1_56, %c2_57, %c0_58] : memref<1x18x18x128xf32, #tpu.memory_space<vmem>>, vector<1x16x16x128xf32>
    %32 = vector.shape_cast %31 : vector<1x16x16x128xf32> to vector<256x128xf32>
    %c0_59 = arith.constant 0 : index
    %c2_60 = arith.constant 2 : index
    %c0_61 = arith.constant 0 : index
    %c0_62 = arith.constant 0 : index
    %33 = vector.load %arg2[%c0_59, %c2_60, %c0_61, %c0_62] : memref<1x18x18x128xf32, #tpu.memory_space<vmem>>, vector<1x16x16x128xf32>
    %34 = vector.shape_cast %33 : vector<1x16x16x128xf32> to vector<256x128xf32>
    %c0_63 = arith.constant 0 : index
    %c2_64 = arith.constant 2 : index
    %c1_65 = arith.constant 1 : index
    %c0_66 = arith.constant 0 : index
    %35 = vector.load %arg2[%c0_63, %c2_64, %c1_65, %c0_66] : memref<1x18x18x128xf32, #tpu.memory_space<vmem>>, vector<1x16x16x128xf32>
    %36 = vector.shape_cast %35 : vector<1x16x16x128xf32> to vector<256x128xf32>
    %c0_67 = arith.constant 0 : index
    %c2_68 = arith.constant 2 : index
    %c2_69 = arith.constant 2 : index
    %c0_70 = arith.constant 0 : index
    %37 = vector.load %arg2[%c0_67, %c2_68, %c2_69, %c0_70] : memref<1x18x18x128xf32, #tpu.memory_space<vmem>>, vector<1x16x16x128xf32>
    %38 = vector.shape_cast %37 : vector<1x16x16x128xf32> to vector<256x128xf32>
    %39 = tpu.concatenate %22, %24, %26, %28, %30, %32, %34, %36, %38 in 1 : vector<256x128xf32>, vector<256x128xf32>, vector<256x128xf32>, vector<256x128xf32>, vector<256x128xf32>, vector<256x128xf32>, vector<256x128xf32>, vector<256x128xf32>, vector<256x128xf32> -> vector<256x1152xf32>
    %c0_71 = arith.constant 0 : index
    %c0_72 = arith.constant 0 : index
    %40 = vector.load %arg4[%c0_71, %c0_72] : memref<1152x128xf32, #tpu.memory_space<vmem>>, vector<1152x128xf32>
    %cst_73 = arith.constant dense<0.000000e+00> : vector<256x128xf32>
    %41 = tpu.matmul %39, %40, %cst_73 {dimension_numbers = #tpu.dot_dimension_numbers<[1], [0], [0], [1], [0, 0, 1, 1], [], []>} : vector<256x1152xf32>, vector<1152x128xf32>, vector<256x128xf32> -> vector<256x128xf32>
    %42 = arith.addf %20, %41 : vector<256x128xf32>
    %c0_74 = arith.constant 0 : index
    %c0_75 = arith.constant 0 : index
    %43 = vector.load %arg5[%c0_74, %c0_75] : memref<1x128xf32, #tpu.memory_space<vmem>>, vector<1x128xf32>
    %44 = vector.broadcast %43 : vector<1x128xf32> to vector<256x128xf32>
    %45 = arith.addf %42, %44 : vector<256x128xf32>
    %46 = vector.shape_cast %45 : vector<256x128xf32> to vector<1x16x16x128xf32>
    %c0_76 = arith.constant 0 : index
    %c0_77 = arith.constant 0 : index
    %c0_78 = arith.constant 0 : index
    %c0_79 = arith.constant 0 : index
    %47 = vector.load %arg6[%c0_76, %c0_77, %c0_78, %c0_79] : memref<1x16x16x128xf32, #tpu.memory_space<vmem>>, vector<1x16x16x128xf32>
    tpu.vector_store %arg6[%c0_76, %c0_77, %c0_78, %c0_79], %46 {strides = array<i32>} : memref<1x16x16x128xf32, #tpu.memory_space<vmem>>, vector<1x16x16x128xf32>,
    %cst_80 = arith.constant dense<0.000000e+00> : vector<128xf32>
    %48 = vector.multi_reduction <add>, %45, %cst_80 [0] : vector<256x128xf32> to vector<128xf32>
    %49 = vector.shape_cast %48 : vector<128xf32> to vector<1x128xf32>
    %50 = arith.mulf %45, %45 : vector<256x128xf32>
    %cst_81 = arith.constant dense<0.000000e+00> : vector<128xf32>
    %51 = vector.multi_reduction <add>, %50, %cst_81 [0] : vector<256x128xf32> to vector<128xf32>
    %52 = vector.shape_cast %51 : vector<128xf32> to vector<1x128xf32>
    %53 = tpu.concatenate %49, %52 in 1 : vector<1x128xf32>, vector<1x128xf32> -> vector<1x256xf32>
    %54 = vector.shape_cast %53 : vector<1x256xf32> to vector<1x1x256xf32>
    %c0_82 = arith.constant 0 : index
    %c0_83 = arith.constant 0 : index
    %c0_84 = arith.constant 0 : index
    %55 = vector.load %arg7[%c0_82, %c0_83, %c0_84] : memref<1x1x256xf32, #tpu.memory_space<vmem>>, vector<1x1x256xf32>
    tpu.vector_store %arg7[%c0_82, %c0_83, %c0_84], %54 {strides = array<i32>} : memref<1x1x256xf32, #tpu.memory_space<vmem>>, vector<1x1x256xf32>,
    return
  }
  func.func @transform_0(%arg0: i32) -> (i32, i32, i32, i32) {
    %c0_i32 = arith.constant 0 : i32
    %c0_i32_0 = arith.constant 0 : i32
    %c0_i32_1 = arith.constant 0 : i32
    %c0_i32_2 = arith.constant 0 : i32
    return %arg0, %c0_i32, %c0_i32_0, %c0_i32_1 : i32, i32, i32, i32
  }
  func.func @transform_1(%arg0: i32) -> (i32, i32, i32, i32) {
    %c0_i32 = arith.constant 0 : i32
    %c0_i32_0 = arith.constant 0 : i32
    %c0_i32_1 = arith.constant 0 : i32
    %c0_i32_2 = arith.constant 0 : i32
    return %arg0, %c0_i32, %c0_i32_0, %c0_i32_1 : i32, i32, i32, i32
  }
  func.func @transform_2(%arg0: i32) -> (i32, i32) {
    %c0_i32 = arith.constant 0 : i32
    %c0_i32_0 = arith.constant 0 : i32
    %c0_i32_1 = arith.constant 0 : i32
    return %c0_i32, %c0_i32_0 : i32, i32
  }
  func.func @transform_3(%arg0: i32) -> (i32, i32) {
    %c0_i32 = arith.constant 0 : i32
    %c0_i32_0 = arith.constant 0 : i32
    %c0_i32_1 = arith.constant 0 : i32
    return %c0_i32, %c0_i32_0 : i32, i32
  }
  func.func @transform_4(%arg0: i32) -> (i32, i32) {
    %c0_i32 = arith.constant 0 : i32
    %c0_i32_0 = arith.constant 0 : i32
    %c0_i32_1 = arith.constant 0 : i32
    return %c0_i32, %c0_i32_0 : i32, i32
  }
  func.func @transform_5(%arg0: i32) -> (i32, i32, i32, i32) {
    %c0_i32 = arith.constant 0 : i32
    %c0_i32_0 = arith.constant 0 : i32
    %c0_i32_1 = arith.constant 0 : i32
    %c0_i32_2 = arith.constant 0 : i32
    return %arg0, %c0_i32, %c0_i32_0, %c0_i32_1 : i32, i32, i32, i32
  }
  func.func @transform_6(%arg0: i32) -> (i32, i32, i32) {
    %c0_i32 = arith.constant 0 : i32
    %c0_i32_0 = arith.constant 0 : i32
    %c0_i32_1 = arith.constant 0 : i32
    return %arg0, %c0_i32, %c0_i32_0 : i32, i32, i32
  }
}

module attributes {stable_mosaic.version = 11 : i64} {
  func.func @_affine_relu_kernel(%arg0: i32, %arg1: memref<512x128xf32, #tpu.memory_space<vmem>>, %arg2: memref<1x128xf32, #tpu.memory_space<vmem>>, %arg3: memref<1x128xf32, #tpu.memory_space<vmem>>, %arg4: memref<512x128xf32, #tpu.memory_space<vmem>>) attributes {dimension_semantics = [#tpu.dimension_semantics<parallel>], iteration_bounds = array<i64: 1>, scalar_prefetch = 0 : i64, scratch_operands = 0 : i64, tpu.core_type = #tpu.core_type<tc>, window_params = [{transform_indices = @transform_0, window_bounds = array<i64: 512, 128>}, {pipeline_mode = #tpu.pipeline_mode<synchronous>, transform_indices = @transform_1, window_bounds = array<i64: 1, 128>}, {pipeline_mode = #tpu.pipeline_mode<synchronous>, transform_indices = @transform_2, window_bounds = array<i64: 1, 128>}, {transform_indices = @transform_3, window_bounds = array<i64: 512, 128>}]} {
    %c0 = arith.constant 0 : index
    %c0_0 = arith.constant 0 : index
    %0 = vector.load %arg1[%c0, %c0_0] : memref<512x128xf32, #tpu.memory_space<vmem>>, vector<512x128xf32>
    %c0_1 = arith.constant 0 : index
    %c0_2 = arith.constant 0 : index
    %1 = vector.load %arg2[%c0_1, %c0_2] : memref<1x128xf32, #tpu.memory_space<vmem>>, vector<1x128xf32>
    %2 = vector.broadcast %1 : vector<1x128xf32> to vector<512x128xf32>
    %3 = arith.mulf %0, %2 : vector<512x128xf32>
    %c0_3 = arith.constant 0 : index
    %c0_4 = arith.constant 0 : index
    %4 = vector.load %arg3[%c0_3, %c0_4] : memref<1x128xf32, #tpu.memory_space<vmem>>, vector<1x128xf32>
    %5 = vector.broadcast %4 : vector<1x128xf32> to vector<512x128xf32>
    %6 = arith.addf %3, %5 : vector<512x128xf32>
    %cst = arith.constant 0.000000e+00 : f32
    %7 = vector.broadcast %cst : f32 to vector<512x128xf32>
    %8 = arith.maximumf %6, %7 : vector<512x128xf32>
    %c0_5 = arith.constant 0 : index
    %c0_6 = arith.constant 0 : index
    %9 = vector.load %arg4[%c0_5, %c0_6] : memref<512x128xf32, #tpu.memory_space<vmem>>, vector<512x128xf32>
    tpu.vector_store %arg4[%c0_5, %c0_6], %8 {strides = array<i32>} : memref<512x128xf32, #tpu.memory_space<vmem>>, vector<512x128xf32>,
    return
  }
  func.func @transform_0(%arg0: i32) -> (i32, i32) {
    %c0_i32 = arith.constant 0 : i32
    %c0_i32_0 = arith.constant 0 : i32
    return %arg0, %c0_i32 : i32, i32
  }
  func.func @transform_1(%arg0: i32) -> (i32, i32) {
    %c0_i32 = arith.constant 0 : i32
    %c0_i32_0 = arith.constant 0 : i32
    %c0_i32_1 = arith.constant 0 : i32
    return %c0_i32, %c0_i32_0 : i32, i32
  }
  func.func @transform_2(%arg0: i32) -> (i32, i32) {
    %c0_i32 = arith.constant 0 : i32
    %c0_i32_0 = arith.constant 0 : i32
    %c0_i32_1 = arith.constant 0 : i32
    return %c0_i32, %c0_i32_0 : i32, i32
  }
  func.func @transform_3(%arg0: i32) -> (i32, i32) {
    %c0_i32 = arith.constant 0 : i32
    %c0_i32_0 = arith.constant 0 : i32
    return %arg0, %c0_i32 : i32, i32
  }
}

module attributes {stable_mosaic.version = 11 : i64} {
  func.func @kernel(%arg0: i32, %arg1: memref<1x18x18x128xf32, #tpu.memory_space<vmem>>, %arg2: memref<1152x128xf32, #tpu.memory_space<vmem>>, %arg3: memref<1x1x1x128xf32, #tpu.memory_space<vmem>>, %arg4: memref<1x1x1x128xf32, #tpu.memory_space<vmem>>, %arg5: memref<1x128xf32, #tpu.memory_space<vmem>>, %arg6: memref<1x16x16x128xf32, #tpu.memory_space<vmem>>, %arg7: memref<1x1x256xf32, #tpu.memory_space<vmem>>) attributes {dimension_semantics = [#tpu.dimension_semantics<parallel>], iteration_bounds = array<i64: 2>, scalar_prefetch = 0 : i64, scratch_operands = 0 : i64, tpu.core_type = #tpu.core_type<tc>, window_params = [{transform_indices = @transform_0, window_bounds = array<i64: 1, 18, 18, 128>}, {pipeline_mode = #tpu.pipeline_mode<synchronous>, transform_indices = @transform_1, window_bounds = array<i64: 1152, 128>}, {pipeline_mode = #tpu.pipeline_mode<synchronous>, transform_indices = @transform_2, window_bounds = array<i64: 1, 1, 1, 128>}, {pipeline_mode = #tpu.pipeline_mode<synchronous>, transform_indices = @transform_3, window_bounds = array<i64: 1, 1, 1, 128>}, {pipeline_mode = #tpu.pipeline_mode<synchronous>, transform_indices = @transform_4, window_bounds = array<i64: 1, 128>}, {transform_indices = @transform_5, window_bounds = array<i64: 1, 16, 16, 128>}, {transform_indices = @transform_6, window_bounds = array<i64: 1, 1, 256>}]} {
    %c0 = arith.constant 0 : index
    %c0_0 = arith.constant 0 : index
    %c0_1 = arith.constant 0 : index
    %c0_2 = arith.constant 0 : index
    %0 = vector.load %arg1[%c0, %c0_0, %c0_1, %c0_2] : memref<1x18x18x128xf32, #tpu.memory_space<vmem>>, vector<1x18x18x128xf32>
    %c0_3 = arith.constant 0 : index
    %c0_4 = arith.constant 0 : index
    %c0_5 = arith.constant 0 : index
    %c0_6 = arith.constant 0 : index
    %1 = vector.load %arg3[%c0_3, %c0_4, %c0_5, %c0_6] : memref<1x1x1x128xf32, #tpu.memory_space<vmem>>, vector<1x1x1x128xf32>
    %2 = vector.broadcast %1 : vector<1x1x1x128xf32> to vector<1x18x18x128xf32>
    %3 = arith.mulf %0, %2 : vector<1x18x18x128xf32>
    %c0_7 = arith.constant 0 : index
    %c0_8 = arith.constant 0 : index
    %c0_9 = arith.constant 0 : index
    %c0_10 = arith.constant 0 : index
    %4 = vector.load %arg4[%c0_7, %c0_8, %c0_9, %c0_10] : memref<1x1x1x128xf32, #tpu.memory_space<vmem>>, vector<1x1x1x128xf32>
    %5 = vector.broadcast %4 : vector<1x1x1x128xf32> to vector<1x18x18x128xf32>
    %6 = arith.addf %3, %5 : vector<1x18x18x128xf32>
    %cst = arith.constant 0.000000e+00 : f32
    %7 = vector.broadcast %cst : f32 to vector<1x18x18x128xf32>
    %8 = arith.maximumf %6, %7 : vector<1x18x18x128xf32>
    %c1_i32 = arith.constant 1 : i32
    %c0_i32 = arith.constant 0 : i32
    %9 = arith.cmpi eq, %c1_i32, %c0_i32 : i32
    %c1_i32_11 = arith.constant 1 : i32
    %10 = arith.select %9, %c1_i32_11, %c1_i32 : i32
    %11 = arith.remsi %arg0, %10 : i32
    %c0_i32_12 = arith.constant 0 : i32
    %12 = arith.cmpi ne, %11, %c0_i32_12 : i32
    %c0_i32_13 = arith.constant 0 : i32
    %13 = arith.cmpi slt, %11, %c0_i32_13 : i32
    %c0_i32_14 = arith.constant 0 : i32
    %14 = arith.cmpi slt, %10, %c0_i32_14 : i32
    %15 = arith.xori %13, %14 : i1
    %16 = arith.andi %15, %12 : i1
    %17 = arith.addi %11, %10 : i32
    %18 = arith.select %16, %17, %11 : i32
    %19 = tpu.iota {dimensions = array<i32: 1>} : vector<1x18x18x128xi32>
    %20 = tpu.iota {dimensions = array<i32: 2>} : vector<1x18x18x128xi32>
    %c0_i32_15 = arith.constant 0 : i32
    %21 = vector.broadcast %c0_i32_15 : i32 to vector<1x18x18x128xi32>
    %22 = arith.cmpi eq, %20, %21 : vector<1x18x18x128xi32>
    %c17_i32 = arith.constant 17 : i32
    %23 = vector.broadcast %c17_i32 : i32 to vector<1x18x18x128xi32>
    %24 = arith.cmpi eq, %20, %23 : vector<1x18x18x128xi32>
    %25 = arith.ori %22, %24 : vector<1x18x18x128xi1>
    %c0_i32_16 = arith.constant 0 : i32
    %26 = vector.broadcast %c0_i32_16 : i32 to vector<1x18x18x128xi32>
    %27 = arith.cmpi eq, %19, %26 : vector<1x18x18x128xi32>
    %c0_i32_17 = arith.constant 0 : i32
    %28 = arith.cmpi eq, %18, %c0_i32_17 : i32
    %29 = vector.broadcast %28 : i1 to vector<1x18x18x128xi1>
    %30 = arith.andi %27, %29 : vector<1x18x18x128xi1>
    %31 = arith.ori %25, %30 : vector<1x18x18x128xi1>
    %c17_i32_18 = arith.constant 17 : i32
    %32 = vector.broadcast %c17_i32_18 : i32 to vector<1x18x18x128xi32>
    %33 = arith.cmpi eq, %19, %32 : vector<1x18x18x128xi32>
    %c0_i32_19 = arith.constant 0 : i32
    %34 = arith.cmpi eq, %18, %c0_i32_19 : i32
    %35 = vector.broadcast %34 : i1 to vector<1x18x18x128xi1>
    %36 = arith.andi %33, %35 : vector<1x18x18x128xi1>
    %37 = arith.ori %31, %36 : vector<1x18x18x128xi1>
    %cst_20 = arith.constant 0.000000e+00 : f32
    %38 = vector.broadcast %cst_20 : f32 to vector<1x18x18x128xf32>
    %39 = arith.select %37, %38, %8 : vector<1x18x18x128xi1>, vector<1x18x18x128xf32>
    %40 = vector.extract_strided_slice %39 {offsets = [0, 0, 0, 0], sizes = [1, 16, 16, 128], strides = [1, 1, 1, 1]} : vector<1x18x18x128xf32> to vector<1x16x16x128xf32>
    %41 = vector.shape_cast %40 : vector<1x16x16x128xf32> to vector<256x128xf32>
    %42 = vector.extract_strided_slice %39 {offsets = [0, 0, 1, 0], sizes = [1, 16, 16, 128], strides = [1, 1, 1, 1]} : vector<1x18x18x128xf32> to vector<1x16x16x128xf32>
    %43 = vector.shape_cast %42 : vector<1x16x16x128xf32> to vector<256x128xf32>
    %44 = vector.extract_strided_slice %39 {offsets = [0, 0, 2, 0], sizes = [1, 16, 16, 128], strides = [1, 1, 1, 1]} : vector<1x18x18x128xf32> to vector<1x16x16x128xf32>
    %45 = vector.shape_cast %44 : vector<1x16x16x128xf32> to vector<256x128xf32>
    %46 = vector.extract_strided_slice %39 {offsets = [0, 1, 0, 0], sizes = [1, 16, 16, 128], strides = [1, 1, 1, 1]} : vector<1x18x18x128xf32> to vector<1x16x16x128xf32>
    %47 = vector.shape_cast %46 : vector<1x16x16x128xf32> to vector<256x128xf32>
    %48 = vector.extract_strided_slice %39 {offsets = [0, 1, 1, 0], sizes = [1, 16, 16, 128], strides = [1, 1, 1, 1]} : vector<1x18x18x128xf32> to vector<1x16x16x128xf32>
    %49 = vector.shape_cast %48 : vector<1x16x16x128xf32> to vector<256x128xf32>
    %50 = vector.extract_strided_slice %39 {offsets = [0, 1, 2, 0], sizes = [1, 16, 16, 128], strides = [1, 1, 1, 1]} : vector<1x18x18x128xf32> to vector<1x16x16x128xf32>
    %51 = vector.shape_cast %50 : vector<1x16x16x128xf32> to vector<256x128xf32>
    %52 = vector.extract_strided_slice %39 {offsets = [0, 2, 0, 0], sizes = [1, 16, 16, 128], strides = [1, 1, 1, 1]} : vector<1x18x18x128xf32> to vector<1x16x16x128xf32>
    %53 = vector.shape_cast %52 : vector<1x16x16x128xf32> to vector<256x128xf32>
    %54 = vector.extract_strided_slice %39 {offsets = [0, 2, 1, 0], sizes = [1, 16, 16, 128], strides = [1, 1, 1, 1]} : vector<1x18x18x128xf32> to vector<1x16x16x128xf32>
    %55 = vector.shape_cast %54 : vector<1x16x16x128xf32> to vector<256x128xf32>
    %56 = vector.extract_strided_slice %39 {offsets = [0, 2, 2, 0], sizes = [1, 16, 16, 128], strides = [1, 1, 1, 1]} : vector<1x18x18x128xf32> to vector<1x16x16x128xf32>
    %57 = vector.shape_cast %56 : vector<1x16x16x128xf32> to vector<256x128xf32>
    %58 = tpu.concatenate %41, %43, %45, %47, %49, %51, %53, %55, %57 in 1 : vector<256x128xf32>, vector<256x128xf32>, vector<256x128xf32>, vector<256x128xf32>, vector<256x128xf32>, vector<256x128xf32>, vector<256x128xf32>, vector<256x128xf32>, vector<256x128xf32> -> vector<256x1152xf32>
    %c0_21 = arith.constant 0 : index
    %c0_22 = arith.constant 0 : index
    %59 = vector.load %arg2[%c0_21, %c0_22] : memref<1152x128xf32, #tpu.memory_space<vmem>>, vector<1152x128xf32>
    %cst_23 = arith.constant dense<0.000000e+00> : vector<256x128xf32>
    %60 = tpu.matmul %58, %59, %cst_23 {dimension_numbers = #tpu.dot_dimension_numbers<[1], [0], [0], [1], [0, 0, 1, 1], [], []>} : vector<256x1152xf32>, vector<1152x128xf32>, vector<256x128xf32> -> vector<256x128xf32>
    %c0_24 = arith.constant 0 : index
    %c0_25 = arith.constant 0 : index
    %61 = vector.load %arg5[%c0_24, %c0_25] : memref<1x128xf32, #tpu.memory_space<vmem>>, vector<1x128xf32>
    %62 = vector.broadcast %61 : vector<1x128xf32> to vector<256x128xf32>
    %63 = arith.addf %60, %62 : vector<256x128xf32>
    %64 = vector.shape_cast %63 : vector<256x128xf32> to vector<1x16x16x128xf32>
    %c0_26 = arith.constant 0 : index
    %c0_27 = arith.constant 0 : index
    %c0_28 = arith.constant 0 : index
    %c0_29 = arith.constant 0 : index
    %65 = vector.load %arg6[%c0_26, %c0_27, %c0_28, %c0_29] : memref<1x16x16x128xf32, #tpu.memory_space<vmem>>, vector<1x16x16x128xf32>
    tpu.vector_store %arg6[%c0_26, %c0_27, %c0_28, %c0_29], %64 {strides = array<i32>} : memref<1x16x16x128xf32, #tpu.memory_space<vmem>>, vector<1x16x16x128xf32>,
    %cst_30 = arith.constant dense<0.000000e+00> : vector<128xf32>
    %66 = vector.multi_reduction <add>, %63, %cst_30 [0] : vector<256x128xf32> to vector<128xf32>
    %67 = vector.shape_cast %66 : vector<128xf32> to vector<1x128xf32>
    %68 = arith.mulf %63, %63 : vector<256x128xf32>
    %cst_31 = arith.constant dense<0.000000e+00> : vector<128xf32>
    %69 = vector.multi_reduction <add>, %68, %cst_31 [0] : vector<256x128xf32> to vector<128xf32>
    %70 = vector.shape_cast %69 : vector<128xf32> to vector<1x128xf32>
    %71 = tpu.concatenate %67, %70 in 1 : vector<1x128xf32>, vector<1x128xf32> -> vector<1x256xf32>
    %72 = vector.shape_cast %71 : vector<1x256xf32> to vector<1x1x256xf32>
    %c0_32 = arith.constant 0 : index
    %c0_33 = arith.constant 0 : index
    %c0_34 = arith.constant 0 : index
    %73 = vector.load %arg7[%c0_32, %c0_33, %c0_34] : memref<1x1x256xf32, #tpu.memory_space<vmem>>, vector<1x1x256xf32>
    tpu.vector_store %arg7[%c0_32, %c0_33, %c0_34], %72 {strides = array<i32>} : memref<1x1x256xf32, #tpu.memory_space<vmem>>, vector<1x1x256xf32>,
    return
  }
  func.func @transform_0(%arg0: i32) -> (i32, i32, i32, i32) {
    %c0_i32 = arith.constant 0 : i32
    %c0_i32_0 = arith.constant 0 : i32
    %c0_i32_1 = arith.constant 0 : i32
    %c0_i32_2 = arith.constant 0 : i32
    return %arg0, %c0_i32, %c0_i32_0, %c0_i32_1 : i32, i32, i32, i32
  }
  func.func @transform_1(%arg0: i32) -> (i32, i32) {
    %c0_i32 = arith.constant 0 : i32
    %c0_i32_0 = arith.constant 0 : i32
    %c0_i32_1 = arith.constant 0 : i32
    return %c0_i32, %c0_i32_0 : i32, i32
  }
  func.func @transform_2(%arg0: i32) -> (i32, i32, i32, i32) {
    %c0_i32 = arith.constant 0 : i32
    %c0_i32_0 = arith.constant 0 : i32
    %c0_i32_1 = arith.constant 0 : i32
    %c0_i32_2 = arith.constant 0 : i32
    %c0_i32_3 = arith.constant 0 : i32
    return %c0_i32, %c0_i32_0, %c0_i32_1, %c0_i32_2 : i32, i32, i32, i32
  }
  func.func @transform_3(%arg0: i32) -> (i32, i32, i32, i32) {
    %c0_i32 = arith.constant 0 : i32
    %c0_i32_0 = arith.constant 0 : i32
    %c0_i32_1 = arith.constant 0 : i32
    %c0_i32_2 = arith.constant 0 : i32
    %c0_i32_3 = arith.constant 0 : i32
    return %c0_i32, %c0_i32_0, %c0_i32_1, %c0_i32_2 : i32, i32, i32, i32
  }
  func.func @transform_4(%arg0: i32) -> (i32, i32) {
    %c0_i32 = arith.constant 0 : i32
    %c0_i32_0 = arith.constant 0 : i32
    %c0_i32_1 = arith.constant 0 : i32
    return %c0_i32, %c0_i32_0 : i32, i32
  }
  func.func @transform_5(%arg0: i32) -> (i32, i32, i32, i32) {
    %c0_i32 = arith.constant 0 : i32
    %c0_i32_0 = arith.constant 0 : i32
    %c0_i32_1 = arith.constant 0 : i32
    %c0_i32_2 = arith.constant 0 : i32
    return %arg0, %c0_i32, %c0_i32_0, %c0_i32_1 : i32, i32, i32, i32
  }
  func.func @transform_6(%arg0: i32) -> (i32, i32, i32) {
    %c0_i32 = arith.constant 0 : i32
    %c0_i32_0 = arith.constant 0 : i32
    %c0_i32_1 = arith.constant 0 : i32
    return %arg0, %c0_i32, %c0_i32_0 : i32, i32, i32
  }
}

</mosaic_0001>

<bundles_post_ra>
// kernel: tile.8
= control target key start
LH: loop header
LB: loop body
LE: loop exit
PB: predicated region body
PF: predicated region fallthrough
CT: control target
= control target key end

     0   :  { %s22_s0 = inlined_call_operand.vmem [shape: f32[128], index: 0, kind: input, shape index: {}]   ;;  %s23_s1 = inlined_call_operand.vmem [shape: f32[4,128], index: 1, kind: output, shape index: {}]  }
   0x1   :  { %v4_v0 = vld [vmem:[%s22_s0] ss:$0 sm:$0xff] }
   0x2   :  { %5 = vst [vmem:[%s23_s1] sm:$0xf] %v4_v0 }

// kernel: decoder_block_forward.4
= control target key start
LH: loop header
LB: loop body
LE: loop exit
PB: predicated region body
PF: predicated region fallthrough
CT: control target
= control target key end

     0   :  { %v528_v3 = vmov 0.0   ;;  %vm56_vm0 = vcmask 64512   ;;  %v36_v21 = vlaneseq  ;;  %s940_s1 = inlined_call_operand.vmem [shape: f32[8,512], index: 1, kind: input, shape index: {}]   ;;  %s941_s0 = inlined_call_operand.vmem [shape: f32[128,8], index: 0, kind: input, shape index: {}]   ;;  %s942_s2 = inlined_call_operand.vmem [shape: f32[1,512], index: 2, kind: input, shape index: {}]   ;;  %s943_s3 = inlined_call_operand.vmem [shape: f32[128,512], index: 3, kind: output, shape index: {}]  }
   0x1   :  { %v31_v0 = vld [vmem:[%s940_s1 + $0x8] sm:$0xff]  ;;  %v33_v1 = vld [vmem:[%s940_s1 + $0x18] sm:$0xff]  ;;  %v30_v2 = vld [vmem:[%s940_s1] sm:$0xff]  ;;  %169 = vmatprep.mubr.f32.mxu0 %v528_v3  ;;  %330 = vmatprep.mubr.f32.mxu1 %v528_v3 }
   0x2   :  { %135 = vmatprep.subr.mxu0 %v31_v0  ;;  %296 = vmatprep.subr.mxu1 %v33_v1  ;;  %v32_v4 = vld [vmem:[%s940_s1 + $0x10] sm:$0xff]  ;;  %v14_v5 = vld [vmem:[%s941_s0] sm:$0xff]  ;;  %v15_v6 = vld [vmem:[%s941_s0 + $0x8] sm:$0xff]  ;;  %v37_v22 = vshrl.u32 %v36_v21, 7 }
   0x3   :  { %136 = vmatpush1.msra.mxu0 %v30_v2  ;;  %297 = vmatpush1.msra.mxu1 %v32_v4  ;;  %v16_v7 = vld [vmem:[%s941_s0 + $0x10] sm:$0xff]  ;;  %v17_v8 = vld [vmem:[%s941_s0 + $0x18] sm:$0xff]  ;;  %v18_v9 = vld [vmem:[%s941_s0 + $0x20] sm:$0xff] }
   0x4   :  { %495 = vmatmul.mubr.msk.f32.vlgmr.msra.gmra.mxu0 %vm56_vm0, %v14_v5  ;;  %511 = vmatmul.mubr.msk.f32.vlgmr.msra.gmra.mxu1 %vm56_vm0, %v14_v5  ;;  %v19_v10 = vld [vmem:[%s941_s0 + $0x28] sm:$0xff]  ;;  %v20_v11 = vld [vmem:[%s941_s0 + $0x30] sm:$0xff]  ;;  %v21_v12 = vld [vmem:[%s941_s0 + $0x38] sm:$0xff]  ;;  %v38_v23 = vsub.s32 0, %v37_v22  ;;  %v46_v24 = vsub.s32 2, %v37_v22  ;;  %v42_v26 = vsub.s32 1, %v37_v22 }
   0x5   :  { %175 = vmatprep.mubr.f32.mxu0 %v528_v3  ;;  %336 = vmatprep.mubr.f32.mxu1 %v528_v3  ;;  %v22_v13 = vld [vmem:[%s941_s0 + $0x40] sm:$0xff]  ;;  %v23_v14 = vld [vmem:[%s941_s0 + $0x48] sm:$0xff]  ;;  %v24_v15 = vld [vmem:[%s941_s0 + $0x50] sm:$0xff]  ;;  %v50_v27 = vsub.s32 3, %v37_v22 }
   0x6   :  { %v25_v16 = vld [vmem:[%s941_s0 + $0x58] sm:$0xff]  ;;  %v26_v17 = vld [vmem:[%s941_s0 + $0x60] sm:$0xff]  ;;  %v27_v18 = vld [vmem:[%s941_s0 + $0x68] sm:$0xff] }
   0x7   :  { %v28_v19 = vld [vmem:[%s941_s0 + $0x70] sm:$0xff]  ;;  %v29_v20 = vld [vmem:[%s941_s0 + $0x78] sm:$0xff]  ;;  %v34_v25 = vld [vmem:[%s942_s2] sm:$0xf] }
   0x8   :  { %496 = vmatmul.mubr.msk.f32.gmra.mxu0 %vm56_vm0, %v15_v6  ;;  %512 = vmatmul.mubr.msk.f32.gmra.mxu1 %vm56_vm0, %v15_v6  ;;  %v676_v28 = vrot.slane %v34_v25, %v38_v23  ;;  %v678_v29 = vrot.slane %v34_v25, %v46_v24  ;;  %v680_v30 = vrot.slane %v34_v25, %v42_v26 }
   0x9   :  { %181 = vmatprep.mubr.f32.mxu0 %v528_v3  ;;  %342 = vmatprep.mubr.f32.mxu1 %v528_v3  ;;  %v682_v31 = vrot.slane %v34_v25, %v50_v27 }
   0xc   :  { %497 = vmatmul.mubr.msk.f32.gmra.mxu0 %vm56_vm0, %v16_v7  ;;  %513 = vmatmul.mubr.msk.f32.gmra.mxu1 %vm56_vm0, %v16_v7 }
   0xd   :  { %187 = vmatprep.mubr.f32.mxu0 %v528_v3  ;;  %348 = vmatprep.mubr.f32.mxu1 %v528_v3 }
  0x10   :  { %498 = vmatmul.mubr.msk.f32.gmra.mxu0 %vm56_vm0, %v17_v8  ;;  %514 = vmatmul.mubr.msk.f32.gmra.mxu1 %vm56_vm0, %v17_v8 }
  0x11   :  { %193 = vmatprep.mubr.f32.mxu0 %v528_v3  ;;  %354 = vmatprep.mubr.f32.mxu1 %v528_v3 }
  0x14   :  { %499 = vmatmul.mubr.msk.f32.gmra.mxu0 %vm56_vm0, %v18_v9  ;;  %515 = vmatmul.mubr.msk.f32.gmra.mxu1 %vm56_vm0, %v18_v9 }
  0x15   :  { %199 = vmatprep.mubr.f32.mxu0 %v528_v3  ;;  %360 = vmatprep.mubr.f32.mxu1 %v528_v3 }
  0x18   :  { %500 = vmatmul.mubr.msk.f32.gmra.mxu0 %vm56_vm0, %v19_v10  ;;  %516 = vmatmul.mubr.msk.f32.gmra.mxu1 %vm56_vm0, %v19_v10 }
  0x19   :  { %205 = vmatprep.mubr.f32.mxu0 %v528_v3  ;;  %366 = vmatprep.mubr.f32.mxu1 %v528_v3 }
  0x1c   :  { %501 = vmatmul.mubr.msk.f32.gmra.mxu0 %vm56_vm0, %v20_v11  ;;  %517 = vmatmul.mubr.msk.f32.gmra.mxu1 %vm56_vm0, %v20_v11 }
  0x1d   :  { %211 = vmatprep.mubr.f32.mxu0 %v528_v3  ;;  %372 = vmatprep.mubr.f32.mxu1 %v528_v3 }
  0x20   :  { %502 = vmatmul.mubr.msk.f32.gmra.mxu0 %vm56_vm0, %v21_v12  ;;  %518 = vmatmul.mubr.msk.f32.gmra.mxu1 %vm56_vm0, %v21_v12 }
  0x21   :  { %217 = vmatprep.mubr.f32.mxu0 %v528_v3  ;;  %378 = vmatprep.mubr.f32.mxu1 %v528_v3 }
  0x24   :  { %503 = vmatmul.mubr.msk.f32.gmra.mxu0 %vm56_vm0, %v22_v13  ;;  %519 = vmatmul.mubr.msk.f32.gmra.mxu1 %vm56_vm0, %v22_v13 }
  0x25   :  { %223 = vmatprep.mubr.f32.mxu0 %v528_v3  ;;  %384 = vmatprep.mubr.f32.mxu1 %v528_v3 }
  0x28   :  { %504 = vmatmul.mubr.msk.f32.gmra.mxu0 %vm56_vm0, %v23_v14  ;;  %520 = vmatmul.mubr.msk.f32.gmra.mxu1 %vm56_vm0, %v23_v14 }
  0x29   :  { %229 = vmatprep.mubr.f32.mxu0 %v528_v3  ;;  %390 = vmatprep.mubr.f32.mxu1 %v528_v3 }
  0x2c   :  { %505 = vmatmul.mubr.msk.f32.gmra.mxu0 %vm56_vm0, %v24_v15  ;;  %521 = vmatmul.mubr.msk.f32.gmra.mxu1 %vm56_vm0, %v24_v15 }
  0x2d   :  { %235 = vmatprep.mubr.f32.mxu0 %v528_v3  ;;  %396 = vmatprep.mubr.f32.mxu1 %v528_v3 }
  0x30   :  { %506 = vmatmul.mubr.msk.f32.gmra.mxu0 %vm56_vm0, %v25_v16  ;;  %522 = vmatmul.mubr.msk.f32.gmra.mxu1 %vm56_vm0, %v25_v16 }
  0x31   :  { %241 = vmatprep.mubr.f32.mxu0 %v528_v3  ;;  %402 = vmatprep.mubr.f32.mxu1 %v528_v3 }
  0x34   :  { %507 = vmatmul.mubr.msk.f32.gmra.mxu0 %vm56_vm0, %v26_v17  ;;  %523 = vmatmul.mubr.msk.f32.gmra.mxu1 %vm56_vm0, %v26_v17 }
  0x35   :  { %247 = vmatprep.mubr.f32.mxu0 %v528_v3  ;;  %408 = vmatprep.mubr.f32.mxu1 %v528_v3 }
  0x38   :  { %508 = vmatmul.mubr.msk.f32.gmra.mxu0 %vm56_vm0, %v27_v18  ;;  %524 = vmatmul.mubr.msk.f32.gmra.mxu1 %vm56_vm0, %v27_v18 }
  0x39   :  { %253 = vmatprep.mubr.f32.mxu0 %v528_v3  ;;  %414 = vmatprep.mubr.f32.mxu1 %v528_v3 }
  0x3c   :  { %509 = vmatmul.mubr.msk.f32.gmra.mxu0 %vm56_vm0, %v28_v19  ;;  %525 = vmatmul.mubr.msk.f32.gmra.mxu1 %vm56_vm0, %v28_v19 }
  0x3d   :  { %259 = vmatprep.mubr.f32.mxu0 %v528_v3  ;;  %420 = vmatprep.mubr.f32.mxu1 %v528_v3 }
  0x40   :  { %510 = vmatmul.mubr.msk.f32.gmra.mxu0 %vm56_vm0, %v29_v20  ;;  %526 = vmatmul.mubr.msk.f32.gmra.mxu1 %vm56_vm0, %v29_v20 }
  0xc4   :  { %v171_v32 = vpop.f32.mrf.mxu0  ;;  %v332_v33 = vpop.f32.mrf.mxu1 }
  0xc5   :  { %v172_v34 = vadd.f32 %v171_v32, %v676_v28  ;;  %v333_v35 = vadd.f32 %v332_v33, %v678_v29 }
  0xc6   :  { %v173_v36 = vpop.f32.mrf.mxu0  ;;  %v334_v37 = vpop.f32.mrf.mxu1 }
  0xc7   :  { %427 = vst [vmem:[%s943_s3] sm:$0xff] %v172_v34  ;;  %429 = vst [vmem:[%s943_s3 + $0x10] sm:$0xff] %v333_v35  ;;  %v174_v38 = vadd.f32 %v173_v36, %v680_v30  ;;  %v335_v39 = vadd.f32 %v334_v37, %v682_v31 }
  0xc8   :  { %v177_v40 = vpop.f32.mrf.mxu0  ;;  %v338_v41 = vpop.f32.mrf.mxu1 }
  0xc9   :  { %428 = vst [vmem:[%s943_s3 + $0x8] sm:$0xff] %v174_v38  ;;  %430 = vst [vmem:[%s943_s3 + $0x18] sm:$0xff] %v335_v39  ;;  %v178_v42 = vadd.f32 %v177_v40, %v676_v28  ;;  %v339_v43 = vadd.f32 %v338_v41, %v678_v29 }
  0xca   :  { %v179_v44 = vpop.f32.mrf.mxu0  ;;  %v340_v45 = vpop.f32.mrf.mxu1 }
  0xcb   :  { %431 = vst [vmem:[%s943_s3 + $0x20] sm:$0xff] %v178_v42  ;;  %433 = vst [vmem:[%s943_s3 + $0x30] sm:$0xff] %v339_v43  ;;  %v180_v46 = vadd.f32 %v179_v44, %v680_v30  ;;  %v341_v47 = vadd.f32 %v340_v45, %v682_v31 }
  0xcc   :  { %v183_v48 = vpop.f32.mrf.mxu0  ;;  %v344_v49 = vpop.f32.mrf.mxu1 }
  0xcd   :  { %432 = vst [vmem:[%s943_s3 + $0x28] sm:$0xff] %v180_v46  ;;  %434 = vst [vmem:[%s943_s3 + $0x38] sm:$0xff] %v341_v47  ;;  %v184_v50 = vadd.f32 %v183_v48, %v676_v28  ;;  %v345_v51 = vadd.f32 %v344_v49, %v678_v29 }
  0xce   :  { %v185_v52 = vpop.f32.mrf.mxu0  ;;  %v346_v53 = vpop.f32.mrf.mxu1 }
  0xcf   :  { %435 = vst [vmem:[%s943_s3 + $0x40] sm:$0xff] %v184_v50  ;;  %437 = vst [vmem:[%s943_s3 + $0x50] sm:$0xff] %v345_v51  ;;  %v186_v54 = vadd.f32 %v185_v52, %v680_v30  ;;  %v347_v55 = vadd.f32 %v346_v53, %v682_v31 }
  0xd0   :  { %v189_v56 = vpop.f32.mrf.mxu0  ;;  %v350_v57 = vpop.f32.mrf.mxu1 }
  0xd1   :  { %436 = vst [vmem:[%s943_s3 + $0x48] sm:$0xff] %v186_v54  ;;  %438 = vst [vmem:[%s943_s3 + $0x58] sm:$0xff] %v347_v55  ;;  %v190_v58 = vadd.f32 %v189_v56, %v676_v28  ;;  %v351_v59 = vadd.f32 %v350_v57, %v678_v29 }
  0xd2   :  { %v191_v60 = vpop.f32.mrf.mxu0  ;;  %v352_v61 = vpop.f32.mrf.mxu1 }
  0xd3   :  { %439 = vst [vmem:[%s943_s3 + $0x60] sm:$0xff] %v190_v58  ;;  %441 = vst [vmem:[%s943_s3 + $0x70] sm:$0xff] %v351_v59  ;;  %v192_v62 = vadd.f32 %v191_v60, %v680_v30  ;;  %v353_v63 = vadd.f32 %v352_v61, %v682_v31 }
  0xd4   :  { %v195_v0 = vpop.f32.mrf.mxu0  ;;  %v356_v1 = vpop.f32.mrf.mxu1 }
  0xd5   :  { %440 = vst [vmem:[%s943_s3 + $0x68] sm:$0xff] %v192_v62  ;;  %442 = vst [vmem:[%s943_s3 + $0x78] sm:$0xff] %v353_v63  ;;  %v196_v2 = vadd.f32 %v195_v0, %v676_v28  ;;  %v357_v3 = vadd.f32 %v356_v1, %v678_v29 }
  0xd6   :  { %v197_v4 = vpop.f32.mrf.mxu0  ;;  %v358_v5 = vpop.f32.mrf.mxu1 }
  0xd7   :  { %443 = vst [vmem:[%s943_s3 + $0x80] sm:$0xff] %v196_v2  ;;  %445 = vst [vmem:[%s943_s3 + $0x90] sm:$0xff] %v357_v3  ;;  %v198_v6 = vadd.f32 %v197_v4, %v680_v30  ;;  %v359_v7 = vadd.f32 %v358_v5, %v682_v31 }
  0xd8   :  { %v201_v8 = vpop.f32.mrf.mxu0  ;;  %v362_v9 = vpop.f32.mrf.mxu1 }
  0xd9   :  { %444 = vst [vmem:[%s943_s3 + $0x88] sm:$0xff] %v198_v6  ;;  %446 = vst [vmem:[%s943_s3 + $0x98] sm:$0xff] %v359_v7  ;;  %v202_v10 = vadd.f32 %v201_v8, %v676_v28  ;;  %v363_v11 = vadd.f32 %v362_v9, %v678_v29 }
  0xda   :  { %v203_v12 = vpop.f32.mrf.mxu0  ;;  %v364_v13 = vpop.f32.mrf.mxu1 }
  0xdb   :  { %447 = vst [vmem:[%s943_s3 + $0xa0] sm:$0xff] %v202_v10  ;;  %449 = vst [vmem:[%s943_s3 + $0xb0] sm:$0xff] %v363_v11  ;;  %v204_v14 = vadd.f32 %v203_v12, %v680_v30  ;;  %v365_v15 = vadd.f32 %v364_v13, %v682_v31 }
  0xdc   :  { %v207_v16 = vpop.f32.mrf.mxu0  ;;  %v368_v17 = vpop.f32.mrf.mxu1 }
  0xdd   :  { %448 = vst [vmem:[%s943_s3 + $0xa8] sm:$0xff] %v204_v14  ;;  %450 = vst [vmem:[%s943_s3 + $0xb8] sm:$0xff] %v365_v15  ;;  %v208_v18 = vadd.f32 %v207_v16, %v676_v28  ;;  %v369_v19 = vadd.f32 %v368_v17, %v678_v29 }
  0xde   :  { %v209_v20 = vpop.f32.mrf.mxu0  ;;  %v370_v21 = vpop.f32.mrf.mxu1 }
  0xdf   :  { %451 = vst [vmem:[%s943_s3 + $0xc0] sm:$0xff] %v208_v18  ;;  %453 = vst [vmem:[%s943_s3 + $0xd0] sm:$0xff] %v369_v19  ;;  %v210_v22 = vadd.f32 %v209_v20, %v680_v30  ;;  %v371_v23 = vadd.f32 %v370_v21, %v682_v31 }
  0xe0   :  { %v213_v24 = vpop.f32.mrf.mxu0  ;;  %v374_v25 = vpop.f32.mrf.mxu1 }
  0xe1   :  { %452 = vst [vmem:[%s943_s3 + $0xc8] sm:$0xff] %v210_v22  ;;  %454 = vst [vmem:[%s943_s3 + $0xd8] sm:$0xff] %v371_v23  ;;  %v214_v26 = vadd.f32 %v213_v24, %v676_v28  ;;  %v375_v27 = vadd.f32 %v374_v25, %v678_v29 }
  0xe2   :  { %v215_v32 = vpop.f32.mrf.mxu0  ;;  %v376_v33 = vpop.f32.mrf.mxu1 }
  0xe3   :  { %455 = vst [vmem:[%s943_s3 + $0xe0] sm:$0xff] %v214_v26  ;;  %457 = vst [vmem:[%s943_s3 + $0xf0] sm:$0xff] %v375_v27  ;;  %v216_v34 = vadd.f32 %v215_v32, %v680_v30  ;;  %v377_v35 = vadd.f32 %v376_v33, %v682_v31 }
  0xe4   :  { %v219_v36 = vpop.f32.mrf.mxu0  ;;  %v380_v37 = vpop.f32.mrf.mxu1 }
  0xe5   :  { %456 = vst [vmem:[%s943_s3 + $0xe8] sm:$0xff] %v216_v34  ;;  %458 = vst [vmem:[%s943_s3 + $0xf8] sm:$0xff] %v377_v35  ;;  %v220_v38 = vadd.f32 %v219_v36, %v676_v28  ;;  %v381_v39 = vadd.f32 %v380_v37, %v678_v29 }
  0xe6   :  { %v221_v40 = vpop.f32.mrf.mxu0  ;;  %v382_v41 = vpop.f32.mrf.mxu1 }
  0xe7   :  { %459 = vst [vmem:[%s943_s3 + $0x100] sm:$0xff] %v220_v38  ;;  %461 = vst [vmem:[%s943_s3 + $0x110] sm:$0xff] %v381_v39  ;;  %v222_v42 = vadd.f32 %v221_v40, %v680_v30  ;;  %v383_v43 = vadd.f32 %v382_v41, %v682_v31 }
  0xe8   :  { %v225_v44 = vpop.f32.mrf.mxu0  ;;  %v386_v45 = vpop.f32.mrf.mxu1 }
  0xe9   :  { %460 = vst [vmem:[%s943_s3 + $0x108] sm:$0xff] %v222_v42  ;;  %462 = vst [vmem:[%s943_s3 + $0x118] sm:$0xff] %v383_v43  ;;  %v226_v46 = vadd.f32 %v225_v44, %v676_v28  ;;  %v387_v47 = vadd.f32 %v386_v45, %v678_v29 }
  0xea   :  { %v227_v48 = vpop.f32.mrf.mxu0  ;;  %v388_v49 = vpop.f32.mrf.mxu1 }
  0xeb   :  { %463 = vst [vmem:[%s943_s3 + $0x120] sm:$0xff] %v226_v46  ;;  %465 = vst [vmem:[%s943_s3 + $0x130] sm:$0xff] %v387_v47  ;;  %v228_v50 = vadd.f32 %v227_v48, %v680_v30  ;;  %v389_v51 = vadd.f32 %v388_v49, %v682_v31 }
  0xec   :  { %v231_v52 = vpop.f32.mrf.mxu0  ;;  %v392_v53 = vpop.f32.mrf.mxu1 }
  0xed   :  { %464 = vst [vmem:[%s943_s3 + $0x128] sm:$0xff] %v228_v50  ;;  %466 = vst [vmem:[%s943_s3 + $0x138] sm:$0xff] %v389_v51  ;;  %v232_v54 = vadd.f32 %v231_v52, %v676_v28  ;;  %v393_v55 = vadd.f32 %v392_v53, %v678_v29 }
  0xee   :  { %v233_v56 = vpop.f32.mrf.mxu0  ;;  %v394_v57 = vpop.f32.mrf.mxu1 }
  0xef   :  { %467 = vst [vmem:[%s943_s3 + $0x140] sm:$0xff] %v232_v54  ;;  %469 = vst [vmem:[%s943_s3 + $0x150] sm:$0xff] %v393_v55  ;;  %v234_v58 = vadd.f32 %v233_v56, %v680_v30  ;;  %v395_v59 = vadd.f32 %v394_v57, %v682_v31 }
  0xf0   :  { %v237_v60 = vpop.f32.mrf.mxu0  ;;  %v398_v61 = vpop.f32.mrf.mxu1 }
  0xf1   :  { %468 = vst [vmem:[%s943_s3 + $0x148] sm:$0xff] %v234_v58  ;;  %470 = vst [vmem:[%s943_s3 + $0x158] sm:$0xff] %v395_v59  ;;  %v238_v62 = vadd.f32 %v237_v60, %v676_v28  ;;  %v399_v63 = vadd.f32 %v398_v61, %v678_v29 }
  0xf2   :  { %v239_v0 = vpop.f32.mrf.mxu0  ;;  %v400_v1 = vpop.f32.mrf.mxu1 }
  0xf3   :  { %471 = vst [vmem:[%s943_s3 + $0x160] sm:$0xff] %v238_v62  ;;  %473 = vst [vmem:[%s943_s3 + $0x170] sm:$0xff] %v399_v63  ;;  %v240_v2 = vadd.f32 %v239_v0, %v680_v30  ;;  %v401_v3 = vadd.f32 %v400_v1, %v682_v31 }
  0xf4   :  { %v243_v4 = vpop.f32.mrf.mxu0  ;;  %v404_v5 = vpop.f32.mrf.mxu1 }
  0xf5   :  { %472 = vst [vmem:[%s943_s3 + $0x168] sm:$0xff] %v240_v2  ;;  %474 = vst [vmem:[%s943_s3 + $0x178] sm:$0xff] %v401_v3  ;;  %v244_v6 = vadd.f32 %v243_v4, %v676_v28  ;;  %v405_v7 = vadd.f32 %v404_v5, %v678_v29 }
  0xf6   :  { %v245_v8 = vpop.f32.mrf.mxu0  ;;  %v406_v9 = vpop.f32.mrf.mxu1 }
  0xf7   :  { %475 = vst [vmem:[%s943_s3 + $0x180] sm:$0xff] %v244_v6  ;;  %477 = vst [vmem:[%s943_s3 + $0x190] sm:$0xff] %v405_v7  ;;  %v246_v10 = vadd.f32 %v245_v8, %v680_v30  ;;  %v407_v11 = vadd.f32 %v406_v9, %v682_v31 }
  0xf8   :  { %v249_v12 = vpop.f32.mrf.mxu0  ;;  %v410_v13 = vpop.f32.mrf.mxu1 }
  0xf9   :  { %476 = vst [vmem:[%s943_s3 + $0x188] sm:$0xff] %v246_v10  ;;  %478 = vst [vmem:[%s943_s3 + $0x198] sm:$0xff] %v407_v11  ;;  %v250_v14 = vadd.f32 %v249_v12, %v676_v28  ;;  %v411_v15 = vadd.f32 %v410_v13, %v678_v29 }
  0xfa   :  { %v251_v16 = vpop.f32.mrf.mxu0  ;;  %v412_v17 = vpop.f32.mrf.mxu1 }
  0xfb   :  { %479 = vst [vmem:[%s943_s3 + $0x1a0] sm:$0xff] %v250_v14  ;;  %481 = vst [vmem:[%s943_s3 + $0x1b0] sm:$0xff] %v411_v15  ;;  %v252_v18 = vadd.f32 %v251_v16, %v680_v30  ;;  %v413_v19 = vadd.f32 %v412_v17, %v682_v31 }
  0xfc   :  { %v255_v20 = vpop.f32.mrf.mxu0  ;;  %v416_v21 = vpop.f32.mrf.mxu1 }
  0xfd   :  { %480 = vst [vmem:[%s943_s3 + $0x1a8] sm:$0xff] %v252_v18  ;;  %482 = vst [vmem:[%s943_s3 + $0x1b8] sm:$0xff] %v413_v19  ;;  %v256_v22 = vadd.f32 %v255_v20, %v676_v28  ;;  %v417_v23 = vadd.f32 %v416_v21, %v678_v29 }
  0xfe   :  { %v257_v24 = vpop.f32.mrf.mxu0  ;;  %v418_v25 = vpop.f32.mrf.mxu1 }
  0xff   :  { %483 = vst [vmem:[%s943_s3 + $0x1c0] sm:$0xff] %v256_v22  ;;  %485 = vst [vmem:[%s943_s3 + $0x1d0] sm:$0xff] %v417_v23  ;;  %v258_v26 = vadd.f32 %v257_v24, %v680_v30  ;;  %v419_v27 = vadd.f32 %v418_v25, %v682_v31 }
 0x100   :  { %v261_v32 = vpop.f32.mrf.mxu0  ;;  %v422_v33 = vpop.f32.mrf.mxu1 }
 0x101   :  { %484 = vst [vmem:[%s943_s3 + $0x1c8] sm:$0xff] %v258_v26  ;;  %486 = vst [vmem:[%s943_s3 + $0x1d8] sm:$0xff] %v419_v27  ;;  %v262_v34 = vadd.f32 %v261_v32, %v676_v28  ;;  %v423_v35 = vadd.f32 %v422_v33, %v678_v29 }
 0x102   :  { %v263_v36 = vpop.f32.mrf.mxu0  ;;  %v424_v37 = vpop.f32.mrf.mxu1 }
 0x103   :  { %487 = vst [vmem:[%s943_s3 + $0x1e0] sm:$0xff] %v262_v34  ;;  %489 = vst [vmem:[%s943_s3 + $0x1f0] sm:$0xff] %v423_v35  ;;  %v264_v38 = vadd.f32 %v263_v36, %v680_v30  ;;  %v425_v39 = vadd.f32 %v424_v37, %v682_v31 }
 0x105   :  { %488 = vst [vmem:[%s943_s3 + $0x1e8] sm:$0xff] %v264_v38  ;;  %490 = vst [vmem:[%s943_s3 + $0x1f8] sm:$0xff] %v425_v39 }

// kernel: decoder_block_forward.7
= control target key start
LH: loop header
LB: loop body
LE: loop exit
PB: predicated region body
PF: predicated region fallthrough
CT: control target
= control target key end

     0   :  { %s896_s0 = inlined_call_operand.vmem [shape: f32[512,128], index: 0, kind: input, shape index: {}]   ;;  %s897_s1 = inlined_call_operand.vmem [shape: f32[1,128], index: 1, kind: input, shape index: {}]   ;;  %s898_s2 = inlined_call_operand.vmem [shape: f32[1,128], index: 2, kind: input, shape index: {}]   ;;  %s899_s3 = inlined_call_operand.vmem [shape: f32[512,128], index: 3, kind: output, shape index: {}]  }
   0x1   :  { %v14_v0 = vld [vmem:[%s896_s0] sm:$0xff]  ;;  %v15_v4 = vld [vmem:[%s896_s0 + $0x8] sm:$0xff]  ;;  %v16_v5 = vld [vmem:[%s896_s0 + $0x10] sm:$0xff] }
   0x2   :  { %v380_v1 = vld [vmem:[%s897_s1] ss:$0 sm:$0xff]  ;;  %v17_v6 = vld [vmem:[%s896_s0 + $0x18] sm:$0xff]  ;;  %v19_v11 = vld [vmem:[%s896_s0 + $0x28] sm:$0xff] }
   0x3   :  { %v385_v2 = vld [vmem:[%s898_s2] ss:$0 sm:$0xff]  ;;  %v85_v3 = vmul.f32 %v380_v1, %v14_v0  ;;  %v86_v7 = vmul.f32 %v380_v1, %v15_v4  ;;  %v87_v8 = vmul.f32 %v380_v1, %v16_v5  ;;  %v88_v9 = vmul.f32 %v380_v1, %v17_v6  ;;  %v20_v12 = vld [vmem:[%s896_s0 + $0x30] sm:$0xff]  ;;  %v21_v17 = vld [vmem:[%s896_s0 + $0x38] sm:$0xff] }
   0x4   :  { %v18_v10 = vld [vmem:[%s896_s0 + $0x20] sm:$0xff]  ;;  %v90_v15 = vmul.f32 %v380_v1, %v19_v11  ;;  %v91_v16 = vmul.f32 %v380_v1, %v20_v12  ;;  %v92_v21 = vmul.f32 %v380_v1, %v21_v17  ;;  %v23_v27 = vld [vmem:[%s896_s0 + $0x48] sm:$0xff]  ;;  %v24_v28 = vld [vmem:[%s896_s0 + $0x50] sm:$0xff] }
   0x5   :  { %v156_v13 = vadd.f32 %v385_v2, %v85_v3  ;;  %v89_v14 = vmul.f32 %v380_v1, %v18_v10  ;;  %v157_v18 = vadd.f32 %v385_v2, %v86_v7  ;;  %v158_v19 = vadd.f32 %v385_v2, %v87_v8  ;;  %v22_v22 = vld [vmem:[%s896_s0 + $0x40] sm:$0xff]  ;;  %v25_v29 = vld [vmem:[%s896_s0 + $0x58] sm:$0xff]  ;;  %v27_v35 = vld [vmem:[%s896_s0 + $0x68] sm:$0xff] }
   0x6   :  { %v159_v20 = vadd.f32 %v385_v2, %v88_v9  ;;  %v161_v25 = vadd.f32 %v385_v2, %v90_v15  ;;  %v162_v26 = vadd.f32 %v385_v2, %v91_v16  ;;  %v163_v33 = vadd.f32 %v385_v2, %v92_v21  ;;  %v26_v34 = vld [vmem:[%s896_s0 + $0x60] sm:$0xff]  ;;  %v28_v36 = vld [vmem:[%s896_s0 + $0x70] sm:$0xff]  ;;  %v29_v41 = vld [vmem:[%s896_s0 + $0x78] sm:$0xff] }
   0x7   :  { %v220_v23 = vmax.f32 %v156_v13, 0.0  ;;  %v160_v24 = vadd.f32 %v385_v2, %v89_v14  ;;  %v221_v30 = vmax.f32 %v157_v18, 0.0  ;;  %v222_v31 = vmax.f32 %v158_v19, 0.0  ;;  %v30_v54 = vld [vmem:[%s896_s0 + $0x80] sm:$0xff]  ;;  %v31_v59 = vld [vmem:[%s896_s0 + $0x88] sm:$0xff]  ;;  %v32_v60 = vld [vmem:[%s896_s0 + $0x90] sm:$0xff] }
   0x8   :  { %v223_v32 = vmax.f32 %v159_v20, 0.0  ;;  %v225_v38 = vmax.f32 %v161_v25, 0.0  ;;  %v226_v39 = vmax.f32 %v162_v26, 0.0  ;;  %v93_v40 = vmul.f32 %v380_v1, %v22_v22  ;;  %v33_v61 = vld [vmem:[%s896_s0 + $0x98] sm:$0xff]  ;;  %v34_v4 = vld [vmem:[%s896_s0 + $0xa0] sm:$0xff]  ;;  %v35_v5 = vld [vmem:[%s896_s0 + $0xa8] sm:$0xff] }
   0x9   :  { %284 = vst [vmem:[%s899_s3] sm:$0xff] %v220_v23  ;;  %v224_v37 = vmax.f32 %v160_v24, 0.0  ;;  %285 = vst [vmem:[%s899_s3 + $0x8] sm:$0xff] %v221_v30  ;;  %v227_v42 = vmax.f32 %v163_v33, 0.0  ;;  %v94_v43 = vmul.f32 %v380_v1, %v23_v27  ;;  %v95_v44 = vmul.f32 %v380_v1, %v24_v28  ;;  %v36_v6 = vld [vmem:[%s896_s0 + $0xb0] sm:$0xff]  ;;  %v37_v11 = vld [vmem:[%s896_s0 + $0xb8] sm:$0xff] }
   0xa   :  { %286 = vst [vmem:[%s899_s3 + $0x10] sm:$0xff] %v222_v31  ;;  %287 = vst [vmem:[%s899_s3 + $0x18] sm:$0xff] %v223_v32  ;;  %v96_v45 = vmul.f32 %v380_v1, %v25_v29  ;;  %v164_v46 = vadd.f32 %v385_v2, %v93_v40  ;;  %v97_v47 = vmul.f32 %v380_v1, %v26_v34  ;;  %v38_v24 = vld [vmem:[%s896_s0 + $0xc0] sm:$0xff]  ;;  %v39_v29 = vld [vmem:[%s896_s0 + $0xc8] sm:$0xff] }
   0xb   :  { %288 = vst [vmem:[%s899_s3 + $0x20] sm:$0xff] %v224_v37  ;;  %289 = vst [vmem:[%s899_s3 + $0x28] sm:$0xff] %v225_v38  ;;  %v98_v48 = vmul.f32 %v380_v1, %v27_v35  ;;  %v99_v49 = vmul.f32 %v380_v1, %v28_v36  ;;  %v165_v50 = vadd.f32 %v385_v2, %v94_v43  ;;  %v40_v30 = vld [vmem:[%s896_s0 + $0xd0] sm:$0xff]  ;;  %v41_v31 = vld [vmem:[%s896_s0 + $0xd8] sm:$0xff] }
   0xc   :  { %290 = vst [vmem:[%s899_s3 + $0x30] sm:$0xff] %v226_v39  ;;  %291 = vst [vmem:[%s899_s3 + $0x38] sm:$0xff] %v227_v42  ;;  %v166_v51 = vadd.f32 %v385_v2, %v95_v44  ;;  %v167_v52 = vadd.f32 %v385_v2, %v96_v45  ;;  %v100_v53 = vmul.f32 %v380_v1, %v29_v41  ;;  %v228_v55 = vmax.f32 %v164_v46, 0.0  ;;  %v42_v36 = vld [vmem:[%s896_s0 + $0xe0] sm:$0xff]  ;;  %v43_v37 = vld [vmem:[%s896_s0 + $0xe8] sm:$0xff] }
   0xd   :  { %v168_v56 = vadd.f32 %v385_v2, %v97_v47  ;;  %v169_v57 = vadd.f32 %v385_v2, %v98_v48  ;;  %v170_v58 = vadd.f32 %v385_v2, %v99_v49  ;;  %v229_v62 = vmax.f32 %v165_v50, 0.0  ;;  %v44_v38 = vld [vmem:[%s896_s0 + $0xf0] sm:$0xff]  ;;  %v45_v43 = vld [vmem:[%s896_s0 + $0xf8] sm:$0xff] }
   0xe   :  { %v230_v63 = vmax.f32 %v166_v51, 0.0  ;;  %v231_v0 = vmax.f32 %v167_v52, 0.0  ;;  %v171_v3 = vadd.f32 %v385_v2, %v100_v53  ;;  %292 = vst [vmem:[%s899_s3 + $0x40] sm:$0xff] %v228_v55  ;;  %v101_v10 = vmul.f32 %v380_v1, %v30_v54 }
   0xf   :  { %v232_v7 = vmax.f32 %v168_v56, 0.0  ;;  %v233_v8 = vmax.f32 %v169_v57, 0.0  ;;  %v234_v9 = vmax.f32 %v170_v58, 0.0  ;;  %293 = vst [vmem:[%s899_s3 + $0x48] sm:$0xff] %v229_v62  ;;  %v102_v13 = vmul.f32 %v380_v1, %v31_v59  ;;  %v46_v56 = vld [vmem:[%s896_s0 + $0x100] sm:$0xff]  ;;  %v48_v62 = vld [vmem:[%s896_s0 + $0x110] sm:$0xff] }
  0x10   :  { %294 = vst [vmem:[%s899_s3 + $0x50] sm:$0xff] %v230_v63  ;;  %295 = vst [vmem:[%s899_s3 + $0x58] sm:$0xff] %v231_v0  ;;  %v235_v12 = vmax.f32 %v171_v3, 0.0  ;;  %v103_v14 = vmul.f32 %v380_v1, %v32_v60  ;;  %v104_v15 = vmul.f32 %v380_v1, %v33_v61  ;;  %v172_v16 = vadd.f32 %v385_v2, %v101_v10  ;;  %v47_v61 = vld [vmem:[%s896_s0 + $0x108] sm:$0xff]  ;;  %v49_v63 = vld [vmem:[%s896_s0 + $0x118] sm:$0xff] }
  0x11   :  { %296 = vst [vmem:[%s899_s3 + $0x60] sm:$0xff] %v232_v7  ;;  %297 = vst [vmem:[%s899_s3 + $0x68] sm:$0xff] %v233_v8  ;;  %v105_v17 = vmul.f32 %v380_v1, %v34_v4  ;;  %v106_v18 = vmul.f32 %v380_v1, %v35_v5  ;;  %v107_v19 = vmul.f32 %v380_v1, %v36_v6  ;;  %v50_v6 = vld [vmem:[%s896_s0 + $0x120] sm:$0xff]  ;;  %v51_v7 = vld [vmem:[%s896_s0 + $0x128] sm:$0xff] }
  0x12   :  { %298 = vst [vmem:[%s899_s3 + $0x70] sm:$0xff] %v234_v9  ;;  %299 = vst [vmem:[%s899_s3 + $0x78] sm:$0xff] %v235_v12  ;;  %v173_v20 = vadd.f32 %v385_v2, %v102_v13  ;;  %v174_v21 = vadd.f32 %v385_v2, %v103_v14  ;;  %v175_v22 = vadd.f32 %v385_v2, %v104_v15  ;;  %v236_v25 = vmax.f32 %v172_v16, 0.0  ;;  %v52_v8 = vld [vmem:[%s896_s0 + $0x130] sm:$0xff]  ;;  %v53_v13 = vld [vmem:[%s896_s0 + $0x138] sm:$0xff] }
  0x13   :  { %v108_v23 = vmul.f32 %v380_v1, %v37_v11  ;;  %v176_v26 = vadd.f32 %v385_v2, %v105_v17  ;;  %v177_v27 = vadd.f32 %v385_v2, %v106_v18  ;;  %v178_v28 = vadd.f32 %v385_v2, %v107_v19 }
  0x14   :  { %v237_v32 = vmax.f32 %v173_v20, 0.0  ;;  %v238_v33 = vmax.f32 %v174_v21, 0.0  ;;  %v239_v34 = vmax.f32 %v175_v22, 0.0  ;;  %300 = vst [vmem:[%s899_s3 + $0x80] sm:$0xff] %v236_v25  ;;  %v109_v42 = vmul.f32 %v380_v1, %v38_v24 }
  0x15   :  { %v179_v35 = vadd.f32 %v385_v2, %v108_v23  ;;  %v240_v39 = vmax.f32 %v176_v26, 0.0  ;;  %v241_v40 = vmax.f32 %v177_v27, 0.0  ;;  %v242_v41 = vmax.f32 %v178_v28, 0.0  ;;  %v54_v26 = vld [vmem:[%s896_s0 + $0x140] sm:$0xff] }
  0x16   :  { %301 = vst [vmem:[%s899_s3 + $0x88] sm:$0xff] %v237_v32  ;;  %302 = vst [vmem:[%s899_s3 + $0x90] sm:$0xff] %v238_v33  ;;  %v110_v45 = vmul.f32 %v380_v1, %v39_v29  ;;  %v111_v46 = vmul.f32 %v380_v1, %v40_v30  ;;  %v112_v47 = vmul.f32 %v380_v1, %v41_v31  ;;  %v55_v31 = vld [vmem:[%s896_s0 + $0x148] sm:$0xff]  ;;  %v56_v32 = vld [vmem:[%s896_s0 + $0x150] sm:$0xff] }
  0x17   :  { %303 = vst [vmem:[%s899_s3 + $0x98] sm:$0xff] %v239_v34  ;;  %v243_v44 = vmax.f32 %v179_v35, 0.0  ;;  %304 = vst [vmem:[%s899_s3 + $0xa0] sm:$0xff] %v240_v39  ;;  %v180_v48 = vadd.f32 %v385_v2, %v109_v42  ;;  %v113_v49 = vmul.f32 %v380_v1, %v42_v36  ;;  %v114_v50 = vmul.f32 %v380_v1, %v43_v37  ;;  %v57_v33 = vld [vmem:[%s896_s0 + $0x158] sm:$0xff]  ;;  %v59_v39 = vld [vmem:[%s896_s0 + $0x168] sm:$0xff] }
  0x18   :  { %305 = vst [vmem:[%s899_s3 + $0xa8] sm:$0xff] %v241_v40  ;;  %306 = vst [vmem:[%s899_s3 + $0xb0] sm:$0xff] %v242_v41  ;;  %v115_v51 = vmul.f32 %v380_v1, %v44_v38  ;;  %v181_v52 = vadd.f32 %v385_v2, %v110_v45  ;;  %v182_v53 = vadd.f32 %v385_v2, %v111_v46  ;;  %v58_v38 = vld [vmem:[%s896_s0 + $0x160] sm:$0xff]  ;;  %v60_v40 = vld [vmem:[%s896_s0 + $0x170] sm:$0xff] }
  0x19   :  { %307 = vst [vmem:[%s899_s3 + $0xb8] sm:$0xff] %v243_v44  ;;  %v183_v54 = vadd.f32 %v385_v2, %v112_v47  ;;  %v116_v55 = vmul.f32 %v380_v1, %v45_v43  ;;  %v244_v57 = vmax.f32 %v180_v48, 0.0  ;;  %v184_v58 = vadd.f32 %v385_v2, %v113_v49  ;;  %v61_v45 = vld [vmem:[%s896_s0 + $0x178] sm:$0xff] }
  0x1a   :  { %v185_v59 = vadd.f32 %v385_v2, %v114_v50  ;;  %v186_v60 = vadd.f32 %v385_v2, %v115_v51  ;;  %v245_v0 = vmax.f32 %v181_v52, 0.0  ;;  %v246_v3 = vmax.f32 %v182_v53, 0.0 }
  0x1b   :  { %v247_v4 = vmax.f32 %v183_v54, 0.0  ;;  %v187_v5 = vadd.f32 %v385_v2, %v116_v55  ;;  %308 = vst [vmem:[%s899_s3 + $0xc0] sm:$0xff] %v244_v57  ;;  %v248_v9 = vmax.f32 %v184_v58, 0.0  ;;  %v117_v12 = vmul.f32 %v380_v1, %v46_v56  ;;  %v62_v58 = vld [vmem:[%s896_s0 + $0x180] sm:$0xff] }
  0x1c   :  { %v249_v10 = vmax.f32 %v185_v59, 0.0  ;;  %v250_v11 = vmax.f32 %v186_v60, 0.0  ;;  %309 = vst [vmem:[%s899_s3 + $0xc8] sm:$0xff] %v245_v0  ;;  %310 = vst [vmem:[%s899_s3 + $0xd0] sm:$0xff] %v246_v3  ;;  %v118_v15 = vmul.f32 %v380_v1, %v47_v61  ;;  %v119_v16 = vmul.f32 %v380_v1, %v48_v62  ;;  %v64_v0 = vld [vmem:[%s896_s0 + $0x190] sm:$0xff]  ;;  %v65_v3 = vld [vmem:[%s896_s0 + $0x198] sm:$0xff] }
  0x1d   :  { %311 = vst [vmem:[%s899_s3 + $0xd8] sm:$0xff] %v247_v4  ;;  %v251_v14 = vmax.f32 %v187_v5, 0.0  ;;  %v120_v17 = vmul.f32 %v380_v1, %v49_v63  ;;  %312 = vst [vmem:[%s899_s3 + $0xe0] sm:$0xff] %v248_v9  ;;  %v188_v18 = vadd.f32 %v385_v2, %v117_v12  ;;  %v121_v19 = vmul.f32 %v380_v1, %v50_v6  ;;  %v63_v63 = vld [vmem:[%s896_s0 + $0x188] sm:$0xff] }
  0x1e   :  { %313 = vst [vmem:[%s899_s3 + $0xe8] sm:$0xff] %v249_v10  ;;  %314 = vst [vmem:[%s899_s3 + $0xf0] sm:$0xff] %v250_v11  ;;  %v122_v20 = vmul.f32 %v380_v1, %v51_v7  ;;  %v123_v21 = vmul.f32 %v380_v1, %v52_v8  ;;  %v189_v22 = vadd.f32 %v385_v2, %v118_v15  ;;  %v66_v8 = vld [vmem:[%s896_s0 + $0x1a0] sm:$0xff]  ;;  %v67_v9 = vld [vmem:[%s896_s0 + $0x1a8] sm:$0xff] }
  0x1f   :  { %315 = vst [vmem:[%s899_s3 + $0xf8] sm:$0xff] %v251_v14  ;;  %v190_v23 = vadd.f32 %v385_v2, %v119_v16  ;;  %v191_v24 = vadd.f32 %v385_v2, %v120_v17  ;;  %v124_v25 = vmul.f32 %v380_v1, %v53_v13  ;;  %v252_v27 = vmax.f32 %v188_v18, 0.0  ;;  %v68_v10 = vld [vmem:[%s896_s0 + $0x1b0] sm:$0xff]  ;;  %v69_v15 = vld [vmem:[%s896_s0 + $0x1b8] sm:$0xff] }
  0x20   :  { %v192_v28 = vadd.f32 %v385_v2, %v121_v19  ;;  %v193_v29 = vadd.f32 %v385_v2, %v122_v20  ;;  %v194_v30 = vadd.f32 %v385_v2, %v123_v21  ;;  %v253_v34 = vmax.f32 %v189_v22, 0.0 }
  0x21   :  { %v254_v35 = vmax.f32 %v190_v23, 0.0  ;;  %v255_v36 = vmax.f32 %v191_v24, 0.0  ;;  %v195_v37 = vadd.f32 %v385_v2, %v124_v25  ;;  %316 = vst [vmem:[%s899_s3 + $0x100] sm:$0xff] %v252_v27  ;;  %v125_v44 = vmul.f32 %v380_v1, %v54_v26 }
  0x22   :  { %v256_v41 = vmax.f32 %v192_v28, 0.0  ;;  %v257_v42 = vmax.f32 %v193_v29, 0.0  ;;  %v258_v43 = vmax.f32 %v194_v30, 0.0  ;;  %317 = vst [vmem:[%s899_s3 + $0x108] sm:$0xff] %v253_v34  ;;  %v126_v47 = vmul.f32 %v380_v1, %v55_v31  ;;  %v70_v28 = vld [vmem:[%s896_s0 + $0x1c0] sm:$0xff]  ;;  %v72_v34 = vld [vmem:[%s896_s0 + $0x1d0] sm:$0xff] }
  0x23   :  { %318 = vst [vmem:[%s899_s3 + $0x110] sm:$0xff] %v254_v35  ;;  %319 = vst [vmem:[%s899_s3 + $0x118] sm:$0xff] %v255_v36  ;;  %v259_v46 = vmax.f32 %v195_v37, 0.0  ;;  %v127_v48 = vmul.f32 %v380_v1, %v56_v32  ;;  %v128_v49 = vmul.f32 %v380_v1, %v57_v33  ;;  %v196_v50 = vadd.f32 %v385_v2, %v125_v44  ;;  %v71_v33 = vld [vmem:[%s896_s0 + $0x1c8] sm:$0xff]  ;;  %v73_v35 = vld [vmem:[%s896_s0 + $0x1d8] sm:$0xff] }
  0x24   :  { %320 = vst [vmem:[%s899_s3 + $0x120] sm:$0xff] %v256_v41  ;;  %321 = vst [vmem:[%s899_s3 + $0x128] sm:$0xff] %v257_v42  ;;  %v129_v51 = vmul.f32 %v380_v1, %v58_v38  ;;  %v130_v52 = vmul.f32 %v380_v1, %v59_v39  ;;  %v131_v53 = vmul.f32 %v380_v1, %v60_v40  ;;  %v74_v40 = vld [vmem:[%s896_s0 + $0x1e0] sm:$0xff]  ;;  %v75_v41 = vld [vmem:[%s896_s0 + $0x1e8] sm:$0xff] }
  0x25   :  { %322 = vst [vmem:[%s899_s3 + $0x130] sm:$0xff] %v258_v43  ;;  %323 = vst [vmem:[%s899_s3 + $0x138] sm:$0xff] %v259_v46  ;;  %v197_v54 = vadd.f32 %v385_v2, %v126_v47  ;;  %v198_v55 = vadd.f32 %v385_v2, %v127_v48  ;;  %v199_v56 = vadd.f32 %v385_v2, %v128_v49  ;;  %v260_v59 = vmax.f32 %v196_v50, 0.0  ;;  %v76_v42 = vld [vmem:[%s896_s0 + $0x1f0] sm:$0xff]  ;;  %v77_v47 = vld [vmem:[%s896_s0 + $0x1f8] sm:$0xff] }
  0x26   :  { %v132_v57 = vmul.f32 %v380_v1, %v61_v45  ;;  %v200_v60 = vadd.f32 %v385_v2, %v129_v51  ;;  %v201_v61 = vadd.f32 %v385_v2, %v130_v52  ;;  %v202_v62 = vadd.f32 %v385_v2, %v131_v53 }
  0x27   :  { %v261_v4 = vmax.f32 %v197_v54, 0.0  ;;  %v262_v5 = vmax.f32 %v198_v55, 0.0  ;;  %v263_v6 = vmax.f32 %v199_v56, 0.0  ;;  %324 = vst [vmem:[%s899_s3 + $0x140] sm:$0xff] %v260_v59  ;;  %v133_v14 = vmul.f32 %v380_v1, %v62_v58 }
  0x28   :  { %v203_v7 = vadd.f32 %v385_v2, %v132_v57  ;;  %v264_v11 = vmax.f32 %v200_v60, 0.0  ;;  %v265_v12 = vmax.f32 %v201_v61, 0.0  ;;  %v266_v13 = vmax.f32 %v202_v62, 0.0 }
  0x29   :  { %325 = vst [vmem:[%s899_s3 + $0x148] sm:$0xff] %v261_v4  ;;  %326 = vst [vmem:[%s899_s3 + $0x150] sm:$0xff] %v262_v5  ;;  %v134_v17 = vmul.f32 %v380_v1, %v63_v63  ;;  %v135_v18 = vmul.f32 %v380_v1, %v64_v0  ;;  %v136_v19 = vmul.f32 %v380_v1, %v65_v3 }
  0x2a   :  { %327 = vst [vmem:[%s899_s3 + $0x158] sm:$0xff] %v263_v6  ;;  %v267_v16 = vmax.f32 %v203_v7, 0.0  ;;  %328 = vst [vmem:[%s899_s3 + $0x160] sm:$0xff] %v264_v11  ;;  %v204_v20 = vadd.f32 %v385_v2, %v133_v14  ;;  %v137_v21 = vmul.f32 %v380_v1, %v66_v8  ;;  %v138_v22 = vmul.f32 %v380_v1, %v67_v9 }
  0x2b   :  { %329 = vst [vmem:[%s899_s3 + $0x168] sm:$0xff] %v265_v12  ;;  %330 = vst [vmem:[%s899_s3 + $0x170] sm:$0xff] %v266_v13  ;;  %v139_v23 = vmul.f32 %v380_v1, %v68_v10  ;;  %v205_v24 = vadd.f32 %v385_v2, %v134_v17  ;;  %v206_v25 = vadd.f32 %v385_v2, %v135_v18 }
  0x2c   :  { %331 = vst [vmem:[%s899_s3 + $0x178] sm:$0xff] %v267_v16  ;;  %v207_v26 = vadd.f32 %v385_v2, %v136_v19  ;;  %v140_v27 = vmul.f32 %v380_v1, %v69_v15  ;;  %v268_v29 = vmax.f32 %v204_v20, 0.0  ;;  %v208_v30 = vadd.f32 %v385_v2, %v137_v21 }
  0x2d   :  { %v209_v31 = vadd.f32 %v385_v2, %v138_v22  ;;  %v210_v32 = vadd.f32 %v385_v2, %v139_v23  ;;  %v269_v36 = vmax.f32 %v205_v24, 0.0  ;;  %v270_v37 = vmax.f32 %v206_v25, 0.0 }
  0x2e   :  { %v271_v38 = vmax.f32 %v207_v26, 0.0  ;;  %v211_v39 = vadd.f32 %v385_v2, %v140_v27  ;;  %332 = vst [vmem:[%s899_s3 + $0x180] sm:$0xff] %v268_v29  ;;  %v272_v43 = vmax.f32 %v208_v30, 0.0  ;;  %v141_v46 = vmul.f32 %v380_v1, %v70_v28 }
  0x2f   :  { %v273_v44 = vmax.f32 %v209_v31, 0.0  ;;  %v274_v45 = vmax.f32 %v210_v32, 0.0  ;;  %333 = vst [vmem:[%s899_s3 + $0x188] sm:$0xff] %v269_v36  ;;  %334 = vst [vmem:[%s899_s3 + $0x190] sm:$0xff] %v270_v37  ;;  %v142_v49 = vmul.f32 %v380_v1, %v71_v33  ;;  %v143_v50 = vmul.f32 %v380_v1, %v72_v34 }
  0x30   :  { %335 = vst [vmem:[%s899_s3 + $0x198] sm:$0xff] %v271_v38  ;;  %v275_v48 = vmax.f32 %v211_v39, 0.0  ;;  %v144_v51 = vmul.f32 %v380_v1, %v73_v35  ;;  %336 = vst [vmem:[%s899_s3 + $0x1a0] sm:$0xff] %v272_v43  ;;  %v212_v52 = vadd.f32 %v385_v2, %v141_v46  ;;  %v145_v53 = vmul.f32 %v380_v1, %v74_v40 }
  0x31   :  { %337 = vst [vmem:[%s899_s3 + $0x1a8] sm:$0xff] %v273_v44  ;;  %338 = vst [vmem:[%s899_s3 + $0x1b0] sm:$0xff] %v274_v45  ;;  %v146_v54 = vmul.f32 %v380_v1, %v75_v41  ;;  %v147_v55 = vmul.f32 %v380_v1, %v76_v42  ;;  %v213_v56 = vadd.f32 %v385_v2, %v142_v49 }
  0x32   :  { %339 = vst [vmem:[%s899_s3 + $0x1b8] sm:$0xff] %v275_v48  ;;  %v214_v57 = vadd.f32 %v385_v2, %v143_v50  ;;  %v215_v58 = vadd.f32 %v385_v2, %v144_v51  ;;  %v148_v59 = vmul.f32 %v380_v1, %v77_v47  ;;  %v276_v60 = vmax.f32 %v212_v52, 0.0 }
  0x33   :  { %v216_v61 = vadd.f32 %v385_v2, %v145_v53  ;;  %v217_v62 = vadd.f32 %v385_v2, %v146_v54  ;;  %v218_v63 = vadd.f32 %v385_v2, %v147_v55  ;;  %v277_v0 = vmax.f32 %v213_v56, 0.0 }
  0x34   :  { %v278_v3 = vmax.f32 %v214_v57, 0.0  ;;  %v279_v4 = vmax.f32 %v215_v58, 0.0  ;;  %v219_v5 = vadd.f32 %v385_v2, %v148_v59  ;;  %340 = vst [vmem:[%s899_s3 + $0x1c0] sm:$0xff] %v276_v60 }
  0x35   :  { %v280_v6 = vmax.f32 %v216_v61, 0.0  ;;  %v281_v7 = vmax.f32 %v217_v62, 0.0  ;;  %v282_v8 = vmax.f32 %v218_v63, 0.0  ;;  %341 = vst [vmem:[%s899_s3 + $0x1c8] sm:$0xff] %v277_v0 }
  0x36   :  { %342 = vst [vmem:[%s899_s3 + $0x1d0] sm:$0xff] %v278_v3  ;;  %343 = vst [vmem:[%s899_s3 + $0x1d8] sm:$0xff] %v279_v4  ;;  %v283_v1 = vmax.f32 %v219_v5, 0.0 }
  0x37   :  { %344 = vst [vmem:[%s899_s3 + $0x1e0] sm:$0xff] %v280_v6  ;;  %345 = vst [vmem:[%s899_s3 + $0x1e8] sm:$0xff] %v281_v7 }
  0x38   :  { %346 = vst [vmem:[%s899_s3 + $0x1f0] sm:$0xff] %v282_v8  ;;  %347 = vst [vmem:[%s899_s3 + $0x1f8] sm:$0xff] %v283_v1 }

// kernel: decoder_block_forward.6
= control target key start
LH: loop header
LB: loop body
LE: loop exit
PB: predicated region body
PF: predicated region fallthrough
CT: control target
= control target key end

     0   :  { %s2731_s21 = smov 0   ;;  %s4631_s0 = inlined_call_operand.vmem [shape: f32[2,18,18,128], index: 0, kind: input, shape index: {}]   ;;  %s4632_s1 = inlined_call_operand.vmem [shape: f32[1152,128], index: 1, kind: input, shape index: {}]   ;;  %s4633_s2 = inlined_call_operand.vmem [shape: f32[1,1,1,128], index: 2, kind: input, shape index: {}]   ;;  %s4634_s3 = inlined_call_operand.vmem [shape: f32[1,1,1,128], index: 3, kind: input, shape index: {}]   ;;  %s4635_s4 = inlined_call_operand.vmem [shape: f32[1,128], index: 4, kind: input, shape index: {}]   ;;  %s4636_s5 = inlined_call_operand.vmem [shape: f32[2,16,16,128], index: 5, kind: output, shape index: {0}]   ;;  %s4637_s6 = inlined_call_operand.vmem [shape: f32[2,1,256], index: 6, kind: output, shape index: {1}]  }
   0x1 LB: > { %s2406_s22 = sadd.s32 4294967295, %s2692_s21   ;;  %p2410_p0 = scmp.ge.s32.totalorder %s2692_s21, 1  ;;  %s2692_s21 = sphi %s2731_s21, %s17_s21  }
   0x2   : > { %p215_p1 = scmp.lt.s32.totalorder %s2692_s21, 3 }
   0x4   : > { %p216_p2 = pnand %p2410_p0, %p215_p1 }
   0x6   : > { %219 = sbr.rel (%p216_p2) target bundleno = 615 (0x267), region = 40 }
   0xb   : > { %v898_v0 = vld [vmem:[%s4632_s1 + $0x78] sm:$0xff]  ;;  %v4645_v2 = vmov 0.0   ;;  %v897_v3 = vld [vmem:[%s4632_s1 + $0x70] sm:$0xff]  ;;  %v896_v5 = vld [vmem:[%s4632_s1 + $0x68] sm:$0xff]  ;;  %p249_p3 = scmp.lt.s32.totalorder %s2406_s22, 1  ;;  %v4638_v60 = vlaneseq  ;;  %vm623_vm3 = vcmask 1046528  }
   0xc   : > { %v930_v1 = vld [vmem:[%s4632_s1 + $0x178] sm:$0xff]  ;;  %1034 = vmatprep.subr.mxu0 %v4645_v2  ;;  %1259 = vmatprep.subr.mxu1 %v4645_v2  ;;  %v929_v4 = vld [vmem:[%s4632_s1 + $0x170] sm:$0xff]  ;;  %v928_v6 = vld [vmem:[%s4632_s1 + $0x168] sm:$0xff]  ;;  %vm736_vm4 = vcmask 1045504  }
   0xd   : > { %1035 = vmatpush1.msra.mxu0 %v898_v0  ;;  %1260 = vmatpush1.msra.mxu1 %v930_v1  ;;  %v895_v7 = vld [vmem:[%s4632_s1 + $0x60] sm:$0xff]  ;;  %v894_v9 = vld [vmem:[%s4632_s1 + $0x58] sm:$0xff]  ;;  %v893_v11 = vld [vmem:[%s4632_s1 + $0x50] sm:$0xff]  ;;  %s4825_s22 = smov (!%p249_p3, %s2406_s22), 1 }
   0xe   : > { %1036 = vmatprep.subr.mxu0 %v4645_v2  ;;  %1261 = vmatprep.subr.mxu1 %v4645_v2  ;;  %v927_v8 = vld [vmem:[%s4632_s1 + $0x160] sm:$0xff]  ;;  %v926_v10 = vld [vmem:[%s4632_s1 + $0x158] sm:$0xff]  ;;  %v925_v12 = vld [vmem:[%s4632_s1 + $0x150] sm:$0xff]  ;;  %s2673_s23 = smul.u32 432, %s4825_s22  ;;  %s2414_s29 = sshll.u32 %s4825_s22, 1 }
   0xf   : > { %1037 = vmatpush1.msra.mxu0 %v897_v3  ;;  %1262 = vmatpush1.msra.mxu1 %v929_v4  ;;  %v892_v13 = vld [vmem:[%s4632_s1 + $0x48] sm:$0xff]  ;;  %v891_v15 = vld [vmem:[%s4632_s1 + $0x40] sm:$0xff]  ;;  %v890_v17 = vld [vmem:[%s4632_s1 + $0x38] sm:$0xff]  ;;  %s262_s8 = scalar_lea.vmem %s4637_s6, %s2414_s29 }
  0x10   : > { %1038 = vmatprep.subr.mxu0 %v4645_v2  ;;  %1263 = vmatprep.subr.mxu1 %v4645_v2  ;;  %v924_v14 = vld [vmem:[%s4632_s1 + $0x148] sm:$0xff]  ;;  %v923_v16 = vld [vmem:[%s4632_s1 + $0x140] sm:$0xff]  ;;  %v922_v18 = vld [vmem:[%s4632_s1 + $0x138] sm:$0xff]  ;;  %s2939_s10 = scalar_lea.vmem %s4631_s0, %s2673_s23 }
  0x11   : > { %1039 = vmatpush1.msra.mxu0 %v896_v5  ;;  %1264 = vmatpush1.msra.mxu1 %v928_v6  ;;  %v889_v19 = vld [vmem:[%s4632_s1 + $0x30] sm:$0xff]  ;;  %v888_v21 = vld [vmem:[%s4632_s1 + $0x28] sm:$0xff]  ;;  %v887_v23 = vld [vmem:[%s4632_s1 + $0x20] sm:$0xff]  ;;  %v2999_v6 = vshrl.u32 %v4638_v60, 7 }
  0x12   : > { %1040 = vmatprep.subr.mxu0 %v4645_v2  ;;  %1265 = vmatprep.subr.mxu1 %v4645_v2  ;;  %v921_v20 = vld [vmem:[%s4632_s1 + $0x130] sm:$0xff]  ;;  %v920_v22 = vld [vmem:[%s4632_s1 + $0x128] sm:$0xff]  ;;  %v919_v24 = vld [vmem:[%s4632_s1 + $0x120] sm:$0xff] }
  0x13   : > { %1041 = vmatpush1.msra.mxu0 %v895_v7  ;;  %1266 = vmatpush1.msra.mxu1 %v927_v8  ;;  %v886_v25 = vld [vmem:[%s4632_s1 + $0x18] sm:$0xff]  ;;  %v885_v27 = vld [vmem:[%s4632_s1 + $0x10] sm:$0xff]  ;;  %v884_v29 = vld [vmem:[%s4632_s1 + $0x8] sm:$0xff]  ;;  %4717 = vst [vmem:[#allocation2_spill] sm:$0xff] %v2999_v6  ;;  %vm497_vm0 = vcmp.eq.s32.totalorder %v2999_v6, 0 }
  0x14   : > { %1042 = vmatprep.subr.mxu0 %v4645_v2  ;;  %1267 = vmatprep.subr.mxu1 %v4645_v2  ;;  %v918_v26 = vld [vmem:[%s4632_s1 + $0x118] sm:$0xff]  ;;  %v917_v28 = vld [vmem:[%s4632_s1 + $0x110] sm:$0xff]  ;;  %v916_v30 = vld [vmem:[%s4632_s1 + $0x108] sm:$0xff] }
  0x15   : > { %1043 = vmatpush1.msra.mxu0 %v894_v9  ;;  %1268 = vmatpush1.msra.mxu1 %v926_v10  ;;  %v883_v31 = vld [vmem:[%s4632_s1] sm:$0xff]  ;;  %v914_v33 = vld [vmem:[%s4632_s1 + $0xf8] sm:$0xff]  ;;  %v913_v35 = vld [vmem:[%s4632_s1 + $0xf0] sm:$0xff] }
  0x16   : > { %1044 = vmatprep.subr.mxu0 %v4645_v2  ;;  %1269 = vmatprep.subr.mxu1 %v4645_v2  ;;  %v915_v32 = vld [vmem:[%s4632_s1 + $0x100] sm:$0xff]  ;;  %v946_v34 = vld [vmem:[%s4632_s1 + $0x1f8] sm:$0xff]  ;;  %v945_v36 = vld [vmem:[%s4632_s1 + $0x1f0] sm:$0xff] }
  0x17   : > { %1045 = vmatpush1.msra.mxu0 %v893_v11  ;;  %1270 = vmatpush1.msra.mxu1 %v925_v12  ;;  %v912_v37 = vld [vmem:[%s4632_s1 + $0xe8] sm:$0xff]  ;;  %v911_v39 = vld [vmem:[%s4632_s1 + $0xe0] sm:$0xff]  ;;  %v910_v41 = vld [vmem:[%s4632_s1 + $0xd8] sm:$0xff] }
  0x18   : > { %1046 = vmatprep.subr.mxu0 %v4645_v2  ;;  %1271 = vmatprep.subr.mxu1 %v4645_v2  ;;  %v944_v38 = vld [vmem:[%s4632_s1 + $0x1e8] sm:$0xff]  ;;  %v943_v40 = vld [vmem:[%s4632_s1 + $0x1e0] sm:$0xff]  ;;  %v942_v42 = vld [vmem:[%s4632_s1 + $0x1d8] sm:$0xff] }
  0x19   : > { %1047 = vmatpush1.msra.mxu0 %v892_v13  ;;  %1272 = vmatpush1.msra.mxu1 %v924_v14  ;;  %v909_v43 = vld [vmem:[%s4632_s1 + $0xd0] sm:$0xff]  ;;  %v908_v45 = vld [vmem:[%s4632_s1 + $0xc8] sm:$0xff]  ;;  %v907_v47 = vld [vmem:[%s4632_s1 + $0xc0] sm:$0xff]  ;;  %v3014_v13 = vadd.s32 16, %v2999_v6 }
  0x1a   : > { %1048 = vmatprep.subr.mxu0 %v4645_v2  ;;  %1273 = vmatprep.subr.mxu1 %v4645_v2  ;;  %v941_v44 = vld [vmem:[%s4632_s1 + $0x1d0] sm:$0xff]  ;;  %v940_v46 = vld [vmem:[%s4632_s1 + $0x1c8] sm:$0xff]  ;;  %v939_v48 = vld [vmem:[%s4632_s1 + $0x1c0] sm:$0xff] }
  0x1b   : > { %1049 = vmatpush1.msra.mxu0 %v891_v15  ;;  %1274 = vmatpush1.msra.mxu1 %v923_v16  ;;  %v906_v49 = vld [vmem:[%s4632_s1 + $0xb8] sm:$0xff]  ;;  %v2953_v52 = vld [vmem:[%s4633_s2] ss:$0 sm:$0xff]  ;;  %v905_v53 = vld [vmem:[%s4632_s1 + $0xb0] sm:$0xff]  ;;  %4718 = vst [vmem:[#allocation3_spill] sm:$0xff] %v3014_v13  ;;  %vm502_vm2 = vcmp.eq.s32.totalorder %v3014_v13, 17 }
  0x1c   : > { %1050 = vmatprep.subr.mxu0 %v4645_v2  ;;  %1275 = vmatprep.subr.mxu1 %v4645_v2  ;;  %v938_v50 = vld [vmem:[%s4632_s1 + $0x1b8] sm:$0xff]  ;;  %v937_v54 = vld [vmem:[%s4632_s1 + $0x1b0] sm:$0xff]  ;;  %v267_v55 = vld [vmem:[%s2939_s10 + $0x20] sm:$0xff] }
  0x1d   : > { %1051 = vmatpush1.msra.mxu0 %v890_v17  ;;  %1276 = vmatpush1.msra.mxu1 %v922_v18  ;;  %v266_v51 = vld [vmem:[%s2939_s10 + $0x18] sm:$0xff]  ;;  %v268_v56 = vld [vmem:[%s2939_s10 + $0x28] sm:$0x3]  ;;  %v2977_v61 = vld [vmem:[%s4634_s3] ss:$0 sm:$0xff]  ;;  %v328_v62 = vmul.f32 %v2953_v52, %v267_v55 }
  0x1e   : > { %1052 = vmatprep.subr.mxu0 %v4645_v2  ;;  %1277 = vmatprep.subr.mxu1 %v4645_v2  ;;  %v904_v57 = vld [vmem:[%s4632_s1 + $0xa8] sm:$0xff]  ;;  %v327_v59 = vmul.f32 %v2953_v52, %v266_v51  ;;  %v903_v63 = vld [vmem:[%s4632_s1 + $0xa0] sm:$0xff]  ;;  %v329_v1 = vmul.f32 %v2953_v52, %v268_v56  ;;  %v902_v3 = vld [vmem:[%s4632_s1 + $0x98] sm:$0xff] }
  0x1f   : > { %1053 = vmatpush1.msra.mxu0 %v889_v19  ;;  %1278 = vmatpush1.msra.mxu1 %v921_v20  ;;  %v936_v58 = vld [vmem:[%s4632_s1 + $0x1a8] sm:$0xff]  ;;  %v935_v0 = vld [vmem:[%s4632_s1 + $0x1a0] sm:$0xff]  ;;  %v934_v4 = vld [vmem:[%s4632_s1 + $0x198] sm:$0xff]  ;;  %v389_v7 = vadd.f32 %v2977_v61, %v328_v62  ;;  %v3030_v19 = vrot.slane %v4645_v2, 1 }
  0x20   : > { %1054 = vmatprep.subr.mxu0 %v4645_v2  ;;  %1279 = vmatprep.subr.mxu1 %v4645_v2  ;;  %v388_v5 = vadd.f32 %v2977_v61, %v327_v59  ;;  %v269_v8 = vld [vmem:[%s2939_s10 + $0x30] sm:$0xff]  ;;  %v390_v11 = vadd.f32 %v2977_v61, %v329_v1  ;;  %v270_v12 = vld [vmem:[%s2939_s10 + $0x38] sm:$0xff]  ;;  %v271_v14 = vld [vmem:[%s2939_s10 + $0x40] sm:$0x3] }
  0x21   : > { %1055 = vmatpush1.msra.mxu0 %v888_v21  ;;  %1280 = vmatpush1.msra.mxu1 %v920_v22  ;;  %v901_v9 = vld [vmem:[%s4632_s1 + $0x90] sm:$0xff]  ;;  %v900_v15 = vld [vmem:[%s4632_s1 + $0x88] sm:$0xff]  ;;  %v330_v18 = vmul.f32 %v2953_v52, %v269_v8  ;;  %4719 = vst [vmem:[#allocation4_spill] sm:$0xff] %v3030_v19  ;;  %v3032_v20 = vmax.f32 %v389_v7, 0.0  ;;  %v331_v21 = vmul.f32 %v2953_v52, %v270_v12  ;;  %v899_v22 = vld [vmem:[%s4632_s1 + $0x80] sm:$0xff] }
  0x22   : > { %1056 = vmatprep.subr.mxu0 %v4645_v2  ;;  %1281 = vmatprep.subr.mxu1 %v4645_v2  ;;  %v933_v10 = vld [vmem:[%s4632_s1 + $0x190] sm:$0xff]  ;;  %v932_v16 = vld [vmem:[%s4632_s1 + $0x188] sm:$0xff]  ;;  %v3025_v17 = vmax.f32 %v388_v5, 0.0  ;;  %vm3049_vm1 = vmneg %vm497_vm0 }
  0x23   : > { %1057 = vmatpush1.msra.mxu0 %v887_v23  ;;  %1282 = vmatpush1.msra.mxu1 %v919_v24  ;;  %v444_v24 = vmax.f32 %v390_v11, 0.0  ;;  %v960_v51 = vld [vmem:[%s4632_s1 + $0x268] sm:$0xff]  ;;  %v277_v7 = vld [vmem:[%s2939_s10 + $0x70] sm:$0x3] }
  0x24   : > { %1058 = vmatprep.subr.mxu0 %v4645_v2  ;;  %1283 = vmatprep.subr.mxu1 %v4645_v2  ;;  %v524_v23 = vsel %vm497_vm0, 0.0, %v3025_v17  ;;  %v993_v8 = vld [vmem:[%s4632_s1 + $0x370] sm:$0xff] }
  0x25   : > { %1059 = vmatpush1.msra.mxu0 %v886_v25  ;;  %1284 = vmatpush1.msra.mxu1 %v918_v26  ;;  %v332_v25 = vmul.f32 %v2953_v52, %v271_v14  ;;  %v931_v26 = vld [vmem:[%s4632_s1 + $0x180] sm:$0xff] }
  0x26   : > { %1060 = vmatprep.subr.mxu0 %v4645_v2  ;;  %1285 = vmatprep.subr.mxu1 %v4645_v2 }
  0x27   : > { %1061 = vmatpush1.msra.mxu0 %v885_v27  ;;  %1286 = vmatpush1.msra.mxu1 %v917_v28  ;;  %v3054_v28 = vrot.slane %v4645_v2, 2 }
  0x28   : > { %1062 = vmatprep.subr.mxu0 %v4645_v2  ;;  %1287 = vmatprep.subr.mxu1 %v4645_v2 }
  0x29   : > { %1063 = vmatpush1.msra.mxu0 %v884_v29  ;;  %1288 = vmatpush1.msra.mxu1 %v916_v30  ;;  %4722 = vst [vmem:[#allocation5_spill] sm:$0xff] %v3054_v28  ;;  %v391_v29 = vadd.f32 %v2977_v61, %v330_v18  ;;  %v272_v30 = vld [vmem:[%s2939_s10 + $0x48] sm:$0xff] }
  0x2a   : > { %1064 = vmatprep.subr.mxu0 %v4645_v2  ;;  %1289 = vmatprep.subr.mxu1 %v4645_v2 }
  0x2b   : > { %1065 = vmatpush1.msra.mxu0 %v883_v31  ;;  %1290 = vmatpush1.msra.mxu1 %v915_v32  ;;  %v629_v31 = vrot.slane %v524_v23, 1  ;;  %v630_v32 = vrot.slane %v3032_v20, 1 }
  0x2c   : > { %1066 = vmatprep.subr.mxu0 %v4645_v2  ;;  %1291 = vmatprep.subr.mxu1 %v4645_v2 }
  0x2d   : > { %1067 = vmatpush2.msra.mxu0 %v914_v33  ;;  %1292 = vmatpush2.msra.mxu1 %v946_v34  ;;  %v392_v33 = vadd.f32 %v2977_v61, %v331_v21  ;;  %v962_v34 = vld [vmem:[%s4632_s1 + $0x278] sm:$0xff] }
  0x2e   : > { %1068 = vmatprep.subr.mxu0 %v4645_v2  ;;  %1293 = vmatprep.subr.mxu1 %v4645_v2 }
  0x2f   : > { %1069 = vmatpush2.msra.mxu0 %v913_v35  ;;  %1294 = vmatpush2.msra.mxu1 %v945_v36  ;;  %v526_v35 = vsel %vm502_vm2, 0.0, %v444_v24  ;;  %v393_v36 = vadd.f32 %v2977_v61, %v332_v25  ;;  %v992_v24 = vld [vmem:[%s4632_s1 + $0x368] sm:$0xff] }
  0x30   : > { %1070 = vmatprep.subr.mxu0 %v4645_v2  ;;  %1295 = vmatprep.subr.mxu1 %v4645_v2  ;;  %v745_v56 = vrot.slane %v526_v35, 2 }
  0x31   : > { %1071 = vmatpush2.msra.mxu0 %v912_v37  ;;  %1296 = vmatpush2.msra.mxu1 %v944_v38  ;;  %v273_v37 = vld [vmem:[%s2939_s10 + $0x50] sm:$0xff]  ;;  %v333_v38 = vmul.f32 %v2953_v52, %v272_v30 }
  0x32   : > { %1072 = vmatprep.subr.mxu0 %v4645_v2  ;;  %1297 = vmatprep.subr.mxu1 %v4645_v2 }
  0x33   : > { %1073 = vmatpush2.msra.mxu0 %v911_v39  ;;  %1298 = vmatpush2.msra.mxu1 %v943_v40  ;;  %v274_v39 = vld [vmem:[%s2939_s10 + $0x58] sm:$0x3]  ;;  %v3080_v40 = vmax.f32 %v391_v29, 0.0 }
  0x34   : > { %1074 = vmatprep.subr.mxu0 %v4645_v2  ;;  %1299 = vmatprep.subr.mxu1 %v4645_v2  ;;  %v278_v29 = vld [vmem:[%s2939_s10 + $0x78] sm:$0xff] }
  0x35   : > { %1075 = vmatpush2.msra.mxu0 %v910_v41  ;;  %1300 = vmatpush2.msra.mxu1 %v942_v42  ;;  %v742_v41 = vrot.slane %v524_v23, 2  ;;  %v743_v42 = vrot.slane %v3032_v20, 2  ;;  %v958_v23 = vld [vmem:[%s4632_s1 + $0x258] sm:$0xff] }
  0x36   : > { %1076 = vmatprep.subr.mxu0 %v4645_v2  ;;  %1301 = vmatprep.subr.mxu1 %v4645_v2 }
  0x37   : > { %1077 = vmatpush2.msra.mxu0 %v909_v43  ;;  %1302 = vmatpush2.msra.mxu1 %v941_v44  ;;  %v961_v43 = vld [vmem:[%s4632_s1 + $0x270] sm:$0xff]  ;;  %v3088_v44 = vsel %vm623_vm3, %v629_v31, %v630_v32  ;;  %v3110_v55 = vsel %vm736_vm4, %v742_v41, %v743_v42  ;;  %v991_v41 = vld [vmem:[%s4632_s1 + $0x360] sm:$0xff] }
  0x38   : > { %1078 = vmatprep.subr.mxu0 %v4645_v2  ;;  %1303 = vmatprep.subr.mxu1 %v4645_v2 }
  0x39   : > { %1079 = vmatpush2.msra.mxu0 %v908_v45  ;;  %1304 = vmatpush2.msra.mxu1 %v940_v46  ;;  %v632_v45 = vrot.slane %v526_v35, 1  ;;  %v3090_v46 = vmax.f32 %v392_v33, 0.0 }
  0x3a   : > { %1080 = vmatprep.subr.mxu0 %v4645_v2  ;;  %1305 = vmatprep.subr.mxu1 %v4645_v2 }
  0x3b   : > { %1081 = vmatpush2.msra.mxu0 %v907_v47  ;;  %1306 = vmatpush2.msra.mxu1 %v939_v48  ;;  %v334_v47 = vmul.f32 %v2953_v52, %v273_v37  ;;  %v527_v48 = vsel %vm497_vm0, 0.0, %v3080_v40  ;;  %v635_v59 = vrot.slane %v3090_v46, 1  ;;  %v748_v11 = vrot.slane %v3090_v46, 2  ;;  %v957_v37 = vld [vmem:[%s4632_s1 + $0x250] sm:$0xff] }
  0x3c   : > { %1082 = vmatprep.subr.mxu0 %v4645_v2  ;;  %1307 = vmatprep.subr.mxu1 %v4645_v2 }
  0x3d   : > { %1083 = vmatpush2.msra.mxu0 %v906_v49  ;;  %1308 = vmatpush2.msra.mxu1 %v938_v50  ;;  %v447_v49 = vmax.f32 %v393_v36, 0.0  ;;  %v335_v50 = vmul.f32 %v2953_v52, %v274_v39  ;;  %v395_v62 = vadd.f32 %v2977_v61, %v334_v47  ;;  %v279_v36 = vld [vmem:[%s2939_s10 + $0x80] sm:$0xff]  ;;  %v280_v39 = vld [vmem:[%s2939_s10 + $0x88] sm:$0x3] }
  0x3e   : > { %1084 = vmatprep.subr.mxu0 %v4645_v2  ;;  %1309 = vmatprep.subr.mxu1 %v4645_v2 }
  0x3f   : > { %1085 = vmatpush2.msra.mxu0 %v905_v53  ;;  %1310 = vmatpush2.msra.mxu1 %v937_v54  ;;  %v394_v53 = vadd.f32 %v2977_v61, %v333_v38  ;;  %v994_v54 = vld [vmem:[%s4632_s1 + $0x378] sm:$0xff]  ;;  %v396_v1 = vadd.f32 %v2977_v61, %v335_v50  ;;  %v339_v38 = vmul.f32 %v2953_v52, %v278_v29 }
  0x40   : > { %1086 = vmatprep.subr.mxu0 %v4645_v2  ;;  %1311 = vmatprep.subr.mxu1 %v4645_v2 }
  0x41   : > { %1087 = vmatpush2.msra.mxu0 %v904_v57  ;;  %1312 = vmatpush2.msra.mxu1 %v936_v58  ;;  %v3117_v57 = vsel %vm623_vm3, %v630_v32, %v632_v45  ;;  %v634_v58 = vrot.slane %v527_v48, 1  ;;  %v3133_v5 = vmax.f32 %v394_v53, 0.0  ;;  %v450_v21 = vmax.f32 %v396_v1, 0.0 }
  0x42   : > { %1088 = vmatprep.subr.mxu0 %v4645_v2  ;;  %1313 = vmatprep.subr.mxu1 %v4645_v2 }
  0x43   : > { %1089 = vmatpush2.msra.mxu0 %v903_v63  ;;  %1314 = vmatpush2.msra.mxu1 %v935_v0  ;;  %v275_v63 = vld [vmem:[%s2939_s10 + $0x60] sm:$0xff]  ;;  %v529_v0 = vsel %vm502_vm2, 0.0, %v447_v49  ;;  %v3148_v14 = vsel %vm623_vm3, %v634_v58, %v635_v59  ;;  %v530_v18 = vsel %vm497_vm0, 0.0, %v3133_v5  ;;  %v956_v58 = vld [vmem:[%s4632_s1 + $0x248] sm:$0xff] }
  0x44   : > { %1090 = vmatprep.subr.mxu0 %v4645_v2  ;;  %1315 = vmatprep.subr.mxu1 %v4645_v2  ;;  %v336_v12 = vmul.f32 %v2953_v52, %v275_v63  ;;  %v639_v31 = vrot.slane %v530_v18, 1  ;;  %v752_v45 = vrot.slane %v530_v18, 2  ;;  %v283_v18 = vld [vmem:[%s2939_s10 + $0xa0] sm:$0x3] }
  0x45   : > { %1091 = vmatpush2.msra.mxu0 %v902_v3  ;;  %1316 = vmatpush2.msra.mxu1 %v934_v4  ;;  %v276_v3 = vld [vmem:[%s2939_s10 + $0x68] sm:$0xff]  ;;  %v959_v4 = vld [vmem:[%s4632_s1 + $0x260] sm:$0xff] }
  0x46   : > { %1092 = vmatprep.subr.mxu0 %v4645_v2  ;;  %1317 = vmatprep.subr.mxu1 %v4645_v2 }
  0x47   : > { %1093 = vmatpush2.msra.mxu0 %v901_v9  ;;  %1318 = vmatpush2.msra.mxu1 %v933_v10  ;;  %v3142_v9 = vsel %vm736_vm4, %v743_v42, %v745_v56  ;;  %v747_v10 = vrot.slane %v527_v48, 2  ;;  %v341_v56 = vmul.f32 %v2953_v52, %v280_v39 }
  0x48   : > { %1094 = vmatprep.subr.mxu0 %v4645_v2  ;;  %1319 = vmatprep.subr.mxu1 %v4645_v2 }
  0x49   : > { %1095 = vmatpush2.msra.mxu0 %v900_v15  ;;  %1320 = vmatpush2.msra.mxu1 %v932_v16  ;;  %v637_v15 = vrot.slane %v529_v0, 1  ;;  %v3150_v16 = vmax.f32 %v395_v62, 0.0  ;;  %v3171_v25 = vsel %vm736_vm4, %v747_v10, %v748_v11  ;;  %v990_v62 = vld [vmem:[%s4632_s1 + $0x358] sm:$0xff] }
  0x4a   : > { %1096 = vmatprep.subr.mxu0 %v4645_v2  ;;  %1321 = vmatprep.subr.mxu1 %v4645_v2 }
  0x4b   : > { %1097 = vmatpush2.msra.mxu0 %v899_v22  ;;  %1098 = vmatprep.mubr.f32.mxu0 %v3030_v19  ;;  %v338_v22 = vmul.f32 %v2953_v52, %v277_v7  ;;  %v3177_v30 = vsel %vm623_vm3, %v635_v59, %v637_v15  ;;  %v640_v32 = vrot.slane %v3150_v16, 1  ;;  %v753_v47 = vrot.slane %v3150_v16, 2  ;;  %v955_v15 = vld [vmem:[%s4632_s1 + $0x240] sm:$0xff] }
  0x4c   : > { %1322 = vmatpush2.msra.mxu1 %v931_v26  ;;  %2449 = vmatprep.mubr.msk.f32.mxu1 %vm3049_vm1, %v3025_v17  ;;  %v397_v26 = vadd.f32 %v2977_v61, %v336_v12  ;;  %v400_v59 = vadd.f32 %v2977_v61, %v339_v38  ;;  %v282_v12 = vld [vmem:[%s2939_s10 + $0x98] sm:$0xff] }
  0x4d   : > { %1099 = vmatmul.mubr.f32.vlgmr.msra.gmra.mxu0 %v4645_v2  ;;  %1324 = vmatmul.mubr.f32.vlgmr.msra.gmra.mxu1 %v3054_v28  ;;  %v399_v35 = vadd.f32 %v2977_v61, %v338_v22  ;;  %v3208_v48 = vsel %vm623_vm3, %v639_v31, %v640_v32  ;;  %v3232_v63 = vsel %vm736_vm4, %v752_v45, %v753_v47 }
  0x4e   : > { %1484 = vmatprep.subr.mxu0 %v4645_v2  ;;  %1103 = vmatprep.mubr.f32.mxu0 %v3030_v19 }
  0x4f   : > { %1485 = vmatpush1.msra.mxu0 %v962_v34  ;;  %1328 = vmatprep.mubr.f32.mxu1 %v3032_v20  ;;  %v532_v34 = vsel %vm502_vm2, 0.0, %v450_v21  ;;  %v989_v21 = vld [vmem:[%s4632_s1 + $0x350] sm:$0xff] }
  0x50   : > { %1486 = vmatprep.subr.mxu0 %v4645_v2  ;;  %1709 = vmatprep.subr.mxu1 %v4645_v2  ;;  %v642_v49 = vrot.slane %v532_v34, 1 }
  0x51   : > { %1104 = vmatmul.mubr.f32.gmra.mxu0 %v4645_v2  ;;  %1329 = vmatmul.mubr.f32.gmra.mxu1 %v3054_v28 }
  0x52   : > { %1487 = vmatpush1.msra.mxu0 %v961_v43  ;;  %1108 = vmatprep.mubr.f32.mxu0 %v3088_v44  ;;  %v3203_v43 = vmax.f32 %v397_v26, 0.0  ;;  %v3236_v1 = vsel %vm623_vm3, %v640_v32, %v642_v49  ;;  %v343_v32 = vmul.f32 %v2953_v52, %v282_v12 }
  0x53   : > { %2451 = vmatprep.mubr.msk.f32.mxu1 %vm3049_vm1, %v3080_v40  ;;  %1488 = vmatprep.subr.mxu0 %v4645_v2 }
  0x54   : > { %1489 = vmatpush1.msra.mxu0 %v960_v51  ;;  %1710 = vmatpush1.msra.mxu1 %v994_v54  ;;  %v340_v51 = vmul.f32 %v2953_v52, %v279_v36  ;;  %v533_v53 = vsel %vm497_vm0, 0.0, %v3203_v43  ;;  %v453_v54 = vmax.f32 %v399_v35, 0.0  ;;  %v344_v35 = vmul.f32 %v2953_v52, %v283_v18  ;;  %v954_v36 = vld [vmem:[%s4632_s1 + $0x238] sm:$0xff] }
  0x55   : > { %2419 = vmatmul.mubr.msk.f32.gmra.mxu0 %vm3049_vm1, %v3025_v17  ;;  %1334 = vmatmul.mubr.f32.gmra.mxu1 %v3110_v55  ;;  %v337_v17 = vmul.f32 %v2953_v52, %v276_v3  ;;  %v644_v3 = vrot.slane %v533_v53, 1 }
  0x56   : > { %1113 = vmatprep.mubr.f32.mxu0 %v3117_v57  ;;  %1338 = vmatprep.mubr.f32.mxu1 %v3090_v46  ;;  %v401_v7 = vadd.f32 %v2977_v61, %v340_v51  ;;  %v535_v10 = vsel %vm502_vm2, 0.0, %v453_v54  ;;  %v404_v51 = vadd.f32 %v2977_v61, %v343_v32 }
  0x57   : > { %1490 = vmatprep.subr.mxu0 %v4645_v2  ;;  %1711 = vmatprep.subr.mxu1 %v4645_v2  ;;  %v398_v33 = vadd.f32 %v2977_v61, %v337_v17  ;;  %v3253_v17 = vmax.f32 %v400_v59, 0.0  ;;  %v647_v29 = vrot.slane %v535_v10, 1  ;;  %v760_v39 = vrot.slane %v535_v10, 2  ;;  %v953_v59 = vld [vmem:[%s4632_s1 + $0x230] sm:$0xff] }
  0x58   : > { %1491 = vmatpush1.msra.mxu0 %v959_v4  ;;  %1712 = vmatpush1.msra.mxu1 %v993_v8  ;;  %v281_v8 = vld [vmem:[%s2939_s10 + $0x90] sm:$0xff]  ;;  %v3270_v31 = vmax.f32 %v401_v7, 0.0 }
  0x59   : > { %1114 = vmatmul.mubr.f32.gmra.mxu0 %v3032_v20  ;;  %1339 = vmatmul.mubr.f32.gmra.mxu1 %v3142_v9  ;;  %v750_v20 = vrot.slane %v529_v0, 2  ;;  %v3210_v50 = vmax.f32 %v398_v33, 0.0  ;;  %v755_v0 = vrot.slane %v532_v34, 2  ;;  %v536_v33 = vsel %vm497_vm0, 0.0, %v3253_v17 }
  0x5a   : > { %1118 = vmatprep.mubr.f32.mxu0 %v3148_v14  ;;  %2453 = vmatprep.mubr.msk.f32.mxu1 %vm3049_vm1, %v3133_v5  ;;  %v650_v49 = vrot.slane %v3270_v31, 1 }
  0x5b   : > { %1492 = vmatprep.subr.mxu0 %v4645_v2  ;;  %1713 = vmatprep.subr.mxu1 %v4645_v2  ;;  %v3201_v42 = vsel %vm736_vm4, %v748_v11, %v750_v20  ;;  %v645_v4 = vrot.slane %v3210_v50, 1  ;;  %v402_v11 = vadd.f32 %v2977_v61, %v341_v56  ;;  %v3262_v22 = vsel %vm736_vm4, %v753_v47, %v755_v0  ;;  %v286_v0 = vld [vmem:[%s2939_s10 + $0xb8] sm:$0x3] }
  0x5c   : > { %1493 = vmatpush1.msra.mxu0 %v958_v23  ;;  %1714 = vmatpush1.msra.mxu1 %v992_v24  ;;  %v757_v23 = vrot.slane %v533_v53, 2  ;;  %v758_v24 = vrot.slane %v3210_v50, 2  ;;  %v342_v20 = vmul.f32 %v2953_v52, %v281_v8  ;;  %v649_v47 = vrot.slane %v536_v33, 1  ;;  %v284_v53 = vld [vmem:[%s2939_s10 + $0xa8] sm:$0xff] }
  0x5d   : > { %2421 = vmatmul.mubr.msk.f32.gmra.mxu0 %vm3049_vm1, %v3080_v40  ;;  %1344 = vmatmul.mubr.f32.gmra.mxu1 %v3171_v25  ;;  %v3268_v26 = vsel %vm623_vm3, %v644_v3, %v645_v4  ;;  %v456_v34 = vmax.f32 %v402_v11, 0.0  ;;  %v3296_v45 = vsel %vm623_vm3, %v645_v4, %v647_v29  ;;  %v405_v56 = vadd.f32 %v2977_v61, %v344_v35  ;;  %v987_v3 = vld [vmem:[%s4632_s1 + $0x340] sm:$0xff]  ;;  %v986_v29 = vld [vmem:[%s4632_s1 + $0x338] sm:$0xff] }
  0x5e   : > { %1123 = vmatprep.mubr.f32.mxu0 %v3177_v30  ;;  %1348 = vmatprep.mubr.f32.mxu1 %v3150_v16  ;;  %v3291_v38 = vsel %vm736_vm4, %v757_v23, %v758_v24  ;;  %v3320_v4 = vsel %vm736_vm4, %v758_v24, %v760_v39  ;;  %v763_v8 = vrot.slane %v3270_v31, 2  ;;  %v345_v10 = vmul.f32 %v2953_v52, %v284_v53  ;;  %v287_v35 = vld [vmem:[%s2939_s10 + $0xc0] sm:$0xff]  ;;  %v288_v53 = vld [vmem:[%s2939_s10 + $0xc8] sm:$0xff] }
  0x5f   : > { %1494 = vmatprep.subr.mxu0 %v4645_v2  ;;  %1715 = vmatprep.subr.mxu1 %v4645_v2  ;;  %v538_v54 = vsel %vm502_vm2, 0.0, %v456_v34  ;;  %v3328_v11 = vsel %vm623_vm3, %v649_v47, %v650_v49  ;;  %v459_v23 = vmax.f32 %v405_v56, 0.0  ;;  %v347_v24 = vmul.f32 %v2953_v52, %v286_v0  ;;  %v289_v56 = vld [vmem:[%s2939_s10 + $0xd0] sm:$0x3] }
  0x60   : > { %1495 = vmatpush1.msra.mxu0 %v957_v37  ;;  %1716 = vmatpush1.msra.mxu1 %v991_v41  ;;  %v988_v37 = vld [vmem:[%s4632_s1 + $0x348] sm:$0xff]  ;;  %v403_v41 = vadd.f32 %v2977_v61, %v342_v20  ;;  %v652_v12 = vrot.slane %v538_v54, 1  ;;  %v406_v34 = vadd.f32 %v2977_v61, %v345_v10 }
  0x61   : > { %1124 = vmatmul.mubr.f32.gmra.mxu0 %v3090_v46  ;;  %1349 = vmatmul.mubr.f32.gmra.mxu1 %v3201_v42  ;;  %v952_v20 = vld [vmem:[%s4632_s1 + $0x228] sm:$0xff]  ;;  %v541_v47 = vsel %vm502_vm2, 0.0, %v459_v23  ;;  %v349_v23 = vmul.f32 %v2953_v52, %v288_v53 }
  0x62   : > { %1128 = vmatprep.mubr.f32.mxu0 %v3208_v48  ;;  %2455 = vmatprep.mubr.msk.f32.mxu1 %vm3049_vm1, %v3203_v43  ;;  %v3322_v7 = vmax.f32 %v403_v41, 0.0 }
  0x63   : > { %1496 = vmatprep.subr.mxu0 %v4645_v2  ;;  %1717 = vmatprep.subr.mxu1 %v4645_v2  ;;  %v410_v53 = vadd.f32 %v2977_v61, %v349_v23 }
  0x64   : > { %1497 = vmatpush1.msra.mxu0 %v956_v58  ;;  %1718 = vmatpush1.msra.mxu1 %v990_v62  ;;  %v285_v58 = vld [vmem:[%s2939_s10 + $0xb0] sm:$0xff]  ;;  %v762_v62 = vrot.slane %v536_v33, 2  ;;  %v765_v33 = vrot.slane %v538_v54, 2  ;;  %v348_v54 = vmul.f32 %v2953_v52, %v287_v35  ;;  %v770_v35 = vrot.slane %v541_v47, 2 }
  0x65   : > { %2423 = vmatmul.mubr.msk.f32.gmra.mxu0 %vm3049_vm1, %v3133_v5  ;;  %1354 = vmatmul.mubr.f32.gmra.mxu1 %v3232_v63  ;;  %v346_v18 = vmul.f32 %v2953_v52, %v285_v58  ;;  %v985_v58 = vld [vmem:[%s4632_s1 + $0x330] sm:$0xff]  ;;  %v3450_v60 = vmax.f32 %v410_v53, 0.0  ;;  %v982_v53 = vld [vmem:[%s4632_s1 + $0x318] sm:$0xff] }
  0x66   : > { %1133 = vmatprep.mubr.f32.mxu0 %v3236_v1  ;;  %1358 = vmatprep.mubr.f32.mxu1 %v3210_v50  ;;  %v3351_v32 = vsel %vm736_vm4, %v762_v62, %v763_v8  ;;  %v3383_v62 = vmax.f32 %v406_v34, 0.0 }
  0x67   : > { %1498 = vmatprep.subr.mxu0 %v4645_v2  ;;  %1719 = vmatprep.subr.mxu1 %v4645_v2  ;;  %v407_v41 = vadd.f32 %v2977_v61, %v346_v18  ;;  %4728 = vst [vmem:[#allocation11_spill] sm:$0xff] %v3450_v60  ;;  %v665_v19 = vrot.slane %v3450_v60, 1 }
  0x68   : > { %1499 = vmatpush1.msra.mxu0 %v955_v15  ;;  %1720 = vmatpush1.msra.mxu1 %v989_v21  ;;  %v3330_v15 = vmax.f32 %v404_v51, 0.0  ;;  %v539_v21 = vsel %vm497_vm0, 0.0, %v3322_v7  ;;  %v408_v51 = vadd.f32 %v2977_v61, %v347_v24  ;;  %4723 = vst [vmem:[#allocation6_spill] sm:$0xff] %v3383_v62  ;;  %v350_v24 = vmul.f32 %v2953_v52, %v289_v56  ;;  %v291_v56 = vld [vmem:[%s2939_s10 + $0xe0] sm:$0xff] }
  0x69   : > { %1134 = vmatmul.mubr.f32.gmra.mxu0 %v3150_v16  ;;  %1359 = vmatmul.mubr.f32.gmra.mxu1 %v3262_v22  ;;  %v767_v0 = vrot.slane %v539_v21, 2  ;;  %v3390_v18 = vmax.f32 %v407_v41, 0.0  ;;  %v352_v28 = vmul.f32 %v2953_v52, %v291_v56 }
  0x6a   : > { %1138 = vmatprep.mubr.f32.mxu0 %v3268_v26  ;;  %2457 = vmatprep.mubr.msk.f32.mxu1 %vm3049_vm1, %v3253_v17  ;;  %v655_v39 = vrot.slane %v3330_v15, 1 }
  0x6b   : > { %1500 = vmatprep.subr.mxu0 %v4645_v2  ;;  %1721 = vmatprep.subr.mxu1 %v4645_v2  ;;  %4724 = vst [vmem:[#allocation7_spill] sm:$0xff] %v3390_v18 }
  0x6c   : > { %1501 = vmatpush1.msra.mxu0 %v954_v36  ;;  %1722 = vmatpush1.msra.mxu1 %v988_v37  ;;  %v3357_v36 = vsel %vm623_vm3, %v650_v49, %v652_v12  ;;  %v654_v37 = vrot.slane %v539_v21, 1  ;;  %v951_v49 = vld [vmem:[%s4632_s1 + $0x220] sm:$0xff]  ;;  %v657_v12 = vrot.slane %v541_v47, 1  ;;  %v462_v21 = vmax.f32 %v408_v51, 0.0 }
  0x6d   : > { %2425 = vmatmul.mubr.msk.f32.gmra.mxu0 %vm3049_vm1, %v3203_v43  ;;  %1364 = vmatmul.mubr.f32.gmra.mxu1 %v3291_v38  ;;  %v660_v51 = vrot.slane %v3390_v18, 1  ;;  %v411_v47 = vadd.f32 %v2977_v61, %v350_v24  ;;  %v773_v24 = vrot.slane %v3390_v18, 2 }
  0x6e   : > { %1143 = vmatprep.mubr.f32.mxu0 %v3296_v45  ;;  %1368 = vmatprep.mubr.f32.mxu1 %v3270_v31  ;;  %v3388_v10 = vsel %vm623_vm3, %v654_v37, %v655_v39  ;;  %v3416_v37 = vsel %vm623_vm3, %v655_v39, %v657_v12  ;;  %v949_v39 = vld [vmem:[%s4632_s1 + $0x210] sm:$0xff]  ;;  %v983_v12 = vld [vmem:[%s4632_s1 + $0x320] sm:$0xff] }
  0x6f   : > { %1502 = vmatprep.subr.mxu0 %v4645_v2  ;;  %1723 = vmatprep.subr.mxu1 %v4645_v2 }
  0x70   : > { %1503 = vmatpush1.msra.mxu0 %v953_v59  ;;  %1724 = vmatpush1.msra.mxu1 %v987_v3  ;;  %v3381_v59 = vsel %vm736_vm4, %v763_v8, %v765_v33  ;;  %v768_v3 = vrot.slane %v3330_v15, 2  ;;  %v542_v8 = vsel %vm497_vm0, 0.0, %v3383_v62  ;;  %v984_v33 = vld [vmem:[%s4632_s1 + $0x328] sm:$0xff] }
  0x71   : > { %1144 = vmatmul.mubr.f32.gmra.mxu0 %v3210_v50  ;;  %1369 = vmatmul.mubr.f32.gmra.mxu1 %v3320_v4  ;;  %v659_v41 = vrot.slane %v542_v8, 1 }
  0x72   : > { %1148 = vmatprep.mubr.f32.mxu0 %v3328_v11  ;;  %2459 = vmatprep.mubr.msk.f32.mxu1 %vm3049_vm1, %v3322_v7  ;;  %v3412_v34 = vsel %vm736_vm4, %v767_v0, %v768_v3  ;;  %v292_v0 = vld [vmem:[%s2939_s10 + $0xe8] sm:$0x3]  ;;  %v3442_v23 = vsel %vm736_vm4, %v768_v3, %v770_v35 }
  0x73   : > { %1504 = vmatprep.subr.mxu0 %v4645_v2  ;;  %1725 = vmatprep.subr.mxu1 %v4645_v2  ;;  %4726 = vst [vmem:[#allocation9_spill] sm:$0xff] %v3442_v23  ;;  %v353_v35 = vmul.f32 %v2953_v52, %v292_v0 }
  0x74   : > { %1505 = vmatpush1.msra.mxu0 %v952_v20  ;;  %1726 = vmatpush1.msra.mxu1 %v986_v29  ;;  %v950_v20 = vld [vmem:[%s4632_s1 + $0x218] sm:$0xff]  ;;  %v409_v29 = vadd.f32 %v2977_v61, %v348_v54  ;;  %v544_v54 = vsel %vm502_vm2, 0.0, %v462_v21  ;;  %v772_v21 = vrot.slane %v542_v8, 2  ;;  %v465_v8 = vmax.f32 %v411_v47, 0.0 }
  0x75   : > { %2427 = vmatmul.mubr.msk.f32.gmra.mxu0 %vm3049_vm1, %v3253_v17  ;;  %1374 = vmatmul.mubr.f32.gmra.mxu1 %v3351_v32  ;;  %v775_v47 = vrot.slane %v544_v54, 2 }
  0x76   : > { %1153 = vmatprep.mubr.f32.mxu0 %v3357_v36  ;;  %1378 = vmatprep.mubr.f32.mxu1 %v3330_v15 }
  0x77   : > { %1506 = vmatprep.subr.mxu0 %v4645_v2  ;;  %1727 = vmatprep.subr.mxu1 %v4645_v2 }
  0x78   : > { %1507 = vmatpush1.msra.mxu0 %v951_v49  ;;  %1728 = vmatpush1.msra.mxu1 %v985_v58  ;;  %v290_v49 = vld [vmem:[%s2939_s10 + $0xd8] sm:$0xff]  ;;  %v3433_v58 = vmax.f32 %v409_v29, 0.0  ;;  %v3448_v29 = vsel %vm623_vm3, %v659_v41, %v660_v51  ;;  %v948_v41 = vld [vmem:[%s4632_s1 + $0x208] sm:$0xff] }
  0x79   : > { %1154 = vmatmul.mubr.f32.gmra.mxu0 %v3270_v31  ;;  %1379 = vmatmul.mubr.f32.gmra.mxu1 %v3381_v59  ;;  %4727 = vst [vmem:[#allocation10_spill] sm:$0xff] %v3448_v29 }
  0x7a   : > { %1158 = vmatprep.mubr.f32.mxu0 %v3388_v10  ;;  %2461 = vmatprep.mubr.msk.f32.mxu1 %vm3049_vm1, %v3383_v62  ;;  %4725 = vst [vmem:[#allocation8_spill] sm:$0xff] %v3433_v58  ;;  %v545_v3 = vsel %vm497_vm0, 0.0, %v3433_v58 }
  0x7b   : > { %1508 = vmatprep.subr.mxu0 %v4645_v2  ;;  %1729 = vmatprep.subr.mxu1 %v4645_v2 }
  0x7c   : > { %1509 = vmatpush1.msra.mxu0 %v950_v20  ;;  %1730 = vmatpush1.msra.mxu1 %v984_v33  ;;  %v351_v20 = vmul.f32 %v2953_v52, %v290_v49  ;;  %v662_v33 = vrot.slane %v544_v54, 1  ;;  %v3471_v49 = vsel %vm736_vm4, %v772_v21, %v773_v24  ;;  %v547_v54 = vsel %vm502_vm2, 0.0, %v465_v8  ;;  %v981_v8 = vld [vmem:[%s4632_s1 + $0x310] sm:$0xff] }
  0x7d   : > { %2429 = vmatmul.mubr.msk.f32.gmra.mxu0 %vm3049_vm1, %v3322_v7  ;;  %1384 = vmatmul.mubr.f32.gmra.mxu1 %v3412_v34  ;;  %4729 = vst [vmem:[#allocation12_spill] sm:$0xff] %v3471_v49  ;;  %v414_v21 = vadd.f32 %v2977_v61, %v353_v35  ;;  %v3501_v35 = vsel %vm736_vm4, %v773_v24, %v775_v47 }
  0x7e   : > { %1163 = vmatprep.mubr.f32.mxu0 %v3416_v37  ;;  %1388 = vmatprep.mubr.f32.mxu1 %v3390_v18  ;;  %v412_v56 = vadd.f32 %v2977_v61, %v351_v20  ;;  %v3477_v0 = vsel %vm623_vm3, %v660_v51, %v662_v33  ;;  %v294_v20 = vld [vmem:[%s2939_s10 + $0xf8] sm:$0xff]  ;;  %v295_v33 = vld [vmem:[%s2939_s10 + $0x100] sm:$0x3]  ;;  %4731 = vst [vmem:[#allocation14_spill] sm:$0xff] %v3501_v35 }
  0x7f   : > { %1510 = vmatprep.subr.mxu0 %v4645_v2  ;;  %1731 = vmatprep.subr.mxu1 %v4645_v2  ;;  %4730 = vst [vmem:[#allocation13_spill] sm:$0xff] %v3477_v0  ;;  %v356_v47 = vmul.f32 %v2953_v52, %v295_v33 }
  0x80   : > { %1511 = vmatpush1.msra.mxu0 %v949_v39  ;;  %1732 = vmatpush1.msra.mxu1 %v983_v12  ;;  %v293_v39 = vld [vmem:[%s2939_s10 + $0xf0] sm:$0xff]  ;;  %v664_v12 = vrot.slane %v545_v3, 1 }
  0x81   : > { %1164 = vmatmul.mubr.f32.gmra.mxu0 %v3330_v15  ;;  %1389 = vmatmul.mubr.f32.gmra.mxu1 %v3442_v23  ;;  %v413_v23 = vadd.f32 %v2977_v61, %v352_v28  ;;  %v947_v28 = vld [vmem:[%s4632_s1 + $0x200] sm:$0xff]  ;;  %v354_v51 = vmul.f32 %v2953_v52, %v293_v39 }
  0x82   : > { %1168 = vmatprep.mubr.f32.mxu0 %v3448_v29  ;;  %2463 = vmatprep.mubr.msk.f32.mxu1 %vm3049_vm1, %v3433_v58  ;;  %v3508_v39 = vsel %vm623_vm3, %v664_v12, %v665_v19  ;;  %v980_v12 = vld [vmem:[%s4632_s1 + $0x308] sm:$0xff] }
  0x83   : > { %1512 = vmatprep.subr.mxu0 %v4645_v2  ;;  %1733 = vmatprep.subr.mxu1 %v4645_v2  ;;  %v778_v2 = vrot.slane %v3450_v60, 2  ;;  %4734 = vst [vmem:[#allocation16_spill] sm:$0xff] %v3508_v39  ;;  %v3510_v29 = vmax.f32 %v413_v23, 0.0  ;;  %v978_v23 = vld [vmem:[%s4632_s1 + $0x2f8] sm:$0xff] }
  0x84   : > { %1513 = vmatpush1.msra.mxu0 %v948_v41  ;;  %1734 = vmatpush1.msra.mxu1 %v982_v53  ;;  %v3503_v41 = vmax.f32 %v412_v56, 0.0  ;;  %v777_v53 = vrot.slane %v545_v3, 2  ;;  %v468_v3 = vmax.f32 %v414_v21, 0.0  ;;  %v415_v56 = vadd.f32 %v2977_v61, %v354_v51 }
  0x85   : > { %2431 = vmatmul.mubr.msk.f32.gmra.mxu0 %vm3049_vm1, %v3383_v62  ;;  %1394 = vmatmul.mubr.f32.gmra.mxu1 %v3471_v49  ;;  %v4733_v49 = vmov 0.0   ;;  %v667_v62 = vrot.slane %v547_v54, 1  ;;  %4735 = vst [vmem:[#allocation17_spill] sm:$0xff] %v3510_v29  ;;  %v670_v33 = vrot.slane %v3510_v29, 1 }
  0x86   : > { %1173 = vmatprep.mubr.f32.mxu0 %v3477_v0  ;;  %1398 = vmatprep.mubr.f32.mxu1 %v3450_v60  ;;  %4732 = vst [vmem:[#allocation15_spill] sm:$0xff] %v3503_v41  ;;  %v355_v0 = vmul.f32 %v2953_v52, %v294_v20  ;;  %v548_v24 = vsel %vm497_vm0, 0.0, %v3503_v41  ;;  %v3532_v21 = vsel %vm736_vm4, %v777_v53, %v778_v2  ;;  %v780_v20 = vrot.slane %v547_v54, 2 }
  0x87   : > { %1514 = vmatprep.subr.mxu0 %v4733_v49  ;;  %1735 = vmatprep.subr.mxu1 %v4733_v49  ;;  %4736 = vst [vmem:[#allocation18_spill] sm:$0xff] %v3532_v21  ;;  %v669_v51 = vrot.slane %v548_v24, 1  ;;  %v550_v53 = vsel %vm502_vm2, 0.0, %v468_v3  ;;  %v417_v54 = vadd.f32 %v2977_v61, %v356_v47  ;;  %v979_v3 = vld [vmem:[%s4632_s1 + $0x300] sm:$0xff] }
  0x88   : > { %1515 = vmatpush1.msra.mxu0 %v947_v28  ;;  %1736 = vmatpush1.msra.mxu1 %v981_v8  ;;  %v3536_v28 = vsel %vm623_vm3, %v665_v19, %v667_v62  ;;  %v416_v8 = vadd.f32 %v2977_v61, %v355_v0  ;;  %v977_v19 = vld [vmem:[%s4632_s1 + $0x2f0] sm:$0xff]  ;;  %v3553_v62 = vmax.f32 %v415_v56, 0.0  ;;  %v298_v0 = vld [vmem:[%s2939_s10 + $0x118] sm:$0x3]  ;;  %v3562_v47 = vsel %vm736_vm4, %v778_v2, %v780_v20 }
  0x89   : > { %1174 = vmatmul.mubr.f32.gmra.mxu0 %v3390_v18  ;;  %1399 = vmatmul.mubr.f32.gmra.mxu1 %v3501_v35  ;;  %4737 = vst [vmem:[#allocation19_spill] sm:$0xff] %v3536_v28  ;;  %v296_v35 = vld [vmem:[%s2939_s10 + $0x108] sm:$0xff]  ;;  %4739 = vst [vmem:[#allocation21_spill] sm:$0xff] %v3562_v47  ;;  %v3568_v56 = vsel %vm623_vm3, %v669_v51, %v670_v33  ;;  %v1010_v20 = vld [vmem:[%s4632_s1 + $0x3f8] sm:$0xff] }
  0x8a   : > { %1178 = vmatprep.mubr.f32.mxu0 %v3508_v39  ;;  %2465 = vmatprep.mubr.msk.f32.mxu1 %vm3049_vm1, %v3503_v41  ;;  %v297_v39 = vld [vmem:[%s2939_s10 + $0x110] sm:$0xff]  ;;  %4738 = vst [vmem:[#allocation20_spill] sm:$0xff] %v3553_v62  ;;  %4740 = vst [vmem:[#allocation22_spill] sm:$0xff] %v3568_v56  ;;  %v3570_v18 = vmax.f32 %v416_v8, 0.0  ;;  %v551_v2 = vsel %vm497_vm0, 0.0, %v3553_v62  ;;  %v785_v8 = vrot.slane %v550_v53, 2 }
  0x8b   : > { %1516 = vmatprep.subr.mxu0 %v4733_v49  ;;  %1737 = vmatprep.subr.mxu1 %v4733_v49 }
  0x8c   : > { %1517 = vmatpush2.msra.mxu0 %v978_v23  ;;  %1738 = vmatpush1.msra.mxu1 %v980_v12  ;;  %v782_v23 = vrot.slane %v548_v24, 2  ;;  %v783_v12 = vrot.slane %v3510_v29, 2  ;;  %4741 = vst [vmem:[#allocation23_spill] sm:$0xff] %v3570_v18  ;;  %v471_v24 = vmax.f32 %v417_v54, 0.0 }
  0x8d   : > { %2433 = vmatmul.mubr.msk.f32.gmra.mxu0 %vm3049_vm1, %v3433_v58  ;;  %1404 = vmatmul.mubr.f32.gmra.mxu1 %v3532_v21  ;;  %v357_v21 = vmul.f32 %v2953_v52, %v296_v35  ;;  %v672_v58 = vrot.slane %v550_v53, 1  ;;  %v359_v35 = vmul.f32 %v2953_v52, %v298_v0 }
  0x8e   : > { %1183 = vmatprep.mubr.f32.mxu0 %v3536_v28  ;;  %1408 = vmatprep.mubr.f32.mxu1 %v3510_v29  ;;  %v358_v28 = vmul.f32 %v2953_v52, %v297_v39  ;;  %v976_v39 = vld [vmem:[%s4632_s1 + $0x2e8] sm:$0xff]  ;;  %v3591_v51 = vsel %vm736_vm4, %v782_v23, %v783_v12  ;;  %v553_v53 = vsel %vm502_vm2, 0.0, %v471_v24  ;;  %v1009_v24 = vld [vmem:[%s4632_s1 + $0x3f0] sm:$0xff] }
  0x8f   : > { %1518 = vmatprep.subr.mxu0 %v4733_v49  ;;  %1739 = vmatprep.subr.mxu1 %v4733_v49  ;;  %4742 = vst [vmem:[#allocation24_spill] sm:$0xff] %v3591_v51  ;;  %v418_v54 = vadd.f32 %v2977_v61, %v357_v21  ;;  %v3597_v0 = vsel %vm623_vm3, %v670_v33, %v672_v58  ;;  %v300_v23 = vld [vmem:[%s2939_s10 + $0x128] sm:$0xff]  ;;  %v975_v58 = vld [vmem:[%s4632_s1 + $0x2e0] sm:$0xff]  ;;  %v301_v33 = vld [vmem:[%s2939_s10 + $0x130] sm:$0x3] }
  0x90   : > { %1519 = vmatpush2.msra.mxu0 %v977_v19  ;;  %1740 = vmatpush1.msra.mxu1 %v979_v3  ;;  %v299_v19 = vld [vmem:[%s2939_s10 + $0x120] sm:$0xff]  ;;  %4743 = vst [vmem:[#allocation25_spill] sm:$0xff] %v3597_v0  ;;  %v674_v3 = vrot.slane %v551_v2, 1  ;;  %v420_v21 = vadd.f32 %v2977_v61, %v359_v35  ;;  %v3621_v35 = vsel %vm736_vm4, %v783_v12, %v785_v8 }
  0x91   : > { %1184 = vmatmul.mubr.f32.gmra.mxu0 %v3450_v60  ;;  %1409 = vmatmul.mubr.f32.gmra.mxu1 %v3562_v47  ;;  %v675_v47 = vrot.slane %v3570_v18, 1  ;;  %4744 = vst [vmem:[#allocation26_spill] sm:$0xff] %v3621_v35  ;;  %v362_v8 = vmul.f32 %v2953_v52, %v301_v33 }
  0x92   : > { %1188 = vmatprep.mubr.f32.mxu0 %v3568_v56  ;;  %2467 = vmatprep.mubr.msk.f32.mxu1 %vm3049_vm1, %v3553_v62  ;;  %v419_v56 = vadd.f32 %v2977_v61, %v358_v28  ;;  %v360_v28 = vmul.f32 %v2953_v52, %v299_v19 }
  0x93   : > { %1520 = vmatprep.subr.mxu0 %v4733_v49  ;;  %1741 = vmatprep.subr.mxu1 %v4733_v49  ;;  %v3628_v19 = vsel %vm623_vm3, %v674_v3, %v675_v47  ;;  %v1008_v3 = vld [vmem:[%s4632_s1 + $0x3e8] sm:$0xff] }
  0x94   : > { %1521 = vmatpush2.msra.mxu0 %v976_v39  ;;  %1742 = vmatpush2.msra.mxu1 %v1010_v20  ;;  %v3623_v39 = vmax.f32 %v418_v54, 0.0  ;;  %v787_v20 = vrot.slane %v551_v2, 2  ;;  %4746 = vst [vmem:[#allocation28_spill] sm:$0xff] %v3628_v19  ;;  %v3630_v60 = vmax.f32 %v419_v56, 0.0  ;;  %v474_v2 = vmax.f32 %v420_v21, 0.0  ;;  %v974_v56 = vld [vmem:[%s4632_s1 + $0x2d8] sm:$0xff] }
  0x95   : > { %2435 = vmatmul.mubr.msk.f32.gmra.mxu0 %vm3049_vm1, %v3503_v41  ;;  %1414 = vmatmul.mubr.f32.gmra.mxu1 %v3591_v51  ;;  %v788_v51 = vrot.slane %v3570_v18, 2  ;;  %v677_v41 = vrot.slane %v553_v53, 1  ;;  %v421_v54 = vadd.f32 %v2977_v61, %v360_v28  ;;  %v790_v21 = vrot.slane %v553_v53, 2 }
  0x96   : > { %1193 = vmatprep.mubr.f32.mxu0 %v3597_v0  ;;  %1418 = vmatprep.mubr.f32.mxu1 %v3570_v18  ;;  %4745 = vst [vmem:[#allocation27_spill] sm:$0xff] %v3623_v39  ;;  %4747 = vst [vmem:[#allocation29_spill] sm:$0xff] %v3630_v60  ;;  %v361_v0 = vmul.f32 %v2953_v52, %v300_v23  ;;  %v554_v12 = vsel %vm497_vm0, 0.0, %v3623_v39  ;;  %v680_v28 = vrot.slane %v3630_v60, 1 }
  0x97   : > { %1522 = vmatprep.subr.mxu0 %v4733_v49  ;;  %1743 = vmatprep.subr.mxu1 %v4733_v49  ;;  %v3652_v52 = vsel %vm736_vm4, %v787_v20, %v788_v51  ;;  %v3656_v23 = vsel %vm623_vm3, %v675_v47, %v677_v41  ;;  %v556_v20 = vsel %vm502_vm2, 0.0, %v474_v2  ;;  %v423_v53 = vadd.f32 %v2977_v61, %v362_v8  ;;  %v973_v41 = vld [vmem:[%s4632_s1 + $0x2d0] sm:$0xff]  ;;  %v304_v2 = vld [vmem:[%s2939_s10 + $0x148] sm:$0x3] }
  0x98   : > { %1523 = vmatpush2.msra.mxu0 %v975_v58  ;;  %1744 = vmatpush2.msra.mxu1 %v1009_v24  ;;  %4748 = vst [vmem:[#allocation30_spill] sm:$0xff] %v3652_v52  ;;  %4749 = vst [vmem:[#allocation31_spill] sm:$0xff] %v3656_v23  ;;  %v679_v58 = vrot.slane %v554_v12, 1  ;;  %v422_v33 = vadd.f32 %v2977_v61, %v361_v0  ;;  %v302_v24 = vld [vmem:[%s2939_s10 + $0x138] sm:$0xff]  ;;  %v3673_v47 = vmax.f32 %v421_v54, 0.0  ;;  %v1007_v0 = vld [vmem:[%s4632_s1 + $0x3e0] sm:$0xff] }
  0x99   : > { %1194 = vmatmul.mubr.f32.gmra.mxu0 %v3510_v29  ;;  %1419 = vmatmul.mubr.f32.gmra.mxu1 %v3621_v35  ;;  %v303_v35 = vld [vmem:[%s2939_s10 + $0x140] sm:$0xff]  ;;  %v3682_v61 = vsel %vm736_vm4, %v788_v51, %v790_v21  ;;  %v792_v8 = vrot.slane %v554_v12, 2  ;;  %v477_v21 = vmax.f32 %v423_v53, 0.0  ;;  %v795_v53 = vrot.slane %v556_v20, 2 }
  0x9a   : > { %1198 = vmatprep.mubr.f32.mxu0 %v3628_v19  ;;  %2469 = vmatprep.mubr.msk.f32.mxu1 %vm3049_vm1, %v3623_v39  ;;  %4750 = vst [vmem:[#allocation32_spill] sm:$0xff] %v3673_v47  ;;  %4751 = vst [vmem:[#allocation33_spill] sm:$0xff] %v3682_v61  ;;  %v3688_v54 = vld [vmem:[%s4633_s2] ss:$0 sm:$0xff]  ;;  %v557_v12 = vsel %vm497_vm0, 0.0, %v3673_v47  ;;  %v306_v19 = vld [vmem:[%s2939_s10 + $0x158] sm:$0xff] }
  0x9b   : > { %1524 = vmatprep.subr.mxu0 %v4733_v49  ;;  %1745 = vmatprep.subr.mxu1 %v4733_v49  ;;  %v364_v51 = vmul.f32 %v3688_v54, %v303_v35  ;;  %v972_v35 = vld [vmem:[%s4632_s1 + $0x2c8] sm:$0xff] }
  0x9c   : > { %1525 = vmatpush2.msra.mxu0 %v974_v56  ;;  %1746 = vmatpush2.msra.mxu1 %v1008_v3  ;;  %v793_v56 = vrot.slane %v3630_v60, 2  ;;  %v363_v3 = vmul.f32 %v3688_v54, %v302_v24  ;;  %v365_v24 = vmul.f32 %v3688_v54, %v304_v2 }
  0x9d   : > { %2437 = vmatmul.mubr.msk.f32.gmra.mxu0 %vm3049_vm1, %v3553_v62  ;;  %1424 = vmatmul.mubr.f32.gmra.mxu1 %v3652_v52  ;;  %v3693_v52 = vsel %vm623_vm3, %v679_v58, %v680_v28  ;;  %v3695_v62 = vmax.f32 %v422_v33, 0.0  ;;  %v1006_v58 = vld [vmem:[%s4632_s1 + $0x3d8] sm:$0xff] }
  0x9e   : > { %1203 = vmatprep.mubr.f32.mxu0 %v3656_v23  ;;  %1428 = vmatprep.mubr.f32.mxu1 %v3630_v60  ;;  %4752 = vst [vmem:[#allocation34_spill] sm:$0xff] %v3693_v52  ;;  %v682_v23 = vrot.slane %v556_v20, 1  ;;  %v3716_v33 = vsel %vm736_vm4, %v792_v8, %v793_v56  ;;  %v559_v20 = vsel %vm502_vm2, 0.0, %v477_v21  ;;  %v307_v21 = vld [vmem:[%s2939_s10 + $0x160] sm:$0x3] }
  0x9f   : > { %1526 = vmatprep.subr.mxu0 %v4733_v49  ;;  %1747 = vmatprep.subr.mxu1 %v4733_v49  ;;  %4753 = vst [vmem:[#allocation35_spill] sm:$0xff] %v3716_v33 }
  0xa0   : > { %1527 = vmatpush2.msra.mxu0 %v973_v41  ;;  %1748 = vmatpush2.msra.mxu1 %v1007_v0  ;;  %v3721_v41 = vld [vmem:[%s4634_s3] ss:$0 sm:$0xff]  ;;  %v3726_v2 = vsel %vm623_vm3, %v680_v28, %v682_v23  ;;  %v797_v28 = vrot.slane %v557_v12, 2 }
  0xa1   : > { %1204 = vmatmul.mubr.f32.gmra.mxu0 %v3570_v18  ;;  %1429 = vmatmul.mubr.f32.gmra.mxu1 %v3682_v61  ;;  %v424_v0 = vadd.f32 %v3721_v41, %v363_v3  ;;  %4754 = vst [vmem:[#allocation36_spill] sm:$0xff] %v3726_v2  ;;  %v684_v61 = vrot.slane %v557_v12, 1  ;;  %v425_v8 = vadd.f32 %v3721_v41, %v364_v51  ;;  %v305_v18 = vld [vmem:[%s2939_s10 + $0x150] sm:$0xff]  ;;  %v971_v23 = vld [vmem:[%s4632_s1 + $0x2c0] sm:$0xff] }
  0xa2   : > { %1208 = vmatprep.mubr.f32.mxu0 %v3693_v52  ;;  %2471 = vmatprep.mubr.msk.f32.mxu1 %vm3049_vm1, %v3673_v47  ;;  %v685_v52 = vrot.slane %v3695_v62, 1  ;;  %v426_v3 = vadd.f32 %v3721_v41, %v365_v24  ;;  %v1005_v51 = vld [vmem:[%s4632_s1 + $0x3d0] sm:$0xff]  ;;  %v3750_v24 = vsel %vm736_vm4, %v793_v56, %v795_v53 }
  0xa3   : > { %1528 = vmatprep.subr.mxu0 %v4733_v49  ;;  %1749 = vmatprep.subr.mxu1 %v4733_v49  ;;  %4755 = vst [vmem:[#allocation37_spill] sm:$0xff] %v3750_v24  ;;  %v3760_v29 = vmax.f32 %v425_v8, 0.0  ;;  %v800_v8 = vrot.slane %v559_v20, 2 }
  0xa4   : > { %1529 = vmatpush2.msra.mxu0 %v972_v35  ;;  %1750 = vmatpush2.msra.mxu1 %v1006_v58  ;;  %v3752_v35 = vmax.f32 %v424_v0, 0.0  ;;  %v798_v58 = vrot.slane %v3695_v62, 2  ;;  %v3758_v12 = vsel %vm623_vm3, %v684_v61, %v685_v52  ;;  %v480_v53 = vmax.f32 %v426_v3, 0.0  ;;  %v970_v61 = vld [vmem:[%s4632_s1 + $0x2b8] sm:$0xff] }
  0xa5   : > { %2439 = vmatmul.mubr.msk.f32.gmra.mxu0 %vm3049_vm1, %v3623_v39  ;;  %1434 = vmatmul.mubr.f32.gmra.mxu1 %v3716_v33  ;;  %v366_v33 = vmul.f32 %v3688_v54, %v305_v18  ;;  %4756 = vst [vmem:[#allocation38_spill] sm:$0xff] %v3758_v12  ;;  %v687_v39 = vrot.slane %v559_v20, 1  ;;  %v368_v18 = vmul.f32 %v3688_v54, %v307_v21  ;;  %v690_v21 = vrot.slane %v3760_v29, 1 }
  0xa6   : > { %1213 = vmatprep.mubr.f32.mxu0 %v3726_v2  ;;  %1438 = vmatprep.mubr.f32.mxu1 %v3695_v62  ;;  %v367_v2 = vmul.f32 %v3688_v54, %v306_v19  ;;  %v560_v56 = vsel %vm497_vm0, 0.0, %v3752_v35  ;;  %v1004_v19 = vld [vmem:[%s4632_s1 + $0x3c8] sm:$0xff]  ;;  %v3781_v0 = vsel %vm736_vm4, %v797_v28, %v798_v58  ;;  %v562_v20 = vsel %vm502_vm2, 0.0, %v480_v53  ;;  %v309_v28 = vld [vmem:[%s2939_s10 + $0x170] sm:$0xff]  ;;  %v310_v53 = vld [vmem:[%s2939_s10 + $0x178] sm:$0x3] }
  0xa7   : > { %1530 = vmatprep.subr.mxu0 %v4733_v49  ;;  %1751 = vmatprep.subr.mxu1 %v4733_v49  ;;  %4757 = vst [vmem:[#allocation39_spill] sm:$0xff] %v3781_v0  ;;  %v427_v3 = vadd.f32 %v3721_v41, %v366_v33  ;;  %v429_v33 = vadd.f32 %v3721_v41, %v368_v18 }
  0xa8   : > { %1531 = vmatpush2.msra.mxu0 %v971_v23  ;;  %1752 = vmatpush2.msra.mxu1 %v1005_v51  ;;  %v3786_v23 = vsel %vm623_vm3, %v685_v52, %v687_v39  ;;  %v689_v51 = vrot.slane %v560_v56, 1  ;;  %v969_v39 = vld [vmem:[%s4632_s1 + $0x2b0] sm:$0xff]  ;;  %v802_v52 = vrot.slane %v560_v56, 2  ;;  %v3810_v18 = vsel %vm736_vm4, %v798_v58, %v800_v8 }
  0xa9   : > { %1214 = vmatmul.mubr.f32.gmra.mxu0 %v3630_v60  ;;  %1439 = vmatmul.mubr.f32.gmra.mxu1 %v3750_v24  ;;  %4758 = vst [vmem:[#allocation40_spill] sm:$0xff] %v3786_v23  ;;  %v428_v24 = vadd.f32 %v3721_v41, %v367_v2  ;;  %v1003_v2 = vld [vmem:[%s4632_s1 + $0x3c0] sm:$0xff]  ;;  %4759 = vst [vmem:[#allocation41_spill] sm:$0xff] %v3810_v18  ;;  %v483_v8 = vmax.f32 %v429_v33, 0.0  ;;  %v805_v33 = vrot.slane %v562_v20, 2 }
  0xaa   : > { %1218 = vmatprep.mubr.f32.mxu0 %v3758_v12  ;;  %2473 = vmatprep.mubr.msk.f32.mxu1 %vm3049_vm1, %v3752_v35  ;;  %v308_v12 = vld [vmem:[%s2939_s10 + $0x168] sm:$0xff]  ;;  %v3818_v56 = vsel %vm623_vm3, %v689_v51, %v690_v21 }
  0xab   : > { %1532 = vmatprep.subr.mxu0 %v4733_v49  ;;  %1753 = vmatprep.subr.mxu1 %v4733_v49  ;;  %4760 = vst [vmem:[#allocation42_spill] sm:$0xff] %v3818_v56  ;;  %v3820_v60 = vmax.f32 %v428_v24, 0.0  ;;  %v968_v24 = vld [vmem:[%s4632_s1 + $0x2a8] sm:$0xff] }
  0xac   : > { %1533 = vmatpush2.msra.mxu0 %v970_v61  ;;  %1754 = vmatpush2.msra.mxu1 %v1004_v19  ;;  %v3812_v61 = vmax.f32 %v427_v3, 0.0  ;;  %v803_v19 = vrot.slane %v3760_v29, 2  ;;  %v1002_v3 = vld [vmem:[%s4632_s1 + $0x3b8] sm:$0xff] }
  0xad   : > { %2441 = vmatmul.mubr.msk.f32.gmra.mxu0 %vm3049_vm1, %v3673_v47  ;;  %1444 = vmatmul.mubr.f32.gmra.mxu1 %v3781_v0  ;;  %v369_v0 = vmul.f32 %v3688_v54, %v308_v12  ;;  %v692_v47 = vrot.slane %v562_v20, 1  ;;  %v371_v12 = vmul.f32 %v3688_v54, %v310_v53  ;;  %v695_v53 = vrot.slane %v3820_v60, 1 }
  0xae   : > { %1223 = vmatprep.mubr.f32.mxu0 %v3786_v23  ;;  %1448 = vmatprep.mubr.f32.mxu1 %v3760_v29  ;;  %v370_v23 = vmul.f32 %v3688_v54, %v309_v28  ;;  %v563_v58 = vsel %vm497_vm0, 0.0, %v3812_v61  ;;  %v3841_v51 = vsel %vm736_vm4, %v802_v52, %v803_v19  ;;  %v565_v20 = vsel %vm502_vm2, 0.0, %v483_v8 }
  0xaf   : > { %1534 = vmatprep.subr.mxu0 %v4733_v49  ;;  %1755 = vmatprep.subr.mxu1 %v4733_v49  ;;  %4761 = vst [vmem:[#allocation43_spill] sm:$0xff] %v3841_v51  ;;  %v430_v28 = vadd.f32 %v3721_v41, %v369_v0  ;;  %v432_v0 = vadd.f32 %v3721_v41, %v371_v12  ;;  %v808_v12 = vrot.slane %v3820_v60, 2 }
  0xb0   : > { %1535 = vmatpush2.msra.mxu0 %v969_v39  ;;  %1756 = vmatpush2.msra.mxu1 %v1003_v2  ;;  %v3846_v39 = vsel %vm623_vm3, %v690_v21, %v692_v47  ;;  %v694_v2 = vrot.slane %v563_v58, 1  ;;  %v967_v47 = vld [vmem:[%s4632_s1 + $0x2a0] sm:$0xff]  ;;  %v807_v21 = vrot.slane %v563_v58, 2  ;;  %v3868_v52 = vsel %vm736_vm4, %v803_v19, %v805_v33 }
  0xb1   : > { %1224 = vmatmul.mubr.f32.gmra.mxu0 %v3695_v62  ;;  %1449 = vmatmul.mubr.f32.gmra.mxu1 %v3810_v18  ;;  %v431_v18 = vadd.f32 %v3721_v41, %v370_v23  ;;  %v1001_v23 = vld [vmem:[%s4632_s1 + $0x3b0] sm:$0xff]  ;;  %4762 = vst [vmem:[#allocation44_spill] sm:$0xff] %v3868_v52  ;;  %v3870_v8 = vmax.f32 %v430_v28, 0.0  ;;  %v486_v33 = vmax.f32 %v432_v0, 0.0  ;;  %v312_v28 = vld [vmem:[%s2939_s10 + $0x188] sm:$0xff]  ;;  %v810_v0 = vrot.slane %v565_v20, 2 }
  0xb2   : > { %1228 = vmatprep.mubr.f32.mxu0 %v3818_v56  ;;  %2475 = vmatprep.mubr.msk.f32.mxu1 %vm3049_vm1, %v3812_v61  ;;  %v311_v56 = vld [vmem:[%s2939_s10 + $0x180] sm:$0xff]  ;;  %v3876_v58 = vsel %vm623_vm3, %v694_v2, %v695_v53  ;;  %v3898_v2 = vsel %vm736_vm4, %v807_v21, %v808_v12 }
  0xb3   : > { %1536 = vmatprep.subr.mxu0 %v4733_v49  ;;  %1757 = vmatprep.subr.mxu1 %v4733_v49  ;;  %4763 = vst [vmem:[#allocation45_spill] sm:$0xff] %v3876_v58  ;;  %v566_v19 = vsel %vm497_vm0, 0.0, %v3870_v8  ;;  %v568_v21 = vsel %vm502_vm2, 0.0, %v486_v33 }
  0xb4   : > { %1537 = vmatpush2.msra.mxu0 %v968_v24  ;;  %1758 = vmatpush2.msra.mxu1 %v1002_v3  ;;  %v372_v24 = vmul.f32 %v3688_v54, %v311_v56  ;;  %v697_v3 = vrot.slane %v565_v20, 1  ;;  %v966_v56 = vld [vmem:[%s4632_s1 + $0x298] sm:$0xff]  ;;  %v699_v6 = vrot.slane %v566_v19, 1  ;;  %v999_v20 = vld [vmem:[%s4632_s1 + $0x3a0] sm:$0xff]  ;;  %v812_v33 = vrot.slane %v566_v19, 2 }
  0xb5   : > { %2443 = vmatmul.mubr.msk.f32.gmra.mxu0 %vm3049_vm1, %v3752_v35  ;;  %1454 = vmatmul.mubr.f32.gmra.mxu1 %v3841_v51  ;;  %v3879_v51 = vmax.f32 %v431_v18, 0.0  ;;  %v1000_v18 = vld [vmem:[%s4632_s1 + $0x3a8] sm:$0xff]  ;;  %v998_v19 = vld [vmem:[%s4632_s1 + $0x398] sm:$0xff] }
  0xb6   : > { %1233 = vmatprep.mubr.f32.mxu0 %v3846_v39  ;;  %1458 = vmatprep.mubr.f32.mxu1 %v3820_v60 }
  0xb7   : > { %1538 = vmatprep.subr.mxu0 %v4733_v49  ;;  %1759 = vmatprep.subr.mxu1 %v4733_v49 }
  0xb8   : > { %1539 = vmatpush2.msra.mxu0 %v967_v47  ;;  %1760 = vmatpush2.msra.mxu1 %v1001_v23  ;;  %v433_v47 = vadd.f32 %v3721_v41, %v372_v24  ;;  %v3903_v23 = vsel %vm623_vm3, %v695_v53, %v697_v3  ;;  %v965_v53 = vld [vmem:[%s4632_s1 + $0x290] sm:$0xff]  ;;  %v3923_v24 = vsel %vm736_vm4, %v808_v12, %v810_v0  ;;  %v964_v12 = vld [vmem:[%s4632_s1 + $0x288] sm:$0xff] }
  0xb9   : > { %1234 = vmatmul.mubr.f32.gmra.mxu0 %v3760_v29  ;;  %1459 = vmatmul.mubr.f32.gmra.mxu1 %v3868_v52  ;;  %v700_v52 = vrot.slane %v3879_v51, 1 }
  0xba   : > { %1238 = vmatprep.mubr.f32.mxu0 %v3876_v58  ;;  %2477 = vmatprep.mubr.msk.f32.mxu1 %vm3049_vm1, %v3870_v8  ;;  %v373_v58 = vmul.f32 %v3688_v54, %v312_v28  ;;  %v3925_v3 = vmax.f32 %v433_v47, 0.0  ;;  %v813_v28 = vrot.slane %v3879_v51, 2 }
  0xbb   : > { %1540 = vmatprep.subr.mxu0 %v4733_v49  ;;  %1761 = vmatprep.subr.mxu1 %v4733_v49 }
  0xbc   : > { %1541 = vmatpush2.msra.mxu0 %v966_v56  ;;  %1762 = vmatpush2.msra.mxu1 %v1000_v18  ;;  %v3931_v56 = vsel %vm623_vm3, %v699_v6, %v700_v52  ;;  %v702_v18 = vrot.slane %v568_v21, 1  ;;  %v434_v13 = vadd.f32 %v3721_v41, %v373_v58  ;;  %v3947_v6 = vsel %vm736_vm4, %v812_v33, %v813_v28  ;;  %v1026_v33 = vld [vmem:[%s4632_s1 + $0x478] sm:$0xff] }
  0xbd   : > { %2445 = vmatmul.mubr.msk.f32.gmra.mxu0 %vm3049_vm1, %v3812_v61  ;;  %1464 = vmatmul.mubr.f32.gmra.mxu1 %v3898_v2  ;;  %v815_v58 = vrot.slane %v568_v21, 2  ;;  %v996_v21 = vld [vmem:[%s4632_s1 + $0x388] sm:$0xff] }
  0xbe   : > { %1243 = vmatprep.mubr.f32.mxu0 %v3903_v23  ;;  %1468 = vmatprep.mubr.f32.mxu1 %v3879_v51  ;;  %v3952_v0 = vsel %vm623_vm3, %v700_v52, %v702_v18  ;;  %v3954_v47 = vmax.f32 %v434_v13, 0.0  ;;  %v963_v13 = vld [vmem:[%s4632_s1 + $0x280] sm:$0xff] }
  0xbf   : > { %1542 = vmatprep.subr.mxu0 %v4733_v49  ;;  %1763 = vmatprep.subr.mxu1 %v4733_v49  ;;  %v3966_v52 = vsel %vm736_vm4, %v813_v28, %v815_v58  ;;  %v1025_v28 = vld [vmem:[%s4632_s1 + $0x470] sm:$0xff]  ;;  %v4775_v18 = vld [vmem:[#allocation18_spill] sm:$0xff] }
  0xc0   : > { %1543 = vmatpush2.msra.mxu0 %v965_v53  ;;  %1764 = vmatpush2.msra.mxu1 %v999_v20  ;;  %v997_v53 = vld [vmem:[%s4632_s1 + $0x390] sm:$0xff]  ;;  %v995_v20 = vld [vmem:[%s4632_s1 + $0x380] sm:$0xff] }
  0xc1   : > { %1244 = vmatmul.mubr.f32.gmra.mxu0 %v3820_v60  ;;  %1469 = vmatmul.mubr.f32.gmra.mxu1 %v3923_v24  ;;  %v1011_v58 = vld [vmem:[%s4632_s1 + $0x400] sm:$0xff] }
  0xc2   : > { %1248 = vmatprep.mubr.f32.mxu0 %v3931_v56  ;;  %2479 = vmatprep.mubr.msk.f32.mxu1 %vm3049_vm1, %v3925_v3 }
  0xc3   : > { %1544 = vmatprep.subr.mxu0 %v4733_v49  ;;  %1765 = vmatprep.subr.mxu1 %v4733_v49 }
  0xc4   : > { %1545 = vmatpush2.msra.mxu0 %v964_v12  ;;  %1766 = vmatpush2.msra.mxu1 %v998_v19  ;;  %v4776_v12 = vld [vmem:[#allocation22_spill] sm:$0xff]  ;;  %v4777_v19 = vld [vmem:[#allocation15_spill] sm:$0xff] }
  0xc5   : > { %2447 = vmatmul.mubr.msk.f32.gmra.mxu0 %vm3049_vm1, %v3870_v8  ;;  %1474 = vmatmul.mubr.f32.gmra.mxu1 %v3947_v6 }
  0xc6   : > { %1767 = vmatprep.subr.mxu1 %v4733_v49  ;;  %1253 = vmatprep.mubr.f32.mxu0 %v3952_v0 }
  0xc7   : > { %1478 = vmatprep.mubr.f32.mxu1 %v3954_v47  ;;  %1768 = vmatpush2.msra.mxu1 %v997_v53  ;;  %v4778_v53 = vld [vmem:[#allocation21_spill] sm:$0xff] }
  0xc8   : > { %1546 = vmatprep.subr.mxu0 %v4733_v49  ;;  %1769 = vmatprep.subr.mxu1 %v4733_v49 }
  0xc9   : > { %1254 = vmatmul.mubr.f32.gmra.mxu0 %v3879_v51  ;;  %1479 = vmatmul.mubr.f32.gmra.mxu1 %v3966_v52 }
  0xca   : > { %1547 = vmatpush2.msra.mxu0 %v963_v13  ;;  %1770 = vmatpush2.msra.mxu1 %v996_v21  ;;  %v4779_v13 = vld [vmem:[#allocation25_spill] sm:$0xff] }
  0xcb   : > { %1771 = vmatprep.subr.mxu1 %v4733_v49  ;;  %1548 = vmatprep.mubr.f32.mxu0 %v3110_v55  ;;  %v1021_v55 = vld [vmem:[%s4632_s1 + $0x450] sm:$0xff]  ;;  %v4780_v21 = vld [vmem:[#allocation17_spill] sm:$0xff] }
  0xcc   : > { %1772 = vmatpush2.msra.mxu1 %v995_v20  ;;  %1773 = vmatprep.mubr.f32.mxu1 %v3148_v14  ;;  %v4781_v20 = vld [vmem:[#allocation24_spill] sm:$0xff] }
  0xcd   : > { %1549 = vmatmul.mubr.f32.vlgmr.msra.gmra.mxu0 %v3088_v44  ;;  %2481 = vmatmul.mubr.msk.f32.vlgmr.msra.gmra.mxu1 %vm3049_vm1, %v3080_v40  ;;  %v1024_v40 = vld [vmem:[%s4632_s1 + $0x468] sm:$0xff]  ;;  %v1023_v44 = vld [vmem:[%s4632_s1 + $0x460] sm:$0xff] }
  0xce   : > { %2561 = vmatprep.subr.mxu0 %v1026_v33  ;;  %1553 = vmatprep.mubr.f32.mxu0 %v3142_v9  ;;  %v1018_v9 = vld [vmem:[%s4632_s1 + $0x438] sm:$0xff] }
  0xcf   : > { %2562 = vmatpush3.msra.mxu0 %v1026_v33  ;;  %1778 = vmatprep.mubr.f32.mxu1 %v3177_v30 }
  0xd0   : > { %2563 = vmatprep.subr.mxu0 %v1025_v28  ;;  %2641 = vmatprep.subr.mxu1 %v1026_v33 }
  0xd1   : > { %1554 = vmatmul.mubr.f32.gmra.mxu0 %v3117_v57  ;;  %1779 = vmatmul.mubr.f32.gmra.mxu1 %v3090_v46  ;;  %v1022_v46 = vld [vmem:[%s4632_s1 + $0x458] sm:$0xff]  ;;  %v1020_v57 = vld [vmem:[%s4632_s1 + $0x448] sm:$0xff] }
  0xd2   : > { %1558 = vmatprep.mubr.f32.mxu0 %v3171_v25  ;;  %1783 = vmatprep.mubr.f32.mxu1 %v3208_v48 }
  0xd3   : > { %2564 = vmatpush3.msra.mxu0 %v1025_v28  ;;  %2657 = vmatpush3.msra.mxu1 %v1026_v33  ;;  %v4782_v33 = vld [vmem:[#allocation28_spill] sm:$0xff] }
  0xd4   : > { %2565 = vmatprep.subr.mxu0 %v1024_v40  ;;  %2642 = vmatprep.subr.mxu1 %v1025_v28 }
  0xd5   : > { %1559 = vmatmul.mubr.f32.gmra.mxu0 %v3148_v14  ;;  %2483 = vmatmul.mubr.msk.f32.gmra.mxu1 %vm3049_vm1, %v3133_v5  ;;  %v1019_v5 = vld [vmem:[%s4632_s1 + $0x440] sm:$0xff]  ;;  %v1017_v14 = vld [vmem:[%s4632_s1 + $0x430] sm:$0xff] }
  0xd6   : > { %1563 = vmatprep.mubr.f32.mxu0 %v3201_v42  ;;  %1788 = vmatprep.mubr.f32.mxu1 %v3236_v1 }
  0xd7   : > { %2566 = vmatpush3.msra.mxu0 %v1024_v40  ;;  %2658 = vmatpush3.msra.mxu1 %v1025_v28  ;;  %v4116_v28 = vld [vmem:[%s4635_s4] ss:$0 sm:$0xff] }
  0xd8   : > { %2567 = vmatprep.subr.mxu0 %v1023_v44  ;;  %2643 = vmatprep.subr.mxu1 %v1024_v40 }
  0xd9   : > { %1564 = vmatmul.mubr.f32.gmra.mxu0 %v3177_v30  ;;  %1789 = vmatmul.mubr.f32.gmra.mxu1 %v3150_v16  ;;  %v1016_v16 = vld [vmem:[%s4632_s1 + $0x428] sm:$0xff]  ;;  %v4764_v30 = vld [vmem:[#allocation10_spill] sm:$0xff] }
  0xda   : > { %1568 = vmatprep.mubr.f32.mxu0 %v3232_v63  ;;  %1793 = vmatprep.mubr.f32.mxu1 %v3268_v26 }
  0xdb   : > { %2568 = vmatpush3.msra.mxu0 %v1023_v44  ;;  %2659 = vmatpush3.msra.mxu1 %v1024_v40 }
  0xdc   : > { %2569 = vmatprep.subr.mxu0 %v1022_v46  ;;  %2644 = vmatprep.subr.mxu1 %v1023_v44 }
  0xdd   : > { %1569 = vmatmul.mubr.f32.gmra.mxu0 %v3208_v48  ;;  %2485 = vmatmul.mubr.msk.f32.gmra.mxu1 %vm3049_vm1, %v3203_v43  ;;  %v4765_v43 = vld [vmem:[#allocation6_spill] sm:$0xff] }
  0xde   : > { %1573 = vmatprep.mubr.f32.mxu0 %v3262_v22  ;;  %1798 = vmatprep.mubr.f32.mxu1 %v3296_v45  ;;  %v1015_v48 = vld [vmem:[%s4632_s1 + $0x420] sm:$0xff] }
  0xdf   : > { %2570 = vmatpush3.msra.mxu0 %v1022_v46  ;;  %2660 = vmatpush3.msra.mxu1 %v1023_v44 }
  0xe0   : > { %2571 = vmatprep.subr.mxu0 %v1021_v55  ;;  %2645 = vmatprep.subr.mxu1 %v1022_v46 }
  0xe1   : > { %1574 = vmatmul.mubr.f32.gmra.mxu0 %v3236_v1  ;;  %1799 = vmatmul.mubr.f32.gmra.mxu1 %v3210_v50  ;;  %v4766_v50 = vld [vmem:[#allocation9_spill] sm:$0xff] }
  0xe2   : > { %1578 = vmatprep.mubr.f32.mxu0 %v3291_v38  ;;  %1803 = vmatprep.mubr.f32.mxu1 %v3328_v11  ;;  %v4767_v1 = vld [vmem:[#allocation13_spill] sm:$0xff] }
  0xe3   : > { %2572 = vmatpush3.msra.mxu0 %v1021_v55  ;;  %2661 = vmatpush3.msra.mxu1 %v1022_v46  ;;  %v4783_v46 = vld [vmem:[#allocation20_spill] sm:$0xff] }
  0xe4   : > { %2573 = vmatprep.subr.mxu0 %v1020_v57  ;;  %2646 = vmatprep.subr.mxu1 %v1021_v55 }
  0xe5   : > { %1579 = vmatmul.mubr.f32.gmra.mxu0 %v3268_v26  ;;  %2487 = vmatmul.mubr.msk.f32.gmra.mxu1 %vm3049_vm1, %v3253_v17  ;;  %v4768_v17 = vld [vmem:[#allocation7_spill] sm:$0xff]  ;;  %v1014_v26 = vld [vmem:[%s4632_s1 + $0x418] sm:$0xff] }
  0xe6   : > { %1583 = vmatprep.mubr.f32.mxu0 %v3320_v4  ;;  %1808 = vmatprep.mubr.f32.mxu1 %v3357_v36 }
  0xe7   : > { %2574 = vmatpush3.msra.mxu0 %v1020_v57  ;;  %2662 = vmatpush3.msra.mxu1 %v1021_v55 }
  0xe8   : > { %2575 = vmatprep.subr.mxu0 %v1019_v5  ;;  %2647 = vmatprep.subr.mxu1 %v1020_v57 }
  0xe9   : > { %1584 = vmatmul.mubr.f32.gmra.mxu0 %v3296_v45  ;;  %1809 = vmatmul.mubr.f32.gmra.mxu1 %v3270_v31  ;;  %v4769_v31 = vld [vmem:[#allocation12_spill] sm:$0xff] }
  0xea   : > { %1588 = vmatprep.mubr.f32.mxu0 %v3351_v32  ;;  %1813 = vmatprep.mubr.f32.mxu1 %v3388_v10  ;;  %v4770_v45 = vld [vmem:[#allocation16_spill] sm:$0xff] }
  0xeb   : > { %2576 = vmatpush3.msra.mxu0 %v1019_v5  ;;  %2663 = vmatpush3.msra.mxu1 %v1020_v57  ;;  %v4784_v57 = vld [vmem:[#allocation26_spill] sm:$0xff] }
  0xec   : > { %2577 = vmatprep.subr.mxu0 %v1018_v9  ;;  %2648 = vmatprep.subr.mxu1 %v1019_v5 }
  0xed   : > { %1589 = vmatmul.mubr.f32.gmra.mxu0 %v3328_v11  ;;  %2489 = vmatmul.mubr.msk.f32.gmra.mxu1 %vm3049_vm1, %v3322_v7  ;;  %v4771_v7 = vld [vmem:[#allocation8_spill] sm:$0xff] }
  0xee   : > { %1593 = vmatprep.mubr.f32.mxu0 %v3381_v59  ;;  %1818 = vmatprep.mubr.f32.mxu1 %v3416_v37  ;;  %v1013_v11 = vld [vmem:[%s4632_s1 + $0x410] sm:$0xff] }
  0xef   : > { %2578 = vmatpush3.msra.mxu0 %v1018_v9  ;;  %2664 = vmatpush3.msra.mxu1 %v1019_v5  ;;  %v4785_v5 = vld [vmem:[#allocation31_spill] sm:$0xff] }
  0xf0   : > { %2579 = vmatprep.subr.mxu0 %v1017_v14  ;;  %2649 = vmatprep.subr.mxu1 %v1018_v9 }
  0xf1   : > { %1594 = vmatmul.mubr.f32.gmra.mxu0 %v3357_v36  ;;  %1819 = vmatmul.mubr.f32.gmra.mxu1 %v3330_v15  ;;  %v4772_v15 = vld [vmem:[#allocation14_spill] sm:$0xff]  ;;  %v4773_v36 = vld [vmem:[#allocation19_spill] sm:$0xff] }
  0xf2   : > { %1598 = vmatprep.mubr.f32.mxu0 %v3412_v34  ;;  %1823 = vmatprep.mubr.f32.mxu1 %v4764_v30 }
  0xf3   : > { %2580 = vmatpush3.msra.mxu0 %v1017_v14  ;;  %2665 = vmatpush3.msra.mxu1 %v1018_v9 }
  0xf4   : > { %2581 = vmatprep.subr.mxu0 %v1016_v16  ;;  %2650 = vmatprep.subr.mxu1 %v1017_v14 }
  0xf5   : > { %1599 = vmatmul.mubr.f32.gmra.mxu0 %v3388_v10  ;;  %2491 = vmatmul.mubr.msk.f32.gmra.mxu1 %vm3049_vm1, %v4765_v43  ;;  %v4774_v10 = vld [vmem:[#allocation11_spill] sm:$0xff] }
  0xf6   : > { %1603 = vmatprep.mubr.f32.mxu0 %v4766_v50  ;;  %1828 = vmatprep.mubr.f32.mxu1 %v4767_v1 }
  0xf7   : > { %2582 = vmatpush3.msra.mxu0 %v1016_v16  ;;  %2666 = vmatpush3.msra.mxu1 %v1017_v14 }
  0xf8   : > { %2583 = vmatprep.subr.mxu0 %v1015_v48  ;;  %2651 = vmatprep.subr.mxu1 %v1016_v16 }
  0xf9   : > { %1604 = vmatmul.mubr.f32.gmra.mxu0 %v3416_v37  ;;  %1829 = vmatmul.mubr.f32.gmra.mxu1 %v4768_v17  ;;  %v1012_v37 = vld [vmem:[%s4632_s1 + $0x408] sm:$0xff]  ;;  %v4787_v17 = vld [vmem:[#allocation30_spill] sm:$0xff] }
  0xfa   : > { %1608 = vmatprep.mubr.f32.mxu0 %v4769_v31  ;;  %1833 = vmatprep.mubr.f32.mxu1 %v4770_v45 }
  0xfb   : > { %2584 = vmatpush3.msra.mxu0 %v1015_v48  ;;  %2667 = vmatpush3.msra.mxu1 %v1016_v16 }
  0xfc   : > { %2585 = vmatprep.subr.mxu0 %v1014_v26  ;;  %2652 = vmatprep.subr.mxu1 %v1015_v48 }
  0xfd   : > { %1609 = vmatmul.mubr.f32.gmra.mxu0 %v4764_v30  ;;  %2493 = vmatmul.mubr.msk.f32.gmra.mxu1 %vm3049_vm1, %v4771_v7 }
  0xfe   : > { %1613 = vmatprep.mubr.f32.mxu0 %v4772_v15  ;;  %1838 = vmatprep.mubr.f32.mxu1 %v4773_v36 }
  0xff   : > { %2586 = vmatpush3.msra.mxu0 %v1014_v26  ;;  %2668 = vmatpush3.msra.mxu1 %v1015_v48  ;;  %v4786_v48 = vld [vmem:[#allocation23_spill] sm:$0xff] }
 0x100   : > { %2587 = vmatprep.subr.mxu0 %v1013_v11  ;;  %2653 = vmatprep.subr.mxu1 %v1014_v26 }
 0x101   : > { %1614 = vmatmul.mubr.f32.gmra.mxu0 %v4767_v1  ;;  %1839 = vmatmul.mubr.f32.gmra.mxu1 %v4774_v10 }
 0x102   : > { %1618 = vmatprep.mubr.f32.mxu0 %v4775_v18  ;;  %1843 = vmatprep.mubr.f32.mxu1 %v4776_v12 }
 0x103   : > { %2588 = vmatpush3.msra.mxu0 %v1013_v11  ;;  %2669 = vmatpush3.msra.mxu1 %v1014_v26  ;;  %v4788_v26 = vld [vmem:[#allocation34_spill] sm:$0xff] }
 0x104   : > { %2589 = vmatprep.subr.mxu0 %v1012_v37  ;;  %2654 = vmatprep.subr.mxu1 %v1013_v11 }
 0x105   : > { %1619 = vmatmul.mubr.f32.gmra.mxu0 %v4770_v45  ;;  %2495 = vmatmul.mubr.msk.f32.gmra.mxu1 %vm3049_vm1, %v4777_v19  ;;  %v4790_v19 = vld [vmem:[#allocation33_spill] sm:$0xff] }
 0x106   : > { %1623 = vmatprep.mubr.f32.mxu0 %v4778_v53  ;;  %1848 = vmatprep.mubr.f32.mxu1 %v4779_v13 }
 0x107   : > { %2590 = vmatpush3.msra.mxu0 %v1012_v37  ;;  %2670 = vmatpush3.msra.mxu1 %v1013_v11 }
 0x108   : > { %2591 = vmatprep.subr.mxu0 %v1011_v58  ;;  %2655 = vmatprep.subr.mxu1 %v1012_v37 }
 0x109   : > { %1624 = vmatmul.mubr.f32.gmra.mxu0 %v4773_v36  ;;  %1849 = vmatmul.mubr.f32.gmra.mxu1 %v4780_v21 }
 0x10a   : > { %1628 = vmatprep.mubr.f32.mxu0 %v4781_v20  ;;  %1853 = vmatprep.mubr.f32.mxu1 %v4782_v33 }
 0x10b   : > { %2592 = vmatpush3.msra.mxu0 %v1011_v58  ;;  %2671 = vmatpush3.msra.mxu1 %v1012_v37  ;;  %v4789_v37 = vld [vmem:[#allocation27_spill] sm:$0xff] }
 0x10c   : > { %2656 = vmatprep.subr.mxu1 %v1011_v58 }
 0x10d   : > { %v1100_v40 = vpop.f32.mrf.mxu0  ;;  %v1325_v44 = vpop.f32.mrf.mxu1  ;;  %1629 = vmatmul.mubr.f32.gmra.mxu0 %v4776_v12  ;;  %2497 = vmatmul.mubr.msk.f32.gmra.mxu1 %vm3049_vm1, %v4783_v46 }
 0x10e   : > { %v1101_v55 = vadd.f32 %v4116_v28, %v1100_v40  ;;  %1633 = vmatprep.mubr.f32.mxu0 %v4784_v57  ;;  %1858 = vmatprep.mubr.f32.mxu1 %v4785_v5 }
 0x10f   : > { %v1102_v9 = vpop.f32.mrf.mxu0  ;;  %v1327_v14 = vpop.f32.mrf.mxu1  ;;  %2672 = vmatpush3.msra.mxu1 %v1011_v58  ;;  %v4791_v58 = vld [vmem:[#allocation36_spill] sm:$0xff] }
 0x110   : > { %v4125_v16 = vadd.f32 %v1325_v44, %v1101_v55  ;;  %v4792_v55 = vld [vmem:[#allocation29_spill] sm:$0xff]  ;;  %v4793_v9 = vld [vmem:[#allocation35_spill] sm:$0xff]  ;;  %v4794_v14 = vld [vmem:[#allocation38_spill] sm:$0xff] }
 0x111   : > { %v1105_v30 = vpop.f32.mrf.mxu0  ;;  %v1330_v43 = vpop.f32.mrf.mxu1  ;;  %1634 = vmatmul.mubr.f32.gmra.mxu0 %v4779_v13  ;;  %1859 = vmatmul.mubr.f32.gmra.mxu1 %v4786_v48 }
 0x112   : > { %v1106_v1 = vadd.f32 %v4116_v28, %v1105_v30  ;;  %1638 = vmatprep.mubr.f32.mxu0 %v4787_v17  ;;  %1863 = vmatprep.mubr.f32.mxu1 %v4788_v26 }
 0x113   : > { %v1107_v45 = vpop.f32.mrf.mxu0  ;;  %v1332_v7 = vpop.f32.mrf.mxu1 }
 0x114   : > { %v4132_v11 = vadd.f32 %v1330_v43, %v1106_v1  ;;  %v4795_v7 = vld [vmem:[#allocation32_spill] sm:$0xff] }
 0x115   : > { %v1110_v36 = vpop.f32.mrf.mxu0  ;;  %v1335_v10 = vpop.f32.mrf.mxu1  ;;  %1639 = vmatmul.mubr.f32.gmra.mxu0 %v4782_v33  ;;  %2499 = vmatmul.mubr.msk.f32.gmra.mxu1 %vm3049_vm1, %v4789_v37 }
 0x116   : > { %v1111_v12 = vadd.f32 %v4116_v28, %v1110_v36  ;;  %1643 = vmatprep.mubr.f32.mxu0 %v4790_v19  ;;  %1868 = vmatprep.mubr.f32.mxu1 %v4791_v58  ;;  %v4796_v36 = vld [vmem:[#allocation37_spill] sm:$0xff] }
 0x117   : > { %v1112_v13 = vpop.f32.mrf.mxu0  ;;  %v1337_v21 = vpop.f32.mrf.mxu1 }
 0x118   : > { %v4141_v40 = vadd.f32 %v1335_v10, %v1111_v12  ;;  %v4797_v10 = vld [vmem:[#allocation40_spill] sm:$0xff] }
 0x119   : > { %v1115_v44 = vpop.f32.mrf.mxu0  ;;  %v1340_v46 = vpop.f32.mrf.mxu1  ;;  %1644 = vmatmul.mubr.f32.gmra.mxu0 %v4785_v5  ;;  %1869 = vmatmul.mubr.f32.gmra.mxu1 %v4792_v55  ;;  %v4799_v55 = vld [vmem:[#allocation42_spill] sm:$0xff] }
 0x11a   : > { %v1116_v33 = vadd.f32 %v4116_v28, %v1115_v44  ;;  %1648 = vmatprep.mubr.f32.mxu0 %v4793_v9  ;;  %1873 = vmatprep.mubr.f32.mxu1 %v4794_v14 }
 0x11b   : > { %v1117_v30 = vpop.f32.mrf.mxu0  ;;  %v1342_v43 = vpop.f32.mrf.mxu1 }
 0x11c   : > { %v4148_v48 = vadd.f32 %v1340_v46, %v1116_v33  ;;  %v4798_v46 = vld [vmem:[#allocation39_spill] sm:$0xff] }
 0x11d   : > { %v1120_v1 = vpop.f32.mrf.mxu0  ;;  %v1345_v45 = vpop.f32.mrf.mxu1  ;;  %1649 = vmatmul.mubr.f32.gmra.mxu0 %v4788_v26  ;;  %2501 = vmatmul.mubr.msk.f32.gmra.mxu1 %vm3049_vm1, %v4795_v7 }
 0x11e   : > { %v1121_v5 = vadd.f32 %v4116_v28, %v1120_v1  ;;  %1653 = vmatprep.mubr.f32.mxu0 %v4796_v36  ;;  %1878 = vmatprep.mubr.f32.mxu1 %v4797_v10 }
 0x11f   : > { %v1122_v37 = vpop.f32.mrf.mxu0  ;;  %v1347_v12 = vpop.f32.mrf.mxu1 }
 0x120   : > { %v4157_v13 = vadd.f32 %v1345_v45, %v1121_v5  ;;  %v4800_v45 = vld [vmem:[#allocation41_spill] sm:$0xff] }
 0x121   : > { %v1125_v21 = vpop.f32.mrf.mxu0  ;;  %v1350_v44 = vpop.f32.mrf.mxu1  ;;  %1654 = vmatmul.mubr.f32.gmra.mxu0 %v4791_v58  ;;  %1879 = vmatmul.mubr.f32.gmra.mxu1 %v3695_v62  ;;  %v313_v58 = vld [vmem:[%s2939_s10 + $0x190] sm:$0x3]  ;;  %s2512_s10 = sshll.u32 %s4825_s22, 8 }
 0x122   : > { %v1126_v26 = vadd.f32 %v4116_v28, %v1125_v21  ;;  %1658 = vmatprep.mubr.f32.mxu0 %v4798_v46  ;;  %1883 = vmatprep.mubr.f32.mxu1 %v4799_v55  ;;  %v374_v21 = vmul.f32 %v3688_v54, %v313_v58  ;;  %s4444_s28 = scalar_lea.vmem %s4636_s5, %s2512_s10 }
 0x123   : > { %v1127_v33 = vpop.f32.mrf.mxu0  ;;  %v1352_v30 = vpop.f32.mrf.mxu1 }
 0x124   : > { %v4164_v43 = vadd.f32 %v1350_v44, %v1126_v26  ;;  %v4802_v33 = vld [vmem:[#allocation45_spill] sm:$0xff] }
 0x125   : > { %v1130_v1 = vpop.f32.mrf.mxu0  ;;  %v1355_v7 = vpop.f32.mrf.mxu1  ;;  %1659 = vmatmul.mubr.f32.gmra.mxu0 %v4794_v14  ;;  %2503 = vmatmul.mubr.msk.f32.gmra.mxu1 %vm3049_vm1, %v3752_v35  ;;  %v4801_v14 = vld [vmem:[#allocation43_spill] sm:$0xff] }
 0x126   : > { %v1131_v62 = vadd.f32 %v4116_v28, %v1130_v1  ;;  %1663 = vmatprep.mubr.f32.mxu0 %v4800_v45  ;;  %1888 = vmatprep.mubr.f32.mxu1 %v3846_v39 }
 0x127   : > { %v1132_v5 = vpop.f32.mrf.mxu0  ;;  %v1357_v37 = vpop.f32.mrf.mxu1 }
 0x128   : > { %v4174_v12 = vadd.f32 %v1355_v7, %v1131_v62  ;;  %v435_v7 = vadd.f32 %v3721_v41, %v374_v21  ;;  %v569_v21 = vsel %vm497_vm0, 0.0, %v3925_v3 }
 0x129   : > { %v1135_v44 = vpop.f32.mrf.mxu0  ;;  %v1360_v26 = vpop.f32.mrf.mxu1  ;;  %1664 = vmatmul.mubr.f32.gmra.mxu0 %v4797_v10  ;;  %1889 = vmatmul.mubr.f32.gmra.mxu1 %v3760_v29  ;;  %v4803_v10 = vld [vmem:[#allocation44_spill] sm:$0xff] }
 0x12a   : > { %v1136_v35 = vadd.f32 %v4116_v28, %v1135_v44  ;;  %1668 = vmatprep.mubr.f32.mxu0 %v4801_v14  ;;  %1893 = vmatprep.mubr.f32.mxu1 %v4802_v33 }
 0x12b   : > { %v1137_v30 = vpop.f32.mrf.mxu0  ;;  %v1362_v1 = vpop.f32.mrf.mxu1 }
 0x12c   : > { %v4182_v5 = vadd.f32 %v1360_v26, %v1136_v35  ;;  %v489_v26 = vmax.f32 %v435_v7, 0.0 }
 0x12d   : > { %v1140_v62 = vpop.f32.mrf.mxu0  ;;  %v1365_v54 = vpop.f32.mrf.mxu1  ;;  %1669 = vmatmul.mubr.f32.gmra.mxu0 %v4799_v55  ;;  %2505 = vmatmul.mubr.msk.f32.gmra.mxu1 %vm3049_vm1, %v3812_v61 }
 0x12e   : > { %v1141_v29 = vadd.f32 %v4116_v28, %v1140_v62  ;;  %1673 = vmatprep.mubr.f32.mxu0 %v4803_v10  ;;  %1898 = vmatprep.mubr.f32.mxu1 %v3903_v23  ;;  %v852_v62 = vrot.slane %v569_v21, 1 }
 0x12f   : > { %v1142_v58 = vpop.f32.mrf.mxu0  ;;  %v1367_v37 = vpop.f32.mrf.mxu1 }
 0x130   : > { %v4192_v44 = vadd.f32 %v1365_v54, %v1141_v29  ;;  %v853_v54 = vrot.slane %v3954_v47, 1  ;;  %v571_v58 = vsel %vm502_vm2, 0.0, %v489_v26 }
 0x131   : > { %v1145_v55 = vpop.f32.mrf.mxu0  ;;  %v1370_v35 = vpop.f32.mrf.mxu1  ;;  %1674 = vmatmul.mubr.f32.gmra.mxu0 %v3846_v39  ;;  %1899 = vmatmul.mubr.f32.gmra.mxu1 %v3820_v60 }
 0x132   : > { %v1146_v61 = vadd.f32 %v4116_v28, %v1145_v55  ;;  %1678 = vmatprep.mubr.f32.mxu0 %v3898_v2  ;;  %1903 = vmatprep.mubr.f32.mxu1 %v3931_v56 }
 0x133   : > { %v1147_v30 = vpop.f32.mrf.mxu0  ;;  %v1372_v1 = vpop.f32.mrf.mxu1 }
 0x134   : > { %v4203_v29 = vadd.f32 %v1370_v35, %v1146_v61  ;;  %v854_v61 = vsel %vm623_vm3, %v852_v62, %v853_v54  ;;  %v855_v30 = vrot.slane %v571_v58, 1  ;;  %v860_v62 = vrot.slane %v3954_v47, 2 }
 0x135   : > { %v1150_v37 = vpop.f32.mrf.mxu0  ;;  %v1375_v39 = vpop.f32.mrf.mxu1  ;;  %1679 = vmatmul.mubr.f32.gmra.mxu0 %v4802_v33  ;;  %2507 = vmatmul.mubr.msk.f32.gmra.mxu1 %vm3049_vm1, %v3870_v8 }
 0x136   : > { %v1151_v60 = vadd.f32 %v4116_v28, %v1150_v37  ;;  %1683 = vmatprep.mubr.f32.mxu0 %v3923_v24  ;;  %1908 = vmatprep.mubr.f32.mxu1 %v3952_v0 }
 0x137   : > { %v1152_v55 = vpop.f32.mrf.mxu0  ;;  %v1377_v35 = vpop.f32.mrf.mxu1 }
 0x138   : > { %v4215_v26 = vadd.f32 %v1375_v39, %v1151_v60  ;;  %v856_v55 = vsel %vm623_vm3, %v853_v54, %v855_v30  ;;  %v859_v35 = vrot.slane %v569_v21, 2  ;;  %v862_v30 = vrot.slane %v571_v58, 2 }
 0x139   : > { %v1155_v1 = vpop.f32.mrf.mxu0  ;;  %v1380_v7 = vpop.f32.mrf.mxu1  ;;  %1684 = vmatmul.mubr.f32.gmra.mxu0 %v3903_v23  ;;  %1909 = vmatmul.mubr.f32.gmra.mxu1 %v3879_v51 }
 0x13a   : > { %v1156_v8 = vadd.f32 %v4116_v28, %v1155_v1  ;;  %1688 = vmatprep.mubr.f32.mxu0 %v3947_v6  ;;  %1913 = vmatprep.mubr.f32.mxu1 %v854_v61  ;;  %v4232_v21 = vsel %vm736_vm4, %v859_v35, %v860_v62 }
 0x13b   : > { %v1157_v33 = vpop.f32.mrf.mxu0  ;;  %v1382_v37 = vpop.f32.mrf.mxu1 }
 0x13c   : > { %v4223_v39 = vadd.f32 %v1380_v7, %v1156_v8  ;;  %v4242_v37 = vsel %vm736_vm4, %v860_v62, %v862_v30 }
 0x13d   : > { %v1160_v60 = vpop.f32.mrf.mxu0  ;;  %v1385_v41 = vpop.f32.mrf.mxu1  ;;  %1689 = vmatmul.mubr.f32.gmra.mxu0 %v3931_v56  ;;  %2509 = vmatmul.mubr.msk.f32.gmra.mxu1 %vm3049_vm1, %v3925_v3  ;;  %v4806_v3 = vld [vmem:[#allocation4_spill] sm:$0xff] }
 0x13e   : > { %v1161_v51 = vadd.f32 %v4116_v28, %v1160_v60  ;;  %1693 = vmatprep.mubr.f32.mxu0 %v3966_v52  ;;  %1918 = vmatprep.mubr.f32.mxu1 %v856_v55 }
 0x13f   : > { %v1162_v23 = vpop.f32.mrf.mxu0  ;;  %v1387_v54 = vpop.f32.mrf.mxu1 }
 0x140   : > { %v4234_v1 = vadd.f32 %v1385_v41, %v1161_v51 }
 0x141   : > { %v1165_v7 = vpop.f32.mrf.mxu0  ;;  %v1390_v8 = vpop.f32.mrf.mxu1  ;;  %1694 = vmatmul.mubr.f32.gmra.mxu0 %v3952_v0  ;;  %1919 = vmatmul.mubr.f32.gmra.mxu1 %v3954_v47 }
 0x142   : > { %v1166_v27 = vadd.f32 %v4116_v28, %v1165_v7  ;;  %1698 = vmatprep.mubr.f32.mxu0 %v4232_v21  ;;  %1923 = vmatprep.mubr.f32.mxu1 %v4806_v3 }
 0x143   : > { %v1167_v56 = vpop.f32.mrf.mxu0  ;;  %v1392_v33 = vpop.f32.mrf.mxu1 }
 0x144   : > { %v4244_v58 = vadd.f32 %v1390_v8, %v1166_v27 }
 0x145   : > { %v1170_v41 = vpop.f32.mrf.mxu0  ;;  %v1395_v35 = vpop.f32.mrf.mxu1  ;;  %1699 = vmatmul.mubr.f32.gmra.mxu0 %v854_v61  ;;  %1924 = vmatmul.mubr.f32.gmra.mxu1 %v4733_v49 }
 0x146   : > { %v1171_v0 = vadd.f32 %v4116_v28, %v1170_v41  ;;  %1703 = vmatprep.mubr.f32.mxu0 %v4242_v37  ;;  %1928 = vmatprep.mubr.f32.mxu1 %v4806_v3 }
 0x147   : > { %v1172_v47 = vpop.f32.mrf.mxu0  ;;  %v1397_v60 = vpop.f32.mrf.mxu1 }
 0x148   : > { %v4250_v51 = vadd.f32 %v1395_v35, %v1171_v0 }
 0x149   : > { %v1175_v23 = vpop.f32.mrf.mxu0  ;;  %v1400_v62 = vpop.f32.mrf.mxu1  ;;  %1704 = vmatmul.mubr.f32.gmra.mxu0 %v856_v55  ;;  %1929 = vmatmul.mubr.f32.gmra.mxu1 %v4733_v49 }
 0x14a   : > { %v1176_v54 = vadd.f32 %v4116_v28, %v1175_v23  ;;  %2593 = vmatprep.mubr.f32.mxu0 %v3171_v25  ;;  %2617 = vmatprep.mubr.f32.mxu1 %v4787_v17 }
 0x14b   : > { %v1177_v61 = vpop.f32.mrf.mxu0  ;;  %v1402_v30 = vpop.f32.mrf.mxu1 }
 0x14c   : > { %v4256_v7 = vadd.f32 %v1400_v62, %v1176_v54 }
 0x14d   : > { %v1180_v8 = vpop.f32.mrf.mxu0  ;;  %v1405_v27 = vpop.f32.mrf.mxu1  ;;  %2594 = vmatmul.mubr.f32.vlgmr.msra.gmra.mxu0 %v3201_v42  ;;  %2618 = vmatmul.mubr.f32.vlgmr.msra.gmra.mxu1 %v4790_v19 }
 0x14e   : > { %v1181_v55 = vadd.f32 %v4116_v28, %v1180_v8  ;;  %2596 = vmatprep.mubr.f32.mxu0 %v3232_v63  ;;  %2620 = vmatprep.mubr.f32.mxu1 %v4793_v9 }
 0x14f   : > { %v1182_v49 = vpop.f32.mrf.mxu0  ;;  %v1407_v25 = vpop.f32.mrf.mxu1 }
 0x150   : > { %v4263_v3 = vadd.f32 %v1405_v27, %v1181_v55 }
 0x151   : > { %v1185_v17 = vpop.f32.mrf.mxu0  ;;  %v1410_v56 = vpop.f32.mrf.mxu1  ;;  %2597 = vmatmul.mubr.f32.gmra.mxu0 %v3262_v22  ;;  %2621 = vmatmul.mubr.f32.gmra.mxu1 %v4796_v36 }
 0x152   : > { %v1186_v42 = vadd.f32 %v4116_v28, %v1185_v17  ;;  %2599 = vmatprep.mubr.f32.mxu0 %v3291_v38  ;;  %2623 = vmatprep.mubr.f32.mxu1 %v4798_v46 }
 0x153   : > { %v1187_v19 = vpop.f32.mrf.mxu0  ;;  %v1412_v63 = vpop.f32.mrf.mxu1 }
 0x154   : > { %v4270_v33 = vadd.f32 %v1410_v56, %v1186_v42 }
 0x155   : > { %v1190_v9 = vpop.f32.mrf.mxu0  ;;  %v1415_v41 = vpop.f32.mrf.mxu1  ;;  %2600 = vmatmul.mubr.f32.gmra.mxu0 %v3320_v4  ;;  %2624 = vmatmul.mubr.f32.gmra.mxu1 %v4800_v45 }
 0x156   : > { %v1191_v22 = vadd.f32 %v4116_v28, %v1190_v9  ;;  %2602 = vmatprep.mubr.f32.mxu0 %v3351_v32  ;;  %2626 = vmatprep.mubr.f32.mxu1 %v4801_v14 }
 0x157   : > { %v1192_v36 = vpop.f32.mrf.mxu0  ;;  %v1417_v38 = vpop.f32.mrf.mxu1 }
 0x158   : > { %v4277_v35 = vadd.f32 %v1415_v41, %v1191_v22 }
 0x159   : > { %v1195_v46 = vpop.f32.mrf.mxu0  ;;  %v1420_v0 = vpop.f32.mrf.mxu1  ;;  %2603 = vmatmul.mubr.f32.gmra.mxu0 %v3381_v59  ;;  %2627 = vmatmul.mubr.f32.gmra.mxu1 %v4803_v10 }
 0x15a   : > { %v1196_v4 = vadd.f32 %v4116_v28, %v1195_v46  ;;  %2605 = vmatprep.mubr.f32.mxu0 %v3412_v34  ;;  %2629 = vmatprep.mubr.f32.mxu1 %v3898_v2 }
 0x15b   : > { %v1197_v45 = vpop.f32.mrf.mxu0  ;;  %v1422_v32 = vpop.f32.mrf.mxu1 }
 0x15c   : > { %v4284_v47 = vadd.f32 %v1420_v0, %v1196_v4 }
 0x15d   : > { %v1200_v14 = vpop.f32.mrf.mxu0  ;;  %v1425_v60 = vpop.f32.mrf.mxu1  ;;  %2606 = vmatmul.mubr.f32.gmra.mxu0 %v4766_v50  ;;  %2630 = vmatmul.mubr.f32.gmra.mxu1 %v3923_v24 }
 0x15e   : > { %v1201_v59 = vadd.f32 %v4116_v28, %v1200_v14  ;;  %2608 = vmatprep.mubr.f32.mxu0 %v4769_v31  ;;  %2632 = vmatprep.mubr.f32.mxu1 %v3947_v6 }
 0x15f   : > { %v1202_v10 = vpop.f32.mrf.mxu0  ;;  %v1427_v34 = vpop.f32.mrf.mxu1 }
 0x160   : > { %v4291_v23 = vadd.f32 %v1425_v60, %v1201_v59 }
 0x161   : > { %v1205_v2 = vpop.f32.mrf.mxu0  ;;  %v1430_v62 = vpop.f32.mrf.mxu1  ;;  %2609 = vmatmul.mubr.f32.gmra.mxu0 %v4772_v15  ;;  %2633 = vmatmul.mubr.f32.gmra.mxu1 %v3966_v52  ;;  %v4807_v52 = vld [vmem:[#allocation5_spill] sm:$0xff] }
 0x162   : > { %v1206_v50 = vadd.f32 %v4116_v28, %v1205_v2  ;;  %2611 = vmatprep.mubr.f32.mxu0 %v4775_v18  ;;  %2635 = vmatprep.mubr.f32.mxu1 %v4232_v21 }
 0x163   : > { %v1207_v24 = vpop.f32.mrf.mxu0  ;;  %v1432_v31 = vpop.f32.mrf.mxu1 }
 0x164   : > { %v4298_v54 = vadd.f32 %v1430_v62, %v1206_v50 }
 0x165   : > { %v1210_v6 = vpop.f32.mrf.mxu0  ;;  %v1435_v61 = vpop.f32.mrf.mxu1  ;;  %2612 = vmatmul.mubr.f32.gmra.mxu0 %v4778_v53  ;;  %2636 = vmatmul.mubr.f32.gmra.mxu1 %v4242_v37 }
 0x166   : > { %v1211_v15 = vadd.f32 %v4116_v28, %v1210_v6  ;;  %2614 = vmatprep.mubr.f32.mxu0 %v4781_v20  ;;  %2638 = vmatprep.mubr.f32.mxu1 %v4807_v52 }
 0x167   : > { %v1212_v30 = vpop.f32.mrf.mxu0  ;;  %v1437_v18 = vpop.f32.mrf.mxu1 }
 0x168   : > { %v4305_v8 = vadd.f32 %v1435_v61, %v1211_v15 }
 0x169   : > { %v1215_v21 = vpop.f32.mrf.mxu0  ;;  %v1440_v27 = vpop.f32.mrf.mxu1  ;;  %2615 = vmatmul.mubr.f32.gmra.mxu0 %v4784_v57  ;;  %2639 = vmatmul.mubr.f32.gmra.mxu1 %v4807_v52 }
 0x16a   : > { %v1216_v53 = vadd.f32 %v4116_v28, %v1215_v21 }
 0x16b   : > { %v1217_v55 = vpop.f32.mrf.mxu0  ;;  %v1442_v37 = vpop.f32.mrf.mxu1 }
 0x16c   : > { %v4310_v49 = vadd.f32 %v1440_v27, %v1216_v53 }
 0x16d   : > { %v1220_v25 = vpop.f32.mrf.mxu0  ;;  %v1445_v20 = vpop.f32.mrf.mxu1 }
 0x16e   : > { %v1221_v17 = vadd.f32 %v4116_v28, %v1220_v25 }
 0x16f   : > { %v1222_v56 = vpop.f32.mrf.mxu0  ;;  %v1447_v42 = vpop.f32.mrf.mxu1 }
 0x170   : > { %v4313_v19 = vadd.f32 %v1445_v20, %v1221_v17 }
 0x171   : > { %v1225_v63 = vpop.f32.mrf.mxu0  ;;  %v1450_v9 = vpop.f32.mrf.mxu1 }
 0x172   : > { %v1226_v57 = vadd.f32 %v4116_v28, %v1225_v63 }
 0x173   : > { %v1227_v41 = vpop.f32.mrf.mxu0  ;;  %v1452_v22 = vpop.f32.mrf.mxu1 }
 0x174   : > { %v4316_v36 = vadd.f32 %v1450_v9, %v1226_v57 }
 0x175   : > { %v1230_v38 = vpop.f32.mrf.mxu0  ;;  %v1455_v46 = vpop.f32.mrf.mxu1 }
 0x176   : > { %v1231_v0 = vadd.f32 %v4116_v28, %v1230_v38 }
 0x177   : > { %v1232_v4 = vpop.f32.mrf.mxu0  ;;  %v1457_v45 = vpop.f32.mrf.mxu1 }
 0x178   : > { %v4319_v32 = vadd.f32 %v1455_v46, %v1231_v0 }
 0x179   : > { %v1235_v14 = vpop.f32.mrf.mxu0  ;;  %v1460_v60 = vpop.f32.mrf.mxu1 }
 0x17a   : > { %v1236_v59 = vadd.f32 %v4116_v28, %v1235_v14 }
 0x17b   : > { %v1237_v10 = vpop.f32.mrf.mxu0  ;;  %v1462_v34 = vpop.f32.mrf.mxu1 }
 0x17c   : > { %v4322_v2 = vadd.f32 %v1460_v60, %v1236_v59 }
 0x17d   : > { %v1240_v62 = vpop.f32.mrf.mxu0  ;;  %v1465_v50 = vpop.f32.mrf.mxu1 }
 0x17e   : > { %v1241_v24 = vadd.f32 %v4116_v28, %v1240_v62 }
 0x17f   : > { %v1242_v31 = vpop.f32.mrf.mxu0  ;;  %v1467_v6 = vpop.f32.mrf.mxu1 }
 0x180   : > { %v4325_v61 = vadd.f32 %v1465_v50, %v1241_v24 }
 0x181   : > { %v1245_v15 = vpop.f32.mrf.mxu0  ;;  %v1470_v52 = vpop.f32.mrf.mxu1 }
 0x182   : > { %v1246_v30 = vadd.f32 %v4116_v28, %v1245_v15 }
 0x183   : > { %v1247_v18 = vpop.f32.mrf.mxu0  ;;  %v1472_v21 = vpop.f32.mrf.mxu1 }
 0x184   : > { %v4328_v27 = vadd.f32 %v1470_v52, %v1246_v30 }
 0x185   : > { %v1250_v53 = vpop.f32.mrf.mxu0  ;;  %v1475_v55 = vpop.f32.mrf.mxu1 }
 0x186   : > { %v1251_v37 = vadd.f32 %v4116_v28, %v1250_v53 }
 0x187   : > { %v1252_v25 = vpop.f32.mrf.mxu0  ;;  %v1477_v20 = vpop.f32.mrf.mxu1 }
 0x188   : > { %v4331_v17 = vadd.f32 %v1475_v55, %v1251_v37 }
 0x189   : > { %v1255_v56 = vpop.f32.mrf.mxu0  ;;  %v1480_v42 = vpop.f32.mrf.mxu1 }
 0x18a   : > { %4808 = vst [vmem:[#allocation10_spill] sm:$0xff] %v4331_v17  ;;  %v1256_v63 = vadd.f32 %v4116_v28, %v1255_v56 }
 0x18b   : > { %v1257_v9 = vpop.f32.mrf.mxu0  ;;  %v1482_v57 = vpop.f32.mrf.mxu1 }
 0x18c   : > { %v4334_v41 = vadd.f32 %v1480_v42, %v1256_v63 }
 0x18d   : > { %v1550_v22 = vpop.f32.mrf.mxu0  ;;  %v1775_v38 = vpop.f32.mrf.mxu1 }
 0x18e   : > { %4809 = vst [vmem:[#allocation6_spill] sm:$0xff] %v4334_v41  ;;  %v1551_v46 = vadd.f32 %v1550_v22, %v4125_v16 }
 0x18f   : > { %v1552_v0 = vpop.f32.mrf.mxu0  ;;  %v1777_v4 = vpop.f32.mrf.mxu1 }
 0x190   : > { %v4337_v45 = vadd.f32 %v1775_v38, %v1551_v46 }
 0x191   : > { %v1555_v14 = vpop.f32.mrf.mxu0  ;;  %v1780_v60 = vpop.f32.mrf.mxu1 }
 0x192   : > { %v1556_v59 = vadd.f32 %v1555_v14, %v4132_v11 }
 0x193   : > { %v1557_v10 = vpop.f32.mrf.mxu0  ;;  %v1782_v34 = vpop.f32.mrf.mxu1 }
 0x194   : > { %v4340_v62 = vadd.f32 %v1780_v60, %v1556_v59 }
 0x195   : > { %v1560_v28 = vpop.f32.mrf.mxu0  ;;  %v1785_v50 = vpop.f32.mrf.mxu1 }
 0x196   : > { %v1561_v24 = vadd.f32 %v1560_v28, %v4141_v40 }
 0x197   : > { %v1562_v31 = vpop.f32.mrf.mxu0  ;;  %v1787_v6 = vpop.f32.mrf.mxu1 }
 0x198   : > { %v4343_v15 = vadd.f32 %v1785_v50, %v1561_v24 }
 0x199   : > { %v1565_v16 = vpop.f32.mrf.mxu0  ;;  %v1790_v52 = vpop.f32.mrf.mxu1 }
 0x19a   : > { %v1566_v30 = vadd.f32 %v1565_v16, %v4148_v48 }
 0x19b   : > { %v1567_v18 = vpop.f32.mrf.mxu0  ;;  %v1792_v21 = vpop.f32.mrf.mxu1 }
 0x19c   : > { %v4346_v53 = vadd.f32 %v1790_v52, %v1566_v30 }
 0x19d   : > { %v1570_v11 = vpop.f32.mrf.mxu0  ;;  %v1795_v55 = vpop.f32.mrf.mxu1 }
 0x19e   : > { %v1571_v37 = vadd.f32 %v1570_v11, %v4157_v13 }
 0x19f   : > { %v1572_v25 = vpop.f32.mrf.mxu0  ;;  %v1797_v20 = vpop.f32.mrf.mxu1 }
 0x1a0   : > { %v4349_v56 = vadd.f32 %v1795_v55, %v1571_v37 }
 0x1a1   : > { %v1575_v40 = vpop.f32.mrf.mxu0  ;;  %v1800_v42 = vpop.f32.mrf.mxu1 }
 0x1a2   : > { %v1576_v63 = vadd.f32 %v1575_v40, %v4164_v43 }
 0x1a3   : > { %v1577_v9 = vpop.f32.mrf.mxu0  ;;  %v1802_v57 = vpop.f32.mrf.mxu1 }
 0x1a4   : > { %v4352_v22 = vadd.f32 %v1800_v42, %v1576_v63 }
 0x1a5   : > { %v1580_v48 = vpop.f32.mrf.mxu0  ;;  %v1805_v38 = vpop.f32.mrf.mxu1 }
 0x1a6   : > { %v1581_v46 = vadd.f32 %v1580_v48, %v4174_v12 }
 0x1a7   : > { %v1582_v0 = vpop.f32.mrf.mxu0  ;;  %v1807_v4 = vpop.f32.mrf.mxu1 }
 0x1a8   : > { %v4355_v14 = vadd.f32 %v1805_v38, %v1581_v46 }
 0x1a9   : > { %v1585_v13 = vpop.f32.mrf.mxu0  ;;  %v1810_v60 = vpop.f32.mrf.mxu1 }
 0x1aa   : > { %v1586_v59 = vadd.f32 %v1585_v13, %v4182_v5 }
 0x1ab   : > { %v1587_v10 = vpop.f32.mrf.mxu0  ;;  %v1812_v34 = vpop.f32.mrf.mxu1 }
 0x1ac   : > { %v4358_v28 = vadd.f32 %v1810_v60, %v1586_v59 }
 0x1ad   : > { %v1590_v43 = vpop.f32.mrf.mxu0  ;;  %v1815_v50 = vpop.f32.mrf.mxu1 }
 0x1ae   : > { %v1591_v24 = vadd.f32 %v1590_v43, %v4192_v44 }
 0x1af   : > { %v1592_v31 = vpop.f32.mrf.mxu0  ;;  %v1817_v6 = vpop.f32.mrf.mxu1 }
 0x1b0   : > { %v4361_v16 = vadd.f32 %v1815_v50, %v1591_v24 }
 0x1b1   : > { %v1595_v12 = vpop.f32.mrf.mxu0  ;;  %v1820_v52 = vpop.f32.mrf.mxu1 }
 0x1b2   : > { %v1596_v30 = vadd.f32 %v1595_v12, %v4203_v29 }
 0x1b3   : > { %v1597_v18 = vpop.f32.mrf.mxu0  ;;  %v1822_v21 = vpop.f32.mrf.mxu1 }
 0x1b4   : > { %v4364_v11 = vadd.f32 %v1820_v52, %v1596_v30 }
 0x1b5   : > { %v1600_v5 = vpop.f32.mrf.mxu0  ;;  %v1825_v55 = vpop.f32.mrf.mxu1 }
 0x1b6   : > { %v1601_v37 = vadd.f32 %v1600_v5, %v4215_v26 }
 0x1b7   : > { %v1602_v25 = vpop.f32.mrf.mxu0  ;;  %v1827_v20 = vpop.f32.mrf.mxu1 }
 0x1b8   : > { %v4367_v40 = vadd.f32 %v1825_v55, %v1601_v37 }
 0x1b9   : > { %v1605_v44 = vpop.f32.mrf.mxu0  ;;  %v1830_v42 = vpop.f32.mrf.mxu1 }
 0x1ba   : > { %v1606_v63 = vadd.f32 %v1605_v44, %v4223_v39 }
 0x1bb   : > { %v1607_v9 = vpop.f32.mrf.mxu0  ;;  %v1832_v57 = vpop.f32.mrf.mxu1 }
 0x1bc   : > { %v4370_v48 = vadd.f32 %v1830_v42, %v1606_v63 }
 0x1bd   : > { %v1610_v29 = vpop.f32.mrf.mxu0  ;;  %v1835_v38 = vpop.f32.mrf.mxu1 }
 0x1be   : > { %v1611_v46 = vadd.f32 %v1610_v29, %v4234_v1 }
 0x1bf   : > { %v1612_v0 = vpop.f32.mrf.mxu0  ;;  %v1837_v4 = vpop.f32.mrf.mxu1 }
 0x1c0   : > { %v4373_v13 = vadd.f32 %v1835_v38, %v1611_v46 }
 0x1c1   : > { %v1615_v26 = vpop.f32.mrf.mxu0  ;;  %v1840_v60 = vpop.f32.mrf.mxu1 }
 0x1c2   : > { %4810 = vst [vmem:[#allocation9_spill] sm:$0xff] %v4373_v13  ;;  %v1616_v59 = vadd.f32 %v1615_v26, %v4244_v58 }
 0x1c3   : > { %v1617_v10 = vpop.f32.mrf.mxu0  ;;  %v1842_v34 = vpop.f32.mrf.mxu1 }
 0x1c4   : > { %v4376_v43 = vadd.f32 %v1840_v60, %v1616_v59 }
 0x1c5   : > { %v1620_v39 = vpop.f32.mrf.mxu0  ;;  %v1845_v50 = vpop.f32.mrf.mxu1 }
 0x1c6   : > { %4811 = vst [vmem:[#allocation13_spill] sm:$0xff] %v4376_v43  ;;  %v1621_v24 = vadd.f32 %v1620_v39, %v4250_v51 }
 0x1c7   : > { %v1622_v31 = vpop.f32.mrf.mxu0  ;;  %v1847_v6 = vpop.f32.mrf.mxu1 }
 0x1c8   : > { %v4379_v12 = vadd.f32 %v1845_v50, %v1621_v24 }
 0x1c9   : > { %v1625_v1 = vpop.f32.mrf.mxu0  ;;  %v1850_v52 = vpop.f32.mrf.mxu1 }
 0x1ca   : > { %4812 = vst [vmem:[#allocation7_spill] sm:$0xff] %v4379_v12  ;;  %v1626_v30 = vadd.f32 %v1625_v1, %v4256_v7 }
 0x1cb   : > { %v1627_v18 = vpop.f32.mrf.mxu0  ;;  %v1852_v21 = vpop.f32.mrf.mxu1 }
 0x1cc   : > { %v4382_v5 = vadd.f32 %v1850_v52, %v1626_v30 }
 0x1cd   : > { %v1630_v58 = vpop.f32.mrf.mxu0  ;;  %v1855_v55 = vpop.f32.mrf.mxu1 }
 0x1ce   : > { %4813 = vst [vmem:[#allocation12_spill] sm:$0xff] %v4382_v5  ;;  %v1631_v37 = vadd.f32 %v1630_v58, %v4263_v3 }
 0x1cf   : > { %v1632_v25 = vpop.f32.mrf.mxu0  ;;  %v1857_v20 = vpop.f32.mrf.mxu1 }
 0x1d0   : > { %v4385_v44 = vadd.f32 %v1855_v55, %v1631_v37 }
 0x1d1   : > { %v1635_v51 = vpop.f32.mrf.mxu0  ;;  %v1860_v42 = vpop.f32.mrf.mxu1 }
 0x1d3   : > { %v1637_v63 = vpop.f32.mrf.mxu0  ;;  %v1862_v9 = vpop.f32.mrf.mxu1 }
 0x1d5   : > { %v1640_v57 = vpop.f32.mrf.mxu0  ;;  %v4387_v29 = vpop.f32.mrf.mxu1 }
 0x1d6   : > { %v1641_v41 = vadd.f32 %v1640_v57, %v4277_v35 }
 0x1d7   : > { %v1642_v7 = vpop.f32.mrf.mxu0  ;;  %v1867_v38 = vpop.f32.mrf.mxu1 }
 0x1d8   : > { %v1866_v57 = vadd.f32 %v4387_v29, %v1641_v41 }
 0x1d9   : > { %v1645_v46 = vpop.f32.mrf.mxu0  ;;  %v4389_v0 = vpop.f32.mrf.mxu1 }
 0x1db   : > { %v1647_v4 = vpop.f32.mrf.mxu0  ;;  %v1872_v26 = vpop.f32.mrf.mxu1 }
 0x1dd   : > { %v4391_v60 = vpop.f32.mrf.mxu0  ;;  %v4393_v3 = vpop.f32.mrf.mxu1 }
 0x1de   : > { %v1651_v41 = vadd.f32 %v4391_v60, %v4291_v23 }
 0x1df   : > { %v1652_v59 = vpop.f32.mrf.mxu0  ;;  %v1877_v10 = vpop.f32.mrf.mxu1 }
 0x1e1   : > { %v1655_v34 = vpop.f32.mrf.mxu0  ;;  %v4395_v39 = vpop.f32.mrf.mxu1 }
 0x1e3   : > { %v1657_v50 = vpop.f32.mrf.mxu0  ;;  %v1882_v24 = vpop.f32.mrf.mxu1 }
 0x1e5   : > { %v4397_v31 = vpop.f32.mrf.mxu0  ;;  %v4399_v6 = vpop.f32.mrf.mxu1 }
 0x1e7   : > { %v1662_v1 = vpop.f32.mrf.mxu0  ;;  %v1887_v52 = vpop.f32.mrf.mxu1 }
 0x1e9   : > { %v4401_v30 = vpop.f32.mrf.mxu0  ;;  %v4403_v18 = vpop.f32.mrf.mxu1 }
 0x1eb   : > { %v1667_v21 = vpop.f32.mrf.mxu0  ;;  %v1892_v58 = vpop.f32.mrf.mxu1 }
 0x1ed   : > { %v4405_v55 = vpop.f32.mrf.mxu0  ;;  %v4407_v37 = vpop.f32.mrf.mxu1 }
 0x1ef   : > { %v1672_v25 = vpop.f32.mrf.mxu0  ;;  %v1897_v20 = vpop.f32.mrf.mxu1 }
 0x1f1   : > { %v4409_v63 = vpop.f32.mrf.mxu0  ;;  %v4411_v9 = vpop.f32.mrf.mxu1 }
 0x1f3   : > { %v1677_v7 = vpop.f32.mrf.mxu0  ;;  %v1902_v38 = vpop.f32.mrf.mxu1 }
 0x1f5   : > { %v4413_v4 = vpop.f32.mrf.mxu0  ;;  %v4415_v26 = vpop.f32.mrf.mxu1 }
 0x1f7   : > { %v1682_v59 = vpop.f32.mrf.mxu0  ;;  %v1907_v10 = vpop.f32.mrf.mxu1 }
 0x1f9   : > { %v4417_v50 = vpop.f32.mrf.mxu0  ;;  %v4419_v24 = vpop.f32.mrf.mxu1 }
 0x1fb   : > { %v1687_v1 = vpop.f32.mrf.mxu0  ;;  %v1912_v52 = vpop.f32.mrf.mxu1 }
 0x1fc   : > { %v1636_v52 = vadd.f32 %v1635_v51, %v4270_v33 }
 0x1fd   : > { %v4421_v21 = vpop.f32.mrf.mxu0  ;;  %v4423_v58 = vpop.f32.mrf.mxu1 }
 0x1fe   : > { %4814 = vst [vmem:[#allocation16_spill] sm:$0xff] %v4423_v58  ;;  %v1861_v58 = vadd.f32 %v1860_v42, %v1636_v52 }
 0x1ff   : > { %v1692_v25 = vpop.f32.mrf.mxu0  ;;  %v1917_v20 = vpop.f32.mrf.mxu1 }
 0x201   : > { %v4425_v7 = vpop.f32.mrf.mxu0  ;;  %v4427_v38 = vpop.f32.mrf.mxu1 }
 0x203   : > { %v1697_v12 = vpop.f32.mrf.mxu0  ;;  %v1922_v59 = vpop.f32.mrf.mxu1 }
 0x204   : > { %v1646_v12 = vadd.f32 %v1645_v46, %v4284_v47 }
 0x205   : > { %v4429_v10 = vpop.f32.mrf.mxu0  ;;  %v4431_v5 = vpop.f32.mrf.mxu1 }
 0x206   : > { %v1871_v46 = vadd.f32 %v4389_v0, %v1646_v12 }
 0x207   : > { %v1702_v13 = vpop.f32.mrf.mxu0  ;;  %v1927_v1 = vpop.f32.mrf.mxu1 }
 0x209   : > { %v4434_v17 = vpop.f32.mrf.mxu0  ;;  %v4436_v43 = vpop.f32.mrf.mxu1 }
 0x20b   : > { %v1707_v25 = vpop.f32.mrf.mxu0  ;;  %v1932_v20 = vpop.f32.mrf.mxu1 }
 0x20d   : > { %v2595_v33 = vpop.f32.mrf.mxu0  ;;  %v2619_v13 = vpop.f32.mrf.mxu1 }
 0x20e   : > { %v2006_v51 = vadd.f32 %v2595_v33, %v4340_v62  ;;  %v4447_v59 = vadd.f32 %v2619_v13, %v1861_v58  ;;  %v1656_v62 = vadd.f32 %v1655_v34, %v4298_v54 }
 0x20f   : > { %v2000_v42 = vpop.f32.mrf.mxu0  ;;  %v2080_v1 = vpop.f32.mrf.mxu1 }
 0x210   : > { %2160 = vst [vmem:[%s4444_s28 + $0x8] sm:$0xff] %v2006_v51  ;;  %2176 = vst [vmem:[%s4444_s28 + $0x88] sm:$0xff] %v4447_v59  ;;  %v2001_v35 = vadd.f32 %v2000_v42, %v4337_v45  ;;  %v4454_v47 = vadd.f32 %v2080_v1, %v4385_v44  ;;  %v2229_v25 = vmul.f32 %v2006_v51, %v2006_v51 }
 0x211   : > { %v2598_v58 = vpop.f32.mrf.mxu0  ;;  %v2622_v52 = vpop.f32.mrf.mxu1  ;;  %v1881_v13 = vadd.f32 %v4395_v39, %v1656_v62  ;;  %v1876_v1 = vadd.f32 %v4393_v3, %v1651_v41  ;;  %v1661_v39 = vadd.f32 %v4397_v31, %v4305_v8 }
 0x212   : > { %2159 = vst [vmem:[%s4444_s28] sm:$0xff] %v2001_v35  ;;  %v2191_v20 = vadd.f32 %v2006_v51, %v2001_v35  ;;  %v2228_v33 = vmul.f32 %v2001_v35, %v2001_v35  ;;  %2175 = vst [vmem:[%s4444_s28 + $0x80] sm:$0xff] %v4454_v47  ;;  %v2016_v45 = vadd.f32 %v2598_v58, %v4346_v53 }
 0x213   : > { %v4465_v44 = vadd.f32 %v2622_v52, %v1871_v46  ;;  %v2010_v29 = vpop.f32.mrf.mxu0  ;;  %v2090_v54 = vpop.f32.mrf.mxu1  ;;  %v1666_v51 = vadd.f32 %v4401_v30, %v4310_v49 }
 0x214   : > { %v2260_v0 = vadd.f32 %v2229_v25, %v2228_v33  ;;  %2162 = vst [vmem:[%s4444_s28 + $0x18] sm:$0xff] %v2016_v45  ;;  %v2011_v34 = vadd.f32 %v2010_v29, %v4343_v15  ;;  %v4469_v12 = vadd.f32 %v2090_v54, %v1866_v57  ;;  %v2231_v57 = vmul.f32 %v2016_v45, %v2016_v45 }
 0x215   : > { %2178 = vst [vmem:[%s4444_s28 + $0x98] sm:$0xff] %v4465_v44  ;;  %v2601_v23 = vpop.f32.mrf.mxu0  ;;  %v2625_v53 = vpop.f32.mrf.mxu1  ;;  %v1891_v52 = vadd.f32 %v4403_v18, %v1666_v51  ;;  %v1671_v18 = vadd.f32 %v4405_v55, %v4313_v19 }
 0x216   : > { %2161 = vst [vmem:[%s4444_s28 + $0x10] sm:$0xff] %v2011_v34  ;;  %v2192_v60 = vadd.f32 %v2191_v20, %v2011_v34  ;;  %v2230_v42 = vmul.f32 %v2011_v34, %v2011_v34  ;;  %2177 = vst [vmem:[%s4444_s28 + $0x90] sm:$0xff] %v4469_v12  ;;  %v2026_v15 = vadd.f32 %v2601_v23, %v4352_v22 }
 0x217   : > { %v4483_v49 = vadd.f32 %v2625_v53, %v1881_v13  ;;  %v2020_v30 = vpop.f32.mrf.mxu0  ;;  %v2100_v35 = vpop.f32.mrf.mxu1  ;;  %v1676_v22 = vadd.f32 %v4409_v63, %v4316_v36 }
 0x218   : > { %v2261_v46 = vadd.f32 %v2260_v0, %v2230_v42  ;;  %2164 = vst [vmem:[%s4444_s28 + $0x28] sm:$0xff] %v2026_v15  ;;  %v2021_v62 = vadd.f32 %v2020_v30, %v4349_v56  ;;  %v2193_v58 = vadd.f32 %v2192_v60, %v2016_v45  ;;  %v4492_v3 = vadd.f32 %v2100_v35, %v1876_v1 }
 0x219   : > { %2180 = vst [vmem:[%s4444_s28 + $0xa8] sm:$0xff] %v4483_v49  ;;  %v2604_v8 = vpop.f32.mrf.mxu0  ;;  %v2628_v31 = vpop.f32.mrf.mxu1  ;;  %v1886_v45 = vadd.f32 %v4399_v6, %v1661_v39  ;;  %v2233_v29 = vmul.f32 %v2026_v15, %v2026_v15  ;;  %v1686_v6 = vadd.f32 %v4417_v50, %v4322_v2  ;;  %v1896_v60 = vadd.f32 %v4407_v37, %v1671_v18 }
 0x21a   : > { %2163 = vst [vmem:[%s4444_s28 + $0x20] sm:$0xff] %v2021_v62  ;;  %v2194_v25 = vadd.f32 %v2193_v58, %v2021_v62  ;;  %v2232_v20 = vmul.f32 %v2021_v62, %v2021_v62  ;;  %v2262_v33 = vadd.f32 %v2261_v46, %v2231_v57  ;;  %v2036_v56 = vadd.f32 %v2604_v8, %v4358_v28 }
 0x21b   : > { %2179 = vst [vmem:[%s4444_s28 + $0xa0] sm:$0xff] %v4492_v3  ;;  %v4501_v36 = vadd.f32 %v2628_v31, %v1891_v52  ;;  %v2030_v63 = vpop.f32.mrf.mxu0  ;;  %v2110_v41 = vpop.f32.mrf.mxu1  ;;  %v1901_v28 = vadd.f32 %v4411_v9, %v1676_v22  ;;  %v1681_v9 = vadd.f32 %v4413_v4, %v4319_v32  ;;  %v1696_v37 = vadd.f32 %v4425_v7, %v4328_v27 }
 0x21c   : > { %v2263_v54 = vadd.f32 %v2262_v33, %v2232_v20  ;;  %2166 = vst [vmem:[%s4444_s28 + $0x38] sm:$0xff] %v2036_v56  ;;  %v2031_v0 = vadd.f32 %v2030_v63, %v4355_v14  ;;  %v2195_v34 = vadd.f32 %v2194_v25, %v2026_v15  ;;  %v4510_v19 = vadd.f32 %v2110_v41, %v1886_v45  ;;  %v4816_v63 = vld [vmem:[#allocation13_spill] sm:$0xff]  ;;  %v4817_v41 = vld [vmem:[#allocation16_spill] sm:$0xff] }
 0x21d   : > { %2182 = vst [vmem:[%s4444_s28 + $0xb8] sm:$0xff] %v4501_v36  ;;  %v2607_v55 = vpop.f32.mrf.mxu0  ;;  %v2631_v13 = vpop.f32.mrf.mxu1  ;;  %v2235_v15 = vmul.f32 %v2036_v56, %v2036_v56  ;;  %v1906_v58 = vadd.f32 %v4415_v26, %v1681_v9  ;;  %v4815_v26 = vld [vmem:[#allocation6_spill] sm:$0xff] }
 0x21e   : > { %2165 = vst [vmem:[%s4444_s28 + $0x30] sm:$0xff] %v2031_v0  ;;  %v2196_v51 = vadd.f32 %v2195_v34, %v2031_v0  ;;  %v2234_v23 = vmul.f32 %v2031_v0, %v2031_v0  ;;  %v2264_v53 = vadd.f32 %v2263_v54, %v2233_v29  ;;  %v2046_v14 = vadd.f32 %v2607_v55, %v4364_v11  ;;  %v4819_v55 = vld [vmem:[#allocation9_spill] sm:$0xff] }
 0x21f   : > { %2181 = vst [vmem:[%s4444_s28 + $0xb0] sm:$0xff] %v4510_v19  ;;  %v4519_v2 = vadd.f32 %v2631_v13, %v1901_v28  ;;  %v2040_v50 = vpop.f32.mrf.mxu0  ;;  %v2120_v42 = vpop.f32.mrf.mxu1  ;;  %v1911_v11 = vadd.f32 %v4419_v24, %v1686_v6  ;;  %v1691_v24 = vadd.f32 %v4421_v21, %v4325_v61  ;;  %v1706_v20 = vadd.f32 %v4434_v17, %v4815_v26 }
 0x220   : > { %v2265_v1 = vadd.f32 %v2264_v53, %v2234_v23  ;;  %2168 = vst [vmem:[%s4444_s28 + $0x48] sm:$0xff] %v2046_v14  ;;  %v2041_v39 = vadd.f32 %v2040_v50, %v4361_v16  ;;  %v2197_v30 = vadd.f32 %v2196_v51, %v2036_v56  ;;  %v4528_v32 = vadd.f32 %v2120_v42, %v1896_v60  ;;  %v4820_v42 = vld [vmem:[#allocation12_spill] sm:$0xff] }
 0x221   : > { %2184 = vst [vmem:[%s4444_s28 + $0xc8] sm:$0xff] %v4519_v2  ;;  %v2610_v4 = vpop.f32.mrf.mxu0  ;;  %v2634_v35 = vpop.f32.mrf.mxu1  ;;  %v2237_v22 = vmul.f32 %v2046_v14, %v2046_v14  ;;  %v1916_v29 = vadd.f32 %v4817_v41, %v1691_v24  ;;  %v1931_v23 = vadd.f32 %v4436_v43, %v1706_v20  ;;  %v2246_v26 = vmul.f32 %v4469_v12, %v4469_v12 }
 0x222   : > { %2167 = vst [vmem:[%s4444_s28 + $0x40] sm:$0xff] %v2041_v39  ;;  %v2198_v57 = vadd.f32 %v2197_v30, %v2041_v39  ;;  %v2236_v46 = vmul.f32 %v2041_v39, %v2041_v39  ;;  %v2266_v62 = vadd.f32 %v2265_v1, %v2235_v15  ;;  %v2056_v16 = vadd.f32 %v2610_v4, %v4370_v48  ;;  %v4821_v4 = vld [vmem:[#allocation7_spill] sm:$0xff] }
 0x223   : > { %2183 = vst [vmem:[%s4444_s28 + $0xc0] sm:$0xff] %v4528_v32  ;;  %v4537_v27 = vadd.f32 %v2634_v35, %v1911_v11  ;;  %v2050_v7 = vpop.f32.mrf.mxu0  ;;  %v2130_v52 = vpop.f32.mrf.mxu1  ;;  %v1921_v48 = vadd.f32 %v4427_v38, %v1696_v37  ;;  %v4818_v38 = vld [vmem:[#allocation10_spill] sm:$0xff] }
 0x224   : > { %v2267_v8 = vadd.f32 %v2266_v62, %v2236_v46  ;;  %2170 = vst [vmem:[%s4444_s28 + $0x58] sm:$0xff] %v2056_v16  ;;  %v2051_v31 = vadd.f32 %v2050_v7, %v4367_v40  ;;  %v2199_v25 = vadd.f32 %v2198_v57, %v2046_v14  ;;  %v4546_v61 = vadd.f32 %v2130_v52, %v1906_v58 }
 0x225   : > { %2186 = vst [vmem:[%s4444_s28 + $0xd8] sm:$0xff] %v4537_v27  ;;  %v2613_v21 = vpop.f32.mrf.mxu0  ;;  %v2637_v33 = vpop.f32.mrf.mxu1  ;;  %v1701_v17 = vadd.f32 %v4429_v10, %v4818_v38  ;;  %v2239_v28 = vmul.f32 %v2056_v16, %v2056_v16  ;;  %v2244_v52 = vmul.f32 %v4454_v47, %v4454_v47 }
 0x226   : > { %2169 = vst [vmem:[%s4444_s28 + $0x50] sm:$0xff] %v2051_v31  ;;  %v2200_v56 = vadd.f32 %v2199_v25, %v2051_v31  ;;  %v2238_v45 = vmul.f32 %v2051_v31, %v2051_v31  ;;  %v2268_v18 = vadd.f32 %v2267_v8, %v2237_v22  ;;  %v2066_v40 = vadd.f32 %v2613_v21, %v4816_v63 }
 0x227   : > { %2185 = vst [vmem:[%s4444_s28 + $0xd0] sm:$0xff] %v4546_v61  ;;  %v4555_v54 = vadd.f32 %v2637_v33, %v1921_v48  ;;  %v2060_v0 = vpop.f32.mrf.mxu0  ;;  %v2140_v34 = vpop.f32.mrf.mxu1  ;;  %v1926_v1 = vadd.f32 %v4431_v5, %v1701_v17  ;;  %v2245_v31 = vmul.f32 %v4447_v59, %v4447_v59  ;;  %v2247_v33 = vmul.f32 %v4465_v44, %v4465_v44 }
 0x228   : > { %v2269_v6 = vadd.f32 %v2268_v18, %v2238_v45  ;;  %2172 = vst [vmem:[%s4444_s28 + $0x68] sm:$0xff] %v2066_v40  ;;  %v2061_v13 = vadd.f32 %v2060_v0, %v4819_v55  ;;  %v2201_v51 = vadd.f32 %v2200_v56, %v2056_v16  ;;  %v4562_v53 = vadd.f32 %v2140_v34, %v1916_v29 }
 0x229   : > { %2188 = vst [vmem:[%s4444_s28 + $0xe8] sm:$0xff] %v4555_v54  ;;  %v2616_v10 = vpop.f32.mrf.mxu0  ;;  %v2640_v14 = vpop.f32.mrf.mxu1  ;;  %v2241_v11 = vmul.f32 %v2066_v40, %v2066_v40 }
 0x22a   : > { %2171 = vst [vmem:[%s4444_s28 + $0x60] sm:$0xff] %v2061_v13  ;;  %v2202_v60 = vadd.f32 %v2201_v51, %v2061_v13  ;;  %v2240_v9 = vmul.f32 %v2061_v13, %v2061_v13  ;;  %v2270_v50 = vadd.f32 %v2269_v6, %v2239_v28  ;;  %v2076_v15 = vadd.f32 %v2616_v10, %v4820_v42 }
 0x22b   : > { %2187 = vst [vmem:[%s4444_s28 + $0xe0] sm:$0xff] %v4562_v53  ;;  %v4569_v43 = vadd.f32 %v2640_v14, %v1931_v23  ;;  %v2070_v39 = vpop.f32.mrf.mxu0  ;;  %v2150_v30 = vpop.f32.mrf.mxu1 }
 0x22c   : > { %v2271_v37 = vadd.f32 %v2270_v50, %v2240_v9  ;;  %2174 = vst [vmem:[%s4444_s28 + $0x78] sm:$0xff] %v2076_v15  ;;  %v2071_v35 = vadd.f32 %v2070_v39, %v4821_v4  ;;  %v2203_v57 = vadd.f32 %v2202_v60, %v2066_v40  ;;  %v2151_v46 = vadd.f32 %v2150_v30, %v1926_v1 }
 0x22d   : > { %2190 = vst [vmem:[%s4444_s28 + $0xf8] sm:$0xff] %v4569_v43  ;;  %v2243_v58 = vmul.f32 %v2076_v15, %v2076_v15  ;;  %v2259_v1 = vmul.f32 %v4569_v43, %v4569_v43 }
 0x22e   : > { %2173 = vst [vmem:[%s4444_s28 + $0x70] sm:$0xff] %v2071_v35  ;;  %v2204_v62 = vadd.f32 %v2203_v57, %v2071_v35  ;;  %v2242_v16 = vmul.f32 %v2071_v35, %v2071_v35  ;;  %v2272_v5 = vadd.f32 %v2271_v37, %v2241_v11  ;;  %2189 = vst [vmem:[%s4444_s28 + $0xf0] sm:$0xff] %v2151_v46  ;;  %v2695_v57 = vmov 1966171168  }
 0x22f   : > { %v2258_v42 = vmul.f32 %v2151_v46, %v2151_v46 }
 0x230   : > { %v2205_v24 = vadd.f32 %v2204_v62, %v2076_v15  ;;  %v2273_v7 = vadd.f32 %v2272_v5, %v2242_v16  ;;  %v2301_v62 = vunpack.c.l.s4 %v2695_v57 }
 0x232   : > { %v2206_v22 = vadd.f32 %v2205_v24, %v4454_v47  ;;  %v2274_v8 = vadd.f32 %v2273_v7, %v2243_v58  ;;  %v2248_v47 = vmul.f32 %v4492_v3, %v4492_v3  ;;  %v2302_v58 = vunpack.c.0.s8 %v2301_v62 }
 0x234   : > { %v2207_v25 = vadd.f32 %v2206_v22, %v4447_v59  ;;  %v2275_v48 = vadd.f32 %v2274_v8, %v2244_v52  ;;  %v2249_v59 = vmul.f32 %v4483_v49, %v4483_v49  ;;  %v4822_v22 = vld [vmem:[#allocation2_spill] sm:$0xff] }
 0x236   : > { %v2208_v20 = vadd.f32 %v2207_v25, %v4469_v12  ;;  %v2276_v21 = vadd.f32 %v2275_v48, %v2245_v31  ;;  %v2250_v12 = vmul.f32 %v4510_v19, %v4510_v19  ;;  %v4823_v25 = vlaneseq }
 0x238   : > { %v2209_v56 = vadd.f32 %v2208_v20, %v4465_v44  ;;  %v2277_v45 = vadd.f32 %v2276_v21, %v2246_v26  ;;  %v2251_v44 = vmul.f32 %v4501_v36, %v4501_v36  ;;  %vm2317_vm5 = vcmp.lt.s32.totalorder %v4823_v25, 256 }
 0x23a   : > { %v2210_v18 = vadd.f32 %v2209_v56, %v4492_v3  ;;  %v2278_v63 = vadd.f32 %v2277_v45, %v2247_v33  ;;  %v2252_v3 = vmul.f32 %v4528_v32, %v4528_v32 }
 0x23c   : > { %v2211_v40 = vadd.f32 %v2210_v18, %v4483_v49  ;;  %v2279_v41 = vadd.f32 %v2278_v63, %v2248_v47  ;;  %v2253_v49 = vmul.f32 %v4519_v2, %v4519_v2 }
 0x23e   : > { %v2280_v29 = vadd.f32 %v2279_v41, %v2249_v59  ;;  %v2212_v38 = vadd.f32 %v2211_v40, %v4510_v19  ;;  %v2254_v19 = vmul.f32 %v4546_v61, %v4546_v61 }
 0x240   : > { %v2213_v17 = vadd.f32 %v2212_v38, %v4501_v36  ;;  %v2281_v0 = vadd.f32 %v2280_v29, %v2250_v12  ;;  %v2255_v36 = vmul.f32 %v4537_v27, %v4537_v27 }
 0x242   : > { %v2214_v34 = vadd.f32 %v2213_v17, %v4528_v32  ;;  %v2282_v28 = vadd.f32 %v2281_v0, %v2251_v44  ;;  %v2256_v32 = vmul.f32 %v4562_v53, %v4562_v53 }
 0x244   : > { %v2215_v6 = vadd.f32 %v2214_v34, %v4519_v2  ;;  %v2283_v55 = vadd.f32 %v2282_v28, %v2252_v3  ;;  %v2257_v2 = vmul.f32 %v4555_v54, %v4555_v54 }
 0x246   : > { %v2216_v13 = vadd.f32 %v2215_v6, %v4546_v61  ;;  %v2284_v51 = vadd.f32 %v2283_v55, %v2253_v49 }
 0x248   : > { %v2217_v23 = vadd.f32 %v2216_v13, %v4537_v27  ;;  %v2285_v10 = vadd.f32 %v2284_v51, %v2254_v19 }
 0x24a   : > { %v2218_v14 = vadd.f32 %v2217_v23, %v4562_v53  ;;  %v2286_v60 = vadd.f32 %v2285_v10, %v2255_v36 }
 0x24c   : > { %v2219_v9 = vadd.f32 %v2218_v14, %v4555_v54  ;;  %v2287_v50 = vadd.f32 %v2286_v60, %v2256_v32 }
 0x24e   : > { %v2220_v61 = vadd.f32 %v2219_v9, %v2151_v46  ;;  %v2288_v15 = vadd.f32 %v2287_v50, %v2257_v2 }
 0x250   : > { %v2221_v27 = vadd.f32 %v2220_v61, %v4569_v43  ;;  %v2289_v39 = vadd.f32 %v2288_v15, %v2258_v42  ;;  %v2305_v43 = vsub.s32 %v2302_v58, %v4822_v22 }
 0x252   : > { %v2222_v30 = vrot.slane %v2221_v27, 4  ;;  %v2290_v11 = vadd.f32 %v2289_v39, %v2259_v1 }
 0x254   : > { %v2223_v53 = vadd.f32 %v2222_v30, %v2221_v27  ;;  %v2291_v37 = vrot.slane %v2290_v11, 4 }
 0x256   : > { %v2224_v4 = vrot.slane %v2223_v53, 2  ;;  %v2292_v35 = vadd.f32 %v2291_v37, %v2290_v11 }
 0x258   : > { %v2225_v54 = vadd.f32 %v2224_v4, %v2223_v53  ;;  %v2293_v16 = vrot.slane %v2292_v35, 2 }
 0x25a   : > { %v2226_v5 = vrot.slane %v2225_v54, 1  ;;  %v2294_v46 = vadd.f32 %v2293_v16, %v2292_v35 }
 0x25c   : > { %v2295_v24 = vrot.slane %v2294_v46, 1  ;;  %v2227_v7 = vadd.f32 %v2226_v5, %v2225_v54 }
 0x25e   : > { %v2296_v52 = vadd.f32 %v2295_v24, %v2294_v46 }
 0x260   : > { %v2299_v8 = vcombine.low %v2227_v7, %v2296_v52 }
 0x262   : > { %v2306_v31 = vrot.slane %v2299_v8, %v2305_v43 }
 0x264   : > { %v2313_v48 = vrot.slane %v2306_v31, %v2305_v43 }
 0x266   : > { %2319 = vst.msk [vmem:[%s262_s8] sm:$0x3] %vm2317_vm5, %v2313_v48 }
 0x267 PF: > { %s17_s21 = sadd.s32 1, %s2692_s21  }
 0x268   : > { %p14_p4 = scmp.ge.s32.totalorder %s17_s21, 4  }
 0x26a   :  { %16 = sbr.rel (!%p14_p4) target bundleno = 1 (0x1), region = 82 }

// kernel: decoder_block_forward.5
= control target key start
LH: loop header
LB: loop body
LE: loop exit
PB: predicated region body
PF: predicated region fallthrough
CT: control target
= control target key end

     0   :  { %s4409_s21 = smov 0   ;;  %s7394_s0 = inlined_call_operand.vmem [shape: f32[2,18,18,128], index: 0, kind: input, shape index: {}]   ;;  %s7395_s1 = inlined_call_operand.vmem [shape: f32[2,18,18,128], index: 1, kind: input, shape index: {}]   ;;  %s7396_s2 = inlined_call_operand.vmem [shape: f32[1152,128], index: 2, kind: input, shape index: {}]   ;;  %s7397_s3 = inlined_call_operand.vmem [shape: f32[1152,128], index: 3, kind: input, shape index: {}]   ;;  %s7398_s4 = inlined_call_operand.vmem [shape: f32[1,128], index: 4, kind: input, shape index: {}]   ;;  %s7399_s5 = inlined_call_operand.vmem [shape: f32[2,16,16,128], index: 5, kind: output, shape index: {0}]   ;;  %s7400_s6 = inlined_call_operand.vmem [shape: f32[2,1,256], index: 6, kind: output, shape index: {1}]  }
   0x1 LB: > { %s3699_s22 = sadd.s32 4294967295, %s4370_s21   ;;  %p3703_p0 = scmp.ge.s32.totalorder %s4370_s21, 1  ;;  %s4370_s21 = sphi %s4409_s21, %s17_s21  }
   0x2   : > { %p225_p1 = scmp.lt.s32.totalorder %s4370_s21, 3 }
   0x4   : > { %p226_p2 = pnand %p3703_p0, %p225_p1 }
   0x6   : > { %229 = sbr.rel (%p226_p2) target bundleno = 889 (0x379), region = 40 }
   0xb   : > { %v1022_v0 = vld [vmem:[%s7397_s3 + $0x78] sm:$0xff]  ;;  %v7402_v2 = vmov 0.0   ;;  %v1021_v3 = vld [vmem:[%s7397_s3 + $0x70] sm:$0xff]  ;;  %v1020_v5 = vld [vmem:[%s7397_s3 + $0x68] sm:$0xff]  ;;  %p264_p3 = scmp.lt.s32.totalorder %s3699_s22, 1 }
   0xc   : > { %v1054_v1 = vld [vmem:[%s7397_s3 + $0x178] sm:$0xff]  ;;  %1151 = vmatprep.subr.mxu0 %v7402_v2  ;;  %1376 = vmatprep.subr.mxu1 %v7402_v2  ;;  %v1053_v4 = vld [vmem:[%s7397_s3 + $0x170] sm:$0xff]  ;;  %v1052_v6 = vld [vmem:[%s7397_s3 + $0x168] sm:$0xff] }
   0xd   : > { %1152 = vmatpush1.msra.mxu0 %v1022_v0  ;;  %1377 = vmatpush1.msra.mxu1 %v1054_v1  ;;  %v1019_v7 = vld [vmem:[%s7397_s3 + $0x60] sm:$0xff]  ;;  %v1018_v9 = vld [vmem:[%s7397_s3 + $0x58] sm:$0xff]  ;;  %v1017_v11 = vld [vmem:[%s7397_s3 + $0x50] sm:$0xff]  ;;  %s7532_s22 = smov (!%p264_p3, %s3699_s22), 1 }
   0xe   : > { %1153 = vmatprep.subr.mxu0 %v7402_v2  ;;  %1378 = vmatprep.subr.mxu1 %v7402_v2  ;;  %v1051_v8 = vld [vmem:[%s7397_s3 + $0x160] sm:$0xff]  ;;  %v1050_v10 = vld [vmem:[%s7397_s3 + $0x158] sm:$0xff]  ;;  %v1049_v12 = vld [vmem:[%s7397_s3 + $0x150] sm:$0xff]  ;;  %s4353_s25 = smul.u32 432, %s7532_s22  ;;  %s3708_s8 = sshll.u32 %s7532_s22, 1 }
   0xf   : > { %1154 = vmatpush1.msra.mxu0 %v1021_v3  ;;  %1379 = vmatpush1.msra.mxu1 %v1053_v4  ;;  %v1016_v13 = vld [vmem:[%s7397_s3 + $0x48] sm:$0xff]  ;;  %v1015_v15 = vld [vmem:[%s7397_s3 + $0x40] sm:$0xff]  ;;  %v1014_v17 = vld [vmem:[%s7397_s3 + $0x38] sm:$0xff]  ;;  %s282_s11 = scalar_lea.vmem %s7400_s6, %s3708_s8 }
  0x10   : > { %1155 = vmatprep.subr.mxu0 %v7402_v2  ;;  %1380 = vmatprep.subr.mxu1 %v7402_v2  ;;  %v1048_v14 = vld [vmem:[%s7397_s3 + $0x148] sm:$0xff]  ;;  %v1047_v16 = vld [vmem:[%s7397_s3 + $0x140] sm:$0xff]  ;;  %v1046_v18 = vld [vmem:[%s7397_s3 + $0x138] sm:$0xff]  ;;  %s4667_s12 = scalar_lea.vmem %s7395_s1, %s4353_s25  ;;  %s5675_s28 = scalar_lea.vmem %s7394_s0, %s4353_s25 }
  0x11   : > { %1156 = vmatpush1.msra.mxu0 %v1020_v5  ;;  %1381 = vmatpush1.msra.mxu1 %v1052_v6  ;;  %v1013_v19 = vld [vmem:[%s7397_s3 + $0x30] sm:$0xff]  ;;  %v1012_v21 = vld [vmem:[%s7397_s3 + $0x28] sm:$0xff]  ;;  %v1011_v23 = vld [vmem:[%s7397_s3 + $0x20] sm:$0xff] }
  0x12   : > { %1157 = vmatprep.subr.mxu0 %v7402_v2  ;;  %1382 = vmatprep.subr.mxu1 %v7402_v2  ;;  %v1045_v20 = vld [vmem:[%s7397_s3 + $0x130] sm:$0xff]  ;;  %v1044_v22 = vld [vmem:[%s7397_s3 + $0x128] sm:$0xff]  ;;  %v1043_v24 = vld [vmem:[%s7397_s3 + $0x120] sm:$0xff] }
  0x13   : > { %1158 = vmatpush1.msra.mxu0 %v1019_v7  ;;  %1383 = vmatpush1.msra.mxu1 %v1051_v8  ;;  %v1010_v25 = vld [vmem:[%s7397_s3 + $0x18] sm:$0xff]  ;;  %v1009_v27 = vld [vmem:[%s7397_s3 + $0x10] sm:$0xff]  ;;  %v1008_v29 = vld [vmem:[%s7397_s3 + $0x8] sm:$0xff] }
  0x14   : > { %1159 = vmatprep.subr.mxu0 %v7402_v2  ;;  %1384 = vmatprep.subr.mxu1 %v7402_v2  ;;  %v1042_v26 = vld [vmem:[%s7397_s3 + $0x118] sm:$0xff]  ;;  %v1041_v28 = vld [vmem:[%s7397_s3 + $0x110] sm:$0xff]  ;;  %v1040_v30 = vld [vmem:[%s7397_s3 + $0x108] sm:$0xff] }
  0x15   : > { %1160 = vmatpush1.msra.mxu0 %v1018_v9  ;;  %1385 = vmatpush1.msra.mxu1 %v1050_v10  ;;  %v1007_v31 = vld [vmem:[%s7397_s3] sm:$0xff]  ;;  %v1038_v33 = vld [vmem:[%s7397_s3 + $0xf8] sm:$0xff]  ;;  %v1037_v35 = vld [vmem:[%s7397_s3 + $0xf0] sm:$0xff] }
  0x16   : > { %1161 = vmatprep.subr.mxu0 %v7402_v2  ;;  %1386 = vmatprep.subr.mxu1 %v7402_v2  ;;  %v1039_v32 = vld [vmem:[%s7397_s3 + $0x100] sm:$0xff]  ;;  %v1070_v34 = vld [vmem:[%s7397_s3 + $0x1f8] sm:$0xff]  ;;  %v1069_v36 = vld [vmem:[%s7397_s3 + $0x1f0] sm:$0xff] }
  0x17   : > { %1162 = vmatpush1.msra.mxu0 %v1017_v11  ;;  %1387 = vmatpush1.msra.mxu1 %v1049_v12  ;;  %v1036_v37 = vld [vmem:[%s7397_s3 + $0xe8] sm:$0xff]  ;;  %v1035_v39 = vld [vmem:[%s7397_s3 + $0xe0] sm:$0xff]  ;;  %v1034_v41 = vld [vmem:[%s7397_s3 + $0xd8] sm:$0xff] }
  0x18   : > { %1163 = vmatprep.subr.mxu0 %v7402_v2  ;;  %1388 = vmatprep.subr.mxu1 %v7402_v2  ;;  %v1068_v38 = vld [vmem:[%s7397_s3 + $0x1e8] sm:$0xff]  ;;  %v1067_v40 = vld [vmem:[%s7397_s3 + $0x1e0] sm:$0xff]  ;;  %v1066_v42 = vld [vmem:[%s7397_s3 + $0x1d8] sm:$0xff] }
  0x19   : > { %1164 = vmatpush1.msra.mxu0 %v1016_v13  ;;  %1389 = vmatpush1.msra.mxu1 %v1048_v14  ;;  %v1033_v43 = vld [vmem:[%s7397_s3 + $0xd0] sm:$0xff]  ;;  %v1032_v45 = vld [vmem:[%s7397_s3 + $0xc8] sm:$0xff]  ;;  %v1031_v47 = vld [vmem:[%s7397_s3 + $0xc0] sm:$0xff] }
  0x1a   : > { %1165 = vmatprep.subr.mxu0 %v7402_v2  ;;  %1390 = vmatprep.subr.mxu1 %v7402_v2  ;;  %v1065_v44 = vld [vmem:[%s7397_s3 + $0x1d0] sm:$0xff]  ;;  %v1064_v46 = vld [vmem:[%s7397_s3 + $0x1c8] sm:$0xff]  ;;  %v1063_v48 = vld [vmem:[%s7397_s3 + $0x1c0] sm:$0xff] }
  0x1b   : > { %1166 = vmatpush1.msra.mxu0 %v1015_v15  ;;  %1391 = vmatpush1.msra.mxu1 %v1047_v16  ;;  %v1030_v49 = vld [vmem:[%s7397_s3 + $0xb8] sm:$0xff]  ;;  %v1029_v51 = vld [vmem:[%s7397_s3 + $0xb0] sm:$0xff]  ;;  %v1028_v53 = vld [vmem:[%s7397_s3 + $0xa8] sm:$0xff] }
  0x1c   : > { %1167 = vmatprep.subr.mxu0 %v7402_v2  ;;  %1392 = vmatprep.subr.mxu1 %v7402_v2  ;;  %v1062_v50 = vld [vmem:[%s7397_s3 + $0x1b8] sm:$0xff]  ;;  %v1061_v52 = vld [vmem:[%s7397_s3 + $0x1b0] sm:$0xff]  ;;  %v1060_v54 = vld [vmem:[%s7397_s3 + $0x1a8] sm:$0xff] }
  0x1d   : > { %1168 = vmatpush1.msra.mxu0 %v1014_v17  ;;  %1393 = vmatpush1.msra.mxu1 %v1046_v18  ;;  %v1027_v55 = vld [vmem:[%s7397_s3 + $0xa0] sm:$0xff]  ;;  %v1026_v57 = vld [vmem:[%s7397_s3 + $0x98] sm:$0xff]  ;;  %v1025_v59 = vld [vmem:[%s7397_s3 + $0x90] sm:$0xff] }
  0x1e   : > { %1169 = vmatprep.subr.mxu0 %v7402_v2  ;;  %1394 = vmatprep.subr.mxu1 %v7402_v2  ;;  %v1059_v56 = vld [vmem:[%s7397_s3 + $0x1a0] sm:$0xff]  ;;  %v1058_v58 = vld [vmem:[%s7397_s3 + $0x198] sm:$0xff]  ;;  %v1057_v60 = vld [vmem:[%s7397_s3 + $0x190] sm:$0xff] }
  0x1f   : > { %1170 = vmatpush1.msra.mxu0 %v1013_v19  ;;  %1395 = vmatpush1.msra.mxu1 %v1045_v20  ;;  %v1024_v61 = vld [vmem:[%s7397_s3 + $0x88] sm:$0xff]  ;;  %v1023_v63 = vld [vmem:[%s7397_s3 + $0x80] sm:$0xff]  ;;  %v3901_v3 = vld [vmem:[%s4667_s12 + $0x18] sm:$0xff] }
  0x20   : > { %1171 = vmatprep.subr.mxu0 %v7402_v2  ;;  %1396 = vmatprep.subr.mxu1 %v7402_v2  ;;  %v1056_v62 = vld [vmem:[%s7397_s3 + $0x188] sm:$0xff]  ;;  %v1055_v1 = vld [vmem:[%s7397_s3 + $0x180] sm:$0xff]  ;;  %v1118_v6 = vld [vmem:[%s7397_s3 + $0x378] sm:$0xff] }
  0x21   : > { %1172 = vmatpush1.msra.mxu0 %v1012_v21  ;;  %1397 = vmatpush1.msra.mxu1 %v1044_v22  ;;  %v749_v0 = vld [vmem:[%s4667_s12 + $0x1] sm:$0xff]  ;;  %v750_v7 = vld [vmem:[%s4667_s12 + $0x9] sm:$0xff]  ;;  %v1086_v9 = vld [vmem:[%s7397_s3 + $0x278] sm:$0xff] }
  0x22   : > { %1173 = vmatprep.subr.mxu0 %v7402_v2  ;;  %1398 = vmatprep.subr.mxu1 %v7402_v2  ;;  %v717_v4 = vld [vmem:[%s4667_s12] sm:$0xff]  ;;  %v718_v10 = vld [vmem:[%s4667_s12 + $0x8] sm:$0xff]  ;;  %v1117_v12 = vld [vmem:[%s7397_s3 + $0x370] sm:$0xff] }
  0x23   : > { %1174 = vmatpush1.msra.mxu0 %v1011_v23  ;;  %1399 = vmatpush1.msra.mxu1 %v1043_v24  ;;  %v781_v5 = vld [vmem:[%s4667_s12 + $0x2] sm:$0xff]  ;;  %v782_v11 = vld [vmem:[%s4667_s12 + $0xa] sm:$0xff]  ;;  %v4707_v13 = vld [vmem:[%s4667_s12 + $0x19] sm:$0xff] }
  0x24   : > { %1175 = vmatprep.subr.mxu0 %v7402_v2  ;;  %1400 = vmatprep.subr.mxu1 %v7402_v2  ;;  %v3902_v8 = vld [vmem:[%s4667_s12 + $0x20] sm:$0xff]  ;;  %v4710_v14 = vld [vmem:[%s4667_s12 + $0x30] sm:$0xff]  ;;  %v1116_v17 = vld [vmem:[%s7397_s3 + $0x368] sm:$0xff] }
  0x25   : > { %1176 = vmatpush1.msra.mxu0 %v1010_v25  ;;  %1401 = vmatpush1.msra.mxu1 %v1042_v26  ;;  %v1085_v15 = vld [vmem:[%s7397_s3 + $0x270] sm:$0xff]  ;;  %v4718_v16 = vld [vmem:[%s4667_s12 + $0x1a] sm:$0xff]  ;;  %v1084_v20 = vld [vmem:[%s7397_s3 + $0x268] sm:$0xff] }
  0x26   : > { %1177 = vmatprep.subr.mxu0 %v7402_v2  ;;  %1402 = vmatprep.subr.mxu1 %v7402_v2  ;;  %v4726_v18 = vld [vmem:[%s4667_s12 + $0x21] sm:$0xff]  ;;  %v4730_v19 = vld [vmem:[%s4667_s12 + $0x38] sm:$0xff] }
  0x27   : > { %1178 = vmatpush1.msra.mxu0 %v1009_v27  ;;  %1403 = vmatpush1.msra.mxu1 %v1041_v28  ;;  %v4738_v21 = vld [vmem:[%s4667_s12 + $0x22] sm:$0xff]  ;;  %v4746_v23 = vld [vmem:[%s4667_s12 + $0x31] sm:$0xff]  ;;  %v4766_v28 = vld [vmem:[%s4667_s12 + $0x39] sm:$0xff] }
  0x28   : > { %1179 = vmatprep.subr.mxu0 %v7402_v2  ;;  %1404 = vmatprep.subr.mxu1 %v7402_v2  ;;  %v1115_v22 = vld [vmem:[%s7397_s3 + $0x360] sm:$0xff]  ;;  %v4750_v24 = vld [vmem:[%s4667_s12 + $0x48] sm:$0xff]  ;;  %v4758_v26 = vld [vmem:[%s4667_s12 + $0x32] sm:$0xff] }
  0x29   : > { %1180 = vmatpush1.msra.mxu0 %v1008_v29  ;;  %1405 = vmatpush1.msra.mxu1 %v1040_v30  ;;  %v1083_v25 = vld [vmem:[%s7397_s3 + $0x260] sm:$0xff]  ;;  %v1114_v27 = vld [vmem:[%s7397_s3 + $0x358] sm:$0xff]  ;;  %v4771_v29 = vld [vmem:[%s4667_s12 + $0x50] sm:$0xff] }
  0x2a   : > { %1181 = vmatprep.subr.mxu0 %v7402_v2  ;;  %1406 = vmatprep.subr.mxu1 %v7402_v2  ;;  %v1082_v30 = vld [vmem:[%s7397_s3 + $0x258] sm:$0xff] }
  0x2b   : > { %1182 = vmatpush1.msra.mxu0 %v1007_v31  ;;  %1407 = vmatpush1.msra.mxu1 %v1039_v32  ;;  %v4779_v31 = vld [vmem:[%s4667_s12 + $0x3a] sm:$0xff]  ;;  %v1113_v32 = vld [vmem:[%s7397_s3 + $0x350] sm:$0xff] }
  0x2c   : > { %1183 = vmatprep.subr.mxu0 %v7402_v2  ;;  %1408 = vmatprep.subr.mxu1 %v7402_v2 }
  0x2d   : > { %1184 = vmatpush2.msra.mxu0 %v1038_v33  ;;  %1409 = vmatpush2.msra.mxu1 %v1070_v34  ;;  %v4787_v33 = vld [vmem:[%s4667_s12 + $0x49] sm:$0xff]  ;;  %v4792_v34 = vld [vmem:[%s4667_s12 + $0x60] sm:$0xff] }
  0x2e   : > { %1185 = vmatprep.subr.mxu0 %v7402_v2  ;;  %1410 = vmatprep.subr.mxu1 %v7402_v2 }
  0x2f   : > { %1186 = vmatpush2.msra.mxu0 %v1037_v35  ;;  %1411 = vmatpush2.msra.mxu1 %v1069_v36  ;;  %v1081_v35 = vld [vmem:[%s7397_s3 + $0x250] sm:$0xff] }
  0x30   : > { %1187 = vmatprep.subr.mxu0 %v7402_v2  ;;  %1412 = vmatprep.subr.mxu1 %v7402_v2  ;;  %v4800_v36 = vld [vmem:[%s4667_s12 + $0x4a] sm:$0xff] }
  0x31   : > { %1188 = vmatpush2.msra.mxu0 %v1036_v37  ;;  %1413 = vmatpush2.msra.mxu1 %v1068_v38  ;;  %v1112_v37 = vld [vmem:[%s7397_s3 + $0x348] sm:$0xff]  ;;  %v4808_v38 = vld [vmem:[%s4667_s12 + $0x51] sm:$0xff] }
  0x32   : > { %1189 = vmatprep.subr.mxu0 %v7402_v2  ;;  %1414 = vmatprep.subr.mxu1 %v7402_v2 }
  0x33   : > { %1190 = vmatpush2.msra.mxu0 %v1035_v39  ;;  %1415 = vmatpush2.msra.mxu1 %v1067_v40  ;;  %v4813_v39 = vld [vmem:[%s4667_s12 + $0x68] sm:$0xff] }
  0x34   : > { %1191 = vmatprep.subr.mxu0 %v7402_v2  ;;  %1416 = vmatprep.subr.mxu1 %v7402_v2  ;;  %v1080_v40 = vld [vmem:[%s7397_s3 + $0x248] sm:$0xff] }
  0x35   : > { %1192 = vmatpush2.msra.mxu0 %v1034_v41  ;;  %1417 = vmatpush2.msra.mxu1 %v1066_v42  ;;  %v4821_v41 = vld [vmem:[%s4667_s12 + $0x52] sm:$0xff]  ;;  %v1111_v42 = vld [vmem:[%s7397_s3 + $0x340] sm:$0xff] }
  0x36   : > { %1193 = vmatprep.subr.mxu0 %v7402_v2  ;;  %1418 = vmatprep.subr.mxu1 %v7402_v2 }
  0x37   : > { %1194 = vmatpush2.msra.mxu0 %v1033_v43  ;;  %1419 = vmatpush2.msra.mxu1 %v1065_v44  ;;  %v4829_v43 = vld [vmem:[%s4667_s12 + $0x61] sm:$0xff]  ;;  %v4834_v44 = vld [vmem:[%s4667_s12 + $0x78] sm:$0xff] }
  0x38   : > { %1195 = vmatprep.subr.mxu0 %v7402_v2  ;;  %1420 = vmatprep.subr.mxu1 %v7402_v2 }
  0x39   : > { %1196 = vmatpush2.msra.mxu0 %v1032_v45  ;;  %1421 = vmatpush2.msra.mxu1 %v1064_v46  ;;  %v1079_v45 = vld [vmem:[%s7397_s3 + $0x240] sm:$0xff] }
  0x3a   : > { %1197 = vmatprep.subr.mxu0 %v7402_v2  ;;  %1422 = vmatprep.subr.mxu1 %v7402_v2  ;;  %v4842_v46 = vld [vmem:[%s4667_s12 + $0x62] sm:$0xff] }
  0x3b   : > { %1198 = vmatpush2.msra.mxu0 %v1031_v47  ;;  %1423 = vmatpush2.msra.mxu1 %v1063_v48  ;;  %v1110_v47 = vld [vmem:[%s7397_s3 + $0x338] sm:$0xff]  ;;  %v4850_v48 = vld [vmem:[%s4667_s12 + $0x69] sm:$0xff] }
  0x3c   : > { %1199 = vmatprep.subr.mxu0 %v7402_v2  ;;  %1424 = vmatprep.subr.mxu1 %v7402_v2 }
  0x3d   : > { %1200 = vmatpush2.msra.mxu0 %v1030_v49  ;;  %1425 = vmatpush2.msra.mxu1 %v1062_v50  ;;  %v4855_v49 = vld [vmem:[%s4667_s12 + $0x80] sm:$0xff]  ;;  %v1078_v50 = vld [vmem:[%s7397_s3 + $0x238] sm:$0xff] }
  0x3e   : > { %1201 = vmatprep.subr.mxu0 %v7402_v2  ;;  %1426 = vmatprep.subr.mxu1 %v7402_v2 }
  0x3f   : > { %1202 = vmatpush2.msra.mxu0 %v1029_v51  ;;  %1427 = vmatpush2.msra.mxu1 %v1061_v52  ;;  %v4863_v51 = vld [vmem:[%s4667_s12 + $0x6a] sm:$0xff] }
  0x40   : > { %1203 = vmatprep.subr.mxu0 %v7402_v2  ;;  %1428 = vmatprep.subr.mxu1 %v7402_v2  ;;  %v1109_v52 = vld [vmem:[%s7397_s3 + $0x330] sm:$0xff] }
  0x41   : > { %1204 = vmatpush2.msra.mxu0 %v1028_v53  ;;  %1429 = vmatpush2.msra.mxu1 %v1060_v54  ;;  %v4871_v53 = vld [vmem:[%s4667_s12 + $0x79] sm:$0xff]  ;;  %v4876_v54 = vld [vmem:[%s4667_s12 + $0x90] sm:$0xff] }
  0x42   : > { %1205 = vmatprep.subr.mxu0 %v7402_v2  ;;  %1430 = vmatprep.subr.mxu1 %v7402_v2 }
  0x43   : > { %1206 = vmatpush2.msra.mxu0 %v1027_v55  ;;  %1431 = vmatpush2.msra.mxu1 %v1059_v56  ;;  %v1077_v55 = vld [vmem:[%s7397_s3 + $0x230] sm:$0xff]  ;;  %v4884_v56 = vld [vmem:[%s4667_s12 + $0x7a] sm:$0xff] }
  0x44   : > { %1207 = vmatprep.subr.mxu0 %v7402_v2  ;;  %1432 = vmatprep.subr.mxu1 %v7402_v2 }
  0x45   : > { %1208 = vmatpush2.msra.mxu0 %v1026_v57  ;;  %1433 = vmatpush2.msra.mxu1 %v1058_v58  ;;  %v1108_v57 = vld [vmem:[%s7397_s3 + $0x328] sm:$0xff] }
  0x46   : > { %1209 = vmatprep.subr.mxu0 %v7402_v2  ;;  %1434 = vmatprep.subr.mxu1 %v7402_v2  ;;  %v4892_v58 = vld [vmem:[%s4667_s12 + $0x81] sm:$0xff] }
  0x47   : > { %1210 = vmatpush2.msra.mxu0 %v1025_v59  ;;  %1435 = vmatpush2.msra.mxu1 %v1057_v60  ;;  %v4897_v59 = vld [vmem:[%s4667_s12 + $0x98] sm:$0xff]  ;;  %v1076_v60 = vld [vmem:[%s7397_s3 + $0x228] sm:$0xff] }
  0x48   : > { %1211 = vmatprep.subr.mxu0 %v7402_v2  ;;  %1436 = vmatprep.subr.mxu1 %v7402_v2 }
  0x49   : > { %1212 = vmatpush2.msra.mxu0 %v1024_v61  ;;  %1437 = vmatpush2.msra.mxu1 %v1056_v62  ;;  %v4905_v61 = vld [vmem:[%s4667_s12 + $0x82] sm:$0xff] }
  0x4a   : > { %1213 = vmatprep.subr.mxu0 %v7402_v2  ;;  %1438 = vmatprep.subr.mxu1 %v7402_v2  ;;  %v1107_v62 = vld [vmem:[%s7397_s3 + $0x320] sm:$0xff] }
  0x4b   : > { %1214 = vmatpush2.msra.mxu0 %v1023_v63  ;;  %1215 = vmatprep.mubr.f32.mxu0 %v749_v0  ;;  %v4913_v63 = vld [vmem:[%s4667_s12 + $0x91] sm:$0xff]  ;;  %v4918_v0 = vld [vmem:[%s4667_s12 + $0xa8] sm:$0xff] }
  0x4c   : > { %1439 = vmatpush2.msra.mxu1 %v1055_v1  ;;  %1440 = vmatprep.mubr.f32.mxu1 %v3901_v3  ;;  %v1075_v1 = vld [vmem:[%s7397_s3 + $0x220] sm:$0xff] }
  0x4d   : > { %1216 = vmatmul.mubr.f32.vlgmr.msra.gmra.mxu0 %v717_v4  ;;  %1441 = vmatmul.mubr.f32.vlgmr.msra.gmra.mxu1 %v781_v5  ;;  %v1106_v4 = vld [vmem:[%s7397_s3 + $0x318] sm:$0xff] }
  0x4e   : > { %1826 = vmatprep.subr.mxu1 %v7402_v2  ;;  %1601 = vmatprep.subr.mxu0 %v7402_v2  ;;  %v4934_v5 = vld [vmem:[%s4667_s12 + $0x99] sm:$0xff] }
  0x4f   : > { %1827 = vmatpush1.msra.mxu1 %v1118_v6  ;;  %1220 = vmatprep.mubr.f32.mxu0 %v750_v7  ;;  %v4939_v6 = vld [vmem:[%s4667_s12 + $0xb0] sm:$0xff]  ;;  %v1074_v7 = vld [vmem:[%s7397_s3 + $0x218] sm:$0xff] }
  0x50   : > { %1445 = vmatprep.mubr.f32.mxu1 %v3902_v8  ;;  %1602 = vmatpush1.msra.mxu0 %v1086_v9  ;;  %v1105_v9 = vld [vmem:[%s7397_s3 + $0x310] sm:$0xff] }
  0x51   : > { %1221 = vmatmul.mubr.f32.gmra.mxu0 %v718_v10  ;;  %1446 = vmatmul.mubr.f32.gmra.mxu1 %v782_v11  ;;  %v4955_v10 = vld [vmem:[%s4667_s12 + $0xa9] sm:$0xff]  ;;  %v4960_v11 = vld [vmem:[%s4667_s12 + $0xc0] sm:$0xff] }
  0x52   : > { %1828 = vmatprep.subr.mxu1 %v7402_v2  ;;  %1603 = vmatprep.subr.mxu0 %v7402_v2 }
  0x53   : > { %1829 = vmatpush1.msra.mxu1 %v1117_v12  ;;  %1225 = vmatprep.mubr.f32.mxu0 %v4707_v13  ;;  %v1073_v12 = vld [vmem:[%s7397_s3 + $0x210] sm:$0xff] }
  0x54   : > { %1450 = vmatprep.mubr.f32.mxu1 %v4710_v14  ;;  %1604 = vmatpush1.msra.mxu0 %v1085_v15  ;;  %v4968_v15 = vld [vmem:[%s4667_s12 + $0xaa] sm:$0xff] }
  0x55   : > { %1226 = vmatmul.mubr.f32.gmra.mxu0 %v3901_v3  ;;  %1451 = vmatmul.mubr.f32.gmra.mxu1 %v4718_v16  ;;  %v4926_v3 = vld [vmem:[%s4667_s12 + $0x92] sm:$0xff] }
  0x56   : > { %1830 = vmatprep.subr.mxu1 %v7402_v2  ;;  %1605 = vmatprep.subr.mxu0 %v7402_v2 }
  0x57   : > { %1831 = vmatpush1.msra.mxu1 %v1116_v17  ;;  %1230 = vmatprep.mubr.f32.mxu0 %v4726_v18  ;;  %v1104_v17 = vld [vmem:[%s7397_s3 + $0x308] sm:$0xff] }
  0x58   : > { %1455 = vmatprep.mubr.f32.mxu1 %v4730_v19  ;;  %1606 = vmatpush1.msra.mxu0 %v1084_v20  ;;  %v4976_v20 = vld [vmem:[%s4667_s12 + $0xb1] sm:$0xff] }
  0x59   : > { %1231 = vmatmul.mubr.f32.gmra.mxu0 %v3902_v8  ;;  %1456 = vmatmul.mubr.f32.gmra.mxu1 %v4738_v21  ;;  %v4947_v8 = vld [vmem:[%s4667_s12 + $0x9a] sm:$0xff] }
  0x5a   : > { %1832 = vmatprep.subr.mxu1 %v7402_v2  ;;  %1607 = vmatprep.subr.mxu0 %v7402_v2 }
  0x5b   : > { %1833 = vmatpush1.msra.mxu1 %v1115_v22  ;;  %1235 = vmatprep.mubr.f32.mxu0 %v4746_v23  ;;  %v4981_v22 = vld [vmem:[%s4667_s12 + $0xc8] sm:$0xff] }
  0x5c   : > { %1460 = vmatprep.mubr.f32.mxu1 %v4750_v24  ;;  %1608 = vmatpush1.msra.mxu0 %v1083_v25  ;;  %v1072_v25 = vld [vmem:[%s7397_s3 + $0x208] sm:$0xff] }
  0x5d   : > { %1236 = vmatmul.mubr.f32.gmra.mxu0 %v4710_v14  ;;  %1461 = vmatmul.mubr.f32.gmra.mxu1 %v4758_v26 }
  0x5e   : > { %1834 = vmatprep.subr.mxu1 %v7402_v2  ;;  %1609 = vmatprep.subr.mxu0 %v7402_v2 }
  0x5f   : > { %1835 = vmatpush1.msra.mxu1 %v1114_v27  ;;  %1240 = vmatprep.mubr.f32.mxu0 %v4766_v28  ;;  %v4989_v27 = vld [vmem:[%s4667_s12 + $0xb2] sm:$0xff] }
  0x60   : > { %1465 = vmatprep.mubr.f32.mxu1 %v4771_v29  ;;  %1610 = vmatpush1.msra.mxu0 %v1082_v30  ;;  %v1103_v30 = vld [vmem:[%s7397_s3 + $0x300] sm:$0xff] }
  0x61   : > { %1241 = vmatmul.mubr.f32.gmra.mxu0 %v4730_v19  ;;  %1466 = vmatmul.mubr.f32.gmra.mxu1 %v4779_v31 }
  0x62   : > { %1836 = vmatprep.subr.mxu1 %v7402_v2  ;;  %1611 = vmatprep.subr.mxu0 %v7402_v2 }
  0x63   : > { %1837 = vmatpush1.msra.mxu1 %v1113_v32  ;;  %1245 = vmatprep.mubr.f32.mxu0 %v4787_v33  ;;  %v4997_v32 = vld [vmem:[%s4667_s12 + $0xc1] sm:$0xff] }
  0x64   : > { %1470 = vmatprep.mubr.f32.mxu1 %v4792_v34  ;;  %1612 = vmatpush1.msra.mxu0 %v1081_v35  ;;  %v5002_v35 = vld [vmem:[%s4667_s12 + $0xd8] sm:$0xff] }
  0x65   : > { %1246 = vmatmul.mubr.f32.gmra.mxu0 %v4750_v24  ;;  %1471 = vmatmul.mubr.f32.gmra.mxu1 %v4800_v36 }
  0x66   : > { %1838 = vmatprep.subr.mxu1 %v7402_v2  ;;  %1613 = vmatprep.subr.mxu0 %v7402_v2 }
  0x67   : > { %1839 = vmatpush1.msra.mxu1 %v1112_v37  ;;  %1250 = vmatprep.mubr.f32.mxu0 %v4808_v38  ;;  %v1071_v37 = vld [vmem:[%s7397_s3 + $0x200] sm:$0xff] }
  0x68   : > { %1475 = vmatprep.mubr.f32.mxu1 %v4813_v39  ;;  %1614 = vmatpush1.msra.mxu0 %v1080_v40  ;;  %v5010_v40 = vld [vmem:[%s4667_s12 + $0xc2] sm:$0xff] }
  0x69   : > { %1251 = vmatmul.mubr.f32.gmra.mxu0 %v4771_v29  ;;  %1476 = vmatmul.mubr.f32.gmra.mxu1 %v4821_v41 }
  0x6a   : > { %1840 = vmatprep.subr.mxu1 %v7402_v2  ;;  %1615 = vmatprep.subr.mxu0 %v7402_v2 }
  0x6b   : > { %1841 = vmatpush1.msra.mxu1 %v1111_v42  ;;  %1255 = vmatprep.mubr.f32.mxu0 %v4829_v43  ;;  %v1134_v42 = vld [vmem:[%s7397_s3 + $0x3f8] sm:$0xff] }
  0x6c   : > { %1480 = vmatprep.mubr.f32.mxu1 %v4834_v44  ;;  %1616 = vmatpush1.msra.mxu0 %v1079_v45  ;;  %v5018_v45 = vld [vmem:[%s4667_s12 + $0xc9] sm:$0xff] }
  0x6d   : > { %1256 = vmatmul.mubr.f32.gmra.mxu0 %v4792_v34  ;;  %1481 = vmatmul.mubr.f32.gmra.mxu1 %v4842_v46 }
  0x6e   : > { %1842 = vmatprep.subr.mxu1 %v7402_v2  ;;  %1617 = vmatprep.subr.mxu0 %v7402_v2 }
  0x6f   : > { %1843 = vmatpush1.msra.mxu1 %v1110_v47  ;;  %1260 = vmatprep.mubr.f32.mxu0 %v4850_v48  ;;  %v5023_v47 = vld [vmem:[%s4667_s12 + $0xe0] sm:$0xff] }
  0x70   : > { %1485 = vmatprep.mubr.f32.mxu1 %v4855_v49  ;;  %1618 = vmatpush1.msra.mxu0 %v1078_v50  ;;  %v1102_v50 = vld [vmem:[%s7397_s3 + $0x2f8] sm:$0xff] }
  0x71   : > { %1261 = vmatmul.mubr.f32.gmra.mxu0 %v4813_v39  ;;  %1486 = vmatmul.mubr.f32.gmra.mxu1 %v4863_v51 }
  0x72   : > { %1844 = vmatprep.subr.mxu1 %v7402_v2  ;;  %1619 = vmatprep.subr.mxu0 %v7402_v2 }
  0x73   : > { %1845 = vmatpush1.msra.mxu1 %v1109_v52  ;;  %1265 = vmatprep.mubr.f32.mxu0 %v4871_v53  ;;  %v5031_v52 = vld [vmem:[%s4667_s12 + $0xca] sm:$0xff] }
  0x74   : > { %1490 = vmatprep.mubr.f32.mxu1 %v4876_v54  ;;  %1620 = vmatpush1.msra.mxu0 %v1077_v55  ;;  %v1133_v55 = vld [vmem:[%s7397_s3 + $0x3f0] sm:$0xff] }
  0x75   : > { %1266 = vmatmul.mubr.f32.gmra.mxu0 %v4834_v44  ;;  %1491 = vmatmul.mubr.f32.gmra.mxu1 %v4884_v56 }
  0x76   : > { %1846 = vmatprep.subr.mxu1 %v7402_v2  ;;  %1621 = vmatprep.subr.mxu0 %v7402_v2 }
  0x77   : > { %1847 = vmatpush1.msra.mxu1 %v1108_v57  ;;  %1270 = vmatprep.mubr.f32.mxu0 %v4892_v58  ;;  %v5039_v57 = vld [vmem:[%s4667_s12 + $0xd9] sm:$0xff] }
  0x78   : > { %1495 = vmatprep.mubr.f32.mxu1 %v4897_v59  ;;  %1622 = vmatpush1.msra.mxu0 %v1076_v60  ;;  %v5044_v60 = vld [vmem:[%s4667_s12 + $0xf0] sm:$0xff] }
  0x79   : > { %1271 = vmatmul.mubr.f32.gmra.mxu0 %v4855_v49  ;;  %1496 = vmatmul.mubr.f32.gmra.mxu1 %v4905_v61 }
  0x7a   : > { %1848 = vmatprep.subr.mxu1 %v7402_v2  ;;  %1623 = vmatprep.subr.mxu0 %v7402_v2 }
  0x7b   : > { %1849 = vmatpush1.msra.mxu1 %v1107_v62  ;;  %1275 = vmatprep.mubr.f32.mxu0 %v4913_v63  ;;  %v1101_v62 = vld [vmem:[%s7397_s3 + $0x2f0] sm:$0xff] }
  0x7c   : > { %1500 = vmatprep.mubr.f32.mxu1 %v4918_v0  ;;  %1624 = vmatpush1.msra.mxu0 %v1075_v1  ;;  %v5052_v1 = vld [vmem:[%s4667_s12 + $0xda] sm:$0xff] }
  0x7d   : > { %1276 = vmatmul.mubr.f32.gmra.mxu0 %v4876_v54  ;;  %1501 = vmatmul.mubr.f32.gmra.mxu1 %v4926_v3 }
  0x7e   : > { %1850 = vmatprep.subr.mxu1 %v7402_v2  ;;  %1625 = vmatprep.subr.mxu0 %v7402_v2 }
  0x7f   : > { %1851 = vmatpush1.msra.mxu1 %v1106_v4  ;;  %1280 = vmatprep.mubr.f32.mxu0 %v4934_v5  ;;  %v1132_v4 = vld [vmem:[%s7397_s3 + $0x3e8] sm:$0xff] }
  0x80   : > { %1505 = vmatprep.mubr.f32.mxu1 %v4939_v6  ;;  %1626 = vmatpush1.msra.mxu0 %v1074_v7  ;;  %v5060_v7 = vld [vmem:[%s4667_s12 + $0xe1] sm:$0xff] }
  0x81   : > { %1281 = vmatmul.mubr.f32.gmra.mxu0 %v4897_v59  ;;  %1506 = vmatmul.mubr.f32.gmra.mxu1 %v4947_v8 }
  0x82   : > { %1852 = vmatprep.subr.mxu1 %v7402_v2  ;;  %1627 = vmatprep.subr.mxu0 %v7402_v2 }
  0x83   : > { %1853 = vmatpush1.msra.mxu1 %v1105_v9  ;;  %1285 = vmatprep.mubr.f32.mxu0 %v4955_v10  ;;  %v5065_v9 = vld [vmem:[%s4667_s12 + $0xf8] sm:$0xff] }
  0x84   : > { %1510 = vmatprep.mubr.f32.mxu1 %v4960_v11  ;;  %1628 = vmatpush1.msra.mxu0 %v1073_v12  ;;  %7444 = vst [vmem:[#allocation2_spill] sm:$0xff] %v5065_v9  ;;  %v1100_v12 = vld [vmem:[%s7397_s3 + $0x2e8] sm:$0xff] }
  0x85   : > { %1286 = vmatmul.mubr.f32.gmra.mxu0 %v4918_v0  ;;  %1511 = vmatmul.mubr.f32.gmra.mxu1 %v4968_v15 }
  0x86   : > { %1854 = vmatprep.subr.mxu1 %v7402_v2  ;;  %1629 = vmatprep.subr.mxu0 %v7402_v2 }
  0x87   : > { %1855 = vmatpush1.msra.mxu1 %v1104_v17  ;;  %1290 = vmatprep.mubr.f32.mxu0 %v4976_v20  ;;  %v5073_v17 = vld [vmem:[%s4667_s12 + $0xe2] sm:$0xff] }
  0x88   : > { %1515 = vmatprep.mubr.f32.mxu1 %v4981_v22  ;;  %1630 = vmatpush1.msra.mxu0 %v1072_v25  ;;  %7445 = vst [vmem:[#allocation3_spill] sm:$0xff] %v5073_v17  ;;  %v1131_v25 = vld [vmem:[%s7397_s3 + $0x3e0] sm:$0xff] }
  0x89   : > { %1291 = vmatmul.mubr.f32.gmra.mxu0 %v4939_v6  ;;  %1516 = vmatmul.mubr.f32.gmra.mxu1 %v4989_v27 }
  0x8a   : > { %1856 = vmatprep.subr.mxu1 %v7402_v2  ;;  %1631 = vmatprep.subr.mxu0 %v7402_v2 }
  0x8b   : > { %1857 = vmatpush1.msra.mxu1 %v1103_v30  ;;  %1295 = vmatprep.mubr.f32.mxu0 %v4997_v32  ;;  %v5081_v30 = vld [vmem:[%s4667_s12 + $0xf1] sm:$0xff] }
  0x8c   : > { %1520 = vmatprep.mubr.f32.mxu1 %v5002_v35  ;;  %1632 = vmatpush1.msra.mxu0 %v1071_v37  ;;  %v5086_v37 = vld [vmem:[%s4667_s12 + $0x108] sm:$0xff] }
  0x8d   : > { %1296 = vmatmul.mubr.f32.gmra.mxu0 %v4960_v11  ;;  %1521 = vmatmul.mubr.f32.gmra.mxu1 %v5010_v40  ;;  %7446 = vst [vmem:[#allocation4_spill] sm:$0xff] %v5086_v37 }
  0x8e   : > { %1858 = vmatprep.subr.mxu1 %v7402_v2  ;;  %1633 = vmatprep.subr.mxu0 %v7402_v2 }
  0x8f   : > { %1859 = vmatpush2.msra.mxu1 %v1134_v42  ;;  %1300 = vmatprep.mubr.f32.mxu0 %v5018_v45  ;;  %v1099_v42 = vld [vmem:[%s7397_s3 + $0x2e0] sm:$0xff] }
  0x90   : > { %1525 = vmatprep.mubr.f32.mxu1 %v5023_v47  ;;  %1634 = vmatpush2.msra.mxu0 %v1102_v50  ;;  %v5094_v50 = vld [vmem:[%s4667_s12 + $0xf2] sm:$0xff] }
  0x91   : > { %1301 = vmatmul.mubr.f32.gmra.mxu0 %v4981_v22  ;;  %1526 = vmatmul.mubr.f32.gmra.mxu1 %v5031_v52  ;;  %7447 = vst [vmem:[#allocation5_spill] sm:$0xff] %v5094_v50 }
  0x92   : > { %1860 = vmatprep.subr.mxu1 %v7402_v2  ;;  %1635 = vmatprep.subr.mxu0 %v7402_v2 }
  0x93   : > { %1861 = vmatpush2.msra.mxu1 %v1133_v55  ;;  %1305 = vmatprep.mubr.f32.mxu0 %v5039_v57  ;;  %v1130_v55 = vld [vmem:[%s7397_s3 + $0x3d8] sm:$0xff] }
  0x94   : > { %1530 = vmatprep.mubr.f32.mxu1 %v5044_v60  ;;  %1636 = vmatpush2.msra.mxu0 %v1101_v62  ;;  %v5102_v62 = vld [vmem:[%s4667_s12 + $0xf9] sm:$0xff] }
  0x95   : > { %1306 = vmatmul.mubr.f32.gmra.mxu0 %v5002_v35  ;;  %1531 = vmatmul.mubr.f32.gmra.mxu1 %v5052_v1  ;;  %7448 = vst [vmem:[#allocation6_spill] sm:$0xff] %v5102_v62 }
  0x96   : > { %1862 = vmatprep.subr.mxu1 %v7402_v2  ;;  %1637 = vmatprep.subr.mxu0 %v7402_v2 }
  0x97   : > { %1863 = vmatpush2.msra.mxu1 %v1132_v4  ;;  %1310 = vmatprep.mubr.f32.mxu0 %v5060_v7  ;;  %v5107_v4 = vld [vmem:[%s4667_s12 + $0x110] sm:$0xff] }
  0x98   : > { %1535 = vmatprep.mubr.f32.mxu1 %v5065_v9  ;;  %1638 = vmatpush2.msra.mxu0 %v1100_v12  ;;  %7449 = vst [vmem:[#allocation7_spill] sm:$0xff] %v5107_v4  ;;  %v1098_v12 = vld [vmem:[%s7397_s3 + $0x2d8] sm:$0xff] }
  0x99   : > { %1311 = vmatmul.mubr.f32.gmra.mxu0 %v5023_v47  ;;  %1536 = vmatmul.mubr.f32.gmra.mxu1 %v5073_v17  ;;  %v5149_v17 = vld [vmem:[%s4667_s12 + $0x128] sm:$0xff] }
  0x9a   : > { %1864 = vmatprep.subr.mxu1 %v7402_v2  ;;  %1639 = vmatprep.subr.mxu0 %v7402_v2  ;;  %7456 = vst [vmem:[#allocation13_spill] sm:$0xff] %v5149_v17 }
  0x9b   : > { %1865 = vmatpush2.msra.mxu1 %v1131_v25  ;;  %1315 = vmatprep.mubr.f32.mxu0 %v5081_v30  ;;  %v5115_v25 = vld [vmem:[%s4667_s12 + $0xfa] sm:$0xff] }
  0x9c   : > { %1540 = vmatprep.mubr.f32.mxu1 %v5086_v37  ;;  %1640 = vmatpush2.msra.mxu0 %v1099_v42  ;;  %7450 = vst [vmem:[#allocation8_spill] sm:$0xff] %v5115_v25  ;;  %v1129_v42 = vld [vmem:[%s7397_s3 + $0x3d0] sm:$0xff] }
  0x9d   : > { %1316 = vmatmul.mubr.f32.gmra.mxu0 %v5044_v60  ;;  %1541 = vmatmul.mubr.f32.gmra.mxu1 %v5094_v50  ;;  %v5123_v50 = vld [vmem:[%s4667_s12 + $0x109] sm:$0xff] }
  0x9e   : > { %1866 = vmatprep.subr.mxu1 %v7402_v2  ;;  %1641 = vmatprep.subr.mxu0 %v7402_v2  ;;  %7451 = vst [vmem:[#allocation9_spill] sm:$0xff] %v5123_v50  ;;  %v5128_v2 = vld [vmem:[%s4667_s12 + $0x120] sm:$0xff] }
  0x9f   : > { %1867 = vmatpush2.msra.mxu1 %v1130_v55  ;;  %1320 = vmatprep.mubr.f32.mxu0 %v5102_v62  ;;  %7452 = vst [vmem:[#allocation10_spill] sm:$0xff] %v5128_v2  ;;  %v1097_v55 = vld [vmem:[%s7397_s3 + $0x2d0] sm:$0xff]  ;;  %v7453_v62 = vmov 0.0  }
  0xa0   : > { %1545 = vmatprep.mubr.f32.mxu1 %v5107_v4  ;;  %1642 = vmatpush2.msra.mxu0 %v1098_v12  ;;  %v5136_v12 = vld [vmem:[%s4667_s12 + $0x10a] sm:$0xff] }
  0xa1   : > { %1321 = vmatmul.mubr.f32.gmra.mxu0 %v5065_v9  ;;  %1546 = vmatmul.mubr.f32.gmra.mxu1 %v5115_v25  ;;  %7454 = vst [vmem:[#allocation11_spill] sm:$0xff] %v5136_v12  ;;  %v1128_v25 = vld [vmem:[%s7397_s3 + $0x3c8] sm:$0xff]  ;;  %v5144_v9 = vld [vmem:[%s4667_s12 + $0x111] sm:$0xff] }
  0xa2   : > { %1868 = vmatprep.subr.mxu1 %v7453_v62  ;;  %1643 = vmatprep.subr.mxu0 %v7453_v62  ;;  %7455 = vst [vmem:[#allocation12_spill] sm:$0xff] %v5144_v9 }
  0xa3   : > { %1869 = vmatpush2.msra.mxu1 %v1129_v42  ;;  %1325 = vmatprep.mubr.f32.mxu0 %v5123_v50  ;;  %v1096_v42 = vld [vmem:[%s7397_s3 + $0x2c8] sm:$0xff]  ;;  %v5170_v50 = vld [vmem:[%s4667_s12 + $0x138] sm:$0xff] }
  0xa4   : > { %1550 = vmatprep.mubr.f32.mxu1 %v5128_v2  ;;  %1644 = vmatpush2.msra.mxu0 %v1097_v55  ;;  %v5157_v55 = vld [vmem:[%s4667_s12 + $0x112] sm:$0xff]  ;;  %7459 = vst [vmem:[#allocation16_spill] sm:$0xff] %v5170_v50 }
  0xa5   : > { %1326 = vmatmul.mubr.f32.gmra.mxu0 %v5086_v37  ;;  %1551 = vmatmul.mubr.f32.gmra.mxu1 %v5136_v12  ;;  %7457 = vst [vmem:[#allocation14_spill] sm:$0xff] %v5157_v55  ;;  %v1127_v12 = vld [vmem:[%s7397_s3 + $0x3c0] sm:$0xff] }
  0xa6   : > { %1870 = vmatprep.subr.mxu1 %v7453_v62  ;;  %1645 = vmatprep.subr.mxu0 %v7453_v62  ;;  %v5165_v37 = vld [vmem:[%s4667_s12 + $0x121] sm:$0xff] }
  0xa7   : > { %1871 = vmatpush2.msra.mxu1 %v1128_v25  ;;  %1330 = vmatprep.mubr.f32.mxu0 %v5144_v9  ;;  %7458 = vst [vmem:[#allocation15_spill] sm:$0xff] %v5165_v37  ;;  %v1095_v25 = vld [vmem:[%s7397_s3 + $0x2c0] sm:$0xff] }
  0xa8   : > { %1555 = vmatprep.mubr.f32.mxu1 %v5149_v17  ;;  %1646 = vmatpush2.msra.mxu0 %v1096_v42  ;;  %v5178_v42 = vld [vmem:[%s4667_s12 + $0x122] sm:$0xff] }
  0xa9   : > { %1331 = vmatmul.mubr.f32.gmra.mxu0 %v5107_v4  ;;  %1556 = vmatmul.mubr.f32.gmra.mxu1 %v5157_v55  ;;  %7460 = vst [vmem:[#allocation17_spill] sm:$0xff] %v5178_v42  ;;  %v1126_v55 = vld [vmem:[%s7397_s3 + $0x3b8] sm:$0xff]  ;;  %v5186_v4 = vld [vmem:[%s4667_s12 + $0x129] sm:$0xff]  ;;  %v5191_v9 = vld [vmem:[%s4667_s12 + $0x140] sm:$0xff] }
  0xaa   : > { %1872 = vmatprep.subr.mxu1 %v7453_v62  ;;  %1647 = vmatprep.subr.mxu0 %v7453_v62  ;;  %7461 = vst [vmem:[#allocation18_spill] sm:$0xff] %v5186_v4  ;;  %7462 = vst [vmem:[#allocation19_spill] sm:$0xff] %v5191_v9 }
  0xab   : > { %1873 = vmatpush2.msra.mxu1 %v1127_v12  ;;  %1335 = vmatprep.mubr.f32.mxu0 %v5165_v37  ;;  %v1094_v12 = vld [vmem:[%s7397_s3 + $0x2b8] sm:$0xff]  ;;  %v5212_v37 = vld [vmem:[%s4667_s12 + $0x150] sm:$0xff] }
  0xac   : > { %1560 = vmatprep.mubr.f32.mxu1 %v5170_v50  ;;  %1648 = vmatpush2.msra.mxu0 %v1095_v25  ;;  %v5199_v25 = vld [vmem:[%s4667_s12 + $0x12a] sm:$0xff]  ;;  %7465 = vst [vmem:[#allocation22_spill] sm:$0xff] %v5212_v37 }
  0xad   : > { %1336 = vmatmul.mubr.f32.gmra.mxu0 %v5128_v2  ;;  %1561 = vmatmul.mubr.f32.gmra.mxu1 %v5178_v42  ;;  %7463 = vst [vmem:[#allocation20_spill] sm:$0xff] %v5199_v25  ;;  %v1125_v42 = vld [vmem:[%s7397_s3 + $0x3b0] sm:$0xff]  ;;  %v5207_v2 = vld [vmem:[%s4667_s12 + $0x139] sm:$0xff] }
  0xae   : > { %1874 = vmatprep.subr.mxu1 %v7453_v62  ;;  %1649 = vmatprep.subr.mxu0 %v7453_v62  ;;  %7464 = vst [vmem:[#allocation21_spill] sm:$0xff] %v5207_v2 }
  0xaf   : > { %1875 = vmatpush2.msra.mxu1 %v1126_v55  ;;  %1340 = vmatprep.mubr.f32.mxu0 %v5186_v4  ;;  %v1093_v55 = vld [vmem:[%s7397_s3 + $0x2b0] sm:$0xff]  ;;  %v5233_v4 = vld [vmem:[%s4667_s12 + $0x158] sm:$0xff] }
  0xb0   : > { %1565 = vmatprep.mubr.f32.mxu1 %v5191_v9  ;;  %1650 = vmatpush2.msra.mxu0 %v1094_v12  ;;  %v5220_v12 = vld [vmem:[%s4667_s12 + $0x13a] sm:$0xff]  ;;  %7468 = vst [vmem:[#allocation25_spill] sm:$0xff] %v5233_v4 }
  0xb1   : > { %1341 = vmatmul.mubr.f32.gmra.mxu0 %v5149_v17  ;;  %1566 = vmatmul.mubr.f32.gmra.mxu1 %v5199_v25  ;;  %7466 = vst [vmem:[#allocation23_spill] sm:$0xff] %v5220_v12  ;;  %v1124_v25 = vld [vmem:[%s7397_s3 + $0x3a8] sm:$0xff] }
  0xb2   : > { %1876 = vmatprep.subr.mxu1 %v7453_v62  ;;  %1651 = vmatprep.subr.mxu0 %v7453_v62  ;;  %v5228_v17 = vld [vmem:[%s4667_s12 + $0x141] sm:$0xff] }
  0xb3   : > { %1877 = vmatpush2.msra.mxu1 %v1125_v42  ;;  %1345 = vmatprep.mubr.f32.mxu0 %v5207_v2  ;;  %7467 = vst [vmem:[#allocation24_spill] sm:$0xff] %v5228_v17  ;;  %v1092_v42 = vld [vmem:[%s7397_s3 + $0x2a8] sm:$0xff] }
  0xb4   : > { %1570 = vmatprep.mubr.f32.mxu1 %v5212_v37  ;;  %1652 = vmatpush2.msra.mxu0 %v1093_v55  ;;  %v5241_v55 = vld [vmem:[%s4667_s12 + $0x142] sm:$0xff] }
  0xb5   : > { %1346 = vmatmul.mubr.f32.gmra.mxu0 %v5170_v50  ;;  %1571 = vmatmul.mubr.f32.gmra.mxu1 %v5220_v12  ;;  %7469 = vst [vmem:[#allocation26_spill] sm:$0xff] %v5241_v55  ;;  %v1123_v12 = vld [vmem:[%s7397_s3 + $0x3a0] sm:$0xff]  ;;  %v5249_v50 = vld [vmem:[%s4667_s12 + $0x151] sm:$0xff]  ;;  %v5254_v2 = vld [vmem:[%s4667_s12 + $0x168] sm:$0xff] }
  0xb6   : > { %1878 = vmatprep.subr.mxu1 %v7453_v62  ;;  %1653 = vmatprep.subr.mxu0 %v7453_v62  ;;  %7470 = vst [vmem:[#allocation27_spill] sm:$0xff] %v5249_v50 }
  0xb7   : > { %1879 = vmatpush2.msra.mxu1 %v1124_v25  ;;  %1350 = vmatprep.mubr.f32.mxu0 %v5228_v17  ;;  %v1091_v25 = vld [vmem:[%s7397_s3 + $0x2a0] sm:$0xff]  ;;  %v5275_v17 = vld [vmem:[%s4667_s12 + $0x170] sm:$0xff] }
  0xb8   : > { %1575 = vmatprep.mubr.f32.mxu1 %v5233_v4  ;;  %1654 = vmatpush2.msra.mxu0 %v1092_v42  ;;  %v5262_v42 = vld [vmem:[%s4667_s12 + $0x152] sm:$0xff] }
  0xb9   : > { %1351 = vmatmul.mubr.f32.gmra.mxu0 %v5191_v9  ;;  %1576 = vmatmul.mubr.f32.gmra.mxu1 %v5241_v55  ;;  %7471 = vst [vmem:[#allocation28_spill] sm:$0xff] %v5262_v42  ;;  %v1122_v55 = vld [vmem:[%s7397_s3 + $0x398] sm:$0xff] }
  0xba   : > { %1880 = vmatprep.subr.mxu1 %v7453_v62  ;;  %1655 = vmatprep.subr.mxu0 %v7453_v62  ;;  %v5270_v9 = vld [vmem:[%s4667_s12 + $0x159] sm:$0xff] }
  0xbb   : > { %1881 = vmatpush2.msra.mxu1 %v1123_v12  ;;  %1355 = vmatprep.mubr.f32.mxu0 %v5249_v50  ;;  %7472 = vst [vmem:[#allocation29_spill] sm:$0xff] %v5270_v9  ;;  %v1090_v12 = vld [vmem:[%s7397_s3 + $0x298] sm:$0xff]  ;;  %v5296_v50 = vld [vmem:[%s4667_s12 + $0x180] sm:$0xff] }
  0xbc   : > { %1580 = vmatprep.mubr.f32.mxu1 %v5254_v2  ;;  %1656 = vmatpush2.msra.mxu0 %v1091_v25  ;;  %v5283_v25 = vld [vmem:[%s4667_s12 + $0x15a] sm:$0xff]  ;;  %7474 = vst [vmem:[#allocation31_spill] sm:$0xff] %v5296_v50 }
  0xbd   : > { %1356 = vmatmul.mubr.f32.gmra.mxu0 %v5212_v37  ;;  %1581 = vmatmul.mubr.f32.gmra.mxu1 %v5262_v42  ;;  %7473 = vst [vmem:[#allocation30_spill] sm:$0xff] %v5283_v25  ;;  %v1121_v42 = vld [vmem:[%s7397_s3 + $0x390] sm:$0xff] }
  0xbe   : > { %1882 = vmatprep.subr.mxu1 %v7453_v62  ;;  %1657 = vmatprep.subr.mxu0 %v7453_v62  ;;  %v5291_v37 = vld [vmem:[%s4667_s12 + $0x169] sm:$0xff] }
  0xbf   : > { %1883 = vmatpush2.msra.mxu1 %v1122_v55  ;;  %1360 = vmatprep.mubr.f32.mxu0 %v5270_v9  ;;  %v1089_v55 = vld [vmem:[%s7397_s3 + $0x290] sm:$0xff]  ;;  %v5317_v9 = vld [vmem:[%s4667_s12 + $0x188] sm:$0xff] }
  0xc0   : > { %1585 = vmatprep.mubr.f32.mxu1 %v5275_v17  ;;  %1658 = vmatpush2.msra.mxu0 %v1090_v12  ;;  %v5304_v12 = vld [vmem:[%s4667_s12 + $0x16a] sm:$0xff] }
  0xc1   : > { %1361 = vmatmul.mubr.f32.gmra.mxu0 %v5233_v4  ;;  %1586 = vmatmul.mubr.f32.gmra.mxu1 %v5283_v25  ;;  %7475 = vst [vmem:[#allocation32_spill] sm:$0xff] %v5304_v12  ;;  %v1120_v25 = vld [vmem:[%s7397_s3 + $0x388] sm:$0xff]  ;;  %v5312_v4 = vld [vmem:[%s4667_s12 + $0x171] sm:$0xff] }
  0xc2   : > { %1884 = vmatprep.subr.mxu1 %v7453_v62  ;;  %1659 = vmatprep.subr.mxu0 %v7453_v62 }
  0xc3   : > { %1885 = vmatpush2.msra.mxu1 %v1121_v42  ;;  %1365 = vmatprep.mubr.f32.mxu0 %v5291_v37  ;;  %v1088_v42 = vld [vmem:[%s7397_s3 + $0x288] sm:$0xff] }
  0xc4   : > { %1590 = vmatprep.mubr.f32.mxu1 %v5296_v50  ;;  %1660 = vmatpush2.msra.mxu0 %v1089_v55  ;;  %v5325_v55 = vld [vmem:[%s4667_s12 + $0x172] sm:$0xff]  ;;  %v1119_v50 = vld [vmem:[%s7397_s3 + $0x380] sm:$0xff] }
  0xc5   : > { %1366 = vmatmul.mubr.f32.gmra.mxu0 %v5254_v2  ;;  %1591 = vmatmul.mubr.f32.gmra.mxu1 %v5304_v12  ;;  %v1087_v12 = vld [vmem:[%s7397_s3 + $0x280] sm:$0xff] }
  0xc6   : > { %1886 = vmatprep.subr.mxu1 %v7453_v62  ;;  %1661 = vmatprep.subr.mxu0 %v7453_v62 }
  0xc7   : > { %1887 = vmatpush2.msra.mxu1 %v1120_v25  ;;  %1370 = vmatprep.mubr.f32.mxu0 %v5312_v4  ;;  %v1150_v25 = vld [vmem:[%s7397_s3 + $0x478] sm:$0xff] }
  0xc8   : > { %1595 = vmatprep.mubr.f32.mxu1 %v5317_v9  ;;  %1662 = vmatpush2.msra.mxu0 %v1088_v42  ;;  %v588_v42 = vld [vmem:[%s7396_s2 + $0x78] sm:$0xff] }
  0xc9   : > { %1371 = vmatmul.mubr.f32.gmra.mxu0 %v5275_v17  ;;  %1596 = vmatmul.mubr.f32.gmra.mxu1 %v5325_v55 }
  0xca   : > { %1888 = vmatprep.subr.mxu1 %v7453_v62  ;;  %1663 = vmatprep.subr.mxu0 %v7453_v62 }
  0xcb   : > { %1889 = vmatpush2.msra.mxu1 %v1119_v50  ;;  %1664 = vmatpush2.msra.mxu0 %v1087_v12  ;;  %v7482_v12 = vld [vmem:[#allocation8_spill] sm:$0xff] }
  0xcc   : > { %1665 = vmatprep.mubr.f32.mxu0 %v4718_v16  ;;  %1890 = vmatprep.mubr.f32.mxu1 %v4746_v23  ;;  %v587_v16 = vld [vmem:[%s7396_s2 + $0x70] sm:$0xff] }
  0xcd   : > { %1666 = vmatmul.mubr.f32.vlgmr.msra.gmra.mxu0 %v4707_v13  ;;  %1891 = vmatmul.mubr.f32.vlgmr.msra.gmra.mxu1 %v4710_v14  ;;  %v1149_v13 = vld [vmem:[%s7397_s3 + $0x470] sm:$0xff]  ;;  %v586_v14 = vld [vmem:[%s7396_s2 + $0x68] sm:$0xff] }
  0xce   : > { %2276 = vmatprep.subr.mxu1 %v7453_v62  ;;  %4193 = vmatprep.subr.mxu0 %v1150_v25 }
  0xcf   : > { %2277 = vmatpush1.msra.mxu1 %v588_v42  ;;  %1670 = vmatprep.mubr.f32.mxu0 %v4738_v21  ;;  %v584_v21 = vld [vmem:[%s7396_s2 + $0x58] sm:$0xff] }
  0xd0   : > { %1895 = vmatprep.mubr.f32.mxu1 %v4766_v28  ;;  %4194 = vmatpush3.msra.mxu0 %v1150_v25  ;;  %v7483_v25 = vld [vmem:[#allocation12_spill] sm:$0xff] }
  0xd1   : > { %1671 = vmatmul.mubr.f32.gmra.mxu0 %v4726_v18  ;;  %1896 = vmatmul.mubr.f32.gmra.mxu1 %v4730_v19  ;;  %v1148_v18 = vld [vmem:[%s7397_s3 + $0x468] sm:$0xff]  ;;  %v585_v19 = vld [vmem:[%s7396_s2 + $0x60] sm:$0xff] }
  0xd2   : > { %2278 = vmatprep.subr.mxu1 %v7453_v62  ;;  %1675 = vmatprep.mubr.f32.mxu0 %v4758_v26  ;;  %v1146_v26 = vld [vmem:[%s7397_s3 + $0x458] sm:$0xff] }
  0xd3   : > { %2279 = vmatpush1.msra.mxu1 %v587_v16  ;;  %1900 = vmatprep.mubr.f32.mxu1 %v4787_v33 }
  0xd4   : > { %2280 = vmatprep.subr.mxu1 %v7453_v62  ;;  %4195 = vmatprep.subr.mxu0 %v1149_v13 }
  0xd5   : > { %1676 = vmatmul.mubr.f32.gmra.mxu0 %v4746_v23  ;;  %1901 = vmatmul.mubr.f32.gmra.mxu1 %v4750_v24  ;;  %v1147_v23 = vld [vmem:[%s7397_s3 + $0x460] sm:$0xff]  ;;  %v583_v24 = vld [vmem:[%s7396_s2 + $0x50] sm:$0xff] }
  0xd6   : > { %2281 = vmatpush1.msra.mxu1 %v586_v14  ;;  %1680 = vmatprep.mubr.f32.mxu0 %v4779_v31  ;;  %v581_v31 = vld [vmem:[%s7396_s2 + $0x40] sm:$0xff] }
  0xd7   : > { %1905 = vmatprep.mubr.f32.mxu1 %v4808_v38  ;;  %4196 = vmatpush3.msra.mxu0 %v1149_v13 }
  0xd8   : > { %2282 = vmatprep.subr.mxu1 %v7453_v62  ;;  %4197 = vmatprep.subr.mxu0 %v1148_v18 }
  0xd9   : > { %1681 = vmatmul.mubr.f32.gmra.mxu0 %v4766_v28  ;;  %1906 = vmatmul.mubr.f32.gmra.mxu1 %v4771_v29  ;;  %v582_v28 = vld [vmem:[%s7396_s2 + $0x48] sm:$0xff]  ;;  %v1145_v29 = vld [vmem:[%s7397_s3 + $0x450] sm:$0xff] }
  0xda   : > { %2283 = vmatpush1.msra.mxu1 %v585_v19  ;;  %1685 = vmatprep.mubr.f32.mxu0 %v4800_v36  ;;  %v1143_v36 = vld [vmem:[%s7397_s3 + $0x440] sm:$0xff] }
  0xdb   : > { %1910 = vmatprep.mubr.f32.mxu1 %v4829_v43  ;;  %2284 = vmatprep.subr.mxu1 %v7453_v62 }
  0xdc   : > { %2285 = vmatpush1.msra.mxu1 %v584_v21  ;;  %4198 = vmatpush3.msra.mxu0 %v1148_v18  ;;  %v600_v18 = vld [vmem:[%s7396_s2 + $0xd8] sm:$0xff]  ;;  %v7485_v21 = vld [vmem:[#allocation11_spill] sm:$0xff] }
  0xdd   : > { %1686 = vmatmul.mubr.f32.gmra.mxu0 %v4787_v33  ;;  %1911 = vmatmul.mubr.f32.gmra.mxu1 %v4792_v34  ;;  %v1144_v33 = vld [vmem:[%s7397_s3 + $0x448] sm:$0xff]  ;;  %v580_v34 = vld [vmem:[%s7396_s2 + $0x38] sm:$0xff] }
  0xde   : > { %1690 = vmatprep.mubr.f32.mxu0 %v4821_v41  ;;  %1915 = vmatprep.mubr.f32.mxu1 %v4850_v48  ;;  %v578_v41 = vld [vmem:[%s7396_s2 + $0x28] sm:$0xff] }
  0xdf   : > { %2286 = vmatprep.subr.mxu1 %v7453_v62  ;;  %4199 = vmatprep.subr.mxu0 %v1147_v23 }
  0xe0   : > { %2287 = vmatpush1.msra.mxu1 %v583_v24  ;;  %4200 = vmatpush3.msra.mxu0 %v1147_v23  ;;  %v7486_v23 = vld [vmem:[#allocation15_spill] sm:$0xff] }
  0xe1   : > { %1691 = vmatmul.mubr.f32.gmra.mxu0 %v4808_v38  ;;  %1916 = vmatmul.mubr.f32.gmra.mxu1 %v4813_v39  ;;  %v579_v38 = vld [vmem:[%s7396_s2 + $0x30] sm:$0xff]  ;;  %v1142_v39 = vld [vmem:[%s7397_s3 + $0x438] sm:$0xff] }
  0xe2   : > { %1695 = vmatprep.mubr.f32.mxu0 %v4842_v46  ;;  %1920 = vmatprep.mubr.f32.mxu1 %v4871_v53  ;;  %v1140_v46 = vld [vmem:[%s7397_s3 + $0x428] sm:$0xff] }
  0xe3   : > { %2288 = vmatprep.subr.mxu1 %v7453_v62  ;;  %4201 = vmatprep.subr.mxu0 %v1146_v26 }
  0xe4   : > { %2289 = vmatpush1.msra.mxu1 %v582_v28  ;;  %4202 = vmatpush3.msra.mxu0 %v1146_v26 }
  0xe5   : > { %1696 = vmatmul.mubr.f32.gmra.mxu0 %v4829_v43  ;;  %1921 = vmatmul.mubr.f32.gmra.mxu1 %v4834_v44  ;;  %v1141_v43 = vld [vmem:[%s7397_s3 + $0x430] sm:$0xff]  ;;  %v577_v44 = vld [vmem:[%s7396_s2 + $0x20] sm:$0xff] }
  0xe6   : > { %1700 = vmatprep.mubr.f32.mxu0 %v4863_v51  ;;  %1925 = vmatprep.mubr.f32.mxu1 %v4892_v58  ;;  %v575_v51 = vld [vmem:[%s7396_s2 + $0x10] sm:$0xff] }
  0xe7   : > { %2290 = vmatprep.subr.mxu1 %v7453_v62  ;;  %4203 = vmatprep.subr.mxu0 %v1145_v29 }
  0xe8   : > { %2291 = vmatpush1.msra.mxu1 %v581_v31  ;;  %4204 = vmatpush3.msra.mxu0 %v1145_v29  ;;  %v7487_v31 = vld [vmem:[#allocation10_spill] sm:$0xff] }
  0xe9   : > { %1701 = vmatmul.mubr.f32.gmra.mxu0 %v4850_v48  ;;  %1926 = vmatmul.mubr.f32.gmra.mxu1 %v4855_v49  ;;  %v576_v48 = vld [vmem:[%s7396_s2 + $0x18] sm:$0xff]  ;;  %v1139_v49 = vld [vmem:[%s7397_s3 + $0x420] sm:$0xff] }
  0xea   : > { %1705 = vmatprep.mubr.f32.mxu0 %v4884_v56  ;;  %1930 = vmatprep.mubr.f32.mxu1 %v4913_v63  ;;  %v1137_v56 = vld [vmem:[%s7397_s3 + $0x410] sm:$0xff] }
  0xeb   : > { %2292 = vmatprep.subr.mxu1 %v7453_v62  ;;  %4205 = vmatprep.subr.mxu0 %v1144_v33 }
  0xec   : > { %2293 = vmatpush1.msra.mxu1 %v580_v34  ;;  %4206 = vmatpush3.msra.mxu0 %v1144_v33  ;;  %v599_v33 = vld [vmem:[%s7396_s2 + $0xd0] sm:$0xff] }
  0xed   : > { %1706 = vmatmul.mubr.f32.gmra.mxu0 %v4871_v53  ;;  %1931 = vmatmul.mubr.f32.gmra.mxu1 %v4876_v54  ;;  %v1138_v53 = vld [vmem:[%s7397_s3 + $0x418] sm:$0xff]  ;;  %v574_v54 = vld [vmem:[%s7396_s2 + $0x8] sm:$0xff] }
  0xee   : > { %1710 = vmatprep.mubr.f32.mxu0 %v4905_v61  ;;  %1935 = vmatprep.mubr.f32.mxu1 %v4934_v5  ;;  %v604_v61 = vld [vmem:[%s7396_s2 + $0xf8] sm:$0xff] }
  0xef   : > { %2294 = vmatprep.subr.mxu1 %v7453_v62  ;;  %4207 = vmatprep.subr.mxu0 %v1143_v36 }
  0xf0   : > { %2295 = vmatpush1.msra.mxu1 %v579_v38  ;;  %4208 = vmatpush3.msra.mxu0 %v1143_v36  ;;  %v7488_v36 = vld [vmem:[#allocation14_spill] sm:$0xff] }
  0xf1   : > { %1711 = vmatmul.mubr.f32.gmra.mxu0 %v4892_v58  ;;  %1936 = vmatmul.mubr.f32.gmra.mxu1 %v4897_v59  ;;  %v573_v58 = vld [vmem:[%s7396_s2] sm:$0xff]  ;;  %v1136_v59 = vld [vmem:[%s7397_s3 + $0x408] sm:$0xff] }
  0xf2   : > { %1715 = vmatprep.mubr.f32.mxu0 %v4926_v3  ;;  %1940 = vmatprep.mubr.f32.mxu1 %v4955_v10  ;;  %v7489_v38 = vld [vmem:[#allocation18_spill] sm:$0xff] }
  0xf3   : > { %2296 = vmatprep.subr.mxu1 %v7453_v62  ;;  %4209 = vmatprep.subr.mxu0 %v1142_v39 }
  0xf4   : > { %2297 = vmatpush1.msra.mxu1 %v578_v41  ;;  %4210 = vmatpush3.msra.mxu0 %v1142_v39 }
  0xf5   : > { %1716 = vmatmul.mubr.f32.gmra.mxu0 %v4913_v63  ;;  %1941 = vmatmul.mubr.f32.gmra.mxu1 %v4918_v0  ;;  %v1135_v63 = vld [vmem:[%s7397_s3 + $0x400] sm:$0xff] }
  0xf6   : > { %1720 = vmatprep.mubr.f32.mxu0 %v4947_v8  ;;  %1945 = vmatprep.mubr.f32.mxu1 %v4976_v20  ;;  %v7476_v8 = vld [vmem:[#allocation3_spill] sm:$0xff] }
  0xf7   : > { %2298 = vmatprep.subr.mxu1 %v7453_v62  ;;  %4211 = vmatprep.subr.mxu0 %v1141_v43 }
  0xf8   : > { %2299 = vmatpush1.msra.mxu1 %v577_v44  ;;  %4212 = vmatpush3.msra.mxu0 %v1141_v43 }
  0xf9   : > { %1721 = vmatmul.mubr.f32.gmra.mxu0 %v4934_v5  ;;  %1946 = vmatmul.mubr.f32.gmra.mxu1 %v4939_v6  ;;  %v603_v5 = vld [vmem:[%s7396_s2 + $0xf0] sm:$0xff] }
  0xfa   : > { %1725 = vmatprep.mubr.f32.mxu0 %v4968_v15  ;;  %1950 = vmatprep.mubr.f32.mxu1 %v4997_v32 }
  0xfb   : > { %2300 = vmatprep.subr.mxu1 %v7453_v62  ;;  %4213 = vmatprep.subr.mxu0 %v1140_v46 }
  0xfc   : > { %2301 = vmatpush1.msra.mxu1 %v576_v48  ;;  %4214 = vmatpush3.msra.mxu0 %v1140_v46  ;;  %v7490_v46 = vld [vmem:[#allocation13_spill] sm:$0xff]  ;;  %v598_v48 = vld [vmem:[%s7396_s2 + $0xc8] sm:$0xff] }
  0xfd   : > { %1726 = vmatmul.mubr.f32.gmra.mxu0 %v4955_v10  ;;  %1951 = vmatmul.mubr.f32.gmra.mxu1 %v4960_v11  ;;  %v7477_v10 = vld [vmem:[#allocation6_spill] sm:$0xff] }
  0xfe   : > { %1730 = vmatprep.mubr.f32.mxu0 %v4989_v27  ;;  %1955 = vmatprep.mubr.f32.mxu1 %v5018_v45  ;;  %v7478_v27 = vld [vmem:[#allocation2_spill] sm:$0xff] }
  0xff   : > { %2302 = vmatprep.subr.mxu1 %v7453_v62  ;;  %4215 = vmatprep.subr.mxu0 %v1139_v49 }
 0x100   : > { %2303 = vmatpush1.msra.mxu1 %v575_v51  ;;  %4216 = vmatpush3.msra.mxu0 %v1139_v49  ;;  %v7491_v51 = vld [vmem:[#allocation17_spill] sm:$0xff] }
 0x101   : > { %1731 = vmatmul.mubr.f32.gmra.mxu0 %v4976_v20  ;;  %1956 = vmatmul.mubr.f32.gmra.mxu1 %v4981_v22 }
 0x102   : > { %1735 = vmatprep.mubr.f32.mxu0 %v5010_v40  ;;  %1960 = vmatprep.mubr.f32.mxu1 %v5039_v57  ;;  %v7479_v40 = vld [vmem:[#allocation5_spill] sm:$0xff] }
 0x103   : > { %2304 = vmatprep.subr.mxu1 %v7453_v62  ;;  %4217 = vmatprep.subr.mxu0 %v1138_v53 }
 0x104   : > { %2305 = vmatpush1.msra.mxu1 %v574_v54  ;;  %4218 = vmatpush3.msra.mxu0 %v1138_v53  ;;  %v7492_v53 = vld [vmem:[#allocation21_spill] sm:$0xff] }
 0x105   : > { %1736 = vmatmul.mubr.f32.gmra.mxu0 %v4997_v32  ;;  %1961 = vmatmul.mubr.f32.gmra.mxu1 %v5002_v35  ;;  %v602_v32 = vld [vmem:[%s7396_s2 + $0xe8] sm:$0xff] }
 0x106   : > { %1740 = vmatprep.mubr.f32.mxu0 %v5031_v52  ;;  %1965 = vmatprep.mubr.f32.mxu1 %v5060_v7 }
 0x107   : > { %2306 = vmatprep.subr.mxu1 %v7453_v62  ;;  %4219 = vmatprep.subr.mxu0 %v1137_v56 }
 0x108   : > { %2307 = vmatpush1.msra.mxu1 %v573_v58  ;;  %4220 = vmatpush3.msra.mxu0 %v1137_v56 }
 0x109   : > { %1741 = vmatmul.mubr.f32.gmra.mxu0 %v5018_v45  ;;  %1966 = vmatmul.mubr.f32.gmra.mxu1 %v5023_v47  ;;  %v7480_v45 = vld [vmem:[#allocation9_spill] sm:$0xff] }
 0x10a   : > { %1745 = vmatprep.mubr.f32.mxu0 %v5052_v1  ;;  %1970 = vmatprep.mubr.f32.mxu1 %v5081_v30  ;;  %v7481_v1 = vld [vmem:[#allocation4_spill] sm:$0xff] }
 0x10b   : > { %2308 = vmatprep.subr.mxu1 %v7453_v62  ;;  %4221 = vmatprep.subr.mxu0 %v1136_v59 }
 0x10c   : > { %2309 = vmatpush2.msra.mxu1 %v604_v61  ;;  %4222 = vmatpush3.msra.mxu0 %v1136_v59  ;;  %v7493_v61 = vld [vmem:[#allocation16_spill] sm:$0xff] }
 0x10d   : > { %v1217_v0 = vpop.f32.mrf.mxu0  ;;  %v1442_v3 = vpop.f32.mrf.mxu1  ;;  %1746 = vmatmul.mubr.f32.gmra.mxu0 %v5039_v57  ;;  %1971 = vmatmul.mubr.f32.gmra.mxu1 %v5044_v60 }
 0x10e   : > { %v5526_v6 = vadd.f32 %v1442_v3, %v1217_v0  ;;  %1750 = vmatprep.mubr.f32.mxu0 %v7476_v8  ;;  %1975 = vmatprep.mubr.f32.mxu1 %v7477_v10  ;;  %v7494_v3 = vld [vmem:[#allocation20_spill] sm:$0xff] }
 0x10f   : > { %v1219_v11 = vpop.f32.mrf.mxu0  ;;  %v1444_v15 = vpop.f32.mrf.mxu1  ;;  %2310 = vmatprep.subr.mxu1 %v7453_v62  ;;  %4223 = vmatprep.subr.mxu0 %v1135_v63 }
 0x110   : > { %2311 = vmatpush2.msra.mxu1 %v603_v5  ;;  %4224 = vmatpush3.msra.mxu0 %v1135_v63  ;;  %v597_v63 = vld [vmem:[%s7396_s2 + $0xc0] sm:$0xff]  ;;  %v7495_v5 = vld [vmem:[#allocation24_spill] sm:$0xff] }
 0x111   : > { %v1222_v20 = vpop.f32.mrf.mxu0  ;;  %v1447_v22 = vpop.f32.mrf.mxu1  ;;  %1751 = vmatmul.mubr.f32.gmra.mxu0 %v5060_v7  ;;  %1976 = vmatmul.mubr.f32.gmra.mxu1 %v7478_v27  ;;  %v601_v7 = vld [vmem:[%s7396_s2 + $0xe0] sm:$0xff] }
 0x112   : > { %v5536_v35 = vadd.f32 %v1447_v22, %v1222_v20  ;;  %1755 = vmatprep.mubr.f32.mxu0 %v7479_v40  ;;  %1980 = vmatprep.mubr.f32.mxu1 %v7480_v45  ;;  %v7496_v20 = vld [vmem:[#allocation19_spill] sm:$0xff]  ;;  %v596_v22 = vld [vmem:[%s7396_s2 + $0xb8] sm:$0xff] }
 0x113   : > { %v1224_v47 = vpop.f32.mrf.mxu0  ;;  %v1449_v52 = vpop.f32.mrf.mxu1  ;;  %2312 = vmatprep.subr.mxu1 %v7453_v62  ;;  %2501 = vmatprep.subr.mxu0 %v7453_v62  ;;  %v7498_v40 = vld [vmem:[#allocation27_spill] sm:$0xff] }
 0x114   : > { %2313 = vmatpush2.msra.mxu1 %v602_v32  ;;  %v7497_v32 = vld [vmem:[#allocation23_spill] sm:$0xff] }
 0x115   : > { %v1227_v57 = vpop.f32.mrf.mxu0  ;;  %v1452_v60 = vpop.f32.mrf.mxu1  ;;  %1756 = vmatmul.mubr.f32.gmra.mxu0 %v5081_v30  ;;  %1981 = vmatmul.mubr.f32.gmra.mxu1 %v7481_v1  ;;  %v7484_v30 = vld [vmem:[#allocation7_spill] sm:$0xff]  ;;  %v595_v1 = vld [vmem:[%s7396_s2 + $0xb0] sm:$0xff] }
 0x116   : > { %v5547_v50 = vadd.f32 %v1452_v60, %v1227_v57  ;;  %1760 = vmatprep.mubr.f32.mxu0 %v7482_v12  ;;  %1985 = vmatprep.mubr.f32.mxu1 %v7483_v25  ;;  %v7499_v60 = vld [vmem:[#allocation22_spill] sm:$0xff] }
 0x117   : > { %v1229_v42 = vpop.f32.mrf.mxu0  ;;  %v1454_v16 = vpop.f32.mrf.mxu1  ;;  %2314 = vmatprep.subr.mxu1 %v7453_v62  ;;  %v7500_v12 = vld [vmem:[#allocation26_spill] sm:$0xff] }
 0x118   : > { %2315 = vmatpush2.msra.mxu1 %v601_v7 }
 0x119   : > { %v1232_v13 = vpop.f32.mrf.mxu0  ;;  %v1457_v14 = vpop.f32.mrf.mxu1  ;;  %1761 = vmatmul.mubr.f32.gmra.mxu0 %v7477_v10  ;;  %1986 = vmatmul.mubr.f32.gmra.mxu1 %v7484_v30  ;;  %v7502_v30 = vld [vmem:[#allocation25_spill] sm:$0xff] }
 0x11a   : > { %v5557_v19 = vadd.f32 %v1457_v14, %v1232_v13  ;;  %1765 = vmatprep.mubr.f32.mxu0 %v7485_v21  ;;  %1990 = vmatprep.mubr.f32.mxu1 %v7486_v23 }
 0x11b   : > { %v1234_v24 = vpop.f32.mrf.mxu0  ;;  %v1459_v26 = vpop.f32.mrf.mxu1  ;;  %2316 = vmatprep.subr.mxu1 %v7453_v62 }
 0x11c   : > { %2317 = vmatpush2.msra.mxu1 %v600_v18  ;;  %v594_v18 = vld [vmem:[%s7396_s2 + $0xa8] sm:$0xff] }
 0x11d   : > { %v1237_v28 = vpop.f32.mrf.mxu0  ;;  %v1462_v29 = vpop.f32.mrf.mxu1  ;;  %1766 = vmatmul.mubr.f32.gmra.mxu0 %v7480_v45  ;;  %1991 = vmatmul.mubr.f32.gmra.mxu1 %v7487_v31  ;;  %v593_v31 = vld [vmem:[%s7396_s2 + $0xa0] sm:$0xff] }
 0x11e   : > { %v5567_v34 = vadd.f32 %v1462_v29, %v1237_v28  ;;  %1770 = vmatprep.mubr.f32.mxu0 %v7488_v36  ;;  %1995 = vmatprep.mubr.f32.mxu1 %v7489_v38  ;;  %v7504_v36 = vld [vmem:[#allocation30_spill] sm:$0xff] }
 0x11f   : > { %v1239_v39 = vpop.f32.mrf.mxu0  ;;  %v1464_v41 = vpop.f32.mrf.mxu1  ;;  %2318 = vmatprep.subr.mxu1 %v7453_v62 }
 0x120   : > { %2319 = vmatpush2.msra.mxu1 %v599_v33  ;;  %v4057_v41 = vld [vmem:[%s4667_s12 + $0x181] sm:$0xff] }
 0x121   : > { %v1242_v43 = vpop.f32.mrf.mxu0  ;;  %v1467_v44 = vpop.f32.mrf.mxu1  ;;  %1771 = vmatmul.mubr.f32.gmra.mxu0 %v7483_v25  ;;  %1996 = vmatmul.mubr.f32.gmra.mxu1 %v7490_v46  ;;  %v7501_v25 = vld [vmem:[#allocation29_spill] sm:$0xff] }
 0x122   : > { %v5577_v49 = vadd.f32 %v1467_v44, %v1242_v43  ;;  %1775 = vmatprep.mubr.f32.mxu0 %v7491_v51  ;;  %2000 = vmatprep.mubr.f32.mxu1 %v7492_v53 }
 0x123   : > { %v1244_v54 = vpop.f32.mrf.mxu0  ;;  %v1469_v56 = vpop.f32.mrf.mxu1  ;;  %2320 = vmatprep.subr.mxu1 %v7453_v62 }
 0x124   : > { %2321 = vmatpush2.msra.mxu1 %v598_v48  ;;  %v7505_v48 = vld [vmem:[#allocation32_spill] sm:$0xff] }
 0x125   : > { %v1247_v58 = vpop.f32.mrf.mxu0  ;;  %v1472_v59 = vpop.f32.mrf.mxu1  ;;  %1776 = vmatmul.mubr.f32.gmra.mxu0 %v7486_v23  ;;  %2001 = vmatmul.mubr.f32.gmra.mxu1 %v7493_v61  ;;  %v7503_v23 = vld [vmem:[#allocation28_spill] sm:$0xff] }
 0x126   : > { %v5587_v0 = vadd.f32 %v1472_v59, %v1247_v58  ;;  %1780 = vmatprep.mubr.f32.mxu0 %v7494_v3  ;;  %2005 = vmatprep.mubr.f32.mxu1 %v7495_v5  ;;  %v4058_v54 = vld [vmem:[%s4667_s12 + $0x189] sm:$0xff] }
 0x127   : > { %v1249_v8 = vpop.f32.mrf.mxu0  ;;  %v1474_v10 = vpop.f32.mrf.mxu1  ;;  %2322 = vmatprep.subr.mxu1 %v7453_v62  ;;  %v591_v59 = vld [vmem:[%s7396_s2 + $0x90] sm:$0xff] }
 0x128   : > { %2323 = vmatpush2.msra.mxu1 %v597_v63 }
 0x129   : > { %v1252_v11 = vpop.f32.mrf.mxu0  ;;  %v1477_v15 = vpop.f32.mrf.mxu1  ;;  %1781 = vmatmul.mubr.f32.gmra.mxu0 %v7489_v38  ;;  %2006 = vmatmul.mubr.f32.gmra.mxu1 %v7496_v20 }
 0x12a   : > { %v5597_v27 = vadd.f32 %v1477_v15, %v1252_v11  ;;  %1785 = vmatprep.mubr.f32.mxu0 %v7497_v32  ;;  %2010 = vmatprep.mubr.f32.mxu1 %v7498_v40  ;;  %v4027_v15 = vld [vmem:[%s4667_s12 + $0x198] sm:$0xff]  ;;  %v5667_v32 = vld [vmem:[%s4667_s12 + $0x18a] sm:$0xff] }
 0x12b   : > { %v1254_v45 = vpop.f32.mrf.mxu0  ;;  %v1479_v47 = vpop.f32.mrf.mxu1  ;;  %2324 = vmatprep.subr.mxu1 %v7453_v62 }
 0x12c   : > { %2325 = vmatpush2.msra.mxu1 %v596_v22  ;;  %v589_v45 = vld [vmem:[%s7396_s2 + $0x80] sm:$0xff] }
 0x12d   : > { %v1257_v52 = vpop.f32.mrf.mxu0  ;;  %v1482_v57 = vpop.f32.mrf.mxu1  ;;  %1786 = vmatmul.mubr.f32.gmra.mxu0 %v7492_v53  ;;  %2011 = vmatmul.mubr.f32.gmra.mxu1 %v7499_v60 }
 0x12e   : > { %v5607_v7 = vadd.f32 %v1482_v57, %v1257_v52  ;;  %1790 = vmatprep.mubr.f32.mxu0 %v7500_v12  ;;  %2015 = vmatprep.mubr.f32.mxu1 %v7501_v25  ;;  %v4028_v52 = vld [vmem:[%s4667_s12 + $0x1a0] sm:$0xff] }
 0x12f   : > { %v1259_v42 = vpop.f32.mrf.mxu0  ;;  %v1484_v16 = vpop.f32.mrf.mxu1  ;;  %2326 = vmatprep.subr.mxu1 %v7453_v62  ;;  %v315_v12 = vld [vmem:[%s5675_s28 + $0x1] sm:$0xff] }
 0x130   : > { %2327 = vmatpush2.msra.mxu1 %v595_v1  ;;  %v4061_v1 = vld [vmem:[%s4667_s12 + $0x32] sm:$0xff] }
 0x131   : > { %v1262_v13 = vpop.f32.mrf.mxu0  ;;  %v1487_v14 = vpop.f32.mrf.mxu1  ;;  %1791 = vmatmul.mubr.f32.gmra.mxu0 %v7495_v5  ;;  %2016 = vmatmul.mubr.f32.gmra.mxu1 %v7502_v30  ;;  %v5653_v5 = vld [vmem:[%s4667_s12 + $0x182] sm:$0xff] }
 0x132   : > { %v5617_v21 = vadd.f32 %v1487_v14, %v1262_v13  ;;  %1795 = vmatprep.mubr.f32.mxu0 %v7503_v23  ;;  %2020 = vmatprep.mubr.f32.mxu1 %v5291_v37  ;;  %v4062_v13 = vld [vmem:[%s4667_s12 + $0x3a] sm:$0xff] }
 0x133   : > { %v1264_v24 = vpop.f32.mrf.mxu0  ;;  %v1489_v26 = vpop.f32.mrf.mxu1  ;;  %2328 = vmatprep.subr.mxu1 %v7453_v62  ;;  %v283_v14 = vld [vmem:[%s5675_s28] sm:$0xff]  ;;  %v620_v23 = vld [vmem:[%s7396_s2 + $0x178] sm:$0xff] }
 0x134   : > { %2329 = vmatpush2.msra.mxu1 %v594_v18  ;;  %v652_v24 = vld [vmem:[%s7396_s2 + $0x278] sm:$0xff]  ;;  %v4063_v26 = vld [vmem:[%s4667_s12 + $0x4a] sm:$0xff] }
 0x135   : > { %v1267_v28 = vpop.f32.mrf.mxu0  ;;  %v1492_v29 = vpop.f32.mrf.mxu1  ;;  %1796 = vmatmul.mubr.f32.gmra.mxu0 %v7498_v40  ;;  %2021 = vmatmul.mubr.f32.gmra.mxu1 %v5254_v2  ;;  %v592_v2 = vld [vmem:[%s7396_s2 + $0x98] sm:$0xff] }
 0x136   : > { %v5627_v33 = vadd.f32 %v1492_v29, %v1267_v28  ;;  %1800 = vmatprep.mubr.f32.mxu0 %v7504_v36  ;;  %2025 = vmatprep.mubr.f32.mxu1 %v5312_v4  ;;  %v619_v36 = vld [vmem:[%s7396_s2 + $0x170] sm:$0xff] }
 0x137   : > { %v1269_v38 = vpop.f32.mrf.mxu0  ;;  %v1494_v39 = vpop.f32.mrf.mxu1  ;;  %2330 = vmatprep.subr.mxu1 %v7453_v62 }
 0x138   : > { %2331 = vmatpush2.msra.mxu1 %v593_v31  ;;  %v316_v31 = vld [vmem:[%s5675_s28 + $0x9] sm:$0xff]  ;;  %v4064_v39 = vld [vmem:[%s4667_s12 + $0x52] sm:$0xff] }
 0x139   : > { %v1272_v43 = vpop.f32.mrf.mxu0  ;;  %v1497_v44 = vpop.f32.mrf.mxu1  ;;  %1801 = vmatmul.mubr.f32.gmra.mxu0 %v7501_v25  ;;  %2026 = vmatmul.mubr.f32.gmra.mxu1 %v5275_v17  ;;  %v7506_v17 = vld [vmem:[#allocation31_spill] sm:$0xff] }
 0x13a   : > { %v5638_v46 = vadd.f32 %v1497_v44, %v1272_v43  ;;  %1805 = vmatprep.mubr.f32.mxu0 %v7505_v48  ;;  %2030 = vmatprep.mubr.f32.mxu1 %v4057_v41  ;;  %v651_v48 = vld [vmem:[%s7396_s2 + $0x270] sm:$0xff] }
 0x13b   : > { %v1274_v51 = vpop.f32.mrf.mxu0  ;;  %v1499_v53 = vpop.f32.mrf.mxu1  ;;  %2332 = vmatprep.subr.mxu1 %v7453_v62 }
 0x13c   : > { %2333 = vmatpush2.msra.mxu1 %v592_v2  ;;  %v618_v2 = vld [vmem:[%s7396_s2 + $0x168] sm:$0xff] }
 0x13d   : > { %v1277_v56 = vpop.f32.mrf.mxu0  ;;  %v1502_v58 = vpop.f32.mrf.mxu1  ;;  %1806 = vmatmul.mubr.f32.gmra.mxu0 %v5291_v37  ;;  %2031 = vmatmul.mubr.f32.gmra.mxu1 %v7506_v17  ;;  %v4059_v37 = vld [vmem:[%s4667_s12 + $0x199] sm:$0xff] }
 0x13e   : > { %v5648_v61 = vadd.f32 %v1502_v58, %v1277_v56  ;;  %1810 = vmatprep.mubr.f32.mxu0 %v5325_v55  ;;  %2035 = vmatprep.mubr.f32.mxu1 %v4058_v54  ;;  %v590_v55 = vld [vmem:[%s7396_s2 + $0x88] sm:$0xff]  ;;  %v317_v58 = vld [vmem:[%s5675_s28 + $0x19] sm:$0xff] }
 0x13f   : > { %v1279_v63 = vpop.f32.mrf.mxu0  ;;  %v1504_v3 = vpop.f32.mrf.mxu1  ;;  %2334 = vmatprep.subr.mxu1 %v7453_v62  ;;  %v617_v17 = vld [vmem:[%s7396_s2 + $0x160] sm:$0xff] }
 0x140   : > { %2335 = vmatpush2.msra.mxu1 %v591_v59  ;;  %v4066_v3 = vld [vmem:[%s4667_s12 + $0x6a] sm:$0xff] }
 0x141   : > { %v1282_v8 = vpop.f32.mrf.mxu0  ;;  %v1507_v10 = vpop.f32.mrf.mxu1  ;;  %1811 = vmatmul.mubr.f32.gmra.mxu0 %v5312_v4  ;;  %2036 = vmatmul.mubr.f32.gmra.mxu1 %v5317_v9  ;;  %v4060_v4 = vld [vmem:[%s4667_s12 + $0x1a1] sm:$0xff] }
 0x142   : > { %v5661_v11 = vadd.f32 %v1507_v10, %v1282_v8  ;;  %1815 = vmatprep.mubr.f32.mxu0 %v5653_v5  ;;  %2040 = vmatprep.mubr.f32.mxu1 %v4059_v37  ;;  %v5725_v37 = vld [vmem:[%s5675_s28 + $0x18] sm:$0xff] }
 0x143   : > { %v1284_v20 = vpop.f32.mrf.mxu0  ;;  %v1509_v22 = vpop.f32.mrf.mxu1  ;;  %2336 = vmatprep.subr.mxu1 %v7453_v62 }
 0x144   : > { %2337 = vmatpush2.msra.mxu1 %v590_v55  ;;  %v616_v55 = vld [vmem:[%s7396_s2 + $0x158] sm:$0xff] }
 0x145   : > { %v1287_v9 = vpop.f32.mrf.mxu0  ;;  %v1512_v40 = vpop.f32.mrf.mxu1  ;;  %1816 = vmatmul.mubr.f32.gmra.mxu0 %v4057_v41  ;;  %2041 = vmatmul.mubr.f32.gmra.mxu1 %v4027_v15  ;;  %v284_v41 = vld [vmem:[%s5675_s28 + $0x8] sm:$0xff]  ;;  %v4067_v22 = vld [vmem:[%s4667_s12 + $0x7a] sm:$0xff] }
 0x146   : > { %v5680_v47 = vadd.f32 %v1512_v40, %v1287_v9  ;;  %1820 = vmatprep.mubr.f32.mxu0 %v5667_v32  ;;  %2045 = vmatprep.mubr.f32.mxu1 %v4060_v4  ;;  %v650_v15 = vld [vmem:[%s7396_s2 + $0x268] sm:$0xff] }
 0x147   : > { %v1289_v57 = vpop.f32.mrf.mxu0  ;;  %v1514_v60 = vpop.f32.mrf.mxu1  ;;  %2338 = vmatprep.subr.mxu1 %v7453_v62  ;;  %v318_v40 = vld [vmem:[%s5675_s28 + $0x21] sm:$0xff] }
 0x148   : > { %2339 = vmatpush2.msra.mxu1 %v589_v45  ;;  %v615_v45 = vld [vmem:[%s7396_s2 + $0x150] sm:$0xff]  ;;  %v5746_v57 = vld [vmem:[%s5675_s28 + $0x20] sm:$0xff] }
 0x149   : > { %v1292_v25 = vpop.f32.mrf.mxu0  ;;  %v1517_v42 = vpop.f32.mrf.mxu1  ;;  %1821 = vmatmul.mubr.f32.gmra.mxu0 %v4058_v54  ;;  %2046 = vmatmul.mubr.f32.gmra.mxu1 %v4028_v52  ;;  %v4065_v54 = vld [vmem:[%s4667_s12 + $0x62] sm:$0xff] }
 0x14a   : > { %v5687_v16 = vadd.f32 %v1517_v42, %v1292_v25  ;;  %4225 = vmatprep.mubr.f32.mxu0 %v4061_v1  ;;  %2340 = vmatprep.mubr.f32.mxu1 %v315_v12  ;;  %v4068_v52 = vld [vmem:[%s4667_s12 + $0x82] sm:$0xff] }
 0x14b   : > { %v1294_v30 = vpop.f32.mrf.mxu0  ;;  %v1519_v18 = vpop.f32.mrf.mxu1  ;;  %2726 = vmatprep.subr.mxu1 %v7453_v62  ;;  %v614_v25 = vld [vmem:[%s7396_s2 + $0x148] sm:$0xff]  ;;  %v649_v42 = vld [vmem:[%s7396_s2 + $0x260] sm:$0xff] }
 0x14c   : > { %v4069_v30 = vld [vmem:[%s4667_s12 + $0x92] sm:$0xff] }
 0x14d   : > { %v1297_v28 = vpop.f32.mrf.mxu0  ;;  %v1522_v29 = vpop.f32.mrf.mxu1  ;;  %4226 = vmatmul.mubr.f32.vlgmr.msra.gmra.mxu0 %v4062_v13  ;;  %2341 = vmatmul.mubr.f32.vlgmr.msra.gmra.mxu1 %v283_v14  ;;  %v319_v18 = vld [vmem:[%s5675_s28 + $0x31] sm:$0xff] }
 0x14e   : > { %v5703_v38 = vadd.f32 %v1522_v29, %v1297_v28  ;;  %2502 = vmatpush1.msra.mxu0 %v620_v23  ;;  %2727 = vmatpush1.msra.mxu1 %v652_v24  ;;  %v613_v23 = vld [vmem:[%s7396_s2 + $0x140] sm:$0xff]  ;;  %v5767_v29 = vld [vmem:[%s5675_s28 + $0x30] sm:$0xff] }
 0x14f   : > { %v1299_v43 = vpop.f32.mrf.mxu0  ;;  %v1524_v44 = vpop.f32.mrf.mxu1  ;;  %2503 = vmatprep.subr.mxu0 %v7453_v62  ;;  %4228 = vmatprep.mubr.f32.mxu0 %v4063_v26  ;;  %v4070_v28 = vld [vmem:[%s4667_s12 + $0x9a] sm:$0xff] }
 0x150   : > { %2345 = vmatprep.mubr.f32.mxu1 %v316_v31  ;;  %2504 = vmatpush1.msra.mxu0 %v619_v36  ;;  %v612_v36 = vld [vmem:[%s7396_s2 + $0x138] sm:$0xff]  ;;  %v4071_v44 = vld [vmem:[%s4667_s12 + $0xaa] sm:$0xff] }
 0x151   : > { %v1302_v51 = vpop.f32.mrf.mxu0  ;;  %v1527_v53 = vpop.f32.mrf.mxu1  ;;  %4229 = vmatmul.mubr.f32.gmra.mxu0 %v4064_v39  ;;  %2346 = vmatmul.mubr.f32.gmra.mxu1 %v284_v41  ;;  %v648_v39 = vld [vmem:[%s7396_s2 + $0x258] sm:$0xff] }
 0x152   : > { %v5715_v56 = vadd.f32 %v1527_v53, %v1302_v51  ;;  %2505 = vmatprep.subr.mxu0 %v7453_v62  ;;  %2728 = vmatprep.subr.mxu1 %v7453_v62 }
 0x153   : > { %2506 = vmatpush1.msra.mxu0 %v618_v2  ;;  %2729 = vmatpush1.msra.mxu1 %v651_v48  ;;  %v1304_v59 = vpop.f32.mrf.mxu0  ;;  %v1529_v63 = vpop.f32.mrf.mxu1  ;;  %v320_v2 = vld [vmem:[%s5675_s28 + $0x39] sm:$0xff]  ;;  %v611_v48 = vld [vmem:[%s7396_s2 + $0x130] sm:$0xff] }
 0x154   : > { %2507 = vmatprep.subr.mxu0 %v7453_v62  ;;  %4231 = vmatprep.mubr.f32.mxu0 %v4065_v54 }
 0x155   : > { %2350 = vmatprep.mubr.f32.mxu1 %v317_v58  ;;  %2508 = vmatpush1.msra.mxu0 %v617_v17  ;;  %v1307_v8 = vpop.f32.mrf.mxu0  ;;  %v1532_v10 = vpop.f32.mrf.mxu1  ;;  %v4072_v58 = vld [vmem:[%s4667_s12 + $0xb2] sm:$0xff] }
 0x156   : > { %v5734_v20 = vadd.f32 %v1532_v10, %v1307_v8  ;;  %4232 = vmatmul.mubr.f32.gmra.mxu0 %v4066_v3  ;;  %2351 = vmatmul.mubr.f32.gmra.mxu1 %v5725_v37  ;;  %v5790_v17 = vld [vmem:[%s5675_s28 + $0x38] sm:$0xff]  ;;  %v610_v3 = vld [vmem:[%s7396_s2 + $0x128] sm:$0xff]  ;;  %v647_v8 = vld [vmem:[%s7396_s2 + $0x250] sm:$0xff] }
 0x157   : > { %2509 = vmatprep.subr.mxu0 %v7453_v62  ;;  %2730 = vmatprep.subr.mxu1 %v7453_v62  ;;  %v1309_v4 = vpop.f32.mrf.mxu0  ;;  %v1534_v9 = vpop.f32.mrf.mxu1  ;;  %v4073_v10 = vld [vmem:[%s4667_s12 + $0xc2] sm:$0xff] }
 0x158   : > { %2510 = vmatpush1.msra.mxu0 %v616_v55  ;;  %2731 = vmatpush1.msra.mxu1 %v650_v15  ;;  %v609_v4 = vld [vmem:[%s7396_s2 + $0x120] sm:$0xff] }
 0x159   : > { %2511 = vmatprep.subr.mxu0 %v7453_v62  ;;  %4234 = vmatprep.mubr.f32.mxu0 %v4067_v22  ;;  %v1312_v60 = vpop.f32.mrf.mxu0  ;;  %v1537_v1 = vpop.f32.mrf.mxu1  ;;  %v321_v22 = vld [vmem:[%s5675_s28 + $0x49] sm:$0xff] }
 0x15a   : > { %2355 = vmatprep.mubr.f32.mxu1 %v318_v40  ;;  %2512 = vmatpush1.msra.mxu0 %v615_v45  ;;  %v5749_v12 = vadd.f32 %v1537_v1, %v1312_v60  ;;  %v4074_v40 = vld [vmem:[%s4667_s12 + $0xca] sm:$0xff]  ;;  %v608_v1 = vld [vmem:[%s7396_s2 + $0x118] sm:$0xff] }
 0x15b   : > { %4235 = vmatmul.mubr.f32.gmra.mxu0 %v4068_v52  ;;  %2356 = vmatmul.mubr.f32.gmra.mxu1 %v5746_v57  ;;  %v1314_v13 = vpop.f32.mrf.mxu0  ;;  %v1539_v14 = vpop.f32.mrf.mxu1  ;;  %v5811_v45 = vld [vmem:[%s5675_s28 + $0x48] sm:$0xff] }
 0x15c   : > { %2513 = vmatprep.subr.mxu0 %v7453_v62  ;;  %2732 = vmatprep.subr.mxu1 %v7453_v62  ;;  %v4075_v14 = vld [vmem:[%s4667_s12 + $0xda] sm:$0xff] }
 0x15d   : > { %2514 = vmatpush1.msra.mxu0 %v614_v25  ;;  %2733 = vmatpush1.msra.mxu1 %v649_v42  ;;  %v1317_v24 = vpop.f32.mrf.mxu0  ;;  %v1542_v26 = vpop.f32.mrf.mxu1  ;;  %v646_v25 = vld [vmem:[%s7396_s2 + $0x248] sm:$0xff] }
 0x15e   : > { %2515 = vmatprep.subr.mxu0 %v7453_v62  ;;  %4237 = vmatprep.mubr.f32.mxu0 %v4069_v30  ;;  %v5770_v31 = vadd.f32 %v1542_v26, %v1317_v24 }
 0x15f   : > { %2360 = vmatprep.mubr.f32.mxu1 %v319_v18  ;;  %2516 = vmatpush1.msra.mxu0 %v613_v23  ;;  %v1319_v41 = vpop.f32.mrf.mxu0  ;;  %v1544_v43 = vpop.f32.mrf.mxu1  ;;  %v322_v18 = vld [vmem:[%s5675_s28 + $0x51] sm:$0xff] }
 0x160   : > { %4238 = vmatmul.mubr.f32.gmra.mxu0 %v4070_v28  ;;  %2361 = vmatmul.mubr.f32.gmra.mxu1 %v5767_v29  ;;  %v607_v23 = vld [vmem:[%s7396_s2 + $0x110] sm:$0xff]  ;;  %v4076_v28 = vld [vmem:[%s4667_s12 + $0xe2] sm:$0xff] }
 0x161   : > { %2517 = vmatprep.subr.mxu0 %v7453_v62  ;;  %2734 = vmatprep.subr.mxu1 %v7453_v62  ;;  %v1322_v51 = vpop.f32.mrf.mxu0  ;;  %v1547_v53 = vpop.f32.mrf.mxu1  ;;  %v606_v43 = vld [vmem:[%s7396_s2 + $0x108] sm:$0xff] }
 0x162   : > { %2518 = vmatpush1.msra.mxu0 %v612_v36  ;;  %2735 = vmatpush1.msra.mxu1 %v648_v39  ;;  %v5786_v54 = vadd.f32 %v1547_v53, %v1322_v51  ;;  %v5832_v36 = vld [vmem:[%s5675_s28 + $0x50] sm:$0xff] }
 0x163   : > { %2519 = vmatprep.subr.mxu0 %v7453_v62  ;;  %4240 = vmatprep.mubr.f32.mxu0 %v4071_v44  ;;  %v1324_v59 = vpop.f32.mrf.mxu0  ;;  %v1549_v63 = vpop.f32.mrf.mxu1  ;;  %v645_v44 = vld [vmem:[%s7396_s2 + $0x240] sm:$0xff] }
 0x164   : > { %2365 = vmatprep.mubr.f32.mxu1 %v320_v2  ;;  %2520 = vmatpush1.msra.mxu0 %v611_v48  ;;  %v4077_v48 = vld [vmem:[%s4667_s12 + $0xf2] sm:$0xff]  ;;  %v605_v59 = vld [vmem:[%s7396_s2 + $0x100] sm:$0xff] }
 0x165   : > { %4241 = vmatmul.mubr.f32.gmra.mxu0 %v4072_v58  ;;  %2366 = vmatmul.mubr.f32.gmra.mxu1 %v5790_v17  ;;  %v1327_v55 = vpop.f32.mrf.mxu0  ;;  %v1552_v15 = vpop.f32.mrf.mxu1  ;;  %v323_v58 = vld [vmem:[%s5675_s28 + $0x61] sm:$0xff] }
 0x166   : > { %2521 = vmatprep.subr.mxu0 %v7453_v62  ;;  %2736 = vmatprep.subr.mxu1 %v7453_v62  ;;  %v5807_v9 = vadd.f32 %v1552_v15, %v1327_v55  ;;  %v4078_v63 = vld [vmem:[%s4667_s12 + $0xfa] sm:$0xff] }
 0x167   : > { %2522 = vmatpush1.msra.mxu0 %v610_v3  ;;  %2737 = vmatpush1.msra.mxu1 %v647_v8  ;;  %v1329_v52 = vpop.f32.mrf.mxu0  ;;  %v1554_v60 = vpop.f32.mrf.mxu1  ;;  %v5853_v3 = vld [vmem:[%s5675_s28 + $0x60] sm:$0xff]  ;;  %v636_v15 = vld [vmem:[%s7396_s2 + $0x1f8] sm:$0xff] }
 0x168   : > { %2523 = vmatprep.subr.mxu0 %v7453_v62  ;;  %4243 = vmatprep.mubr.f32.mxu0 %v4073_v10  ;;  %v4079_v52 = vld [vmem:[%s4667_s12 + $0x10a] sm:$0xff] }
 0x169   : > { %2370 = vmatprep.mubr.f32.mxu1 %v321_v22  ;;  %2524 = vmatpush1.msra.mxu0 %v609_v4  ;;  %v1332_v42 = vpop.f32.mrf.mxu0  ;;  %v1557_v13 = vpop.f32.mrf.mxu1  ;;  %v644_v22 = vld [vmem:[%s7396_s2 + $0x238] sm:$0xff]  ;;  %v324_v60 = vld [vmem:[%s5675_s28 + $0x69] sm:$0xff] }
 0x16a   : > { %4244 = vmatmul.mubr.f32.gmra.mxu0 %v4074_v40  ;;  %2371 = vmatmul.mubr.f32.gmra.mxu1 %v5811_v45  ;;  %v5822_v30 = vadd.f32 %v1557_v13, %v1332_v42  ;;  %v4080_v13 = vld [vmem:[%s4667_s12 + $0x112] sm:$0xff] }
 0x16b   : > { %2525 = vmatprep.subr.mxu0 %v7453_v62  ;;  %2738 = vmatprep.subr.mxu1 %v7453_v62  ;;  %v1334_v24 = vpop.f32.mrf.mxu0  ;;  %v1559_v26 = vpop.f32.mrf.mxu1 }
 0x16c   : > { %2526 = vmatpush1.msra.mxu0 %v608_v1  ;;  %2739 = vmatpush1.msra.mxu1 %v646_v25  ;;  %v635_v1 = vld [vmem:[%s7396_s2 + $0x1f0] sm:$0xff]  ;;  %v634_v26 = vld [vmem:[%s7396_s2 + $0x1e8] sm:$0xff] }
 0x16d   : > { %2527 = vmatprep.subr.mxu0 %v7453_v62  ;;  %4246 = vmatprep.mubr.f32.mxu0 %v4075_v14  ;;  %v1337_v39 = vpop.f32.mrf.mxu0  ;;  %v1562_v41 = vpop.f32.mrf.mxu1  ;;  %v5874_v14 = vld [vmem:[%s5675_s28 + $0x68] sm:$0xff] }
 0x16e   : > { %2375 = vmatprep.mubr.f32.mxu1 %v322_v18  ;;  %2528 = vmatpush1.msra.mxu0 %v607_v23  ;;  %v5841_v2 = vadd.f32 %v1562_v41, %v1337_v39  ;;  %v4081_v39 = vld [vmem:[%s4667_s12 + $0x122] sm:$0xff] }
 0x16f   : > { %4247 = vmatmul.mubr.f32.gmra.mxu0 %v4076_v28  ;;  %2376 = vmatmul.mubr.f32.gmra.mxu1 %v5832_v36  ;;  %v1339_v51 = vpop.f32.mrf.mxu0  ;;  %v1564_v53 = vpop.f32.mrf.mxu1  ;;  %v643_v28 = vld [vmem:[%s7396_s2 + $0x230] sm:$0xff] }
 0x170   : > { %2529 = vmatprep.subr.mxu0 %v7453_v62  ;;  %2740 = vmatprep.subr.mxu1 %v7453_v62  ;;  %v4082_v53 = vld [vmem:[%s4667_s12 + $0x12a] sm:$0xff] }
 0x171   : > { %2530 = vmatpush1.msra.mxu0 %v606_v43  ;;  %2741 = vmatpush1.msra.mxu1 %v645_v44  ;;  %v1342_v8 = vpop.f32.mrf.mxu0  ;;  %v1567_v10 = vpop.f32.mrf.mxu1  ;;  %v325_v44 = vld [vmem:[%s5675_s28 + $0x79] sm:$0xff] }
 0x172   : > { %2531 = vmatprep.subr.mxu0 %v7453_v62  ;;  %4249 = vmatprep.mubr.f32.mxu0 %v4077_v48  ;;  %v5856_v55 = vadd.f32 %v1567_v10, %v1342_v8  ;;  %v633_v48 = vld [vmem:[%s7396_s2 + $0x1e0] sm:$0xff]  ;;  %v632_v8 = vld [vmem:[%s7396_s2 + $0x1d8] sm:$0xff]  ;;  %v642_v10 = vld [vmem:[%s7396_s2 + $0x228] sm:$0xff] }
 0x173   : > { %2380 = vmatprep.mubr.f32.mxu1 %v323_v58  ;;  %2532 = vmatpush1.msra.mxu0 %v605_v59  ;;  %v1344_v4 = vpop.f32.mrf.mxu0  ;;  %v1569_v40 = vpop.f32.mrf.mxu1  ;;  %v5897_v58 = vld [vmem:[%s5675_s28 + $0x78] sm:$0xff] }
 0x174   : > { %4250 = vmatmul.mubr.f32.gmra.mxu0 %v4078_v63  ;;  %2381 = vmatmul.mubr.f32.gmra.mxu1 %v5853_v3  ;;  %v4083_v4 = vld [vmem:[%s4667_s12 + $0x13a] sm:$0xff] }
 0x175   : > { %2533 = vmatprep.subr.mxu0 %v7453_v62  ;;  %2742 = vmatprep.subr.mxu1 %v7453_v62  ;;  %v1347_v25 = vpop.f32.mrf.mxu0  ;;  %v1572_v42 = vpop.f32.mrf.mxu1 }
 0x176   : > { %2534 = vmatpush2.msra.mxu0 %v636_v15  ;;  %2743 = vmatpush1.msra.mxu1 %v644_v22  ;;  %v5876_v18 = vadd.f32 %v1572_v42, %v1347_v25  ;;  %v4084_v42 = vld [vmem:[%s4667_s12 + $0x142] sm:$0xff] }
 0x177   : > { %2535 = vmatprep.subr.mxu0 %v7453_v62  ;;  %4252 = vmatprep.mubr.f32.mxu0 %v4079_v52  ;;  %v1349_v23 = vpop.f32.mrf.mxu0  ;;  %v1574_v24 = vpop.f32.mrf.mxu1  ;;  %v326_v52 = vld [vmem:[%s5675_s28 + $0x81] sm:$0xff] }
 0x178   : > { %2385 = vmatprep.mubr.f32.mxu1 %v324_v60  ;;  %2536 = vmatpush2.msra.mxu0 %v635_v1  ;;  %v631_v60 = vld [vmem:[%s7396_s2 + $0x1d0] sm:$0xff] }
 0x179   : > { %4253 = vmatmul.mubr.f32.gmra.mxu0 %v4080_v13  ;;  %2386 = vmatmul.mubr.f32.gmra.mxu1 %v5874_v14  ;;  %v1352_v41 = vpop.f32.mrf.mxu0  ;;  %v1577_v43 = vpop.f32.mrf.mxu1  ;;  %v5918_v13 = vld [vmem:[%s5675_s28 + $0x80] sm:$0xff] }
 0x17a   : > { %2537 = vmatprep.subr.mxu0 %v7453_v62  ;;  %2744 = vmatprep.subr.mxu1 %v7453_v62  ;;  %v5893_v51 = vadd.f32 %v1577_v43, %v1352_v41  ;;  %v4085_v41 = vld [vmem:[%s4667_s12 + $0x152] sm:$0xff] }
 0x17b   : > { %2538 = vmatpush2.msra.mxu0 %v634_v26  ;;  %2745 = vmatpush1.msra.mxu1 %v643_v28  ;;  %v1354_v59 = vpop.f32.mrf.mxu0  ;;  %v1579_v63 = vpop.f32.mrf.mxu1  ;;  %v630_v26 = vld [vmem:[%s7396_s2 + $0x1c8] sm:$0xff]  ;;  %v641_v28 = vld [vmem:[%s7396_s2 + $0x220] sm:$0xff] }
 0x17c   : > { %2539 = vmatprep.subr.mxu0 %v7453_v62  ;;  %4255 = vmatprep.mubr.f32.mxu0 %v4081_v39  ;;  %v4086_v59 = vld [vmem:[%s4667_s12 + $0x15a] sm:$0xff]  ;;  %v5939_v63 = vld [vmem:[%s5675_s28 + $0x90] sm:$0xff] }
 0x17d   : > { %2390 = vmatprep.mubr.f32.mxu1 %v325_v44  ;;  %2540 = vmatpush2.msra.mxu0 %v633_v48  ;;  %v1357_v15 = vpop.f32.mrf.mxu0  ;;  %v1582_v22 = vpop.f32.mrf.mxu1  ;;  %v327_v48 = vld [vmem:[%s5675_s28 + $0x91] sm:$0xff] }
 0x17e   : > { %4256 = vmatmul.mubr.f32.gmra.mxu0 %v4082_v53  ;;  %2391 = vmatmul.mubr.f32.gmra.mxu1 %v5897_v58  ;;  %v5908_v40 = vadd.f32 %v1582_v22, %v1357_v15  ;;  %v629_v53 = vld [vmem:[%s7396_s2 + $0x1c0] sm:$0xff]  ;;  %v628_v22 = vld [vmem:[%s7396_s2 + $0x1b8] sm:$0xff] }
 0x17f   : > { %2541 = vmatprep.subr.mxu0 %v7453_v62  ;;  %2746 = vmatprep.subr.mxu1 %v7453_v62  ;;  %v1359_v1 = vpop.f32.mrf.mxu0  ;;  %v1584_v25 = vpop.f32.mrf.mxu1 }
 0x180   : > { %2542 = vmatpush2.msra.mxu0 %v632_v8  ;;  %2747 = vmatpush1.msra.mxu1 %v642_v10  ;;  %v4087_v1 = vld [vmem:[%s4667_s12 + $0x16a] sm:$0xff]  ;;  %v328_v25 = vld [vmem:[%s5675_s28 + $0x99] sm:$0xff] }
 0x181   : > { %2543 = vmatprep.subr.mxu0 %v7453_v62  ;;  %4258 = vmatprep.mubr.f32.mxu0 %v4083_v4  ;;  %v1362_v23 = vpop.f32.mrf.mxu0  ;;  %v1587_v24 = vpop.f32.mrf.mxu1  ;;  %v640_v4 = vld [vmem:[%s7396_s2 + $0x218] sm:$0xff] }
 0x182   : > { %2395 = vmatprep.mubr.f32.mxu1 %v326_v52  ;;  %2544 = vmatpush2.msra.mxu0 %v631_v60  ;;  %v5927_v39 = vadd.f32 %v1587_v24, %v1362_v23 }
 0x183   : > { %4259 = vmatmul.mubr.f32.gmra.mxu0 %v4084_v42  ;;  %2396 = vmatmul.mubr.f32.gmra.mxu1 %v5918_v13  ;;  %v1364_v43 = vpop.f32.mrf.mxu0  ;;  %v1589_v44 = vpop.f32.mrf.mxu1  ;;  %v627_v42 = vld [vmem:[%s7396_s2 + $0x1b0] sm:$0xff] }
 0x184   : > { %2545 = vmatprep.subr.mxu0 %v7453_v62  ;;  %2748 = vmatprep.subr.mxu1 %v7453_v62 }
 0x185   : > { %2546 = vmatpush2.msra.mxu0 %v630_v26  ;;  %2749 = vmatpush1.msra.mxu1 %v641_v28  ;;  %v1367_v8 = vpop.f32.mrf.mxu0  ;;  %v1592_v10 = vpop.f32.mrf.mxu1  ;;  %v4088_v26 = vld [vmem:[%s4667_s12 + $0x172] sm:$0xff] }
 0x186   : > { %2547 = vmatprep.subr.mxu0 %v7453_v62  ;;  %4261 = vmatprep.mubr.f32.mxu0 %v4085_v41  ;;  %v5942_v15 = vadd.f32 %v1592_v10, %v1367_v8  ;;  %v5960_v28 = vld [vmem:[%s5675_s28 + $0x98] sm:$0xff]  ;;  %v329_v10 = vld [vmem:[%s5675_s28 + $0xa9] sm:$0xff] }
 0x187   : > { %2400 = vmatprep.mubr.f32.mxu1 %v327_v48  ;;  %2548 = vmatpush2.msra.mxu0 %v629_v53  ;;  %v1369_v52 = vpop.f32.mrf.mxu0  ;;  %v1594_v60 = vpop.f32.mrf.mxu1  ;;  %v626_v48 = vld [vmem:[%s7396_s2 + $0x1a8] sm:$0xff]  ;;  %v639_v53 = vld [vmem:[%s7396_s2 + $0x210] sm:$0xff] }
 0x188   : > { %4262 = vmatmul.mubr.f32.gmra.mxu0 %v4086_v59  ;;  %2401 = vmatmul.mubr.f32.gmra.mxu1 %v5939_v63  ;;  %v5980_v52 = vld [vmem:[%s5675_s28 + $0xa8] sm:$0xff] }
 0x189   : > { %2549 = vmatprep.subr.mxu0 %v7453_v62  ;;  %2750 = vmatprep.subr.mxu1 %v7453_v62  ;;  %v1372_v23 = vpop.f32.mrf.mxu0  ;;  %v1597_v24 = vpop.f32.mrf.mxu1 }
 0x18a   : > { %2550 = vmatpush2.msra.mxu0 %v628_v22  ;;  %2751 = vmatpush1.msra.mxu1 %v640_v4  ;;  %v5962_v41 = vadd.f32 %v1597_v24, %v1372_v23  ;;  %v625_v22 = vld [vmem:[%s7396_s2 + $0x1a0] sm:$0xff] }
 0x18b   : > { %2551 = vmatprep.subr.mxu0 %v7453_v62  ;;  %4264 = vmatprep.mubr.f32.mxu0 %v4087_v1  ;;  %v1374_v43 = vpop.f32.mrf.mxu0  ;;  %v1599_v44 = vpop.f32.mrf.mxu1 }
 0x18c   : > { %2405 = vmatprep.mubr.f32.mxu1 %v328_v25  ;;  %2552 = vmatpush2.msra.mxu0 %v627_v42  ;;  %v638_v42 = vld [vmem:[%s7396_s2 + $0x208] sm:$0xff]  ;;  %v330_v43 = vld [vmem:[%s5675_s28 + $0xb1] sm:$0xff] }
 0x18d   : > { %4265 = vmatmul.mubr.f32.gmra.mxu0 %v4088_v26  ;;  %2406 = vmatmul.mubr.f32.gmra.mxu1 %v5960_v28  ;;  %v1667_v59 = vpop.f32.mrf.mxu0  ;;  %v1892_v8 = vpop.f32.mrf.mxu1  ;;  %v623_v44 = vld [vmem:[%s7396_s2 + $0x190] sm:$0xff] }
 0x18e   : > { %2553 = vmatprep.subr.mxu0 %v7453_v62  ;;  %2752 = vmatprep.subr.mxu1 %v7453_v62  ;;  %v1668_v4 = vadd.f32 %v1667_v59, %v5526_v6  ;;  %v624_v6 = vld [vmem:[%s7396_s2 + $0x198] sm:$0xff]  ;;  %v6004_v59 = vld [vmem:[%s5675_s28 + $0xb0] sm:$0xff] }
 0x18f   : > { %2554 = vmatpush2.msra.mxu0 %v626_v48  ;;  %2753 = vmatpush1.msra.mxu1 %v639_v53  ;;  %v1669_v60 = vpop.f32.mrf.mxu0  ;;  %v1894_v1 = vpop.f32.mrf.mxu1 }
 0x190   : > { %2555 = vmatprep.subr.mxu0 %v7453_v62  ;;  %4267 = vmatprep.mubr.f32.mxu0 %v5653_v5  ;;  %v5984_v25 = vadd.f32 %v1892_v8, %v1668_v4  ;;  %v4091_v5 = vld [vmem:[%s4667_s12 + $0x19a] sm:$0xff] }
 0x191   : > { %2410 = vmatprep.mubr.f32.mxu1 %v329_v10  ;;  %2556 = vmatpush2.msra.mxu0 %v625_v22  ;;  %v1672_v23 = vpop.f32.mrf.mxu0  ;;  %v1897_v24 = vpop.f32.mrf.mxu1  ;;  %v622_v22 = vld [vmem:[%s7396_s2 + $0x188] sm:$0xff]  ;;  %v637_v4 = vld [vmem:[%s7396_s2 + $0x200] sm:$0xff] }
 0x192   : > { %4268 = vmatmul.mubr.f32.gmra.mxu0 %v5667_v32  ;;  %2411 = vmatmul.mubr.f32.gmra.mxu1 %v5980_v52  ;;  %v1673_v26 = vadd.f32 %v1672_v23, %v5536_v35  ;;  %v4092_v32 = vld [vmem:[%s4667_s12 + $0x1a2] sm:$0xff] }
 0x193   : > { %2557 = vmatprep.subr.mxu0 %v7453_v62  ;;  %2754 = vmatprep.subr.mxu1 %v7453_v62  ;;  %v1674_v48 = vpop.f32.mrf.mxu0  ;;  %v1899_v53 = vpop.f32.mrf.mxu1  ;;  %v331_v1 = vld [vmem:[%s5675_s28 + $0xc1] sm:$0xff] }
 0x194   : > { %2558 = vmatpush2.msra.mxu0 %v624_v6  ;;  %2755 = vmatpush1.msra.mxu1 %v638_v42  ;;  %v6006_v8 = vadd.f32 %v1897_v24, %v1673_v26  ;;  %v621_v23 = vld [vmem:[%s7396_s2 + $0x180] sm:$0xff]  ;;  %v668_v48 = vld [vmem:[%s7396_s2 + $0x2f8] sm:$0xff]  ;;  %v332_v53 = vld [vmem:[%s5675_s28 + $0xc9] sm:$0xff] }
 0x195   : > { %2559 = vmatprep.subr.mxu0 %v7453_v62  ;;  %4270 = vmatprep.mubr.f32.mxu0 %v4091_v5  ;;  %v1677_v35 = vpop.f32.mrf.mxu0  ;;  %v1902_v10 = vpop.f32.mrf.mxu1  ;;  %v347_v5 = vld [vmem:[%s5675_s28 + $0x2] sm:$0xff] }
 0x196   : > { %2415 = vmatprep.mubr.f32.mxu1 %v330_v43  ;;  %2560 = vmatpush2.msra.mxu0 %v623_v44  ;;  %v1678_v60 = vadd.f32 %v1677_v35, %v5547_v50  ;;  %v6026_v50 = vld [vmem:[%s5675_s28 + $0xc0] sm:$0xff] }
 0x197   : > { %4271 = vmatmul.mubr.f32.gmra.mxu0 %v4092_v32  ;;  %2416 = vmatmul.mubr.f32.gmra.mxu1 %v6004_v59  ;;  %v1679_v6 = vpop.f32.mrf.mxu0  ;;  %v1904_v42 = vpop.f32.mrf.mxu1 }
 0x198   : > { %2561 = vmatprep.subr.mxu0 %v7453_v62  ;;  %2756 = vmatprep.subr.mxu1 %v7453_v62  ;;  %v6023_v24 = vadd.f32 %v1902_v10, %v1678_v60  ;;  %v684_v10 = vld [vmem:[%s7396_s2 + $0x378] sm:$0xff]  ;;  %v667_v6 = vld [vmem:[%s7396_s2 + $0x2f0] sm:$0xff] }
 0x199   : > { %2562 = vmatpush2.msra.mxu0 %v622_v22  ;;  %2757 = vmatpush1.msra.mxu1 %v637_v4  ;;  %v1682_v26 = vpop.f32.mrf.mxu0  ;;  %v1907_v43 = vpop.f32.mrf.mxu1  ;;  %v333_v42 = vld [vmem:[%s5675_s28 + $0xd9] sm:$0xff] }
 0x19a   : > { %2563 = vmatprep.subr.mxu0 %v7453_v62  ;;  %2420 = vmatprep.mubr.f32.mxu1 %v331_v1  ;;  %v1683_v44 = vadd.f32 %v1682_v26, %v5557_v19  ;;  %v6045_v19 = vld [vmem:[%s5675_s28 + $0xc8] sm:$0xff]  ;;  %v683_v26 = vld [vmem:[%s7396_s2 + $0x370] sm:$0xff] }
 0x19b   : > { %2564 = vmatpush2.msra.mxu0 %v621_v23  ;;  %2565 = vmatprep.mubr.f32.mxu0 %v5725_v37  ;;  %v1684_v32 = vpop.f32.mrf.mxu0  ;;  %v1909_v35 = vpop.f32.mrf.mxu1  ;;  %v348_v37 = vld [vmem:[%s5675_s28 + $0xa] sm:$0xff] }
 0x19c   : > { %2421 = vmatmul.mubr.f32.gmra.mxu1 %v6026_v50  ;;  %2566 = vmatmul.mubr.f32.vlgmr.msra.gmra.mxu0 %v347_v5  ;;  %v6040_v22 = vadd.f32 %v1907_v43, %v1683_v44  ;;  %v666_v32 = vld [vmem:[%s7396_s2 + $0x2e8] sm:$0xff] }
 0x19d   : > { %2758 = vmatprep.subr.mxu1 %v7453_v62  ;;  %2951 = vmatprep.subr.mxu0 %v7453_v62  ;;  %v1687_v4 = vpop.f32.mrf.mxu0  ;;  %v1912_v60 = vpop.f32.mrf.mxu1  ;;  %v334_v35 = vld [vmem:[%s5675_s28 + $0xe1] sm:$0xff] }
 0x19e   : > { %2759 = vmatpush2.msra.mxu1 %v668_v48  ;;  %2425 = vmatprep.mubr.f32.mxu1 %v332_v53  ;;  %v1688_v1 = vadd.f32 %v1687_v4, %v5567_v34  ;;  %v6063_v34 = vld [vmem:[%s5675_s28 + $0xd8] sm:$0xff]  ;;  %v682_v4 = vld [vmem:[%s7396_s2 + $0x368] sm:$0xff] }
 0x19f   : > { %2570 = vmatprep.mubr.f32.mxu0 %v5746_v57  ;;  %2952 = vmatpush1.msra.mxu0 %v684_v10  ;;  %v1689_v23 = vpop.f32.mrf.mxu0  ;;  %v1914_v5 = vpop.f32.mrf.mxu1  ;;  %v6066_v57 = vld [vmem:[%s5675_s28 + $0x1a] sm:$0xff] }
 0x1a0   : > { %2426 = vmatmul.mubr.f32.gmra.mxu1 %v6045_v19  ;;  %2571 = vmatmul.mubr.f32.gmra.mxu0 %v348_v37  ;;  %v6058_v43 = vadd.f32 %v1912_v60, %v1688_v1  ;;  %v6087_v60 = vld [vmem:[%s5675_s28 + $0x22] sm:$0xff]  ;;  %v335_v5 = vld [vmem:[%s5675_s28 + $0xf1] sm:$0xff] }
 0x1a1   : > { %2760 = vmatprep.subr.mxu1 %v7453_v62  ;;  %2953 = vmatprep.subr.mxu0 %v7453_v62  ;;  %v1692_v44 = vpop.f32.mrf.mxu0  ;;  %v1917_v48 = vpop.f32.mrf.mxu1  ;;  %v665_v23 = vld [vmem:[%s7396_s2 + $0x2e0] sm:$0xff] }
 0x1a2   : > { %2761 = vmatpush2.msra.mxu1 %v667_v6  ;;  %2430 = vmatprep.mubr.f32.mxu1 %v333_v42  ;;  %v1693_v53 = vadd.f32 %v1692_v44, %v5577_v49 }
 0x1a3   : > { %2575 = vmatprep.mubr.f32.mxu0 %v5767_v29  ;;  %2954 = vmatpush1.msra.mxu0 %v683_v26  ;;  %v1694_v10 = vpop.f32.mrf.mxu0  ;;  %v1919_v37 = vpop.f32.mrf.mxu1  ;;  %v6084_v29 = vld [vmem:[%s5675_s28 + $0xe0] sm:$0xff] }
 0x1a4   : > { %2431 = vmatmul.mubr.f32.gmra.mxu1 %v6063_v34  ;;  %2576 = vmatmul.mubr.f32.gmra.mxu0 %v6066_v57  ;;  %v6079_v49 = vadd.f32 %v1917_v48, %v1693_v53  ;;  %v681_v48 = vld [vmem:[%s7396_s2 + $0x360] sm:$0xff]  ;;  %v6108_v53 = vld [vmem:[%s5675_s28 + $0x32] sm:$0xff] }
 0x1a5   : > { %2762 = vmatprep.subr.mxu1 %v7453_v62  ;;  %2955 = vmatprep.subr.mxu0 %v7453_v62  ;;  %v1697_v1 = vpop.f32.mrf.mxu0  ;;  %v1922_v6 = vpop.f32.mrf.mxu1  ;;  %v664_v37 = vld [vmem:[%s7396_s2 + $0x2d8] sm:$0xff] }
 0x1a6   : > { %2763 = vmatpush2.msra.mxu1 %v666_v32  ;;  %2435 = vmatprep.mubr.f32.mxu1 %v334_v35  ;;  %v1698_v42 = vadd.f32 %v1697_v1, %v5587_v0 }
 0x1a7   : > { %2580 = vmatprep.mubr.f32.mxu0 %v5790_v17  ;;  %2956 = vmatpush1.msra.mxu0 %v682_v4  ;;  %v1699_v26 = vpop.f32.mrf.mxu0  ;;  %v1924_v44 = vpop.f32.mrf.mxu1  ;;  %v6105_v17 = vld [vmem:[%s5675_s28 + $0xf0] sm:$0xff]  ;;  %v336_v4 = vld [vmem:[%s5675_s28 + $0xf9] sm:$0xff] }
 0x1a8   : > { %2436 = vmatmul.mubr.f32.gmra.mxu1 %v6084_v29  ;;  %2581 = vmatmul.mubr.f32.gmra.mxu0 %v6087_v60  ;;  %v6100_v0 = vadd.f32 %v1922_v6, %v1698_v42  ;;  %v680_v42 = vld [vmem:[%s7396_s2 + $0x358] sm:$0xff] }
 0x1a9   : > { %2764 = vmatprep.subr.mxu1 %v7453_v62  ;;  %2957 = vmatprep.subr.mxu0 %v7453_v62  ;;  %v1702_v32 = vpop.f32.mrf.mxu0  ;;  %v1927_v35 = vpop.f32.mrf.mxu1 }
 0x1aa   : > { %2765 = vmatpush2.msra.mxu1 %v665_v23  ;;  %2440 = vmatprep.mubr.f32.mxu1 %v335_v5  ;;  %v1703_v10 = vadd.f32 %v1702_v32, %v5597_v27  ;;  %v6129_v23 = vld [vmem:[%s5675_s28 + $0x3a] sm:$0xff]  ;;  %v337_v32 = vld [vmem:[%s5675_s28 + $0x109] sm:$0xff] }
 0x1ab   : > { %2585 = vmatprep.mubr.f32.mxu0 %v5811_v45  ;;  %2958 = vmatpush1.msra.mxu0 %v681_v48  ;;  %v1704_v1 = vpop.f32.mrf.mxu0  ;;  %v1929_v6 = vpop.f32.mrf.mxu1  ;;  %v6126_v45 = vld [vmem:[%s5675_s28 + $0xf8] sm:$0xff]  ;;  %v663_v48 = vld [vmem:[%s7396_s2 + $0x2d0] sm:$0xff] }
 0x1ac   : > { %2441 = vmatmul.mubr.f32.gmra.mxu1 %v6105_v17  ;;  %2586 = vmatmul.mubr.f32.gmra.mxu0 %v6108_v53  ;;  %v6121_v27 = vadd.f32 %v1927_v35, %v1703_v10 }
 0x1ad   : > { %2766 = vmatprep.subr.mxu1 %v7453_v62  ;;  %2959 = vmatprep.subr.mxu0 %v7453_v62  ;;  %v1707_v5 = vpop.f32.mrf.mxu0  ;;  %v1932_v26 = vpop.f32.mrf.mxu1 }
 0x1ae   : > { %2767 = vmatpush2.msra.mxu1 %v664_v37  ;;  %2445 = vmatprep.mubr.f32.mxu1 %v336_v4  ;;  %v1708_v44 = vadd.f32 %v1707_v5, %v5607_v7  ;;  %v679_v37 = vld [vmem:[%s7396_s2 + $0x350] sm:$0xff]  ;;  %v662_v5 = vld [vmem:[%s7396_s2 + $0x2c8] sm:$0xff] }
 0x1af   : > { %2590 = vmatprep.mubr.f32.mxu0 %v5832_v36  ;;  %2960 = vmatpush1.msra.mxu0 %v680_v42  ;;  %v1709_v35 = vpop.f32.mrf.mxu0  ;;  %v1934_v10 = vpop.f32.mrf.mxu1  ;;  %v6147_v36 = vld [vmem:[%s5675_s28 + $0x108] sm:$0xff] }
 0x1b0   : > { %2446 = vmatmul.mubr.f32.gmra.mxu1 %v6126_v45  ;;  %2591 = vmatmul.mubr.f32.gmra.mxu0 %v6129_v23  ;;  %v6142_v7 = vadd.f32 %v1932_v26, %v1708_v44  ;;  %v6150_v4 = vld [vmem:[%s5675_s28 + $0x4a] sm:$0xff] }
 0x1b1   : > { %2768 = vmatprep.subr.mxu1 %v7453_v62  ;;  %2961 = vmatprep.subr.mxu0 %v7453_v62  ;;  %v1712_v1 = vpop.f32.mrf.mxu0  ;;  %v1937_v6 = vpop.f32.mrf.mxu1  ;;  %v338_v26 = vld [vmem:[%s5675_s28 + $0x111] sm:$0xff] }
 0x1b2   : > { %2769 = vmatpush2.msra.mxu1 %v663_v48  ;;  %2450 = vmatprep.mubr.f32.mxu1 %v337_v32  ;;  %v1713_v42 = vadd.f32 %v1712_v1, %v5617_v21  ;;  %v678_v48 = vld [vmem:[%s7396_s2 + $0x348] sm:$0xff]  ;;  %v6171_v32 = vld [vmem:[%s5675_s28 + $0x52] sm:$0xff] }
 0x1b3   : > { %2595 = vmatprep.mubr.f32.mxu0 %v5853_v3  ;;  %2962 = vmatpush1.msra.mxu0 %v679_v37  ;;  %v1714_v44 = vpop.f32.mrf.mxu0  ;;  %v1939_v35 = vpop.f32.mrf.mxu1  ;;  %v6168_v3 = vld [vmem:[%s5675_s28 + $0x110] sm:$0xff] }
 0x1b4   : > { %2451 = vmatmul.mubr.f32.gmra.mxu1 %v6147_v36  ;;  %2596 = vmatmul.mubr.f32.gmra.mxu0 %v6150_v4  ;;  %v6163_v21 = vadd.f32 %v1937_v6, %v1713_v42  ;;  %v661_v6 = vld [vmem:[%s7396_s2 + $0x2c0] sm:$0xff] }
 0x1b5   : > { %2770 = vmatprep.subr.mxu1 %v7453_v62  ;;  %2963 = vmatprep.subr.mxu0 %v7453_v62  ;;  %v1717_v10 = vpop.f32.mrf.mxu0  ;;  %v1942_v37 = vpop.f32.mrf.mxu1  ;;  %v339_v42 = vld [vmem:[%s5675_s28 + $0x121] sm:$0xff] }
 0x1b6   : > { %2771 = vmatpush2.msra.mxu1 %v662_v5  ;;  %2455 = vmatprep.mubr.f32.mxu1 %v338_v26  ;;  %v1718_v1 = vadd.f32 %v1717_v10, %v5627_v33  ;;  %v677_v5 = vld [vmem:[%s7396_s2 + $0x340] sm:$0xff] }
 0x1b7   : > { %2600 = vmatprep.mubr.f32.mxu0 %v5874_v14  ;;  %2964 = vmatpush1.msra.mxu0 %v678_v48  ;;  %v1719_v44 = vpop.f32.mrf.mxu0  ;;  %v1944_v35 = vpop.f32.mrf.mxu1  ;;  %v6189_v14 = vld [vmem:[%s5675_s28 + $0x120] sm:$0xff] }
 0x1b8   : > { %2456 = vmatmul.mubr.f32.gmra.mxu1 %v6168_v3  ;;  %2601 = vmatmul.mubr.f32.gmra.mxu0 %v6171_v32  ;;  %v6184_v33 = vadd.f32 %v1942_v37, %v1718_v1  ;;  %v6192_v26 = vld [vmem:[%s5675_s28 + $0x62] sm:$0xff]  ;;  %v660_v37 = vld [vmem:[%s7396_s2 + $0x2b8] sm:$0xff] }
 0x1b9   : > { %2772 = vmatprep.subr.mxu1 %v7453_v62  ;;  %2965 = vmatprep.subr.mxu0 %v7453_v62  ;;  %v1722_v48 = vpop.f32.mrf.mxu0  ;;  %v1947_v10 = vpop.f32.mrf.mxu1  ;;  %v340_v1 = vld [vmem:[%s5675_s28 + $0x129] sm:$0xff] }
 0x1ba   : > { %7507 = vst [vmem:[#allocation3_spill] sm:$0xff] %v6184_v33  ;;  %2773 = vmatpush2.msra.mxu1 %v661_v6  ;;  %2460 = vmatprep.mubr.f32.mxu1 %v339_v42  ;;  %v1723_v44 = vadd.f32 %v1722_v48, %v5638_v46  ;;  %v676_v6 = vld [vmem:[%s7396_s2 + $0x338] sm:$0xff]  ;;  %v6213_v42 = vld [vmem:[%s5675_s28 + $0x6a] sm:$0xff] }
 0x1bb   : > { %2605 = vmatprep.mubr.f32.mxu0 %v5897_v58  ;;  %2966 = vmatpush1.msra.mxu0 %v677_v5  ;;  %v1724_v35 = vpop.f32.mrf.mxu0  ;;  %v1949_v33 = vpop.f32.mrf.mxu1  ;;  %v6210_v58 = vld [vmem:[%s5675_s28 + $0x128] sm:$0xff] }
 0x1bc   : > { %2461 = vmatmul.mubr.f32.gmra.mxu1 %v6189_v14  ;;  %2606 = vmatmul.mubr.f32.gmra.mxu0 %v6192_v26  ;;  %v6205_v46 = vadd.f32 %v1947_v10, %v1723_v44  ;;  %v659_v10 = vld [vmem:[%s7396_s2 + $0x2b0] sm:$0xff]  ;;  %v341_v44 = vld [vmem:[%s5675_s28 + $0x139] sm:$0xff] }
 0x1bd   : > { %2774 = vmatprep.subr.mxu1 %v7453_v62  ;;  %2967 = vmatprep.subr.mxu0 %v7453_v62  ;;  %v1727_v5 = vpop.f32.mrf.mxu0  ;;  %v1952_v33 = vpop.f32.mrf.mxu1 }
 0x1be   : > { %7508 = vst [vmem:[#allocation6_spill] sm:$0xff] %v6205_v46  ;;  %2775 = vmatpush2.msra.mxu1 %v660_v37  ;;  %2465 = vmatprep.mubr.f32.mxu1 %v340_v1  ;;  %v1728_v48 = vadd.f32 %v1727_v5, %v5648_v61  ;;  %v675_v37 = vld [vmem:[%s7396_s2 + $0x330] sm:$0xff]  ;;  %v6234_v1 = vld [vmem:[%s5675_s28 + $0x7a] sm:$0xff] }
 0x1bf   : > { %2610 = vmatprep.mubr.f32.mxu0 %v5918_v13  ;;  %2968 = vmatpush1.msra.mxu0 %v676_v6  ;;  %v1729_v35 = vpop.f32.mrf.mxu0  ;;  %v1954_v46 = vpop.f32.mrf.mxu1  ;;  %v6231_v13 = vld [vmem:[%s5675_s28 + $0x138] sm:$0xff] }
 0x1c0   : > { %2466 = vmatmul.mubr.f32.gmra.mxu1 %v6210_v58  ;;  %2611 = vmatmul.mubr.f32.gmra.mxu0 %v6213_v42  ;;  %v6226_v61 = vadd.f32 %v1952_v33, %v1728_v48  ;;  %v658_v33 = vld [vmem:[%s7396_s2 + $0x2a8] sm:$0xff] }
 0x1c1   : > { %2776 = vmatprep.subr.mxu1 %v7453_v62  ;;  %2969 = vmatprep.subr.mxu0 %v7453_v62  ;;  %v1732_v6 = vpop.f32.mrf.mxu0  ;;  %v1957_v46 = vpop.f32.mrf.mxu1  ;;  %v342_v48 = vld [vmem:[%s5675_s28 + $0x141] sm:$0xff] }
 0x1c2   : > { %7509 = vst [vmem:[#allocation2_spill] sm:$0xff] %v6226_v61  ;;  %2777 = vmatpush2.msra.mxu1 %v659_v10  ;;  %2470 = vmatprep.mubr.f32.mxu1 %v341_v44  ;;  %v1733_v5 = vadd.f32 %v1732_v6, %v5661_v11  ;;  %v674_v10 = vld [vmem:[%s7396_s2 + $0x328] sm:$0xff] }
 0x1c3   : > { %2615 = vmatprep.mubr.f32.mxu0 %v5939_v63  ;;  %2970 = vmatpush1.msra.mxu0 %v675_v37  ;;  %v1734_v35 = vpop.f32.mrf.mxu0  ;;  %v1959_v61 = vpop.f32.mrf.mxu1  ;;  %v6252_v63 = vld [vmem:[%s5675_s28 + $0x140] sm:$0xff] }
 0x1c4   : > { %2471 = vmatmul.mubr.f32.gmra.mxu1 %v6231_v13  ;;  %2616 = vmatmul.mubr.f32.gmra.mxu0 %v6234_v1  ;;  %v6247_v11 = vadd.f32 %v1957_v46, %v1733_v5  ;;  %v6255_v44 = vld [vmem:[%s5675_s28 + $0x82] sm:$0xff]  ;;  %v343_v5 = vld [vmem:[%s5675_s28 + $0x151] sm:$0xff] }
 0x1c5   : > { %2778 = vmatprep.subr.mxu1 %v7453_v62  ;;  %2971 = vmatprep.subr.mxu0 %v7453_v62  ;;  %v1737_v37 = vpop.f32.mrf.mxu0  ;;  %v1962_v61 = vpop.f32.mrf.mxu1  ;;  %v657_v46 = vld [vmem:[%s7396_s2 + $0x2a0] sm:$0xff] }
 0x1c6   : > { %7510 = vst [vmem:[#allocation5_spill] sm:$0xff] %v6247_v11  ;;  %2779 = vmatpush2.msra.mxu1 %v658_v33  ;;  %2475 = vmatprep.mubr.f32.mxu1 %v342_v48  ;;  %v1738_v6 = vadd.f32 %v1737_v37, %v5680_v47  ;;  %v673_v33 = vld [vmem:[%s7396_s2 + $0x320] sm:$0xff]  ;;  %v6276_v48 = vld [vmem:[%s5675_s28 + $0x92] sm:$0xff] }
 0x1c7   : > { %2620 = vmatprep.mubr.f32.mxu0 %v5960_v28  ;;  %2972 = vmatpush1.msra.mxu0 %v674_v10  ;;  %v1739_v35 = vpop.f32.mrf.mxu0  ;;  %v1964_v11 = vpop.f32.mrf.mxu1  ;;  %v6273_v28 = vld [vmem:[%s5675_s28 + $0x150] sm:$0xff] }
 0x1c8   : > { %2476 = vmatmul.mubr.f32.gmra.mxu1 %v6252_v63  ;;  %2621 = vmatmul.mubr.f32.gmra.mxu0 %v6255_v44  ;;  %v6268_v47 = vadd.f32 %v1962_v61, %v1738_v6  ;;  %v656_v61 = vld [vmem:[%s7396_s2 + $0x298] sm:$0xff] }
 0x1c9   : > { %2780 = vmatprep.subr.mxu1 %v7453_v62  ;;  %2973 = vmatprep.subr.mxu0 %v7453_v62  ;;  %v1742_v10 = vpop.f32.mrf.mxu0  ;;  %v1967_v11 = vpop.f32.mrf.mxu1  ;;  %v344_v6 = vld [vmem:[%s5675_s28 + $0x159] sm:$0xff] }
 0x1ca   : > { %7511 = vst [vmem:[#allocation9_spill] sm:$0xff] %v6268_v47  ;;  %2781 = vmatpush2.msra.mxu1 %v657_v46  ;;  %2480 = vmatprep.mubr.f32.mxu1 %v343_v5  ;;  %v1743_v37 = vadd.f32 %v1742_v10, %v5687_v16  ;;  %v672_v46 = vld [vmem:[%s7396_s2 + $0x318] sm:$0xff] }
 0x1cb   : > { %2625 = vmatprep.mubr.f32.mxu0 %v5980_v52  ;;  %2974 = vmatpush1.msra.mxu0 %v673_v33  ;;  %v1744_v35 = vpop.f32.mrf.mxu0  ;;  %v1969_v47 = vpop.f32.mrf.mxu1  ;;  %v6294_v52 = vld [vmem:[%s5675_s28 + $0x158] sm:$0xff] }
 0x1cc   : > { %2481 = vmatmul.mubr.f32.gmra.mxu1 %v6273_v28  ;;  %2626 = vmatmul.mubr.f32.gmra.mxu0 %v6276_v48  ;;  %v6289_v16 = vadd.f32 %v1967_v11, %v1743_v37  ;;  %v6297_v5 = vld [vmem:[%s5675_s28 + $0x9a] sm:$0xff]  ;;  %v655_v11 = vld [vmem:[%s7396_s2 + $0x290] sm:$0xff] }
 0x1cd   : > { %2782 = vmatprep.subr.mxu1 %v7453_v62  ;;  %2975 = vmatprep.subr.mxu0 %v7453_v62  ;;  %v1747_v33 = vpop.f32.mrf.mxu0  ;;  %v1972_v47 = vpop.f32.mrf.mxu1  ;;  %v345_v37 = vld [vmem:[%s5675_s28 + $0x169] sm:$0xff] }
 0x1ce   : > { %7512 = vst [vmem:[#allocation4_spill] sm:$0xff] %v6289_v16  ;;  %2783 = vmatpush2.msra.mxu1 %v656_v61  ;;  %2485 = vmatprep.mubr.f32.mxu1 %v344_v6  ;;  %v1748_v10 = vadd.f32 %v1747_v33, %v5703_v38  ;;  %v671_v61 = vld [vmem:[%s7396_s2 + $0x310] sm:$0xff] }
 0x1cf   : > { %2630 = vmatprep.mubr.f32.mxu0 %v6004_v59  ;;  %2976 = vmatpush1.msra.mxu0 %v672_v46  ;;  %v1749_v35 = vpop.f32.mrf.mxu0  ;;  %v1974_v16 = vpop.f32.mrf.mxu1  ;;  %v6315_v59 = vld [vmem:[%s5675_s28 + $0x168] sm:$0xff] }
 0x1d0   : > { %2486 = vmatmul.mubr.f32.gmra.mxu1 %v6294_v52  ;;  %2631 = vmatmul.mubr.f32.gmra.mxu0 %v6297_v5  ;;  %v6310_v38 = vadd.f32 %v1972_v47, %v1748_v10  ;;  %v6318_v6 = vld [vmem:[%s5675_s28 + $0xaa] sm:$0xff] }
 0x1d1   : > { %2784 = vmatprep.subr.mxu1 %v7453_v62  ;;  %2977 = vmatprep.subr.mxu0 %v7453_v62  ;;  %v1752_v46 = vpop.f32.mrf.mxu0  ;;  %v1977_v16 = vpop.f32.mrf.mxu1  ;;  %v654_v47 = vld [vmem:[%s7396_s2 + $0x288] sm:$0xff]  ;;  %v346_v10 = vld [vmem:[%s5675_s28 + $0x171] sm:$0xff] }
 0x1d2   : > { %7513 = vst [vmem:[#allocation8_spill] sm:$0xff] %v6310_v38  ;;  %2785 = vmatpush2.msra.mxu1 %v655_v11  ;;  %2490 = vmatprep.mubr.f32.mxu1 %v345_v37  ;;  %v1753_v33 = vadd.f32 %v1752_v46, %v5715_v56  ;;  %v670_v11 = vld [vmem:[%s7396_s2 + $0x308] sm:$0xff]  ;;  %v6336_v56 = vld [vmem:[%s5675_s28 + $0x170] sm:$0xff] }
 0x1d3   : > { %2635 = vmatprep.mubr.f32.mxu0 %v6026_v50  ;;  %2978 = vmatpush1.msra.mxu0 %v671_v61  ;;  %v1754_v35 = vpop.f32.mrf.mxu0  ;;  %v1979_v38 = vpop.f32.mrf.mxu1  ;;  %v6339_v50 = vld [vmem:[%s5675_s28 + $0xb2] sm:$0xff] }
 0x1d4   : > { %2491 = vmatmul.mubr.f32.gmra.mxu1 %v6315_v59  ;;  %2636 = vmatmul.mubr.f32.gmra.mxu0 %v6318_v6  ;;  %v6331_v37 = vadd.f32 %v1977_v16, %v1753_v33  ;;  %v653_v16 = vld [vmem:[%s7396_s2 + $0x280] sm:$0xff] }
 0x1d5   : > { %2786 = vmatprep.subr.mxu1 %v7453_v62  ;;  %2979 = vmatprep.subr.mxu0 %v7453_v62  ;;  %v1757_v61 = vpop.f32.mrf.mxu0  ;;  %v1982_v38 = vpop.f32.mrf.mxu1 }
 0x1d6   : > { %2787 = vmatpush2.msra.mxu1 %v654_v47  ;;  %2495 = vmatprep.mubr.f32.mxu1 %v346_v10  ;;  %v1758_v46 = vadd.f32 %v1757_v61, %v5734_v20  ;;  %v669_v47 = vld [vmem:[%s7396_s2 + $0x300] sm:$0xff] }
 0x1d7   : > { %2640 = vmatprep.mubr.f32.mxu0 %v6045_v19  ;;  %2980 = vmatpush1.msra.mxu0 %v670_v11  ;;  %v1759_v33 = vpop.f32.mrf.mxu0  ;;  %v1984_v35 = vpop.f32.mrf.mxu1  ;;  %v6356_v20 = vld [vmem:[%s5675_s28 + $0xc2] sm:$0xff]  ;;  %v3741_v19 = vld [vmem:[%s5675_s28 + $0x19] sm:$0xff] }
 0x1d8   : > { %2496 = vmatmul.mubr.f32.gmra.mxu1 %v6336_v56  ;;  %2641 = vmatmul.mubr.f32.gmra.mxu0 %v6339_v50  ;;  %v6351_v10 = vadd.f32 %v1982_v38, %v1758_v46  ;;  %v716_v33 = vld [vmem:[%s7396_s2 + $0x478] sm:$0xff] }
 0x1d9   : > { %2788 = vmatprep.subr.mxu1 %v7453_v62  ;;  %2981 = vmatprep.subr.mxu0 %v7453_v62  ;;  %v1762_v11 = vpop.f32.mrf.mxu0  ;;  %v1987_v61 = vpop.f32.mrf.mxu1 }
 0x1da   : > { %7514 = vst [vmem:[#allocation12_spill] sm:$0xff] %v6351_v10  ;;  %2789 = vmatpush2.msra.mxu1 %v653_v16  ;;  %2645 = vmatprep.mubr.f32.mxu0 %v6063_v34  ;;  %v1763_v38 = vadd.f32 %v1762_v11, %v5749_v12  ;;  %v700_v16 = vld [vmem:[%s7396_s2 + $0x3f8] sm:$0xff]  ;;  %v6373_v34 = vld [vmem:[%s5675_s28 + $0xca] sm:$0xff]  ;;  %v3742_v12 = vld [vmem:[%s5675_s28 + $0x21] sm:$0xff] }
 0x1db   : > { %2790 = vmatprep.mubr.f32.mxu1 %v6066_v57  ;;  %2982 = vmatpush1.msra.mxu0 %v669_v47  ;;  %v1764_v46 = vpop.f32.mrf.mxu0  ;;  %v1989_v35 = vpop.f32.mrf.mxu1 }
 0x1dc   : > { %2646 = vmatmul.mubr.f32.gmra.mxu0 %v6356_v20  ;;  %2791 = vmatmul.mubr.f32.vlgmr.msra.gmra.mxu1 %v3741_v19  ;;  %v6369_v10 = vadd.f32 %v1987_v61, %v1763_v38  ;;  %v699_v19 = vld [vmem:[%s7396_s2 + $0x3f0] sm:$0xff] }
 0x1dd   : > { %4273 = vmatprep.subr.mxu1 %v716_v33  ;;  %2983 = vmatprep.subr.mxu0 %v7453_v62  ;;  %v1767_v11 = vpop.f32.mrf.mxu0  ;;  %v1992_v57 = vpop.f32.mrf.mxu1 }
 0x1de   : > { %4274 = vmatpush3.msra.mxu1 %v716_v33  ;;  %2650 = vmatprep.mubr.f32.mxu0 %v6084_v29  ;;  %v1768_v47 = vadd.f32 %v1767_v11, %v5770_v31  ;;  %v715_v33 = vld [vmem:[%s7396_s2 + $0x470] sm:$0xff]  ;;  %v6391_v31 = vld [vmem:[%s5675_s28 + $0xda] sm:$0xff] }
 0x1df   : > { %2795 = vmatprep.mubr.f32.mxu1 %v6087_v60  ;;  %2984 = vmatpush2.msra.mxu0 %v700_v16  ;;  %v1769_v61 = vpop.f32.mrf.mxu0  ;;  %v1994_v38 = vpop.f32.mrf.mxu1  ;;  %v6394_v29 = vld [vmem:[%s5675_s28 + $0x31] sm:$0xff] }
 0x1e0   : > { %2651 = vmatmul.mubr.f32.gmra.mxu0 %v6373_v34  ;;  %2796 = vmatmul.mubr.f32.gmra.mxu1 %v3742_v12  ;;  %v6386_v46 = vadd.f32 %v1992_v57, %v1768_v47  ;;  %v6414_v47 = vld [vmem:[%s5675_s28 + $0x39] sm:$0xff] }
 0x1e1   : > { %2985 = vmatprep.subr.mxu0 %v7453_v62  ;;  %2655 = vmatprep.mubr.f32.mxu0 %v6105_v17  ;;  %v1772_v60 = vpop.f32.mrf.mxu0  ;;  %v1997_v35 = vpop.f32.mrf.mxu1  ;;  %v698_v17 = vld [vmem:[%s7396_s2 + $0x3e8] sm:$0xff] }
 0x1e2   : > { %2800 = vmatprep.mubr.f32.mxu1 %v6108_v53  ;;  %2986 = vmatpush2.msra.mxu0 %v699_v19  ;;  %v1773_v16 = vadd.f32 %v1772_v60, %v5786_v54  ;;  %v714_v53 = vld [vmem:[%s7396_s2 + $0x468] sm:$0xff] }
 0x1e3   : > { %4275 = vmatprep.subr.mxu1 %v715_v33  ;;  %2987 = vmatprep.subr.mxu0 %v7453_v62  ;;  %v1774_v12 = vpop.f32.mrf.mxu0  ;;  %v1999_v11 = vpop.f32.mrf.mxu1  ;;  %v6411_v54 = vld [vmem:[%s5675_s28 + $0xe2] sm:$0xff] }
 0x1e4   : > { %2656 = vmatmul.mubr.f32.gmra.mxu0 %v6391_v31  ;;  %2801 = vmatmul.mubr.f32.gmra.mxu1 %v6394_v29  ;;  %v6407_v57 = vadd.f32 %v1997_v35, %v1773_v16  ;;  %v6435_v16 = vld [vmem:[%s5675_s28 + $0x49] sm:$0xff] }
 0x1e5   : > { %4276 = vmatpush3.msra.mxu1 %v715_v33  ;;  %2660 = vmatprep.mubr.f32.mxu0 %v6126_v45  ;;  %v1777_v19 = vpop.f32.mrf.mxu0  ;;  %v2002_v61 = vpop.f32.mrf.mxu1  ;;  %v697_v33 = vld [vmem:[%s7396_s2 + $0x3e0] sm:$0xff] }
 0x1e6   : > { %2805 = vmatprep.mubr.f32.mxu1 %v6129_v23  ;;  %2988 = vmatpush2.msra.mxu0 %v698_v17  ;;  %v1778_v38 = vadd.f32 %v1777_v19, %v5807_v9  ;;  %v713_v23 = vld [vmem:[%s7396_s2 + $0x460] sm:$0xff]  ;;  %v6432_v9 = vld [vmem:[%s5675_s28 + $0xf2] sm:$0xff] }
 0x1e7   : > { %2989 = vmatprep.subr.mxu0 %v7453_v62  ;;  %4277 = vmatprep.subr.mxu1 %v714_v53  ;;  %v1779_v45 = vpop.f32.mrf.mxu0  ;;  %v2004_v60 = vpop.f32.mrf.mxu1 }
 0x1e8   : > { %2661 = vmatmul.mubr.f32.gmra.mxu0 %v6411_v54  ;;  %2806 = vmatmul.mubr.f32.gmra.mxu1 %v6414_v47  ;;  %v6424_v35 = vadd.f32 %v2002_v61, %v1778_v38  ;;  %v6455_v38 = vld [vmem:[%s5675_s28 + $0x51] sm:$0xff] }
 0x1e9   : > { %2665 = vmatprep.mubr.f32.mxu0 %v6147_v36  ;;  %2810 = vmatprep.mubr.f32.mxu1 %v6150_v4  ;;  %v1782_v17 = vpop.f32.mrf.mxu0  ;;  %v2007_v12 = vpop.f32.mrf.mxu1  ;;  %v696_v36 = vld [vmem:[%s7396_s2 + $0x3d8] sm:$0xff] }
 0x1ea   : > { %2990 = vmatpush2.msra.mxu0 %v697_v33  ;;  %4278 = vmatpush3.msra.mxu1 %v714_v53  ;;  %v1783_v11 = vadd.f32 %v1782_v17, %v5822_v30  ;;  %v712_v53 = vld [vmem:[%s7396_s2 + $0x458] sm:$0xff] }
 0x1eb   : > { %2991 = vmatprep.subr.mxu0 %v7453_v62  ;;  %4279 = vmatprep.subr.mxu1 %v713_v23  ;;  %v1784_v4 = vpop.f32.mrf.mxu0  ;;  %v2009_v19 = vpop.f32.mrf.mxu1  ;;  %v6452_v30 = vld [vmem:[%s5675_s28 + $0xfa] sm:$0xff] }
 0x1ec   : > { %2666 = vmatmul.mubr.f32.gmra.mxu0 %v6432_v9  ;;  %2811 = vmatmul.mubr.f32.gmra.mxu1 %v6435_v16  ;;  %v6444_v61 = vadd.f32 %v2007_v12, %v1783_v11  ;;  %v6475_v11 = vld [vmem:[%s5675_s28 + $0x61] sm:$0xff] }
 0x1ed   : > { %2670 = vmatprep.mubr.f32.mxu0 %v6168_v3  ;;  %2815 = vmatprep.mubr.f32.mxu1 %v6171_v32  ;;  %v1787_v33 = vpop.f32.mrf.mxu0  ;;  %v2012_v45 = vpop.f32.mrf.mxu1  ;;  %v695_v3 = vld [vmem:[%s7396_s2 + $0x3d0] sm:$0xff] }
 0x1ee   : > { %2992 = vmatpush2.msra.mxu0 %v696_v36  ;;  %4280 = vmatpush3.msra.mxu1 %v713_v23  ;;  %v1788_v60 = vadd.f32 %v1787_v33, %v5841_v2  ;;  %v711_v23 = vld [vmem:[%s7396_s2 + $0x450] sm:$0xff] }
 0x1ef   : > { %2993 = vmatprep.subr.mxu0 %v7453_v62  ;;  %4281 = vmatprep.subr.mxu1 %v712_v53  ;;  %v1789_v32 = vpop.f32.mrf.mxu0  ;;  %v2014_v17 = vpop.f32.mrf.mxu1  ;;  %v6472_v2 = vld [vmem:[%s5675_s28 + $0x10a] sm:$0xff] }
 0x1f0   : > { %2671 = vmatmul.mubr.f32.gmra.mxu0 %v6452_v30  ;;  %2816 = vmatmul.mubr.f32.gmra.mxu1 %v6455_v38  ;;  %v6464_v12 = vadd.f32 %v2012_v45, %v1788_v60  ;;  %v6495_v60 = vld [vmem:[%s5675_s28 + $0x69] sm:$0xff] }
 0x1f1   : > { %2675 = vmatprep.mubr.f32.mxu0 %v6189_v14  ;;  %2820 = vmatprep.mubr.f32.mxu1 %v6192_v26  ;;  %v1792_v36 = vpop.f32.mrf.mxu0  ;;  %v2017_v4 = vpop.f32.mrf.mxu1  ;;  %v694_v14 = vld [vmem:[%s7396_s2 + $0x3c8] sm:$0xff] }
 0x1f2   : > { %2994 = vmatpush2.msra.mxu0 %v695_v3  ;;  %4282 = vmatpush3.msra.mxu1 %v712_v53  ;;  %v1793_v19 = vadd.f32 %v1792_v36, %v5856_v55  ;;  %v710_v53 = vld [vmem:[%s7396_s2 + $0x448] sm:$0xff]  ;;  %v6492_v55 = vld [vmem:[%s5675_s28 + $0x112] sm:$0xff] }
 0x1f3   : > { %2995 = vmatprep.subr.mxu0 %v7453_v62  ;;  %v1794_v33 = vpop.f32.mrf.mxu0  ;;  %v2019_v26 = vpop.f32.mrf.mxu1  ;;  %4283 = vmatprep.subr.mxu1 %v711_v23 }
 0x1f4   : > { %2676 = vmatmul.mubr.f32.gmra.mxu0 %v6472_v2  ;;  %2821 = vmatmul.mubr.f32.gmra.mxu1 %v6475_v11  ;;  %v6484_v45 = vadd.f32 %v2017_v4, %v1793_v19  ;;  %v6515_v19 = vld [vmem:[%s5675_s28 + $0x79] sm:$0xff] }
 0x1f5   : > { %2680 = vmatprep.mubr.f32.mxu0 %v6210_v58  ;;  %2825 = vmatprep.mubr.f32.mxu1 %v6213_v42  ;;  %v1797_v3 = vpop.f32.mrf.mxu0  ;;  %v2022_v32 = vpop.f32.mrf.mxu1  ;;  %v693_v58 = vld [vmem:[%s7396_s2 + $0x3c0] sm:$0xff] }
 0x1f6   : > { %2996 = vmatpush2.msra.mxu0 %v694_v14  ;;  %v1798_v17 = vadd.f32 %v1797_v3, %v5876_v18  ;;  %4284 = vmatpush3.msra.mxu1 %v711_v23  ;;  %v709_v18 = vld [vmem:[%s7396_s2 + $0x440] sm:$0xff] }
 0x1f7   : > { %2997 = vmatprep.subr.mxu0 %v7453_v62  ;;  %v1799_v36 = vpop.f32.mrf.mxu0  ;;  %v2024_v42 = vpop.f32.mrf.mxu1  ;;  %4285 = vmatprep.subr.mxu1 %v710_v53  ;;  %v6512_v23 = vld [vmem:[%s5675_s28 + $0x122] sm:$0xff] }
 0x1f8   : > { %2681 = vmatmul.mubr.f32.gmra.mxu0 %v6492_v55  ;;  %2826 = vmatmul.mubr.f32.gmra.mxu1 %v6495_v60  ;;  %v6504_v4 = vadd.f32 %v2022_v32, %v1798_v17  ;;  %v6535_v17 = vld [vmem:[%s5675_s28 + $0x81] sm:$0xff] }
 0x1f9   : > { %2685 = vmatprep.mubr.f32.mxu0 %v6231_v13  ;;  %2830 = vmatprep.mubr.f32.mxu1 %v6234_v1  ;;  %v1802_v14 = vpop.f32.mrf.mxu0  ;;  %v2027_v33 = vpop.f32.mrf.mxu1  ;;  %v692_v13 = vld [vmem:[%s7396_s2 + $0x3b8] sm:$0xff] }
 0x1fa   : > { %2998 = vmatpush2.msra.mxu0 %v693_v58  ;;  %v1803_v26 = vadd.f32 %v1802_v14, %v5893_v51  ;;  %4286 = vmatpush3.msra.mxu1 %v710_v53  ;;  %v708_v51 = vld [vmem:[%s7396_s2 + $0x438] sm:$0xff]  ;;  %v6532_v53 = vld [vmem:[%s5675_s28 + $0x12a] sm:$0xff] }
 0x1fb   : > { %2999 = vmatprep.subr.mxu0 %v7453_v62  ;;  %v1804_v3 = vpop.f32.mrf.mxu0  ;;  %v2029_v1 = vpop.f32.mrf.mxu1  ;;  %4287 = vmatprep.subr.mxu1 %v709_v18 }
 0x1fc   : > { %2686 = vmatmul.mubr.f32.gmra.mxu0 %v6512_v23  ;;  %2831 = vmatmul.mubr.f32.gmra.mxu1 %v6515_v19  ;;  %v6524_v32 = vadd.f32 %v2027_v33, %v1803_v26  ;;  %v6555_v26 = vld [vmem:[%s5675_s28 + $0x91] sm:$0xff] }
 0x1fd   : > { %2690 = vmatprep.mubr.f32.mxu0 %v6252_v63  ;;  %2835 = vmatprep.mubr.f32.mxu1 %v6255_v44  ;;  %v1807_v58 = vpop.f32.mrf.mxu0  ;;  %v2032_v36 = vpop.f32.mrf.mxu1  ;;  %v691_v63 = vld [vmem:[%s7396_s2 + $0x3b0] sm:$0xff] }
 0x1fe   : > { %3000 = vmatpush2.msra.mxu0 %v692_v13  ;;  %v1808_v42 = vadd.f32 %v1807_v58, %v5908_v40  ;;  %4288 = vmatpush3.msra.mxu1 %v709_v18  ;;  %v707_v40 = vld [vmem:[%s7396_s2 + $0x430] sm:$0xff]  ;;  %v6552_v18 = vld [vmem:[%s5675_s28 + $0x13a] sm:$0xff] }
 0x1ff   : > { %3001 = vmatprep.subr.mxu0 %v7453_v62  ;;  %v1809_v14 = vpop.f32.mrf.mxu0  ;;  %v2034_v44 = vpop.f32.mrf.mxu1  ;;  %4289 = vmatprep.subr.mxu1 %v708_v51 }
 0x200   : > { %2691 = vmatmul.mubr.f32.gmra.mxu0 %v6532_v53  ;;  %2836 = vmatmul.mubr.f32.gmra.mxu1 %v6535_v17  ;;  %v6544_v33 = vadd.f32 %v2032_v36, %v1808_v42  ;;  %v6575_v42 = vld [vmem:[%s5675_s28 + $0x99] sm:$0xff] }
 0x201   : > { %2695 = vmatprep.mubr.f32.mxu0 %v6273_v28  ;;  %2840 = vmatprep.mubr.f32.mxu1 %v6276_v48  ;;  %v1812_v13 = vpop.f32.mrf.mxu0  ;;  %v2037_v3 = vpop.f32.mrf.mxu1  ;;  %v690_v28 = vld [vmem:[%s7396_s2 + $0x3a8] sm:$0xff] }
 0x202   : > { %3002 = vmatpush2.msra.mxu0 %v691_v63  ;;  %v1813_v1 = vadd.f32 %v1812_v13, %v5927_v39  ;;  %4290 = vmatpush3.msra.mxu1 %v708_v51  ;;  %v706_v39 = vld [vmem:[%s7396_s2 + $0x428] sm:$0xff] }
 0x203   : > { %3003 = vmatprep.subr.mxu0 %v7453_v62  ;;  %v1814_v58 = vpop.f32.mrf.mxu0  ;;  %v2039_v48 = vpop.f32.mrf.mxu1  ;;  %4291 = vmatprep.subr.mxu1 %v707_v40  ;;  %v6572_v51 = vld [vmem:[%s5675_s28 + $0x142] sm:$0xff] }
 0x204   : > { %2696 = vmatmul.mubr.f32.gmra.mxu0 %v6552_v18  ;;  %2841 = vmatmul.mubr.f32.gmra.mxu1 %v6555_v26  ;;  %v6564_v36 = vadd.f32 %v2037_v3, %v1813_v1  ;;  %v6595_v1 = vld [vmem:[%s5675_s28 + $0xa9] sm:$0xff] }
 0x205   : > { %2700 = vmatprep.mubr.f32.mxu0 %v6294_v52  ;;  %2845 = vmatprep.mubr.f32.mxu1 %v6297_v5  ;;  %v1817_v63 = vpop.f32.mrf.mxu0  ;;  %v2042_v14 = vpop.f32.mrf.mxu1  ;;  %v689_v52 = vld [vmem:[%s7396_s2 + $0x3a0] sm:$0xff] }
 0x206   : > { %3004 = vmatpush2.msra.mxu0 %v690_v28  ;;  %v1818_v44 = vadd.f32 %v1817_v63, %v5942_v15  ;;  %4292 = vmatpush3.msra.mxu1 %v707_v40  ;;  %v705_v15 = vld [vmem:[%s7396_s2 + $0x420] sm:$0xff]  ;;  %v6592_v40 = vld [vmem:[%s5675_s28 + $0x152] sm:$0xff] }
 0x207   : > { %3005 = vmatprep.subr.mxu0 %v7453_v62  ;;  %v1819_v13 = vpop.f32.mrf.mxu0  ;;  %v2044_v5 = vpop.f32.mrf.mxu1  ;;  %4293 = vmatprep.subr.mxu1 %v706_v39 }
 0x208   : > { %2701 = vmatmul.mubr.f32.gmra.mxu0 %v6572_v51  ;;  %2846 = vmatmul.mubr.f32.gmra.mxu1 %v6575_v42  ;;  %v6584_v3 = vadd.f32 %v2042_v14, %v1818_v44  ;;  %v6615_v44 = vld [vmem:[%s5675_s28 + $0xb1] sm:$0xff]  ;;  %v6618_v5 = vld [vmem:[%s5675_s28 + $0x180] sm:$0xff] }
 0x209   : > { %2705 = vmatprep.mubr.f32.mxu0 %v6315_v59  ;;  %2850 = vmatprep.mubr.f32.mxu1 %v6318_v6  ;;  %v1822_v28 = vpop.f32.mrf.mxu0  ;;  %v2047_v58 = vpop.f32.mrf.mxu1  ;;  %v688_v59 = vld [vmem:[%s7396_s2 + $0x398] sm:$0xff]  ;;  %7516 = vst [vmem:[#allocation11_spill] sm:$0xff] %v6618_v5 }
 0x20a   : > { %7515 = vst [vmem:[#allocation7_spill] sm:$0xff] %v6584_v3  ;;  %3006 = vmatpush2.msra.mxu0 %v689_v52  ;;  %v1823_v48 = vadd.f32 %v1822_v28, %v5962_v41  ;;  %4294 = vmatpush3.msra.mxu1 %v706_v39  ;;  %v704_v41 = vld [vmem:[%s7396_s2 + $0x418] sm:$0xff] }
 0x20b   : > { %3007 = vmatprep.subr.mxu0 %v7453_v62  ;;  %v1824_v6 = vpop.f32.mrf.mxu0  ;;  %v2049_v63 = vpop.f32.mrf.mxu1  ;;  %4295 = vmatprep.subr.mxu1 %v705_v15  ;;  %v6612_v39 = vld [vmem:[%s5675_s28 + $0x15a] sm:$0xff] }
 0x20c   : > { %2706 = vmatmul.mubr.f32.gmra.mxu0 %v6592_v40  ;;  %2851 = vmatmul.mubr.f32.gmra.mxu1 %v6595_v1  ;;  %v6604_v14 = vadd.f32 %v2047_v58, %v1823_v48 }
 0x20d   : > { %2710 = vmatprep.mubr.f32.mxu0 %v6336_v56  ;;  %2855 = vmatprep.mubr.f32.mxu1 %v6339_v50  ;;  %v4227_v52 = vpop.f32.mrf.mxu0  ;;  %v2342_v13 = vpop.f32.mrf.mxu1  ;;  %v687_v56 = vld [vmem:[%s7396_s2 + $0x390] sm:$0xff] }
 0x20e   : > { %3008 = vmatpush2.msra.mxu0 %v688_v59  ;;  %v2123_v28 = vadd.f32 %v4227_v52, %v6006_v8  ;;  %4296 = vmatpush3.msra.mxu1 %v705_v15  ;;  %v703_v8 = vld [vmem:[%s7396_s2 + $0x410] sm:$0xff]  ;;  %v6637_v59 = vld [vmem:[%s5675_s28 + $0xc1] sm:$0xff] }
 0x20f   : > { %3009 = vmatprep.subr.mxu0 %v7453_v62  ;;  %v2117_v50 = vpop.f32.mrf.mxu0  ;;  %v2344_v58 = vpop.f32.mrf.mxu1  ;;  %4297 = vmatprep.subr.mxu1 %v704_v41  ;;  %v6634_v15 = vld [vmem:[%s5675_s28 + $0x16a] sm:$0xff] }
 0x210   : > { %2711 = vmatmul.mubr.f32.gmra.mxu0 %v6612_v39  ;;  %2856 = vmatmul.mubr.f32.gmra.mxu1 %v6615_v44  ;;  %v2118_v48 = vadd.f32 %v2117_v50, %v5984_v25  ;;  %v6640_v52 = vld [vmem:[%s5675_s28 + $0x188] sm:$0xff] }
 0x211   : > { %2715 = vmatprep.mubr.f32.mxu0 %v6618_v5  ;;  %2860 = vmatprep.mubr.f32.mxu1 %v6356_v20  ;;  %v4230_v6 = vpop.f32.mrf.mxu0  ;;  %v2347_v63 = vpop.f32.mrf.mxu1  ;;  %v686_v20 = vld [vmem:[%s7396_s2 + $0x388] sm:$0xff] }
 0x212   : > { %3010 = vmatpush2.msra.mxu0 %v687_v56  ;;  %v2133_v25 = vadd.f32 %v4230_v6, %v6040_v22  ;;  %v6643_v50 = vadd.f32 %v2347_v63, %v2123_v28  ;;  %4298 = vmatpush3.msra.mxu1 %v704_v41  ;;  %v6645_v58 = vadd.f32 %v2342_v13, %v2118_v48  ;;  %v702_v41 = vld [vmem:[%s7396_s2 + $0x408] sm:$0xff]  ;;  %v6660_v13 = vld [vmem:[%s5675_s28 + $0x172] sm:$0xff]  ;;  %v701_v63 = vld [vmem:[%s7396_s2 + $0x400] sm:$0xff] }
 0x213   : > { %3011 = vmatprep.subr.mxu0 %v7453_v62  ;;  %v2127_v5 = vpop.f32.mrf.mxu0  ;;  %v2349_v3 = vpop.f32.mrf.mxu1  ;;  %4299 = vmatprep.subr.mxu1 %v703_v8  ;;  %v6663_v28 = vld [vmem:[%s5675_s28 + $0xc9] sm:$0xff] }
 0x214   : > { %2716 = vmatmul.mubr.f32.gmra.mxu0 %v6634_v15  ;;  %2861 = vmatmul.mubr.f32.gmra.mxu1 %v6637_v59  ;;  %v2128_v22 = vadd.f32 %v2127_v5, %v6023_v24  ;;  %v685_v3 = vld [vmem:[%s7396_s2 + $0x380] sm:$0xff] }
 0x215   : > { %2720 = vmatprep.mubr.f32.mxu0 %v6640_v52  ;;  %2865 = vmatprep.mubr.f32.mxu1 %v6373_v34 }
 0x216   : > { %3012 = vmatpush2.msra.mxu0 %v686_v20  ;;  %v4233_v24 = vpop.f32.mrf.mxu0  ;;  %v2352_v5 = vpop.f32.mrf.mxu1  ;;  %4300 = vmatpush3.msra.mxu1 %v703_v8 }
 0x217   : > { %3013 = vmatprep.subr.mxu0 %v7453_v62  ;;  %v2143_v56 = vadd.f32 %v4233_v24, %v6079_v49  ;;  %v6670_v48 = vadd.f32 %v2352_v5, %v2128_v22  ;;  %4301 = vmatprep.subr.mxu1 %v702_v41  ;;  %v6679_v62 = vld [vmem:[%s5675_s28 + $0xd9] sm:$0xff]  ;;  %v3805_v49 = vld [vmem:[%s5675_s28 + $0x30] sm:$0xff] }
 0x218   : > { %2721 = vmatmul.mubr.f32.gmra.mxu0 %v6660_v13  ;;  %2866 = vmatmul.mubr.f32.gmra.mxu1 %v6663_v28  ;;  %v2137_v34 = vpop.f32.mrf.mxu0  ;;  %v2354_v6 = vpop.f32.mrf.mxu1 }
 0x219   : > { %2870 = vmatprep.mubr.f32.mxu1 %v6391_v31  ;;  %3014 = vmatpush2.msra.mxu0 %v685_v3  ;;  %v2138_v8 = vadd.f32 %v2137_v34, %v6058_v43  ;;  %v6691_v43 = vld [vmem:[%s5675_s28 + $0xe1] sm:$0xff] }
 0x21a   : > { %3015 = vmatprep.mubr.f32.mxu0 %v6394_v29  ;;  %4302 = vmatpush3.msra.mxu1 %v702_v41  ;;  %v3806_v29 = vld [vmem:[%s5675_s28 + $0x38] sm:$0xff] }
 0x21b   : > { %v4236_v20 = vpop.f32.mrf.mxu0  ;;  %v2357_v22 = vpop.f32.mrf.mxu1  ;;  %4303 = vmatprep.subr.mxu1 %v701_v63 }
 0x21c   : > { %2871 = vmatmul.mubr.f32.gmra.mxu1 %v6679_v62  ;;  %3016 = vmatmul.mubr.f32.vlgmr.msra.gmra.mxu0 %v3805_v49  ;;  %v2153_v24 = vadd.f32 %v4236_v20, %v6121_v27  ;;  %v6686_v31 = vadd.f32 %v2357_v22, %v2133_v25 }
 0x21d   : > { %2875 = vmatprep.mubr.f32.mxu1 %v6411_v54  ;;  %3020 = vmatprep.mubr.f32.mxu0 %v6414_v47  ;;  %v2147_v41 = vpop.f32.mrf.mxu0  ;;  %v2359_v3 = vpop.f32.mrf.mxu1  ;;  %v6699_v54 = vld [vmem:[%s5675_s28 + $0xf1] sm:$0xff]  ;;  %v3807_v47 = vld [vmem:[%s5675_s28 + $0x48] sm:$0xff] }
 0x21e   : > { %v2148_v5 = vadd.f32 %v2147_v41, %v6100_v0  ;;  %4304 = vmatpush3.msra.mxu1 %v701_v63  ;;  %v7518_v3 = vld [vmem:[#allocation3_spill] sm:$0xff] }
 0x220   : > { %2876 = vmatmul.mubr.f32.gmra.mxu1 %v6691_v43  ;;  %3021 = vmatmul.mubr.f32.gmra.mxu0 %v3806_v29  ;;  %v4239_v27 = vpop.f32.mrf.mxu0  ;;  %v2362_v25 = vpop.f32.mrf.mxu1 }
 0x221   : > { %2880 = vmatprep.mubr.f32.mxu1 %v6432_v9  ;;  %3025 = vmatprep.mubr.f32.mxu0 %v6435_v16  ;;  %v6703_v34 = vadd.f32 %v4239_v27, %v6163_v21  ;;  %v6705_v6 = vadd.f32 %v2362_v25, %v2138_v8  ;;  %v6712_v9 = vld [vmem:[%s5675_s28 + $0xf9] sm:$0xff]  ;;  %v3808_v16 = vld [vmem:[%s5675_s28 + $0x50] sm:$0xff] }
 0x222   : > { %v2157_v0 = vpop.f32.mrf.mxu0  ;;  %v2364_v63 = vpop.f32.mrf.mxu1  ;;  %v7517_v8 = vld [vmem:[#allocation6_spill] sm:$0xff] }
 0x223   : > { %v2158_v49 = vadd.f32 %v2157_v0, %v6142_v7  ;;  %v3809_v27 = vld [vmem:[%s5675_s28 + $0x60] sm:$0xff] }
 0x224   : > { %2881 = vmatmul.mubr.f32.gmra.mxu1 %v6699_v54  ;;  %3026 = vmatmul.mubr.f32.gmra.mxu0 %v3807_v47  ;;  %v7519_v47 = vld [vmem:[#allocation5_spill] sm:$0xff] }
 0x225   : > { %2885 = vmatprep.mubr.f32.mxu1 %v6452_v30  ;;  %3030 = vmatprep.mubr.f32.mxu0 %v6455_v38  ;;  %v4242_v21 = vpop.f32.mrf.mxu0  ;;  %v2367_v20 = vpop.f32.mrf.mxu1  ;;  %v6727_v38 = vld [vmem:[%s5675_s28 + $0x109] sm:$0xff] }
 0x226   : > { %v6716_v22 = vadd.f32 %v4242_v21, %v7517_v8  ;;  %v6718_v29 = vadd.f32 %v2367_v20, %v2143_v56  ;;  %v7520_v20 = vld [vmem:[#allocation2_spill] sm:$0xff] }
 0x227   : > { %v2167_v7 = vpop.f32.mrf.mxu0  ;;  %v2369_v41 = vpop.f32.mrf.mxu1 }
 0x228   : > { %2886 = vmatmul.mubr.f32.gmra.mxu1 %v6712_v9  ;;  %3031 = vmatmul.mubr.f32.gmra.mxu0 %v3808_v16  ;;  %v6722_v30 = vadd.f32 %v2167_v7, %v7518_v3  ;;  %v7521_v41 = vld [vmem:[#allocation4_spill] sm:$0xff] }
 0x229   : > { %2890 = vmatprep.mubr.f32.mxu1 %v6472_v2  ;;  %3035 = vmatprep.mubr.f32.mxu0 %v6475_v11  ;;  %v6739_v2 = vld [vmem:[%s5675_s28 + $0x111] sm:$0xff]  ;;  %v3810_v11 = vld [vmem:[%s5675_s28 + $0x68] sm:$0xff] }
 0x22a   : > { %v4245_v25 = vpop.f32.mrf.mxu0  ;;  %v2372_v56 = vpop.f32.mrf.mxu1 }
 0x22b   : > { %v6731_v0 = vadd.f32 %v4245_v25, %v7519_v47  ;;  %v6733_v63 = vadd.f32 %v2372_v56, %v2148_v5  ;;  %v7522_v47 = vld [vmem:[#allocation9_spill] sm:$0xff] }
 0x22c   : > { %2891 = vmatmul.mubr.f32.gmra.mxu1 %v6727_v38  ;;  %3036 = vmatmul.mubr.f32.gmra.mxu0 %v3809_v27  ;;  %v2177_v16 = vpop.f32.mrf.mxu0  ;;  %v2374_v21 = vpop.f32.mrf.mxu1 }
 0x22d   : > { %2895 = vmatprep.mubr.f32.mxu1 %v6492_v55  ;;  %3040 = vmatprep.mubr.f32.mxu0 %v6495_v60  ;;  %v6743_v8 = vadd.f32 %v2177_v16, %v7520_v20  ;;  %v6754_v55 = vld [vmem:[%s5675_s28 + $0x121] sm:$0xff]  ;;  %v3811_v60 = vld [vmem:[%s5675_s28 + $0x78] sm:$0xff] }
 0x22f   : > { %v4248_v7 = vpop.f32.mrf.mxu0  ;;  %v2377_v5 = vpop.f32.mrf.mxu1 }
 0x230   : > { %2896 = vmatmul.mubr.f32.gmra.mxu1 %v6739_v2  ;;  %3041 = vmatmul.mubr.f32.gmra.mxu0 %v3810_v11  ;;  %v6747_v3 = vadd.f32 %v4248_v7, %v7521_v41  ;;  %v6749_v27 = vadd.f32 %v2377_v5, %v2153_v24  ;;  %v7523_v41 = vld [vmem:[#allocation8_spill] sm:$0xff] }
 0x231   : > { %2900 = vmatprep.mubr.f32.mxu1 %v6512_v23  ;;  %3045 = vmatprep.mubr.f32.mxu0 %v6515_v19  ;;  %v2187_v25 = vpop.f32.mrf.mxu0  ;;  %v2379_v56 = vpop.f32.mrf.mxu1  ;;  %v6764_v23 = vld [vmem:[%s5675_s28 + $0x129] sm:$0xff]  ;;  %v3812_v19 = vld [vmem:[%s5675_s28 + $0x80] sm:$0xff] }
 0x232   : > { %v6758_v16 = vadd.f32 %v2187_v25, %v7522_v47 }
 0x234   : > { %2901 = vmatmul.mubr.f32.gmra.mxu1 %v6754_v55  ;;  %3046 = vmatmul.mubr.f32.gmra.mxu0 %v3811_v60  ;;  %v4251_v21 = vpop.f32.mrf.mxu0  ;;  %v2382_v24 = vpop.f32.mrf.mxu1 }
 0x235   : > { %2905 = vmatprep.mubr.f32.mxu1 %v6532_v53  ;;  %3050 = vmatprep.mubr.f32.mxu0 %v6535_v17  ;;  %v6768_v11 = vadd.f32 %v4251_v21, %v6331_v37  ;;  %v6770_v20 = vadd.f32 %v2382_v24, %v2158_v49  ;;  %v6779_v53 = vld [vmem:[%s5675_s28 + $0x139] sm:$0xff]  ;;  %v3813_v37 = vld [vmem:[%s5675_s28 + $0x90] sm:$0xff] }
 0x236   : > { %v2197_v7 = vpop.f32.mrf.mxu0  ;;  %v2384_v5 = vpop.f32.mrf.mxu1 }
 0x237   : > { %v6773_v60 = vadd.f32 %v2197_v7, %v7523_v41 }
 0x238   : > { %2906 = vmatmul.mubr.f32.gmra.mxu1 %v6764_v23  ;;  %3051 = vmatmul.mubr.f32.gmra.mxu0 %v3812_v19 }
 0x239   : > { %2910 = vmatprep.mubr.f32.mxu1 %v6552_v18  ;;  %3055 = vmatprep.mubr.f32.mxu0 %v6555_v26  ;;  %v4254_v17 = vpop.f32.mrf.mxu0  ;;  %v2387_v49 = vpop.f32.mrf.mxu1  ;;  %v7524_v18 = vld [vmem:[#allocation12_spill] sm:$0xff]  ;;  %v6795_v26 = vld [vmem:[%s5675_s28 + $0x141] sm:$0xff] }
 0x23a   : > { %v6783_v25 = vadd.f32 %v4254_v17, %v6369_v10  ;;  %v6786_v56 = vadd.f32 %v2387_v49, %v6703_v34  ;;  %v3814_v10 = vld [vmem:[%s5675_s28 + $0x98] sm:$0xff]  ;;  %v3815_v17 = vld [vmem:[%s5675_s28 + $0xa8] sm:$0xff] }
 0x23b   : > { %v2207_v47 = vpop.f32.mrf.mxu0  ;;  %v2389_v21 = vpop.f32.mrf.mxu1 }
 0x23c   : > { %2911 = vmatmul.mubr.f32.gmra.mxu1 %v6779_v53  ;;  %3056 = vmatmul.mubr.f32.gmra.mxu0 %v3813_v37  ;;  %v6790_v24 = vadd.f32 %v2207_v47, %v7524_v18 }
 0x23d   : > { %2915 = vmatprep.mubr.f32.mxu1 %v6572_v51  ;;  %3060 = vmatprep.mubr.f32.mxu0 %v6575_v42  ;;  %v6808_v42 = vld [vmem:[%s5675_s28 + $0x151] sm:$0xff] }
 0x23e   : > { %v4257_v19 = vpop.f32.mrf.mxu0  ;;  %v2392_v34 = vpop.f32.mrf.mxu1 }
 0x23f   : > { %v6799_v7 = vadd.f32 %v4257_v19, %v6407_v57  ;;  %v6802_v5 = vadd.f32 %v2392_v34, %v6722_v30 }
 0x240   : > { %2916 = vmatmul.mubr.f32.gmra.mxu1 %v6795_v26  ;;  %3061 = vmatmul.mubr.f32.gmra.mxu0 %v3814_v10  ;;  %v2217_v41 = vpop.f32.mrf.mxu0  ;;  %v2394_v37 = vpop.f32.mrf.mxu1 }
 0x241   : > { %2920 = vmatprep.mubr.f32.mxu1 %v6592_v40  ;;  %3065 = vmatprep.mubr.f32.mxu0 %v6595_v1  ;;  %v6812_v57 = vadd.f32 %v2217_v41, %v6386_v46  ;;  %v6824_v1 = vld [vmem:[%s5675_s28 + $0x159] sm:$0xff]  ;;  %v3816_v46 = vld [vmem:[%s5675_s28 + $0xb0] sm:$0xff] }
 0x242   : > { %v3817_v41 = vld [vmem:[%s5675_s28 + $0xc0] sm:$0xff] }
 0x243   : > { %v4260_v49 = vpop.f32.mrf.mxu0  ;;  %v2397_v30 = vpop.f32.mrf.mxu1 }
 0x244   : > { %2921 = vmatmul.mubr.f32.gmra.mxu1 %v6808_v42  ;;  %3066 = vmatmul.mubr.f32.gmra.mxu0 %v3815_v17  ;;  %v6816_v47 = vadd.f32 %v4260_v49, %v6444_v61  ;;  %v6819_v21 = vadd.f32 %v2397_v30, %v6716_v22  ;;  %v3818_v30 = vld [vmem:[%s5675_s28 + $0xc8] sm:$0xff] }
 0x245   : > { %2925 = vmatprep.mubr.f32.mxu1 %v6612_v39  ;;  %3070 = vmatprep.mubr.f32.mxu0 %v6615_v44  ;;  %v2227_v18 = vpop.f32.mrf.mxu0  ;;  %v2399_v10 = vpop.f32.mrf.mxu1 }
 0x246   : > { %v6828_v19 = vadd.f32 %v2227_v18, %v6424_v35  ;;  %v6840_v35 = vld [vmem:[%s5675_s28 + $0x169] sm:$0xff] }
 0x247   : > { %v6860_v18 = vld [vmem:[%s5675_s28 + $0x182] sm:$0xff] }
 0x248   : > { %2926 = vmatmul.mubr.f32.gmra.mxu1 %v6824_v1  ;;  %3071 = vmatmul.mubr.f32.gmra.mxu0 %v3816_v46  ;;  %v4263_v61 = vpop.f32.mrf.mxu0  ;;  %v2402_v22 = vpop.f32.mrf.mxu1 }
 0x249   : > { %2930 = vmatprep.mubr.f32.mxu1 %v6634_v15  ;;  %3075 = vmatprep.mubr.f32.mxu0 %v6637_v59  ;;  %v6834_v44 = vadd.f32 %v4263_v61, %v6484_v45  ;;  %v6837_v34 = vadd.f32 %v2402_v22, %v6743_v8  ;;  %v6850_v8 = vld [vmem:[%s5675_s28 + $0x171] sm:$0xff] }
 0x24a   : > { %v2237_v37 = vpop.f32.mrf.mxu0  ;;  %v2404_v17 = vpop.f32.mrf.mxu1 }
 0x24b   : > { %v6844_v49 = vadd.f32 %v2237_v37, %v6464_v12  ;;  %v6873_v37 = vld [vmem:[%s5675_s28 + $0x18a] sm:$0xff] }
 0x24c   : > { %2931 = vmatmul.mubr.f32.gmra.mxu1 %v6840_v35  ;;  %3076 = vmatmul.mubr.f32.gmra.mxu0 %v3817_v41 }
 0x24d   : > { %2935 = vmatprep.mubr.f32.mxu1 %v6660_v13  ;;  %3080 = vmatprep.mubr.f32.mxu0 %v6663_v28  ;;  %v4266_v45 = vpop.f32.mrf.mxu0  ;;  %v2407_v59 = vpop.f32.mrf.mxu1 }
 0x24e   : > { %v6854_v46 = vadd.f32 %v4266_v45, %v6524_v32  ;;  %v6857_v12 = vadd.f32 %v2407_v59, %v6731_v0  ;;  %v6869_v32 = vld [vmem:[%s5675_s28 + $0x181] sm:$0xff]  ;;  %v3819_v0 = vld [vmem:[%s5675_s28 + $0xd8] sm:$0xff] }
 0x24f   : > { %v2247_v10 = vpop.f32.mrf.mxu0  ;;  %v2409_v61 = vpop.f32.mrf.mxu1 }
 0x250   : > { %2936 = vmatmul.mubr.f32.gmra.mxu1 %v6850_v8  ;;  %3081 = vmatmul.mubr.f32.gmra.mxu0 %v3818_v30  ;;  %v6864_v28 = vadd.f32 %v2247_v10, %v6504_v4  ;;  %v6888_v30 = vld [vmem:[%s5675_s28 + $0x189] sm:$0xff] }
 0x251   : > { %2940 = vmatprep.mubr.f32.mxu1 %v6860_v18  ;;  %3085 = vmatprep.mubr.f32.mxu0 %v6679_v62 }
 0x252   : > { %v4269_v22 = vpop.f32.mrf.mxu0  ;;  %v2412_v41 = vpop.f32.mrf.mxu1 }
 0x253   : > { %v6876_v17 = vadd.f32 %v4269_v22, %v6564_v36  ;;  %v6879_v4 = vadd.f32 %v2412_v41, %v6758_v16  ;;  %v3820_v36 = vld [vmem:[%s5675_s28 + $0xe0] sm:$0xff]  ;;  %v3869_v16 = vld [vmem:[%s5675_s28 + $0x32] sm:$0xff] }
 0x254   : > { %2941 = vmatmul.mubr.f32.gmra.mxu1 %v6869_v32  ;;  %3086 = vmatmul.mubr.f32.gmra.mxu0 %v3819_v0  ;;  %v2257_v45 = vpop.f32.mrf.mxu0  ;;  %v2414_v62 = vpop.f32.mrf.mxu1 }
 0x255   : > { %7525 = vst [vmem:[#allocation15_spill] sm:$0xff] %v6879_v4  ;;  %v6883_v59 = vadd.f32 %v2257_v45, %v6544_v33  ;;  %2945 = vmatprep.mubr.f32.mxu1 %v6873_v37  ;;  %3090 = vmatprep.mubr.f32.mxu0 %v6691_v43  ;;  %v3821_v43 = vld [vmem:[%s5675_s28 + $0xf0] sm:$0xff]  ;;  %v3870_v45 = vld [vmem:[%s5675_s28 + $0x3a] sm:$0xff]  ;;  %v7527_v62 = vld [vmem:[#allocation7_spill] sm:$0xff] }
 0x257   : > { %v4272_v10 = vpop.f32.mrf.mxu0  ;;  %v2417_v61 = vpop.f32.mrf.mxu1 }
 0x258   : > { %v6893_v0 = vadd.f32 %v4272_v10, %v6604_v14  ;;  %v6896_v22 = vadd.f32 %v2417_v61, %v6747_v3  ;;  %2946 = vmatmul.mubr.f32.gmra.mxu1 %v6888_v30  ;;  %3091 = vmatmul.mubr.f32.gmra.mxu0 %v3820_v36  ;;  %v3871_v14 = vld [vmem:[%s5675_s28 + $0x4a] sm:$0xff] }
 0x259   : > { %v2267_v33 = vpop.f32.mrf.mxu0  ;;  %v2419_v41 = vpop.f32.mrf.mxu1  ;;  %3095 = vmatprep.mubr.f32.mxu0 %v6699_v54  ;;  %4305 = vmatprep.mubr.f32.mxu1 %v3869_v16  ;;  %v3822_v54 = vld [vmem:[%s5675_s28 + $0xf8] sm:$0xff] }
 0x25a   : > { %7526 = vst [vmem:[#allocation10_spill] sm:$0xff] %v6896_v22  ;;  %v6903_v4 = vadd.f32 %v2267_v33, %v7527_v62  ;;  %v3872_v16 = vld [vmem:[%s5675_s28 + $0x52] sm:$0xff]  ;;  %v3873_v62 = vld [vmem:[%s5675_s28 + $0x62] sm:$0xff] }
 0x25c   : > { %v2422_v10 = vpop.f32.mrf.mxu1  ;;  %v2567_v3 = vpop.f32.mrf.mxu0  ;;  %3096 = vmatmul.mubr.f32.gmra.mxu0 %v3821_v43  ;;  %4306 = vmatmul.mubr.f32.vlgmr.msra.gmra.mxu1 %v3870_v45  ;;  %v3874_v45 = vld [vmem:[%s5675_s28 + $0x6a] sm:$0xff] }
 0x25d   : > { %v6907_v36 = vadd.f32 %v2422_v10, %v6773_v60  ;;  %v6910_v61 = vadd.f32 %v2567_v3, %v6645_v58  ;;  %3100 = vmatprep.mubr.f32.mxu0 %v6712_v9  ;;  %4308 = vmatprep.mubr.f32.mxu1 %v3871_v14  ;;  %v3823_v9 = vld [vmem:[%s5675_s28 + $0x108] sm:$0xff]  ;;  %v3875_v3 = vld [vmem:[%s5675_s28 + $0x7a] sm:$0xff] }
 0x25e   : > { %v2424_v33 = vpop.f32.mrf.mxu1  ;;  %v2569_v41 = vpop.f32.mrf.mxu0 }
 0x260   : > { %v2427_v22 = vpop.f32.mrf.mxu1  ;;  %v2572_v43 = vpop.f32.mrf.mxu0  ;;  %3101 = vmatmul.mubr.f32.gmra.mxu0 %v3822_v54  ;;  %4309 = vmatmul.mubr.f32.gmra.mxu1 %v3872_v16 }
 0x261   : > { %v6917_v60 = vadd.f32 %v2427_v22, %v6768_v11  ;;  %v6920_v58 = vadd.f32 %v2572_v43, %v6643_v50  ;;  %3105 = vmatprep.mubr.f32.mxu0 %v6727_v38  ;;  %4311 = vmatprep.mubr.f32.mxu1 %v3873_v62  ;;  %v3824_v38 = vld [vmem:[%s5675_s28 + $0x110] sm:$0xff]  ;;  %v3876_v22 = vld [vmem:[%s5675_s28 + $0x82] sm:$0xff] }
 0x262   : > { %v2429_v14 = vpop.f32.mrf.mxu1  ;;  %v2574_v10 = vpop.f32.mrf.mxu0  ;;  %v3877_v62 = vld [vmem:[%s5675_s28 + $0x92] sm:$0xff] }
 0x264   : > { %v2432_v33 = vpop.f32.mrf.mxu1  ;;  %v2577_v54 = vpop.f32.mrf.mxu0  ;;  %3106 = vmatmul.mubr.f32.gmra.mxu0 %v3823_v9  ;;  %4312 = vmatmul.mubr.f32.gmra.mxu1 %v3874_v45  ;;  %v3878_v45 = vld [vmem:[%s5675_s28 + $0x9a] sm:$0xff] }
 0x265   : > { %v6927_v11 = vadd.f32 %v2432_v33, %v6790_v24  ;;  %v6930_v50 = vadd.f32 %v2577_v54, %v6670_v48  ;;  %3110 = vmatprep.mubr.f32.mxu0 %v6739_v2  ;;  %4314 = vmatprep.mubr.f32.mxu1 %v3875_v3  ;;  %v3825_v2 = vld [vmem:[%s5675_s28 + $0x120] sm:$0xff]  ;;  %v3879_v3 = vld [vmem:[%s5675_s28 + $0xaa] sm:$0xff] }
 0x266   : > { %v2434_v16 = vpop.f32.mrf.mxu1  ;;  %v2579_v41 = vpop.f32.mrf.mxu0 }
 0x267   : > { %v3881_v41 = vld [vmem:[%s5675_s28 + $0xc2] sm:$0xff] }
 0x268   : > { %v2437_v43 = vpop.f32.mrf.mxu1  ;;  %v2582_v9 = vpop.f32.mrf.mxu0  ;;  %3111 = vmatmul.mubr.f32.gmra.mxu0 %v3824_v38  ;;  %4315 = vmatmul.mubr.f32.gmra.mxu1 %v3876_v22  ;;  %v3880_v38 = vld [vmem:[%s5675_s28 + $0xb2] sm:$0xff] }
 0x269   : > { %v6937_v24 = vadd.f32 %v2437_v43, %v6783_v25  ;;  %v6940_v48 = vadd.f32 %v2582_v9, %v6686_v31  ;;  %3115 = vmatprep.mubr.f32.mxu0 %v6754_v55  ;;  %4317 = vmatprep.mubr.f32.mxu1 %v3877_v62  ;;  %v3826_v55 = vld [vmem:[%s5675_s28 + $0x128] sm:$0xff] }
 0x26a   : > { %v2439_v14 = vpop.f32.mrf.mxu1  ;;  %v2584_v10 = vpop.f32.mrf.mxu0  ;;  %v3882_v9 = vld [vmem:[%s5675_s28 + $0xca] sm:$0xff] }
 0x26b   : > { %v3883_v14 = vld [vmem:[%s5675_s28 + $0xda] sm:$0xff] }
 0x26c   : > { %v2442_v33 = vpop.f32.mrf.mxu1  ;;  %v2587_v54 = vpop.f32.mrf.mxu0  ;;  %3116 = vmatmul.mubr.f32.gmra.mxu0 %v3825_v2  ;;  %4318 = vmatmul.mubr.f32.gmra.mxu1 %v3878_v45 }
 0x26d   : > { %v6947_v25 = vadd.f32 %v2442_v33, %v6812_v57  ;;  %v6950_v31 = vadd.f32 %v2587_v54, %v6705_v6  ;;  %3120 = vmatprep.mubr.f32.mxu0 %v6764_v23  ;;  %4320 = vmatprep.mubr.f32.mxu1 %v3879_v3  ;;  %v3827_v23 = vld [vmem:[%s5675_s28 + $0x138] sm:$0xff]  ;;  %v3884_v33 = vld [vmem:[%s5675_s28 + $0xe2] sm:$0xff] }
 0x26e   : > { %v2444_v22 = vpop.f32.mrf.mxu1  ;;  %v2589_v16 = vpop.f32.mrf.mxu0 }
 0x270   : > { %v2447_v62 = vpop.f32.mrf.mxu1  ;;  %v2592_v43 = vpop.f32.mrf.mxu0  ;;  %3121 = vmatmul.mubr.f32.gmra.mxu0 %v3826_v55  ;;  %4321 = vmatmul.mubr.f32.gmra.mxu1 %v3880_v38  ;;  %v3885_v38 = vld [vmem:[%s5675_s28 + $0xf2] sm:$0xff] }
 0x271   : > { %v6957_v57 = vadd.f32 %v2447_v62, %v6799_v7  ;;  %v6960_v6 = vadd.f32 %v2592_v43, %v6718_v29  ;;  %3125 = vmatprep.mubr.f32.mxu0 %v6779_v53  ;;  %4323 = vmatprep.mubr.f32.mxu1 %v3881_v41  ;;  %v3828_v53 = vld [vmem:[%s5675_s28 + $0x140] sm:$0xff] }
 0x272   : > { %v2449_v2 = vpop.f32.mrf.mxu1  ;;  %v2594_v45 = vpop.f32.mrf.mxu0  ;;  %v3886_v41 = vld [vmem:[%s5675_s28 + $0xfa] sm:$0xff] }
 0x273   : > { %v3888_v45 = vld [vmem:[%s5675_s28 + $0x112] sm:$0xff] }
 0x274   : > { %v2452_v10 = vpop.f32.mrf.mxu1  ;;  %v2597_v3 = vpop.f32.mrf.mxu0  ;;  %3126 = vmatmul.mubr.f32.gmra.mxu0 %v3827_v23  ;;  %4324 = vmatmul.mubr.f32.gmra.mxu1 %v3882_v9  ;;  %v3887_v23 = vld [vmem:[%s5675_s28 + $0x10a] sm:$0xff] }
 0x275   : > { %v6967_v7 = vadd.f32 %v2452_v10, %v6828_v19  ;;  %v6970_v29 = vadd.f32 %v2597_v3, %v6733_v63  ;;  %3130 = vmatprep.mubr.f32.mxu0 %v6795_v26  ;;  %4326 = vmatprep.mubr.f32.mxu1 %v3883_v14  ;;  %v3829_v26 = vld [vmem:[%s5675_s28 + $0x150] sm:$0xff]  ;;  %v3889_v3 = vld [vmem:[%s5675_s28 + $0x122] sm:$0xff] }
 0x276   : > { %v2454_v54 = vpop.f32.mrf.mxu1  ;;  %v2599_v55 = vpop.f32.mrf.mxu0 }
 0x277   : > { %v3890_v54 = vld [vmem:[%s5675_s28 + $0x12a] sm:$0xff] }
 0x278   : > { %v2457_v22 = vpop.f32.mrf.mxu1  ;;  %v2602_v16 = vpop.f32.mrf.mxu0  ;;  %3131 = vmatmul.mubr.f32.gmra.mxu0 %v3828_v53  ;;  %4327 = vmatmul.mubr.f32.gmra.mxu1 %v3884_v33 }
 0x279   : > { %v6977_v19 = vadd.f32 %v2457_v22, %v6816_v47  ;;  %v6980_v63 = vadd.f32 %v2602_v16, %v6749_v27  ;;  %3135 = vmatprep.mubr.f32.mxu0 %v6808_v42  ;;  %4329 = vmatprep.mubr.f32.mxu1 %v3885_v38  ;;  %v3830_v42 = vld [vmem:[%s5675_s28 + $0x158] sm:$0xff] }
 0x27a   : > { %v2459_v62 = vpop.f32.mrf.mxu1  ;;  %v2604_v43 = vpop.f32.mrf.mxu0  ;;  %v3891_v22 = vld [vmem:[%s5675_s28 + $0x13a] sm:$0xff] }
 0x27c   : > { %v2462_v9 = vpop.f32.mrf.mxu1  ;;  %v2607_v2 = vpop.f32.mrf.mxu0  ;;  %3136 = vmatmul.mubr.f32.gmra.mxu0 %v3829_v26  ;;  %4330 = vmatmul.mubr.f32.gmra.mxu1 %v3886_v41 }
 0x27d   : > { %v6987_v47 = vadd.f32 %v2462_v9, %v6844_v49  ;;  %v6990_v27 = vadd.f32 %v2607_v2, %v6770_v20  ;;  %3140 = vmatprep.mubr.f32.mxu0 %v6824_v1  ;;  %4332 = vmatprep.mubr.f32.mxu1 %v3887_v23  ;;  %v3831_v1 = vld [vmem:[%s5675_s28 + $0x168] sm:$0xff] }
 0x27e   : > { %v2464_v14 = vpop.f32.mrf.mxu1  ;;  %v2609_v10 = vpop.f32.mrf.mxu0 }
 0x280   : > { %v2467_v53 = vpop.f32.mrf.mxu1  ;;  %v2612_v33 = vpop.f32.mrf.mxu0  ;;  %3141 = vmatmul.mubr.f32.gmra.mxu0 %v3830_v42  ;;  %4333 = vmatmul.mubr.f32.gmra.mxu1 %v3888_v45  ;;  %v7528_v45 = vld [vmem:[#allocation11_spill] sm:$0xff] }
 0x281   : > { %v6997_v49 = vadd.f32 %v2467_v53, %v6834_v44  ;;  %v7000_v20 = vadd.f32 %v2612_v33, %v6786_v56  ;;  %3145 = vmatprep.mubr.f32.mxu0 %v6840_v35  ;;  %4335 = vmatprep.mubr.f32.mxu1 %v3889_v3  ;;  %v3832_v56 = vld [vmem:[%s5675_s28 + $0x170] sm:$0xff]  ;;  %v3868_v3 = vld [vmem:[%s5675_s28 + $0x1a1] sm:$0xff] }
 0x282   : > { %v2469_v55 = vpop.f32.mrf.mxu1  ;;  %v2614_v38 = vpop.f32.mrf.mxu0  ;;  %v3899_v53 = vld [vmem:[%s5675_s28 + $0x19a] sm:$0xff] }
 0x284   : > { %v2472_v16 = vpop.f32.mrf.mxu1  ;;  %v2617_v26 = vpop.f32.mrf.mxu0  ;;  %3146 = vmatmul.mubr.f32.gmra.mxu0 %v3831_v1  ;;  %4336 = vmatmul.mubr.f32.gmra.mxu1 %v3890_v54  ;;  %v3836_v1 = vld [vmem:[%s5675_s28 + $0x1a0] sm:$0xff] }
 0x285   : > { %v7007_v41 = vadd.f32 %v2472_v16, %v6864_v28  ;;  %v7010_v44 = vadd.f32 %v2617_v26, %v6802_v5  ;;  %3150 = vmatprep.mubr.f32.mxu0 %v6850_v8  ;;  %4338 = vmatprep.mubr.f32.mxu1 %v3891_v22 }
 0x286   : > { %v2474_v35 = vpop.f32.mrf.mxu1  ;;  %v2619_v62 = vpop.f32.mrf.mxu0 }
 0x288   : > { %v2477_v43 = vpop.f32.mrf.mxu1  ;;  %v2622_v23 = vpop.f32.mrf.mxu0  ;;  %3151 = vmatmul.mubr.f32.gmra.mxu0 %v3832_v56  ;;  %4339 = vmatmul.mubr.f32.gmra.mxu1 %v6572_v51 }
 0x289   : > { %v7016_v9 = vadd.f32 %v2477_v43, %v6854_v46  ;;  %v7019_v28 = vadd.f32 %v2622_v23, %v6819_v21  ;;  %3155 = vmatprep.mubr.f32.mxu0 %v6869_v32  ;;  %4341 = vmatprep.mubr.f32.mxu1 %v6592_v40  ;;  %v3867_v32 = vld [vmem:[%s5675_s28 + $0x199] sm:$0xff] }
 0x28a   : > { %v2479_v5 = vpop.f32.mrf.mxu1  ;;  %v2624_v8 = vpop.f32.mrf.mxu0 }
 0x28c   : > { %v2482_v2 = vpop.f32.mrf.mxu1  ;;  %v2627_v42 = vpop.f32.mrf.mxu0  ;;  %3156 = vmatmul.mubr.f32.gmra.mxu0 %v7528_v45  ;;  %4342 = vmatmul.mubr.f32.gmra.mxu1 %v6612_v39 }
 0x28d   : > { %v7026_v51 = vadd.f32 %v2482_v2, %v6883_v59  ;;  %v7029_v46 = vadd.f32 %v2627_v42, %v6837_v34  ;;  %3160 = vmatprep.mubr.f32.mxu0 %v6888_v30  ;;  %4344 = vmatprep.mubr.f32.mxu1 %v6634_v15  ;;  %v3835_v15 = vld [vmem:[%s5675_s28 + $0x198] sm:$0xff] }
 0x28e   : > { %v2484_v40 = vpop.f32.mrf.mxu1  ;;  %v2629_v21 = vpop.f32.mrf.mxu0 }
 0x290   : > { %v2487_v14 = vpop.f32.mrf.mxu1  ;;  %v2632_v10 = vpop.f32.mrf.mxu0  ;;  %3161 = vmatmul.mubr.f32.gmra.mxu0 %v6640_v52  ;;  %4345 = vmatmul.mubr.f32.gmra.mxu1 %v6660_v13 }
 0x291   : > { %v7037_v39 = vadd.f32 %v2487_v14, %v6876_v17  ;;  %v7040_v34 = vadd.f32 %v2632_v10, %v6857_v12  ;;  %3165 = vmatprep.mubr.f32.mxu0 %v3867_v32  ;;  %4347 = vmatprep.mubr.f32.mxu1 %v6860_v18  ;;  %v7529_v12 = vld [vmem:[#allocation15_spill] sm:$0xff] }
 0x292   : > { %v2489_v59 = vpop.f32.mrf.mxu1  ;;  %v2634_v30 = vpop.f32.mrf.mxu0  ;;  %v3900_v18 = vld [vmem:[%s5675_s28 + $0x1a2] sm:$0xff]  ;;  %s4096_s28 = sshll.u32 %s7532_s22, 8 }
 0x293   : > { %s7250_s7 = scalar_lea.vmem %s7399_s5, %s4096_s28 }
 0x294   : > { %v2492_v33 = vpop.f32.mrf.mxu1  ;;  %v2637_v52 = vpop.f32.mrf.mxu0  ;;  %3166 = vmatmul.mubr.f32.gmra.mxu0 %v3835_v15  ;;  %4348 = vmatmul.mubr.f32.gmra.mxu1 %v6873_v37  ;;  %v7530_v37 = vld [vmem:[#allocation10_spill] sm:$0xff] }
 0x295   : > { %v7048_v13 = vadd.f32 %v2492_v33, %v6903_v4  ;;  %v7051_v17 = vadd.f32 %v2637_v52, %v7529_v12  ;;  %3170 = vmatprep.mubr.f32.mxu0 %v3868_v3  ;;  %4350 = vmatprep.mubr.f32.mxu1 %v3899_v53 }
 0x296   : > { %v2494_v54 = vpop.f32.mrf.mxu1  ;;  %v2639_v55 = vpop.f32.mrf.mxu0 }
 0x298   : > { %v2497_v38 = vpop.f32.mrf.mxu1  ;;  %v2642_v22 = vpop.f32.mrf.mxu0  ;;  %3171 = vmatmul.mubr.f32.gmra.mxu0 %v3836_v1  ;;  %4351 = vmatmul.mubr.f32.gmra.mxu1 %v3900_v18 }
 0x299   : > { %v7056_v16 = vadd.f32 %v2497_v38, %v6893_v0  ;;  %v7059_v26 = vadd.f32 %v2642_v22, %v7530_v37 }
 0x29a   : > { %v2499_v4 = vpop.f32.mrf.mxu1  ;;  %v2644_v56 = vpop.f32.mrf.mxu0 }
 0x29c   : > { %v2647_v35 = vpop.f32.mrf.mxu0  ;;  %v2792_v62 = vpop.f32.mrf.mxu1 }
 0x29d   : > { %v7062_v43 = vadd.f32 %v2647_v35, %v6907_v36  ;;  %v7065_v23 = vadd.f32 %v2792_v62, %v6910_v61 }
 0x29e   : > { %v2649_v5 = vpop.f32.mrf.mxu0  ;;  %v2794_v8 = vpop.f32.mrf.mxu1 }
 0x2a0   : > { %v2652_v2 = vpop.f32.mrf.mxu0  ;;  %v2797_v42 = vpop.f32.mrf.mxu1 }
 0x2a1   : > { %v7068_v0 = vadd.f32 %v2652_v2, %v6917_v60  ;;  %v7071_v45 = vadd.f32 %v2797_v42, %v6920_v58 }
 0x2a2   : > { %v2654_v40 = vpop.f32.mrf.mxu0  ;;  %v2799_v21 = vpop.f32.mrf.mxu1 }
 0x2a4   : > { %v2657_v32 = vpop.f32.mrf.mxu0  ;;  %v2802_v14 = vpop.f32.mrf.mxu1 }
 0x2a5   : > { %v7074_v36 = vadd.f32 %v2657_v32, %v6927_v11  ;;  %v7077_v61 = vadd.f32 %v2802_v14, %v6930_v50 }
 0x2a6   : > { %v2659_v10 = vpop.f32.mrf.mxu0  ;;  %v2804_v15 = vpop.f32.mrf.mxu1 }
 0x2a8   : > { %v2662_v59 = vpop.f32.mrf.mxu0  ;;  %v2807_v30 = vpop.f32.mrf.mxu1 }
 0x2a9   : > { %v7080_v60 = vadd.f32 %v2662_v59, %v6937_v24  ;;  %v7083_v58 = vadd.f32 %v2807_v30, %v6940_v48 }
 0x2aa   : > { %v2664_v3 = vpop.f32.mrf.mxu0  ;;  %v2809_v53 = vpop.f32.mrf.mxu1 }
 0x2ac   : > { %v2667_v33 = vpop.f32.mrf.mxu0  ;;  %v2812_v52 = vpop.f32.mrf.mxu1 }
 0x2ad   : > { %v7086_v11 = vadd.f32 %v2667_v33, %v6947_v25  ;;  %v7089_v50 = vadd.f32 %v2812_v52, %v6950_v31 }
 0x2ae   : > { %v2669_v12 = vpop.f32.mrf.mxu0  ;;  %v2814_v1 = vpop.f32.mrf.mxu1 }
 0x2b0   : > { %v2672_v18 = vpop.f32.mrf.mxu0  ;;  %v2817_v54 = vpop.f32.mrf.mxu1 }
 0x2b1   : > { %v7092_v24 = vadd.f32 %v2672_v18, %v6957_v57  ;;  %v7095_v48 = vadd.f32 %v2817_v54, %v6960_v6 }
 0x2b2   : > { %v2674_v55 = vpop.f32.mrf.mxu0  ;;  %v2819_v38 = vpop.f32.mrf.mxu1 }
 0x2b4   : > { %v2677_v22 = vpop.f32.mrf.mxu0  ;;  %v2822_v37 = vpop.f32.mrf.mxu1 }
 0x2b5   : > { %v7098_v25 = vadd.f32 %v2677_v22, %v6967_v7  ;;  %v7101_v31 = vadd.f32 %v2822_v37, %v6970_v29 }
 0x2b6   : > { %v2679_v4 = vpop.f32.mrf.mxu0  ;;  %v2824_v56 = vpop.f32.mrf.mxu1 }
 0x2b8   : > { %v2682_v35 = vpop.f32.mrf.mxu0  ;;  %v2827_v62 = vpop.f32.mrf.mxu1 }
 0x2b9   : > { %v7104_v57 = vadd.f32 %v2682_v35, %v6977_v19  ;;  %v7107_v6 = vadd.f32 %v2827_v62, %v6980_v63 }
 0x2ba   : > { %v2684_v5 = vpop.f32.mrf.mxu0  ;;  %v2829_v8 = vpop.f32.mrf.mxu1 }
 0x2bc   : > { %v2687_v2 = vpop.f32.mrf.mxu0  ;;  %v2832_v42 = vpop.f32.mrf.mxu1 }
 0x2bd   : > { %v7110_v7 = vadd.f32 %v2687_v2, %v6987_v47  ;;  %v7113_v29 = vadd.f32 %v2832_v42, %v6990_v27 }
 0x2be   : > { %v2689_v40 = vpop.f32.mrf.mxu0  ;;  %v2834_v21 = vpop.f32.mrf.mxu1 }
 0x2c0   : > { %v2692_v32 = vpop.f32.mrf.mxu0  ;;  %v2837_v14 = vpop.f32.mrf.mxu1 }
 0x2c1   : > { %v7116_v19 = vadd.f32 %v2692_v32, %v6997_v49  ;;  %v7119_v63 = vadd.f32 %v2837_v14, %v7000_v20 }
 0x2c2   : > { %v2694_v10 = vpop.f32.mrf.mxu0  ;;  %v2839_v15 = vpop.f32.mrf.mxu1 }
 0x2c4   : > { %v2697_v59 = vpop.f32.mrf.mxu0  ;;  %v2842_v30 = vpop.f32.mrf.mxu1 }
 0x2c5   : > { %v7122_v47 = vadd.f32 %v2697_v59, %v7007_v41  ;;  %v7125_v27 = vadd.f32 %v2842_v30, %v7010_v44 }
 0x2c6   : > { %v2699_v3 = vpop.f32.mrf.mxu0  ;;  %v2844_v53 = vpop.f32.mrf.mxu1 }
 0x2c8   : > { %v2702_v33 = vpop.f32.mrf.mxu0  ;;  %v2847_v52 = vpop.f32.mrf.mxu1 }
 0x2c9   : > { %v7128_v49 = vadd.f32 %v2702_v33, %v7016_v9  ;;  %v7131_v20 = vadd.f32 %v2847_v52, %v7019_v28 }
 0x2ca   : > { %v2704_v12 = vpop.f32.mrf.mxu0  ;;  %v2849_v1 = vpop.f32.mrf.mxu1 }
 0x2cc   : > { %v2707_v18 = vpop.f32.mrf.mxu0  ;;  %v2852_v54 = vpop.f32.mrf.mxu1 }
 0x2cd   : > { %v7134_v41 = vadd.f32 %v2707_v18, %v7026_v51  ;;  %v7137_v44 = vadd.f32 %v2852_v54, %v7029_v46 }
 0x2ce   : > { %v2709_v55 = vpop.f32.mrf.mxu0  ;;  %v2854_v38 = vpop.f32.mrf.mxu1 }
 0x2d0   : > { %v2712_v22 = vpop.f32.mrf.mxu0  ;;  %v2857_v37 = vpop.f32.mrf.mxu1 }
 0x2d1   : > { %v7140_v9 = vadd.f32 %v2712_v22, %v7037_v39  ;;  %v7143_v28 = vadd.f32 %v2857_v37, %v7040_v34 }
 0x2d2   : > { %v2714_v4 = vpop.f32.mrf.mxu0  ;;  %v2859_v56 = vpop.f32.mrf.mxu1 }
 0x2d4   : > { %v2717_v35 = vpop.f32.mrf.mxu0  ;;  %v2862_v62 = vpop.f32.mrf.mxu1 }
 0x2d5   : > { %v7146_v51 = vadd.f32 %v2717_v35, %v7048_v13  ;;  %v7149_v46 = vadd.f32 %v2862_v62, %v7051_v17 }
 0x2d6   : > { %v2719_v5 = vpop.f32.mrf.mxu0  ;;  %v2864_v8 = vpop.f32.mrf.mxu1 }
 0x2d8   : > { %v2722_v2 = vpop.f32.mrf.mxu0  ;;  %v2867_v42 = vpop.f32.mrf.mxu1 }
 0x2d9   : > { %v7152_v39 = vadd.f32 %v2722_v2, %v7056_v16  ;;  %v7155_v34 = vadd.f32 %v2867_v42, %v7059_v26 }
 0x2da   : > { %v2724_v40 = vpop.f32.mrf.mxu0  ;;  %v2869_v21 = vpop.f32.mrf.mxu1 }
 0x2dc   : > { %v2872_v32 = vpop.f32.mrf.mxu1  ;;  %v3017_v14 = vpop.f32.mrf.mxu0 }
 0x2dd   : > { %v7158_v13 = vadd.f32 %v2872_v32, %v7062_v43  ;;  %v7161_v17 = vadd.f32 %v3017_v14, %v7065_v23 }
 0x2de   : > { %v2874_v10 = vpop.f32.mrf.mxu1  ;;  %v3019_v15 = vpop.f32.mrf.mxu0 }
 0x2e0   : > { %v2877_v59 = vpop.f32.mrf.mxu1  ;;  %v7163_v30 = vpop.f32.mrf.mxu0 }
 0x2e1   : > { %v7166_v16 = vadd.f32 %v2877_v59, %v7068_v0 }
 0x2e2   : > { %v2879_v26 = vpop.f32.mrf.mxu1  ;;  %v3024_v3 = vpop.f32.mrf.mxu0 }
 0x2e4   : > { %v2882_v53 = vpop.f32.mrf.mxu1  ;;  %v7168_v33 = vpop.f32.mrf.mxu0 }
 0x2e5   : > { %v7171_v52 = vadd.f32 %v2882_v53, %v7074_v36 }
 0x2e6   : > { %v2884_v43 = vpop.f32.mrf.mxu1  ;;  %v3029_v12 = vpop.f32.mrf.mxu0 }
 0x2e8   : > { %v2887_v23 = vpop.f32.mrf.mxu1  ;;  %v7173_v1 = vpop.f32.mrf.mxu0 }
 0x2e9   : > { %v7176_v18 = vadd.f32 %v2887_v23, %v7080_v60 }
 0x2ea   : > { %v2889_v54 = vpop.f32.mrf.mxu1  ;;  %v3034_v55 = vpop.f32.mrf.mxu0 }
 0x2ec   : > { %v2892_v0 = vpop.f32.mrf.mxu1  ;;  %v7178_v38 = vpop.f32.mrf.mxu0 }
 0x2ed   : > { %v7181_v22 = vadd.f32 %v2892_v0, %v7086_v11 }
 0x2ee   : > { %v2894_v37 = vpop.f32.mrf.mxu1  ;;  %v3039_v4 = vpop.f32.mrf.mxu0 }
 0x2f0   : > { %v2897_v36 = vpop.f32.mrf.mxu1  ;;  %v7183_v56 = vpop.f32.mrf.mxu0 }
 0x2f1   : > { %v7186_v35 = vadd.f32 %v2897_v36, %v7092_v24 }
 0x2f2   : > { %v2899_v62 = vpop.f32.mrf.mxu1  ;;  %v3044_v5 = vpop.f32.mrf.mxu0 }
 0x2f4   : > { %v2902_v60 = vpop.f32.mrf.mxu1  ;;  %v7188_v8 = vpop.f32.mrf.mxu0 }
 0x2f5   : > { %v7191_v2 = vadd.f32 %v2902_v60, %v7098_v25 }
 0x2f6   : > { %v2904_v42 = vpop.f32.mrf.mxu1  ;;  %v3049_v40 = vpop.f32.mrf.mxu0 }
 0x2f8   : > { %v2907_v11 = vpop.f32.mrf.mxu1  ;;  %v7193_v21 = vpop.f32.mrf.mxu0 }
 0x2f9   : > { %v7196_v32 = vadd.f32 %v2907_v11, %v7104_v57 }
 0x2fa   : > { %v2909_v14 = vpop.f32.mrf.mxu1  ;;  %v3054_v10 = vpop.f32.mrf.mxu0 }
 0x2fc   : > { %v2912_v24 = vpop.f32.mrf.mxu1  ;;  %v7198_v15 = vpop.f32.mrf.mxu0 }
 0x2fd   : > { %v7201_v59 = vadd.f32 %v2912_v24, %v7110_v7 }
 0x2fe   : > { %v2914_v26 = vpop.f32.mrf.mxu1  ;;  %v3059_v3 = vpop.f32.mrf.mxu0 }
 0x300   : > { %v2917_v25 = vpop.f32.mrf.mxu1  ;;  %v7203_v53 = vpop.f32.mrf.mxu0 }
 0x301   : > { %v7206_v43 = vadd.f32 %v2917_v25, %v7116_v19 }
 0x302   : > { %v2919_v12 = vpop.f32.mrf.mxu1  ;;  %v3064_v23 = vpop.f32.mrf.mxu0 }
 0x304   : > { %v2922_v57 = vpop.f32.mrf.mxu1  ;;  %v7208_v54 = vpop.f32.mrf.mxu0 }
 0x305   : > { %v7211_v55 = vadd.f32 %v2922_v57, %v7122_v47 }
 0x306   : > { %v2924_v0 = vpop.f32.mrf.mxu1  ;;  %v3069_v37 = vpop.f32.mrf.mxu0 }
 0x308   : > { %v2927_v7 = vpop.f32.mrf.mxu1  ;;  %v7213_v4 = vpop.f32.mrf.mxu0 }
 0x309   : > { %v7216_v36 = vadd.f32 %v2927_v7, %v7128_v49 }
 0x30a   : > { %v2929_v62 = vpop.f32.mrf.mxu1  ;;  %v3074_v5 = vpop.f32.mrf.mxu0 }
 0x30c   : > { %v2932_v19 = vpop.f32.mrf.mxu1  ;;  %v7218_v60 = vpop.f32.mrf.mxu0 }
 0x30d   : > { %v7221_v42 = vadd.f32 %v2932_v19, %v7134_v41 }
 0x30e   : > { %v2934_v40 = vpop.f32.mrf.mxu1  ;;  %v3079_v11 = vpop.f32.mrf.mxu0 }
 0x310   : > { %v2937_v47 = vpop.f32.mrf.mxu1  ;;  %v7223_v14 = vpop.f32.mrf.mxu0 }
 0x311   : > { %v7226_v10 = vadd.f32 %v2937_v47, %v7140_v9  ;;  %v3023_v9 = vadd.f32 %v7163_v30, %v7071_v45  ;;  %v3033_v45 = vadd.f32 %v7173_v1, %v7083_v58 }
 0x312   : > { %v2939_v24 = vpop.f32.mrf.mxu1  ;;  %v3084_v49 = vpop.f32.mrf.mxu0 }
 0x313   : > { %v3028_v49 = vadd.f32 %v7168_v33, %v7077_v61  ;;  %v3038_v33 = vadd.f32 %v7178_v38, %v7089_v50 }
 0x314   : > { %v2942_v26 = vpop.f32.mrf.mxu1  ;;  %v7228_v3 = vpop.f32.mrf.mxu0 }
 0x315   : > { %v7231_v25 = vadd.f32 %v2942_v26, %v7146_v51  ;;  %v7245_v51 = vld [vmem:[%s7398_s4] ss:$0 sm:$0xff] }
 0x316   : > { %v2944_v12 = vpop.f32.mrf.mxu1  ;;  %v3089_v41 = vpop.f32.mrf.mxu0 }
 0x318   : > { %v7233_v23 = vpop.f32.mrf.mxu1  ;;  %v7235_v57 = vpop.f32.mrf.mxu0 }
 0x31a   : > { %v2949_v0 = vpop.f32.mrf.mxu1  ;;  %v3094_v37 = vpop.f32.mrf.mxu0 }
 0x31c   : > { %v7240_v7 = vpop.f32.mrf.mxu0  ;;  %v4307_v62 = vpop.f32.mrf.mxu1 }
 0x31d   : > { %v3248_v5 = vadd.f32 %v4307_v62, %v3023_v9  ;;  %v3043_v62 = vadd.f32 %v7183_v56, %v7095_v48  ;;  %v3048_v48 = vadd.f32 %v7188_v8, %v7101_v31  ;;  %v3053_v56 = vadd.f32 %v7193_v21, %v7107_v6 }
 0x31e   : > { %v3099_v19 = vpop.f32.mrf.mxu0  ;;  %v3242_v40 = vpop.f32.mrf.mxu1 }
 0x31f   : > { %v3409_v30 = vadd.f32 %v7245_v51, %v3248_v5  ;;  %v3243_v11 = vadd.f32 %v3242_v40, %v7161_v17 }
 0x320   : > { %v7256_v47 = vpop.f32.mrf.mxu0  ;;  %v4310_v24 = vpop.f32.mrf.mxu1 }
 0x321   : > { %3441 = vst [vmem:[%s7250_s7 + $0x8] sm:$0xff] %v3409_v30  ;;  %v3408_v26 = vadd.f32 %v7245_v51, %v3243_v11  ;;  %v3258_v12 = vadd.f32 %v4310_v24, %v3033_v45  ;;  %v3510_v41 = vmul.f32 %v3409_v30, %v3409_v30 }
 0x322   : > { %v3104_v0 = vpop.f32.mrf.mxu0  ;;  %v3252_v37 = vpop.f32.mrf.mxu1 }
 0x323   : > { %3440 = vst [vmem:[%s7250_s7] sm:$0xff] %v3408_v26  ;;  %v3472_v58 = vadd.f32 %v3409_v30, %v3408_v26  ;;  %v3509_v1 = vmul.f32 %v3408_v26, %v3408_v26  ;;  %v3411_v17 = vadd.f32 %v7245_v51, %v3258_v12  ;;  %v3253_v9 = vadd.f32 %v3252_v37, %v3028_v49 }
 0x324   : > { %v7266_v5 = vpop.f32.mrf.mxu0  ;;  %v4313_v61 = vpop.f32.mrf.mxu1 }
 0x325   : > { %v3541_v19 = vadd.f32 %v3510_v41, %v3509_v1  ;;  %3443 = vst [vmem:[%s7250_s7 + $0x18] sm:$0xff] %v3411_v17  ;;  %v3410_v40 = vadd.f32 %v7245_v51, %v3253_v9  ;;  %v3268_v45 = vadd.f32 %v4313_v61, %v3043_v62  ;;  %v3512_v41 = vmul.f32 %v3411_v17, %v3411_v17 }
 0x326   : > { %v3109_v30 = vpop.f32.mrf.mxu0  ;;  %v3262_v11 = vpop.f32.mrf.mxu1  ;;  %v3058_v61 = vadd.f32 %v7198_v15, %v7113_v29 }
 0x327   : > { %3442 = vst [vmem:[%s7250_s7 + $0x10] sm:$0xff] %v3410_v40  ;;  %v3473_v24 = vadd.f32 %v3472_v58, %v3410_v40  ;;  %v3511_v49 = vmul.f32 %v3410_v40, %v3410_v40  ;;  %v3263_v26 = vadd.f32 %v3262_v11, %v3038_v33  ;;  %v3413_v50 = vadd.f32 %v7245_v51, %v3268_v45 }
 0x328   : > { %v7278_v38 = vpop.f32.mrf.mxu0  ;;  %v4316_v12 = vpop.f32.mrf.mxu1  ;;  %v3063_v33 = vadd.f32 %v7203_v53, %v7119_v63 }
 0x329   : > { %v3542_v0 = vadd.f32 %v3541_v19, %v3511_v49  ;;  %v3412_v37 = vadd.f32 %v7245_v51, %v3263_v26  ;;  %v3474_v1 = vadd.f32 %v3473_v24, %v3411_v17  ;;  %3445 = vst [vmem:[%s7250_s7 + $0x28] sm:$0xff] %v3413_v50  ;;  %v3278_v58 = vadd.f32 %v4316_v12, %v3053_v56 }
 0x32a   : > { %v3114_v9 = vpop.f32.mrf.mxu0  ;;  %v3272_v62 = vpop.f32.mrf.mxu1  ;;  %v3514_v45 = vmul.f32 %v3413_v50, %v3413_v50  ;;  %v3068_v56 = vadd.f32 %v7208_v54, %v7125_v27  ;;  %v3073_v12 = vadd.f32 %v7213_v4, %v7131_v20 }
 0x32b   : > { %3444 = vst [vmem:[%s7250_s7 + $0x20] sm:$0xff] %v3412_v37  ;;  %v3475_v31 = vadd.f32 %v3474_v1, %v3412_v37  ;;  %v3513_v8 = vmul.f32 %v3412_v37, %v3412_v37  ;;  %v3543_v6 = vadd.f32 %v3542_v0, %v3512_v41  ;;  %v3273_v21 = vadd.f32 %v3272_v62, %v3048_v48 }
 0x32c   : > { %v3415_v19 = vadd.f32 %v7245_v51, %v3278_v58  ;;  %v7288_v17 = vpop.f32.mrf.mxu0  ;;  %v4319_v40 = vpop.f32.mrf.mxu1 }
 0x32d   : > { %v3544_v30 = vadd.f32 %v3543_v6, %v3513_v8  ;;  %v3414_v11 = vadd.f32 %v7245_v51, %v3273_v21  ;;  %v3476_v24 = vadd.f32 %v3475_v31, %v3413_v50  ;;  %v3288_v49 = vadd.f32 %v4319_v40, %v3063_v33 }
 0x32e   : > { %3447 = vst [vmem:[%s7250_s7 + $0x38] sm:$0xff] %v3415_v19  ;;  %v3119_v26 = vpop.f32.mrf.mxu0  ;;  %v3282_v48 = vpop.f32.mrf.mxu1  ;;  %v3516_v37 = vmul.f32 %v3415_v19, %v3415_v19  ;;  %v3078_v6 = vadd.f32 %v7218_v60, %v7137_v44  ;;  %v3083_v21 = vadd.f32 %v7223_v14, %v7143_v28 }
 0x32f   : > { %3446 = vst [vmem:[%s7250_s7 + $0x30] sm:$0xff] %v3414_v11  ;;  %v3477_v29 = vadd.f32 %v3476_v24, %v3414_v11  ;;  %v3515_v15 = vmul.f32 %v3414_v11, %v3414_v11  ;;  %v3545_v63 = vadd.f32 %v3544_v30, %v3514_v45  ;;  %v3283_v53 = vadd.f32 %v3282_v48, %v3058_v61 }
 0x330   : > { %v3417_v41 = vadd.f32 %v7245_v51, %v3288_v49  ;;  %v7298_v50 = vpop.f32.mrf.mxu0  ;;  %v4322_v0 = vpop.f32.mrf.mxu1  ;;  %v3088_v48 = vadd.f32 %v7228_v3, %v7149_v46 }
 0x331   : > { %v3546_v1 = vadd.f32 %v3545_v63, %v3515_v15  ;;  %v3416_v58 = vadd.f32 %v7245_v51, %v3283_v53  ;;  %v3478_v9 = vadd.f32 %v3477_v29, %v3415_v19  ;;  %v3298_v62 = vadd.f32 %v4322_v0, %v3073_v12 }
 0x332   : > { %3449 = vst [vmem:[%s7250_s7 + $0x48] sm:$0xff] %v3417_v41  ;;  %v3124_v31 = vpop.f32.mrf.mxu0  ;;  %v3292_v8 = vpop.f32.mrf.mxu1  ;;  %v3518_v40 = vmul.f32 %v3417_v41, %v3417_v41  ;;  %v3093_v29 = vadd.f32 %v7235_v57, %v7155_v34 }
 0x333   : > { %3448 = vst [vmem:[%s7250_s7 + $0x40] sm:$0xff] %v3416_v58  ;;  %v3479_v27 = vadd.f32 %v3478_v9, %v3416_v58  ;;  %v3517_v54 = vmul.f32 %v3416_v58, %v3416_v58  ;;  %v3547_v20 = vadd.f32 %v3546_v1, %v3516_v37  ;;  %v3293_v4 = vadd.f32 %v3292_v8, %v3068_v56 }
 0x334   : > { %v3419_v61 = vadd.f32 %v7245_v51, %v3298_v62  ;;  %v7308_v33 = vpop.f32.mrf.mxu0  ;;  %v4325_v19 = vpop.f32.mrf.mxu1  ;;  %v3098_v9 = vadd.f32 %v7240_v7, %v7158_v13  ;;  %v3103_v62 = vadd.f32 %v7256_v47, %v7166_v16 }
 0x335   : > { %v3548_v45 = vadd.f32 %v3547_v20, %v3517_v54  ;;  %v3418_v30 = vadd.f32 %v7245_v51, %v3293_v4  ;;  %v3480_v11 = vadd.f32 %v3479_v27, %v3417_v41  ;;  %v3308_v24 = vadd.f32 %v4325_v19, %v3083_v21 }
 0x336   : > { %3451 = vst [vmem:[%s7250_s7 + $0x58] sm:$0xff] %v3419_v61  ;;  %v3129_v49 = vpop.f32.mrf.mxu0  ;;  %v3302_v26 = vpop.f32.mrf.mxu1  ;;  %v3520_v56 = vmul.f32 %v3419_v61, %v3419_v61 }
 0x337   : > { %3450 = vst [vmem:[%s7250_s7 + $0x50] sm:$0xff] %v3418_v30  ;;  %v3481_v44 = vadd.f32 %v3480_v11, %v3418_v30  ;;  %v3519_v60 = vmul.f32 %v3418_v30, %v3418_v30  ;;  %v3549_v28 = vadd.f32 %v3548_v45, %v3518_v40  ;;  %v3303_v14 = vadd.f32 %v3302_v26, %v3078_v6 }
 0x338   : > { %v3421_v15 = vadd.f32 %v7245_v51, %v3308_v24  ;;  %v7318_v63 = vpop.f32.mrf.mxu0  ;;  %v4328_v53 = vpop.f32.mrf.mxu1  ;;  %v3108_v40 = vadd.f32 %v7266_v5, %v7171_v52  ;;  %v3113_v45 = vadd.f32 %v7278_v38, %v7176_v18  ;;  %v3118_v38 = vadd.f32 %v7288_v17, %v7181_v22 }
 0x339   : > { %v3550_v12 = vadd.f32 %v3549_v28, %v3519_v60  ;;  %v3420_v41 = vadd.f32 %v7245_v51, %v3303_v14  ;;  %v3482_v0 = vadd.f32 %v3481_v44, %v3419_v61  ;;  %v3318_v37 = vadd.f32 %v4328_v53, %v3093_v29 }
 0x33a   : > { %3453 = vst [vmem:[%s7250_s7 + $0x68] sm:$0xff] %v3421_v15  ;;  %v3134_v1 = vpop.f32.mrf.mxu0  ;;  %v3312_v58 = vpop.f32.mrf.mxu1  ;;  %v3522_v54 = vmul.f32 %v3421_v15, %v3421_v15 }
 0x33b   : > { %3452 = vst [vmem:[%s7250_s7 + $0x60] sm:$0xff] %v3420_v41  ;;  %v3483_v46 = vadd.f32 %v3482_v0, %v3420_v41  ;;  %v3521_v3 = vmul.f32 %v3420_v41, %v3420_v41  ;;  %v3551_v34 = vadd.f32 %v3550_v12, %v3520_v56  ;;  %v3313_v57 = vadd.f32 %v3312_v58, %v3088_v48 }
 0x33c   : > { %v3423_v31 = vadd.f32 %v7245_v51, %v3318_v37  ;;  %v7328_v8 = vpop.f32.mrf.mxu0  ;;  %v4331_v27 = vpop.f32.mrf.mxu1 }
 0x33d   : > { %v3552_v20 = vadd.f32 %v3551_v34, %v3521_v3  ;;  %v3422_v4 = vadd.f32 %v7245_v51, %v3313_v57  ;;  %v3484_v6 = vadd.f32 %v3483_v46, %v3421_v15  ;;  %v3328_v21 = vadd.f32 %v4331_v27, %v3103_v62 }
 0x33e   : > { %3455 = vst [vmem:[%s7250_s7 + $0x78] sm:$0xff] %v3423_v31  ;;  %v3139_v61 = vpop.f32.mrf.mxu0  ;;  %v3322_v19 = vpop.f32.mrf.mxu1  ;;  %v3524_v49 = vmul.f32 %v3423_v31, %v3423_v31  ;;  %v3123_v15 = vadd.f32 %v7298_v50, %v7186_v35  ;;  %v3128_v50 = vadd.f32 %v7308_v33, %v7191_v2  ;;  %v3133_v57 = vadd.f32 %v7318_v63, %v7196_v32 }
 0x33f   : > { %3454 = vst [vmem:[%s7250_s7 + $0x70] sm:$0xff] %v3422_v4  ;;  %v3485_v13 = vadd.f32 %v3484_v6, %v3422_v4  ;;  %v3523_v7 = vmul.f32 %v3422_v4, %v3422_v4  ;;  %v3553_v16 = vadd.f32 %v3552_v20, %v3522_v54  ;;  %v3323_v47 = vadd.f32 %v3322_v19, %v3098_v9 }
 0x340   : > { %v3425_v30 = vadd.f32 %v7245_v51, %v3328_v21  ;;  %v3142_v11 = vpop.f32.mrf.mxu0  ;;  %v4334_v24 = vpop.f32.mrf.mxu1  ;;  %v3138_v63 = vadd.f32 %v7328_v8, %v7201_v59 }
 0x341   : > { %v3554_v26 = vadd.f32 %v3553_v16, %v3523_v7  ;;  %v3424_v44 = vadd.f32 %v7245_v51, %v3323_v47  ;;  %v3486_v60 = vadd.f32 %v3485_v13, %v3423_v31  ;;  %v3338_v28 = vadd.f32 %v4334_v24, %v3113_v45 }
 0x342   : > { %3457 = vst [vmem:[%s7250_s7 + $0x88] sm:$0xff] %v3425_v30  ;;  %v3144_v14 = vpop.f32.mrf.mxu0  ;;  %v3332_v48 = vpop.f32.mrf.mxu1  ;;  %v3526_v41 = vmul.f32 %v3425_v30, %v3425_v30  ;;  %v3143_v13 = vadd.f32 %v3142_v11, %v7206_v43 }
 0x343   : > { %3456 = vst [vmem:[%s7250_s7 + $0x80] sm:$0xff] %v3424_v44  ;;  %v3487_v29 = vadd.f32 %v3486_v60, %v3424_v44  ;;  %v3525_v52 = vmul.f32 %v3424_v44, %v3424_v44  ;;  %v3555_v5 = vadd.f32 %v3554_v26, %v3524_v49  ;;  %v3333_v18 = vadd.f32 %v3332_v48, %v3108_v40 }
 0x344   : > { %v3427_v53 = vadd.f32 %v7245_v51, %v3338_v28  ;;  %v3147_v56 = vpop.f32.mrf.mxu0  ;;  %v4337_v12 = vpop.f32.mrf.mxu1 }
 0x345   : > { %v3556_v0 = vadd.f32 %v3555_v5, %v3525_v52  ;;  %v3426_v37 = vadd.f32 %v7245_v51, %v3333_v18  ;;  %v3488_v1 = vadd.f32 %v3487_v29, %v3425_v30  ;;  %v3348_v58 = vadd.f32 %v4337_v12, %v3123_v15 }
 0x346   : > { %3459 = vst [vmem:[%s7250_s7 + $0x98] sm:$0xff] %v3427_v53  ;;  %v3149_v46 = vpop.f32.mrf.mxu0  ;;  %v3342_v3 = vpop.f32.mrf.mxu1  ;;  %v3528_v27 = vmul.f32 %v3427_v53, %v3427_v53  ;;  %v3148_v8 = vadd.f32 %v3147_v56, %v7211_v55 }
 0x347   : > { %3458 = vst [vmem:[%s7250_s7 + $0x90] sm:$0xff] %v3426_v37  ;;  %v3489_v34 = vadd.f32 %v3488_v1, %v3426_v37  ;;  %v3527_v22 = vmul.f32 %v3426_v37, %v3426_v37  ;;  %v3557_v17 = vadd.f32 %v3556_v0, %v3526_v41  ;;  %v3343_v35 = vadd.f32 %v3342_v3, %v3118_v38 }
 0x348   : > { %v3429_v9 = vadd.f32 %v7245_v51, %v3348_v58  ;;  %v3152_v62 = vpop.f32.mrf.mxu0  ;;  %v4340_v31 = vpop.f32.mrf.mxu1 }
 0x349   : > { %v3558_v54 = vadd.f32 %v3557_v17, %v3527_v22  ;;  %v3428_v20 = vadd.f32 %v7245_v51, %v3343_v35  ;;  %v3490_v4 = vadd.f32 %v3489_v34, %v3427_v53  ;;  %v3358_v6 = vadd.f32 %v4340_v31, %v3133_v57 }
 0x34a   : > { %3461 = vst [vmem:[%s7250_s7 + $0xa8] sm:$0xff] %v3429_v9  ;;  %v3154_v21 = vpop.f32.mrf.mxu0  ;;  %v3352_v61 = vpop.f32.mrf.mxu1  ;;  %v3530_v40 = vmul.f32 %v3429_v9, %v3429_v9  ;;  %v3153_v11 = vadd.f32 %v3152_v62, %v7216_v36  ;;  %v2948_v35 = vadd.f32 %v7233_v23, %v7152_v39 }
 0x34b   : > { %3460 = vst [vmem:[%s7250_s7 + $0xa0] sm:$0xff] %v3428_v20  ;;  %v3491_v19 = vadd.f32 %v3490_v4, %v3428_v20  ;;  %v3529_v2 = vmul.f32 %v3428_v20, %v3428_v20  ;;  %v3559_v33 = vadd.f32 %v3558_v54, %v3528_v27  ;;  %v3353_v32 = vadd.f32 %v3352_v61, %v3128_v50 }
 0x34c   : > { %v3431_v7 = vadd.f32 %v7245_v51, %v3358_v6  ;;  %v3157_v16 = vpop.f32.mrf.mxu0  ;;  %v4343_v47 = vpop.f32.mrf.mxu1 }
 0x34d   : > { %v3560_v45 = vadd.f32 %v3559_v33, %v3529_v2  ;;  %v3430_v30 = vadd.f32 %v7245_v51, %v3353_v32  ;;  %v3492_v24 = vadd.f32 %v3491_v19, %v3429_v9  ;;  %v3368_v49 = vadd.f32 %v4343_v47, %v3143_v13 }
 0x34e   : > { %3463 = vst [vmem:[%s7250_s7 + $0xb8] sm:$0xff] %v3431_v7  ;;  %v3159_v26 = vpop.f32.mrf.mxu0  ;;  %v3362_v44 = vpop.f32.mrf.mxu1  ;;  %v3532_v52 = vmul.f32 %v3431_v7, %v3431_v7  ;;  %v3158_v56 = vadd.f32 %v3157_v16, %v7221_v42 }
 0x34f   : > { %3462 = vst [vmem:[%s7250_s7 + $0xb0] sm:$0xff] %v3430_v30  ;;  %v3493_v60 = vadd.f32 %v3492_v24, %v3430_v30  ;;  %v3531_v28 = vmul.f32 %v3430_v30, %v3430_v30  ;;  %v3561_v59 = vadd.f32 %v3560_v45, %v3530_v40  ;;  %v3363_v43 = vadd.f32 %v3362_v44, %v3138_v63 }
 0x350   : > { %v3433_v14 = vadd.f32 %v7245_v51, %v3368_v49  ;;  %v3162_v48 = vpop.f32.mrf.mxu0  ;;  %v4346_v29 = vpop.f32.mrf.mxu1 }
 0x351   : > { %v3562_v5 = vadd.f32 %v3561_v59, %v3531_v28  ;;  %v3432_v18 = vadd.f32 %v7245_v51, %v3363_v43  ;;  %v3494_v38 = vadd.f32 %v3493_v60, %v3431_v7  ;;  %v3378_v15 = vadd.f32 %v4346_v29, %v3153_v11 }
 0x352   : > { %3465 = vst [vmem:[%s7250_s7 + $0xc8] sm:$0xff] %v3433_v14  ;;  %v3164_v53 = vpop.f32.mrf.mxu0  ;;  %v3372_v12 = vpop.f32.mrf.mxu1  ;;  %v3163_v37 = vadd.f32 %v3162_v48, %v7226_v10  ;;  %v3534_v3 = vmul.f32 %v3433_v14, %v3433_v14  ;;  %v4373_v48 = vmov 1966171168  }
 0x353   : > { %3464 = vst [vmem:[%s7250_s7 + $0xc0] sm:$0xff] %v3432_v18  ;;  %v3495_v41 = vadd.f32 %v3494_v38, %v3432_v18  ;;  %v3533_v0 = vmul.f32 %v3432_v18, %v3432_v18  ;;  %v3563_v55 = vadd.f32 %v3562_v5, %v3532_v52  ;;  %v3373_v36 = vadd.f32 %v3372_v12, %v3148_v8 }
 0x354   : > { %v3435_v1 = vadd.f32 %v7245_v51, %v3378_v15  ;;  %v3167_v58 = vpop.f32.mrf.mxu0  ;;  %v4349_v46 = vpop.f32.mrf.mxu1  ;;  %v3582_v29 = vunpack.c.l.s4 %v4373_v48  ;;  %v3584_v52 = vlaneseq }
 0x355   : > { %v3564_v34 = vadd.f32 %v3563_v55, %v3533_v0  ;;  %v3434_v22 = vadd.f32 %v7245_v51, %v3373_v36  ;;  %v3496_v17 = vadd.f32 %v3495_v41, %v3433_v14  ;;  %v3388_v50 = vadd.f32 %v4349_v46, %v3163_v37 }
 0x356   : > { %3467 = vst [vmem:[%s7250_s7 + $0xd8] sm:$0xff] %v3435_v1  ;;  %v3169_v57 = vpop.f32.mrf.mxu0  ;;  %v3382_v9 = vpop.f32.mrf.mxu1  ;;  %v3536_v27 = vmul.f32 %v3435_v1, %v3435_v1  ;;  %v3168_v61 = vadd.f32 %v3167_v58, %v7231_v25  ;;  %v3583_v15 = vunpack.c.0.s8 %v3582_v29  ;;  %v3585_v53 = vshrl.u32 %v3584_v52, 7 }
 0x357   : > { %3466 = vst [vmem:[%s7250_s7 + $0xd0] sm:$0xff] %v3434_v22  ;;  %v3497_v42 = vadd.f32 %v3496_v17, %v3434_v22  ;;  %v3535_v10 = vmul.f32 %v3434_v22, %v3434_v22  ;;  %v3565_v62 = vadd.f32 %v3564_v34, %v3534_v3  ;;  %v3383_v31 = vadd.f32 %v3382_v9, %v3158_v56 }
 0x358   : > { %v3437_v54 = vadd.f32 %v7245_v51, %v3388_v50  ;;  %v3172_v20 = vpop.f32.mrf.mxu0  ;;  %v4352_v4 = vpop.f32.mrf.mxu1  ;;  %v3586_v55 = vsub.s32 %v3583_v15, %v3585_v53  ;;  %vm3598_vm0 = vcmp.lt.s32.totalorder %v3584_v52, 256 }
 0x359   : > { %v3566_v6 = vadd.f32 %v3565_v62, %v3535_v10  ;;  %v3436_v21 = vadd.f32 %v7245_v51, %v3383_v31  ;;  %v3498_v39 = vadd.f32 %v3497_v42, %v3435_v1  ;;  %v3173_v23 = vadd.f32 %v3172_v20, %v2948_v35 }
 0x35a   : > { %3469 = vst [vmem:[%s7250_s7 + $0xe8] sm:$0xff] %v3437_v54  ;;  %v3392_v19 = vpop.f32.mrf.mxu1  ;;  %v3174_v2 = vpop.f32.mrf.mxu0  ;;  %v3538_v16 = vmul.f32 %v3437_v54, %v3437_v54 }
 0x35b   : > { %3468 = vst [vmem:[%s7250_s7 + $0xe0] sm:$0xff] %v3436_v21  ;;  %v3499_v33 = vadd.f32 %v3498_v39, %v3436_v21  ;;  %v3537_v32 = vmul.f32 %v3436_v21, %v3436_v21  ;;  %v3567_v63 = vadd.f32 %v3566_v6, %v3536_v27  ;;  %v3398_v13 = vadd.f32 %v4352_v4, %v3173_v23 }
 0x35c   : > { %v3393_v7 = vadd.f32 %v3392_v19, %v3168_v61 }
 0x35d   : > { %v3568_v47 = vadd.f32 %v3567_v63, %v3537_v32  ;;  %v3439_v40 = vadd.f32 %v7245_v51, %v3398_v13  ;;  %v3500_v45 = vadd.f32 %v3499_v33, %v3437_v54 }
 0x35e   : > { %v3438_v30 = vadd.f32 %v7245_v51, %v3393_v7 }
 0x35f   : > { %3471 = vst [vmem:[%s7250_s7 + $0xf8] sm:$0xff] %v3439_v40  ;;  %v3569_v24 = vadd.f32 %v3568_v47, %v3538_v16  ;;  %v3540_v26 = vmul.f32 %v3439_v40, %v3439_v40 }
 0x360   : > { %3470 = vst [vmem:[%s7250_s7 + $0xf0] sm:$0xff] %v3438_v30  ;;  %v3501_v25 = vadd.f32 %v3500_v45, %v3438_v30  ;;  %v3539_v49 = vmul.f32 %v3438_v30, %v3438_v30 }
 0x362   : > { %v3502_v44 = vadd.f32 %v3501_v25, %v3439_v40  ;;  %v3570_v60 = vadd.f32 %v3569_v24, %v3539_v49 }
 0x364   : > { %v3503_v28 = vrot.slane %v3502_v44, 4  ;;  %v3571_v59 = vadd.f32 %v3570_v60, %v3540_v26 }
 0x366   : > { %v3504_v43 = vadd.f32 %v3503_v28, %v3502_v44  ;;  %v3572_v8 = vrot.slane %v3571_v59, 4 }
 0x368   : > { %v3505_v11 = vrot.slane %v3504_v43, 2  ;;  %v3573_v14 = vadd.f32 %v3572_v8, %v3571_v59 }
 0x36a   : > { %v3506_v5 = vadd.f32 %v3505_v11, %v3504_v43  ;;  %v3574_v51 = vrot.slane %v3573_v14, 2 }
 0x36c   : > { %v3507_v18 = vrot.slane %v3506_v5, 1  ;;  %v3575_v38 = vadd.f32 %v3574_v51, %v3573_v14 }
 0x36e   : > { %v3576_v12 = vrot.slane %v3575_v38, 1  ;;  %v3508_v41 = vadd.f32 %v3507_v18, %v3506_v5 }
 0x370   : > { %v3577_v0 = vadd.f32 %v3576_v12, %v3575_v38 }
 0x372   : > { %v3580_v36 = vcombine.low %v3508_v41, %v3577_v0 }
 0x374   : > { %v3587_v56 = vrot.slane %v3580_v36, %v3586_v55 }
 0x376   : > { %v3594_v37 = vrot.slane %v3587_v56, %v3586_v55 }
 0x378   : > { %3600 = vst.msk [vmem:[%s282_s11] sm:$0x3] %vm3598_vm0, %v3594_v37 }
 0x379 PF: > { %s17_s21 = sadd.s32 1, %s4370_s21  }
 0x37a   : > { %p14_p4 = scmp.ge.s32.totalorder %s17_s21, 4  }
 0x37c   :  { %16 = sbr.rel (!%p14_p4) target bundleno = 1 (0x1), region = 89 }

</bundles_post_ra>
